<compile_context>
chip_gen: v6e
topology: v6e:2x2x1
jax: 0.10.0
libtpu: 0.0.40
codegen_flags: <defaults>
</compile_context>

<pallas_src>
import functools
import math

import jax
import jax.numpy as jnp
import numpy as np
from jax import lax
from jax.experimental import pallas as pl
from jax.experimental.pallas import tpu as pltpu

EPS = 1e-5

_STAGE_WEIGHTS = ("wc", "s0", "b0", "sm", "sc", "sp",
                  "w11", "s11", "b11", "w12", "s12", "b12",
                  "w21", "s21", "b21", "w22", "s22", "b22")
_HEAD_WEIGHTS = ("wd", "sd", "bd")


# ------------------------------ kernel helpers ------------------------------

def _band_conv(xb, w_ref):
    """3x3 conv as ONE GEMM: ky-shifted views concatenated along K (lanes).

    xb:    (T, K) bf16 value of stacked per-image H-padded slabs (period H+2).
    w_ref: (3*K, Ko) bf16 ky-stacked banded weights (kx taps + x zero padding).
    Returns (T-2, Ko) f32.  Row i is only meaningful when (i % (H+2)) < H; the
    remaining rows straddle two images and must be masked by the caller before
    they can reach a padding row.
    """
    t = xb.shape[0]
    xc = jnp.concatenate([xb[0:t - 2], xb[1:t - 1], xb[2:t]], axis=1)
    return jnp.dot(xc, w_ref[...], preferred_element_type=jnp.float32)


def _conv_sequence(xb, w, cw_ref, p_ref, h_ref, *, batch, hin):
    """One ConvSequence (conv+BN -> maxpool(3,2,1) -> res1 -> res2), batched.

    xb: (batch*(hin+2), W*Cin) bf16 value (per-image H-padded row slabs).
    Result is left in p_ref: (batch*(hin//2+2), Wo*D) f32, already H-padded,
    i.e. exactly the next stage's input layout.
    """
    f32 = jnp.float32
    ho = hin // 2
    pin, pout = hin + 2, ho + 2
    tin, tout = batch * pin, batch * pout
    kp = w["sm"].shape[1]                       # Wo * depth

    # ---- first conv + folded BatchNorm (one batched GEMM) -------------------
    y = _band_conv(xb, w["wc"]) * w["s0"][...] + w["b0"][...]    # (tin-2, W*D)

    # ---- MaxPool(kernel=3, stride=2, padding=1), fully fused -----------------
    # W direction: exact 0/1 selection GEMMs (bf16 operands are exact here).
    yb = y.astype(jnp.bfloat16)
    cw = jnp.maximum(
        jnp.maximum(jnp.dot(yb, w["sc"][...], preferred_element_type=f32),
                    jnp.dot(yb, w["sp"][...], preferred_element_type=f32)),
        jnp.dot(yb, w["sm"][...], preferred_element_type=f32))   # (tin-2, kp)
    cw_ref[pl.ds(0, tin - 2), :] = cw

    # H direction: stride-2 row reads + ONE dense ho-row store per image.
    # (A single dense zero of the tiny padded scratch is cheaper than 2*batch
    #  masked single-row pad stores; interior rows are overwritten below.)
    p_ref[...] = jnp.zeros_like(p_ref)
    for b in range(batch):
        base = b * pin
        ev = cw_ref[pl.ds(base, ho, stride=2), :]        # rows 2*yo
        od = cw_ref[pl.ds(base + 1, ho, stride=2), :]    # rows 2*yo + 1
        up = pltpu.roll(od, 1, 0)                        # rows 2*yo - 1 (yo>=1)
        row0 = lax.broadcasted_iota(jnp.int32, (ho, kp), 0) == 0
        prev = jnp.where(row0, od, up)                   # yo==0: harmless dup
        p_ref[pl.ds(b * pout + 1, ho), :] = jnp.maximum(jnp.maximum(ev, od),
                                                        prev)

    # ---- two residual blocks; hidden state / residual never leave VMEM ------
    h_ref[...] = jnp.zeros_like(h_ref)                   # boundary rows stay 0
    valid = (lax.broadcasted_iota(jnp.int32, (tout - 2, kp), 0) % pout) < ho

    def res_block(wa, sa, ba, wb2, sb2, bb2):
        a = jnp.maximum(p_ref[...], 0.0).astype(jnp.bfloat16)     # relu(x)
        hh = _band_conv(a, wa) * sa[...] + ba[...]
        # masked-to-zero rows land exactly on the padding rows of h_ref
        h_ref[pl.ds(1, tout - 2), :] = jnp.where(valid,
                                                 jnp.maximum(hh, 0.0), 0.0)
        cc = _band_conv(h_ref[...].astype(jnp.bfloat16), wb2) * sb2[...] + bb2[...]
        p_ref[pl.ds(1, tout - 2), :] = (p_ref[pl.ds(1, tout - 2), :]
                                        + jnp.where(valid, cc, 0.0))

    res_block(w["w11"], w["s11"], w["b11"], w["w12"], w["s12"], w["b12"])
    res_block(w["w21"], w["s21"], w["b21"], w["w22"], w["s22"], w["b22"])


def _impala_kernel(*refs, batch, hin0, num_stages):
    """Whole ImpalaCNN forward for one batch block (all stages + head)."""
    ns = len(_STAGE_WEIGHTS)
    x_ref = refs[0]
    stage_w = [dict(zip(_STAGE_WEIGHTS, refs[1 + s * ns: 1 + (s + 1) * ns]))
               for s in range(num_stages)]
    base = 1 + num_stages * ns
    wd_ref, sd_ref, bd_ref = refs[base: base + 3]
    out_ref = refs[base + 3]
    scratch = refs[base + 4:]

    xb = x_ref[...]                                      # bf16, already padded
    hin = hin0
    p_ref = None
    for s in range(num_stages):
        cw_ref, p_ref, h_ref = scratch[3 * s: 3 * (s + 1)]
        _conv_sequence(xb, stage_w[s], cw_ref, p_ref, h_ref,
                       batch=batch, hin=hin)
        hin //= 2
        if s + 1 < num_stages:
            xb = p_ref[...].astype(jnp.bfloat16)         # one cast per stage

    # ---- head: relu(flatten) -> Linear(+bias) -> BatchNorm1d -> ReLU --------
    pout = hin + 2                                       # final padded period
    rows = [jnp.maximum(p_ref[pl.ds(1 + r, batch, stride=pout), :], 0.0)
            for r in range(hin)]
    feat = rows[0] if len(rows) == 1 else jnp.concatenate(rows, axis=1)
    z = jnp.dot(feat.astype(jnp.bfloat16), wd_ref[...],
                preferred_element_type=jnp.float32)
    z = z * sd_ref[...] + bd_ref[...]
    out_ref[...] = jnp.maximum(z, 0.0)                   # (batch, 256), dense


# ------------------------------ Pallas wrapper -------------------------------

def _pick_batch_block(n, h):
    """Batch block size: whole batch when small, else an 8-aligned divisor of n
    (keeps the (8,128) block rule and pushes the conv GEMM M towards ~256)."""
    if n * (h + 2) <= 512:
        return n
    target = max(8, (256 // (h + 2)) // 8 * 8)
    for b in range(min(n - 1, target), 0, -1):
        if n % b == 0 and b % 8 == 0:
            return b
    return n


def impala_forward(x_nchw, params):
    n, c, h, w = x_nchw.shape
    # NCHW -> lane-dense (x, channel) slab with the first conv's H zero-padding
    # already in place (plain-JAX data movement, fused by XLA; no FLOPs).
    x = jnp.transpose(x_nchw, (0, 2, 3, 1)).reshape(n, h, w * c)
    x = jnp.pad(x, ((0, 0), (1, 1), (0, 0)))
    x = x.reshape(n * (h + 2), w * c).astype(jnp.bfloat16)
    # (the x/255 input scaling is folded into the first conv's banded weights)

    num_stages = len(params["stages"])
    batch = _pick_batch_block(n, h)
    out_dim = params["head"]["sd"].shape[1]

    weights = []
    for st in params["stages"]:
        weights += [st[k] for k in _STAGE_WEIGHTS]
    weights += [params["head"][k] for k in _HEAD_WEIGHTS]

    # Constant weight blocks (~1.8 MB bf16/f32 total) stay resident in VMEM.
    # (pipeline_mode=pl.Buffered(1) would halve their footprint; skipped, as
    #  2x ~1.8 MB is negligible against 64-128 MiB of VMEM.)
    w_specs = [pl.BlockSpec(wt.shape, lambda i: (0, 0)) for wt in weights]
    in_specs = [pl.BlockSpec((batch * (h + 2), w * c), lambda i: (i, 0))] + w_specs

    # Per-stage VMEM scratch: W-pooled rows, padded stage output, padded hidden.
    scratch = []
    hin, wi = h, w
    for st in params["stages"]:
        depth = st["s0"].shape[1] // wi
        ho, wo = hin // 2, wi // 2
        kp = wo * depth
        scratch += [pltpu.VMEM((batch * (hin + 2), kp), jnp.float32),
                    pltpu.VMEM((batch * (ho + 2), kp), jnp.float32),
                    pltpu.VMEM((batch * (ho + 2), kp), jnp.float32)]
        hin, wi = ho, wo

    kernel = functools.partial(_impala_kernel, batch=batch, hin0=h,
                               num_stages=num_stages)
    return pl.pallas_call(
        kernel,
        out_shape=jax.ShapeDtypeStruct((n, out_dim), jnp.float32),
        grid=(n // batch,),
        in_specs=in_specs,
        out_specs=pl.BlockSpec((batch, out_dim), lambda i: (i, 0)),
        scratch_shapes=scratch,
        compiler_params=pltpu.CompilerParams(
            dimension_semantics=("parallel",),        # keep batch parallel (v7x)
            vmem_limit_bytes=32 * 1024 * 1024),
    )(x, *weights)


# ----------------------------- parameter setup -------------------------------

def _fold_bn(conv_bias, gamma, beta, mean, var):
    s = gamma / np.sqrt(var + EPS)
    scale = s.reshape(1, -1).astype(np.float32)
    bias = ((conv_bias - mean) * s + beta).reshape(1, -1).astype(np.float32)
    return scale, bias


def _rand_bn(keys, cout):
    gamma = np.asarray(jax.random.uniform(keys[0], (cout,), jnp.float32, 0.5, 1.5))
    beta = 0.1 * np.asarray(jax.random.normal(keys[1], (cout,), jnp.float32))
    mean = 0.1 * np.asarray(jax.random.normal(keys[2], (cout,), jnp.float32))
    var = np.asarray(jax.random.uniform(keys[3], (cout,), jnp.float32, 0.5, 1.5))
    return gamma, beta, mean, var


def _band_matrix(w3, width):
    """ky-stacked banded GEMM weights:
       B[ky*W*Cin + xi*Cin + ci, xo*Cout + co] = w3[ky, xi-xo+1, ci, co].
    NOTE: density is ~3/W (stage 1 ~19% useful MXU FLOPs); fine while the
    kernel is latency-bound, revisit if stage 1 ever becomes MXU-bound."""
    _, _, cin, cout = w3.shape
    b = np.zeros((3, width * cin, width * cout), np.float32)
    for ky in range(3):
        for xo in range(width):
            for kx in range(3):
                xi = xo + kx - 1
                if 0 <= xi < width:
                    b[ky, xi * cin:(xi + 1) * cin,
                      xo * cout:(xo + 1) * cout] = w3[ky, kx]
    return b.reshape(3 * width * cin, width * cout)


def _pool_matrices(width, depth):
    """0/1 lane-selection matrices for the W direction of MaxPool(3,2,1).
    For xo == 0 the nonexistent x = -1 column is replaced by a duplicate of
    x = 0, which never changes the max (no additive mask needed)."""
    wo = width // 2
    eye = np.eye(depth, dtype=np.float32)
    sm = np.zeros((width * depth, wo * depth), np.float32)
    sc = np.zeros_like(sm)
    sp = np.zeros_like(sm)
    for xo in range(wo):
        xm = max(2 * xo - 1, 0)
        sm[xm * depth:(xm + 1) * depth, xo * depth:(xo + 1) * depth] = eye
        sc[(2 * xo) * depth:(2 * xo + 1) * depth, xo * depth:(xo + 1) * depth] = eye
        sp[(2 * xo + 1) * depth:(2 * xo + 2) * depth, xo * depth:(xo + 1) * depth] = eye
    return sm, sc, sp


def make_conv_bn(key, cin, cout, width, in_scale=1.0):
    ks = jax.random.split(key, 6)
    bound = 1.0 / math.sqrt(9 * cin)
    w3 = np.asarray(jax.random.uniform(ks[0], (3, 3, cin, cout), jnp.float32,
                                       -bound, bound))
    b = np.asarray(jax.random.uniform(ks[1], (cout,), jnp.float32, -bound, bound))
    gamma, beta, mean, var = _rand_bn(ks[2:6], cout)
    scale, bias = _fold_bn(b, gamma, beta, mean, var)
    band = _band_matrix(w3 * in_scale, width)
    return {"w": jnp.asarray(band, jnp.bfloat16),
            "scale": jnp.asarray(np.tile(scale, (1, width))),
            "bias": jnp.asarray(np.tile(bias, (1, width)))}


def make_stage(key, cin, depth, spatial, first=False):
    assert spatial % 2 == 0, "even spatial dims assumed"   # TODO(synk): odd dims
    wo = spatial // 2
    k0, k11, k12, k21, k22 = jax.random.split(key, 5)
    c0 = make_conv_bn(k0, cin, depth, spatial,
                      in_scale=(1.0 / 255.0 if first else 1.0))
    sm, sc, sp_ = _pool_matrices(spatial, depth)
    p = {"wc": c0["w"], "s0": c0["scale"], "b0": c0["bias"],
         "sm": jnp.asarray(sm, jnp.bfloat16),
         "sc": jnp.asarray(sc, jnp.bfloat16),
         "sp": jnp.asarray(sp_, jnp.bfloat16)}
    for name, kk in (("11", k11), ("12", k12), ("21", k21), ("22", k22)):
        cc = make_conv_bn(kk, depth, depth, wo)
        p["w" + name], p["s" + name], p["b" + name] = cc["w"], cc["scale"], cc["bias"]
    return p


def make_dense_bn(key, depth, ho, wo, out_dim):
    fin = depth * ho * wo
    ks = jax.random.split(key, 6)
    bound = 1.0 / math.sqrt(fin)
    w = np.asarray(jax.random.uniform(ks[0], (fin, out_dim), jnp.float32,
                                      -bound, bound))
    b = np.asarray(jax.random.uniform(ks[1], (out_dim,), jnp.float32, -bound, bound))
    gamma, beta, mean, var = _rand_bn(ks[2:6], out_dim)
    scale, bias = _fold_bn(b, gamma, beta, mean, var)
    # Permute the rows so the kernel's lane-packed flatten (row h, lane x*D+c)
    # consumes them directly with exact NCHW-flatten semantics:
    #   kernel index (h*wo + x)*depth + c   <-   torch index (c*ho + h)*wo + x.
    w_used = np.zeros_like(w)
    for ci in range(depth):
        for hh in range(ho):
            for xx in range(wo):
                w_used[(hh * wo + xx) * depth + ci] = w[(ci * ho + hh) * wo + xx]
    return {"wd": jnp.asarray(w_used, jnp.bfloat16),
            "sd": jnp.asarray(scale), "bd": jnp.asarray(bias)}


def build_params(key, input_channels, input_hw, depths, output_dim):
    h, w = input_hw
    assert h == w, "square inputs assumed by the lane-packed layout helpers"
    stages = []
    cin, spatial = input_channels, h
    for i, depth in enumerate(depths):
        key, k = jax.random.split(key)
        stages.append(make_stage(k, cin, depth, spatial, first=(i == 0)))
        cin, spatial = depth, spatial // 2
    key, kd = jax.random.split(key)
    head = make_dense_bn(kd, depths[-1], spatial, spatial, output_dim)
    return {"stages": stages, "head": head}


# ----------------------------------- main ------------------------------------

if __name__ == "__main__":
    key = jax.random.PRNGKey(0)
    kx, kp = jax.random.split(key)

    N, C, H, W = 2, 4, 16, 16
    depths = [16, 32, 32]
    output_dim = 256

    x = jax.random.uniform(kx, (N, C, H, W), jnp.float32, 0.0, 255.0)
    params = build_params(kp, C, (H, W), depths, output_dim)

    out = jax.jit(impala_forward)(x, params)
    out = jax.block_until_ready(out)

    assert out.shape == (N, output_dim), out.shape
    assert bool(jnp.all(jnp.isfinite(out)))
    assert bool(jnp.all(out >= 0.0))       # final ReLU
    print("KERNEL_OK")
</pallas_src>

<mosaic_0001>
module attributes {stable_mosaic.version = 11 : i64} {
  func.func @_impala_kernel(%arg0: i32, %arg1: memref<36x64xbf16, #tpu.memory_space<vmem>>, %arg2: memref<192x256xbf16, #tpu.memory_space<vmem>>, %arg3: memref<1x256xf32, #tpu.memory_space<vmem>>, %arg4: memref<1x256xf32, #tpu.memory_space<vmem>>, %arg5: memref<256x128xbf16, #tpu.memory_space<vmem>>, %arg6: memref<256x128xbf16, #tpu.memory_space<vmem>>, %arg7: memref<256x128xbf16, #tpu.memory_space<vmem>>, %arg8: memref<384x128xbf16, #tpu.memory_space<vmem>>, %arg9: memref<1x128xf32, #tpu.memory_space<vmem>>, %arg10: memref<1x128xf32, #tpu.memory_space<vmem>>, %arg11: memref<384x128xbf16, #tpu.memory_space<vmem>>, %arg12: memref<1x128xf32, #tpu.memory_space<vmem>>, %arg13: memref<1x128xf32, #tpu.memory_space<vmem>>, %arg14: memref<384x128xbf16, #tpu.memory_space<vmem>>, %arg15: memref<1x128xf32, #tpu.memory_space<vmem>>, %arg16: memref<1x128xf32, #tpu.memory_space<vmem>>, %arg17: memref<384x128xbf16, #tpu.memory_space<vmem>>, %arg18: memref<1x128xf32, #tpu.memory_space<vmem>>, %arg19: memref<1x128xf32, #tpu.memory_space<vmem>>, %arg20: memref<384x256xbf16, #tpu.memory_space<vmem>>, %arg21: memref<1x256xf32, #tpu.memory_space<vmem>>, %arg22: memref<1x256xf32, #tpu.memory_space<vmem>>, %arg23: memref<256x128xbf16, #tpu.memory_space<vmem>>, %arg24: memref<256x128xbf16, #tpu.memory_space<vmem>>, %arg25: memref<256x128xbf16, #tpu.memory_space<vmem>>, %arg26: memref<384x128xbf16, #tpu.memory_space<vmem>>, %arg27: memref<1x128xf32, #tpu.memory_space<vmem>>, %arg28: memref<1x128xf32, #tpu.memory_space<vmem>>, %arg29: memref<384x128xbf16, #tpu.memory_space<vmem>>, %arg30: memref<1x128xf32, #tpu.memory_space<vmem>>, %arg31: memref<1x128xf32, #tpu.memory_space<vmem>>, %arg32: memref<384x128xbf16, #tpu.memory_space<vmem>>, %arg33: memref<1x128xf32, #tpu.memory_space<vmem>>, %arg34: memref<1x128xf32, #tpu.memory_space<vmem>>, %arg35: memref<384x128xbf16, #tpu.memory_space<vmem>>, %arg36: memref<1x128xf32, #tpu.memory_space<vmem>>, %arg37: memref<1x128xf32, #tpu.memory_space<vmem>>, %arg38: memref<384x128xbf16, #tpu.memory_space<vmem>>, %arg39: memref<1x128xf32, #tpu.memory_space<vmem>>, %arg40: memref<1x128xf32, #tpu.memory_space<vmem>>, %arg41: memref<128x64xbf16, #tpu.memory_space<vmem>>, %arg42: memref<128x64xbf16, #tpu.memory_space<vmem>>, %arg43: memref<128x64xbf16, #tpu.memory_space<vmem>>, %arg44: memref<192x64xbf16, #tpu.memory_space<vmem>>, %arg45: memref<1x64xf32, #tpu.memory_space<vmem>>, %arg46: memref<1x64xf32, #tpu.memory_space<vmem>>, %arg47: memref<192x64xbf16, #tpu.memory_space<vmem>>, %arg48: memref<1x64xf32, #tpu.memory_space<vmem>>, %arg49: memref<1x64xf32, #tpu.memory_space<vmem>>, %arg50: memref<192x64xbf16, #tpu.memory_space<vmem>>, %arg51: memref<1x64xf32, #tpu.memory_space<vmem>>, %arg52: memref<1x64xf32, #tpu.memory_space<vmem>>, %arg53: memref<192x64xbf16, #tpu.memory_space<vmem>>, %arg54: memref<1x64xf32, #tpu.memory_space<vmem>>, %arg55: memref<1x64xf32, #tpu.memory_space<vmem>>, %arg56: memref<128x256xbf16, #tpu.memory_space<vmem>>, %arg57: memref<1x256xf32, #tpu.memory_space<vmem>>, %arg58: memref<1x256xf32, #tpu.memory_space<vmem>>, %arg59: memref<2x256xf32, #tpu.memory_space<vmem>>, %arg60: memref<36x128xf32, #tpu.memory_space<vmem>>, %arg61: memref<20x128xf32, #tpu.memory_space<vmem>>, %arg62: memref<20x128xf32, #tpu.memory_space<vmem>>, %arg63: memref<20x128xf32, #tpu.memory_space<vmem>>, %arg64: memref<12x128xf32, #tpu.memory_space<vmem>>, %arg65: memref<12x128xf32, #tpu.memory_space<vmem>>, %arg66: memref<12x64xf32, #tpu.memory_space<vmem>>, %arg67: memref<8x64xf32, #tpu.memory_space<vmem>>, %arg68: memref<8x64xf32, #tpu.memory_space<vmem>>) attributes {dimension_semantics = [#tpu.dimension_semantics<parallel>], iteration_bounds = array<i64: 1>, scalar_prefetch = 0 : i64, scratch_operands = 9 : i64, tpu.core_type = #tpu.core_type<tc>, window_params = [{transform_indices = @transform_0, window_bounds = array<i64: 36, 64>}, {pipeline_mode = #tpu.pipeline_mode<synchronous>, transform_indices = @transform_1, window_bounds = array<i64: 192, 256>}, {pipeline_mode = #tpu.pipeline_mode<synchronous>, transform_indices = @transform_2, window_bounds = array<i64: 1, 256>}, {pipeline_mode = #tpu.pipeline_mode<synchronous>, transform_indices = @transform_3, window_bounds = array<i64: 1, 256>}, {pipeline_mode = #tpu.pipeline_mode<synchronous>, transform_indices = @transform_4, window_bounds = array<i64: 256, 128>}, {pipeline_mode = #tpu.pipeline_mode<synchronous>, transform_indices = @transform_5, window_bounds = array<i64: 256, 128>}, {pipeline_mode = #tpu.pipeline_mode<synchronous>, transform_indices = @transform_6, window_bounds = array<i64: 256, 128>}, {pipeline_mode = #tpu.pipeline_mode<synchronous>, transform_indices = @transform_7, window_bounds = array<i64: 384, 128>}, {pipeline_mode = #tpu.pipeline_mode<synchronous>, transform_indices = @transform_8, window_bounds = array<i64: 1, 128>}, {pipeline_mode = #tpu.pipeline_mode<synchronous>, transform_indices = @transform_9, window_bounds = array<i64: 1, 128>}, {pipeline_mode = #tpu.pipeline_mode<synchronous>, transform_indices = @transform_10, window_bounds = array<i64: 384, 128>}, {pipeline_mode = #tpu.pipeline_mode<synchronous>, transform_indices = @transform_11, window_bounds = array<i64: 1, 128>}, {pipeline_mode = #tpu.pipeline_mode<synchronous>, transform_indices = @transform_12, window_bounds = array<i64: 1, 128>}, {pipeline_mode = #tpu.pipeline_mode<synchronous>, transform_indices = @transform_13, window_bounds = array<i64: 384, 128>}, {pipeline_mode = #tpu.pipeline_mode<synchronous>, transform_indices = @transform_14, window_bounds = array<i64: 1, 128>}, {pipeline_mode = #tpu.pipeline_mode<synchronous>, transform_indices = @transform_15, window_bounds = array<i64: 1, 128>}, {pipeline_mode = #tpu.pipeline_mode<synchronous>, transform_indices = @transform_16, window_bounds = array<i64: 384, 128>}, {pipeline_mode = #tpu.pipeline_mode<synchronous>, transform_indices = @transform_17, window_bounds = array<i64: 1, 128>}, {pipeline_mode = #tpu.pipeline_mode<synchronous>, transform_indices = @transform_18, window_bounds = array<i64: 1, 128>}, {pipeline_mode = #tpu.pipeline_mode<synchronous>, transform_indices = @transform_19, window_bounds = array<i64: 384, 256>}, {pipeline_mode = #tpu.pipeline_mode<synchronous>, transform_indices = @transform_20, window_bounds = array<i64: 1, 256>}, {pipeline_mode = #tpu.pipeline_mode<synchronous>, transform_indices = @transform_21, window_bounds = array<i64: 1, 256>}, {pipeline_mode = #tpu.pipeline_mode<synchronous>, transform_indices = @transform_22, window_bounds = array<i64: 256, 128>}, {pipeline_mode = #tpu.pipeline_mode<synchronous>, transform_indices = @transform_23, window_bounds = array<i64: 256, 128>}, {pipeline_mode = #tpu.pipeline_mode<synchronous>, transform_indices = @transform_24, window_bounds = array<i64: 256, 128>}, {pipeline_mode = #tpu.pipeline_mode<synchronous>, transform_indices = @transform_25, window_bounds = array<i64: 384, 128>}, {pipeline_mode = #tpu.pipeline_mode<synchronous>, transform_indices = @transform_26, window_bounds = array<i64: 1, 128>}, {pipeline_mode = #tpu.pipeline_mode<synchronous>, transform_indices = @transform_27, window_bounds = array<i64: 1, 128>}, {pipeline_mode = #tpu.pipeline_mode<synchronous>, transform_indices = @transform_28, window_bounds = array<i64: 384, 128>}, {pipeline_mode = #tpu.pipeline_mode<synchronous>, transform_indices = @transform_29, window_bounds = array<i64: 1, 128>}, {pipeline_mode = #tpu.pipeline_mode<synchronous>, transform_indices = @transform_30, window_bounds = array<i64: 1, 128>}, {pipeline_mode = #tpu.pipeline_mode<synchronous>, transform_indices = @transform_31, window_bounds = array<i64: 384, 128>}, {pipeline_mode = #tpu.pipeline_mode<synchronous>, transform_indices = @transform_32, window_bounds = array<i64: 1, 128>}, {pipeline_mode = #tpu.pipeline_mode<synchronous>, transform_indices = @transform_33, window_bounds = array<i64: 1, 128>}, {pipeline_mode = #tpu.pipeline_mode<synchronous>, transform_indices = @transform_34, window_bounds = array<i64: 384, 128>}, {pipeline_mode = #tpu.pipeline_mode<synchronous>, transform_indices = @transform_35, window_bounds = array<i64: 1, 128>}, {pipeline_mode = #tpu.pipeline_mode<synchronous>, transform_indices = @transform_36, window_bounds = array<i64: 1, 128>}, {pipeline_mode = #tpu.pipeline_mode<synchronous>, transform_indices = @transform_37, window_bounds = array<i64: 384, 128>}, {pipeline_mode = #tpu.pipeline_mode<synchronous>, transform_indices = @transform_38, window_bounds = array<i64: 1, 128>}, {pipeline_mode = #tpu.pipeline_mode<synchronous>, transform_indices = @transform_39, window_bounds = array<i64: 1, 128>}, {pipeline_mode = #tpu.pipeline_mode<synchronous>, transform_indices = @transform_40, window_bounds = array<i64: 128, 64>}, {pipeline_mode = #tpu.pipeline_mode<synchronous>, transform_indices = @transform_41, window_bounds = array<i64: 128, 64>}, {pipeline_mode = #tpu.pipeline_mode<synchronous>, transform_indices = @transform_42, window_bounds = array<i64: 128, 64>}, {pipeline_mode = #tpu.pipeline_mode<synchronous>, transform_indices = @transform_43, window_bounds = array<i64: 192, 64>}, {pipeline_mode = #tpu.pipeline_mode<synchronous>, transform_indices = @transform_44, window_bounds = array<i64: 1, 64>}, {pipeline_mode = #tpu.pipeline_mode<synchronous>, transform_indices = @transform_45, window_bounds = array<i64: 1, 64>}, {pipeline_mode = #tpu.pipeline_mode<synchronous>, transform_indices = @transform_46, window_bounds = array<i64: 192, 64>}, {pipeline_mode = #tpu.pipeline_mode<synchronous>, transform_indices = @transform_47, window_bounds = array<i64: 1, 64>}, {pipeline_mode = #tpu.pipeline_mode<synchronous>, transform_indices = @transform_48, window_bounds = array<i64: 1, 64>}, {pipeline_mode = #tpu.pipeline_mode<synchronous>, transform_indices = @transform_49, window_bounds = array<i64: 192, 64>}, {pipeline_mode = #tpu.pipeline_mode<synchronous>, transform_indices = @transform_50, window_bounds = array<i64: 1, 64>}, {pipeline_mode = #tpu.pipeline_mode<synchronous>, transform_indices = @transform_51, window_bounds = array<i64: 1, 64>}, {pipeline_mode = #tpu.pipeline_mode<synchronous>, transform_indices = @transform_52, window_bounds = array<i64: 192, 64>}, {pipeline_mode = #tpu.pipeline_mode<synchronous>, transform_indices = @transform_53, window_bounds = array<i64: 1, 64>}, {pipeline_mode = #tpu.pipeline_mode<synchronous>, transform_indices = @transform_54, window_bounds = array<i64: 1, 64>}, {pipeline_mode = #tpu.pipeline_mode<synchronous>, transform_indices = @transform_55, window_bounds = array<i64: 128, 256>}, {pipeline_mode = #tpu.pipeline_mode<synchronous>, transform_indices = @transform_56, window_bounds = array<i64: 1, 256>}, {pipeline_mode = #tpu.pipeline_mode<synchronous>, transform_indices = @transform_57, window_bounds = array<i64: 1, 256>}, {transform_indices = @transform_58, window_bounds = array<i64: 2, 256>}]} {
    %c0 = arith.constant 0 : index
    %c0_0 = arith.constant 0 : index
    %0 = vector.load %arg1[%c0, %c0_0] : memref<36x64xbf16, #tpu.memory_space<vmem>>, vector<36x64xbf16>
    %1 = vector.extract_strided_slice %0 {offsets = [0, 0], sizes = [34, 64], strides = [1, 1]} : vector<36x64xbf16> to vector<34x64xbf16>
    %2 = vector.extract_strided_slice %0 {offsets = [1, 0], sizes = [34, 64], strides = [1, 1]} : vector<36x64xbf16> to vector<34x64xbf16>
    %3 = vector.extract_strided_slice %0 {offsets = [2, 0], sizes = [34, 64], strides = [1, 1]} : vector<36x64xbf16> to vector<34x64xbf16>
    %4 = tpu.concatenate %1, %2, %3 in 1 : vector<34x64xbf16>, vector<34x64xbf16>, vector<34x64xbf16> -> vector<34x192xbf16>
    %c0_1 = arith.constant 0 : index
    %c0_2 = arith.constant 0 : index
    %5 = vector.load %arg2[%c0_1, %c0_2] : memref<192x256xbf16, #tpu.memory_space<vmem>>, vector<192x256xbf16>
    %cst = arith.constant dense<0.000000e+00> : vector<34x256xf32>
    %6 = tpu.matmul %4, %5, %cst {dimension_numbers = #tpu.dot_dimension_numbers<[1], [0], [0], [1], [0, 0, 1, 1], [], []>} : vector<34x192xbf16>, vector<192x256xbf16>, vector<34x256xf32> -> vector<34x256xf32>
    %c0_3 = arith.constant 0 : index
    %c0_4 = arith.constant 0 : index
    %7 = vector.load %arg3[%c0_3, %c0_4] : memref<1x256xf32, #tpu.memory_space<vmem>>, vector<1x256xf32>
    %8 = vector.broadcast %7 : vector<1x256xf32> to vector<34x256xf32>
    %9 = arith.mulf %6, %8 : vector<34x256xf32>
    %c0_5 = arith.constant 0 : index
    %c0_6 = arith.constant 0 : index
    %10 = vector.load %arg4[%c0_5, %c0_6] : memref<1x256xf32, #tpu.memory_space<vmem>>, vector<1x256xf32>
    %11 = vector.broadcast %10 : vector<1x256xf32> to vector<34x256xf32>
    %12 = arith.addf %9, %11 : vector<34x256xf32>
    %13 = arith.truncf %12 : vector<34x256xf32> to vector<34x256xbf16>
    %c0_7 = arith.constant 0 : index
    %c0_8 = arith.constant 0 : index
    %14 = vector.load %arg6[%c0_7, %c0_8] : memref<256x128xbf16, #tpu.memory_space<vmem>>, vector<256x128xbf16>
    %cst_9 = arith.constant dense<0.000000e+00> : vector<34x128xf32>
    %15 = tpu.matmul %13, %14, %cst_9 {dimension_numbers = #tpu.dot_dimension_numbers<[1], [0], [0], [1], [0, 0, 1, 1], [], []>} : vector<34x256xbf16>, vector<256x128xbf16>, vector<34x128xf32> -> vector<34x128xf32>
    %c0_10 = arith.constant 0 : index
    %c0_11 = arith.constant 0 : index
    %16 = vector.load %arg7[%c0_10, %c0_11] : memref<256x128xbf16, #tpu.memory_space<vmem>>, vector<256x128xbf16>
    %cst_12 = arith.constant dense<0.000000e+00> : vector<34x128xf32>
    %17 = tpu.matmul %13, %16, %cst_12 {dimension_numbers = #tpu.dot_dimension_numbers<[1], [0], [0], [1], [0, 0, 1, 1], [], []>} : vector<34x256xbf16>, vector<256x128xbf16>, vector<34x128xf32> -> vector<34x128xf32>
    %18 = arith.maximumf %15, %17 : vector<34x128xf32>
    %c0_13 = arith.constant 0 : index
    %c0_14 = arith.constant 0 : index
    %19 = vector.load %arg5[%c0_13, %c0_14] : memref<256x128xbf16, #tpu.memory_space<vmem>>, vector<256x128xbf16>
    %cst_15 = arith.constant dense<0.000000e+00> : vector<34x128xf32>
    %20 = tpu.matmul %13, %19, %cst_15 {dimension_numbers = #tpu.dot_dimension_numbers<[1], [0], [0], [1], [0, 0, 1, 1], [], []>} : vector<34x256xbf16>, vector<256x128xbf16>, vector<34x128xf32> -> vector<34x128xf32>
    %21 = arith.maximumf %18, %20 : vector<34x128xf32>
    %c0_16 = arith.constant 0 : index
    %c0_17 = arith.constant 0 : index
    %22 = vector.load %arg60[%c0_16, %c0_17] : memref<36x128xf32, #tpu.memory_space<vmem>>, vector<34x128xf32>
    tpu.vector_store %arg60[%c0_16, %c0_17], %21 {strides = array<i32>} : memref<36x128xf32, #tpu.memory_space<vmem>>, vector<34x128xf32>,
    %cst_18 = arith.constant 0.000000e+00 : f32
    %23 = vector.broadcast %cst_18 : f32 to vector<20x128xf32>
    %c0_19 = arith.constant 0 : index
    %c0_20 = arith.constant 0 : index
    %24 = vector.load %arg61[%c0_19, %c0_20] : memref<20x128xf32, #tpu.memory_space<vmem>>, vector<20x128xf32>
    tpu.vector_store %arg61[%c0_19, %c0_20], %23 {strides = array<i32>} : memref<20x128xf32, #tpu.memory_space<vmem>>, vector<20x128xf32>,
    %c0_21 = arith.constant 0 : index
    %c0_22 = arith.constant 0 : index
    %25 = tpu.strided_load %arg60[%c0_21, %c0_22] {strides = array<i32: 2, 1>} : memref<36x128xf32, #tpu.memory_space<vmem>>, vector<8x128xf32>
    %c1 = arith.constant 1 : index
    %c0_23 = arith.constant 0 : index
    %26 = tpu.strided_load %arg60[%c1, %c0_23] {strides = array<i32: 2, 1>} : memref<36x128xf32, #tpu.memory_space<vmem>>, vector<8x128xf32>
    %c1_i32 = arith.constant 1 : i32
    %27 = tpu.dynamic_rotate %26 by %c1_i32 dim 0 : vector<8x128xf32>, i32 -> vector<8x128xf32>
    %28 = tpu.iota {dimensions = array<i32: 0>} : vector<8x128xi32>
    %c0_i32 = arith.constant 0 : i32
    %29 = vector.broadcast %c0_i32 : i32 to vector<8x128xi32>
    %30 = arith.cmpi eq, %28, %29 : vector<8x128xi32>
    %31 = arith.select %30, %26, %27 : vector<8x128xi1>, vector<8x128xf32>
    %32 = arith.maximumf %25, %26 : vector<8x128xf32>
    %33 = arith.maximumf %32, %31 : vector<8x128xf32>
    %c1_24 = arith.constant 1 : index
    %c0_25 = arith.constant 0 : index
    %34 = vector.load %arg61[%c1_24, %c0_25] : memref<20x128xf32, #tpu.memory_space<vmem>>, vector<8x128xf32>
    tpu.vector_store %arg61[%c1_24, %c0_25], %33 {strides = array<i32>} : memref<20x128xf32, #tpu.memory_space<vmem>>, vector<8x128xf32>,
    %c18 = arith.constant 18 : index
    %c0_26 = arith.constant 0 : index
    %35 = tpu.strided_load %arg60[%c18, %c0_26] {strides = array<i32: 2, 1>} : memref<36x128xf32, #tpu.memory_space<vmem>>, vector<8x128xf32>
    %c19 = arith.constant 19 : index
    %c0_27 = arith.constant 0 : index
    %36 = tpu.strided_load %arg60[%c19, %c0_27] {strides = array<i32: 2, 1>} : memref<36x128xf32, #tpu.memory_space<vmem>>, vector<8x128xf32>
    %c1_i32_28 = arith.constant 1 : i32
    %37 = tpu.dynamic_rotate %36 by %c1_i32_28 dim 0 : vector<8x128xf32>, i32 -> vector<8x128xf32>
    %38 = tpu.iota {dimensions = array<i32: 0>} : vector<8x128xi32>
    %c0_i32_29 = arith.constant 0 : i32
    %39 = vector.broadcast %c0_i32_29 : i32 to vector<8x128xi32>
    %40 = arith.cmpi eq, %38, %39 : vector<8x128xi32>
    %41 = arith.select %40, %36, %37 : vector<8x128xi1>, vector<8x128xf32>
    %42 = arith.maximumf %35, %36 : vector<8x128xf32>
    %43 = arith.maximumf %42, %41 : vector<8x128xf32>
    %c11 = arith.constant 11 : index
    %c0_30 = arith.constant 0 : index
    %44 = vector.load %arg61[%c11, %c0_30] : memref<20x128xf32, #tpu.memory_space<vmem>>, vector<8x128xf32>
    tpu.vector_store %arg61[%c11, %c0_30], %43 {strides = array<i32>} : memref<20x128xf32, #tpu.memory_space<vmem>>, vector<8x128xf32>,
    %cst_31 = arith.constant 0.000000e+00 : f32
    %45 = vector.broadcast %cst_31 : f32 to vector<20x128xf32>
    %c0_32 = arith.constant 0 : index
    %c0_33 = arith.constant 0 : index
    %46 = vector.load %arg62[%c0_32, %c0_33] : memref<20x128xf32, #tpu.memory_space<vmem>>, vector<20x128xf32>
    tpu.vector_store %arg62[%c0_32, %c0_33], %45 {strides = array<i32>} : memref<20x128xf32, #tpu.memory_space<vmem>>, vector<20x128xf32>,
    %47 = tpu.iota {dimensions = array<i32: 0>} : vector<18x128xi32>
    %c10_i32 = arith.constant 10 : i32
    %c0_i32_34 = arith.constant 0 : i32
    %48 = arith.cmpi eq, %c10_i32, %c0_i32_34 : i32
    %c1_i32_35 = arith.constant 1 : i32
    %49 = arith.select %48, %c1_i32_35, %c10_i32 : i32
    %50 = vector.broadcast %49 : i32 to vector<18x128xi32>
    %51 = arith.remsi %47, %50 : vector<18x128xi32>
    %c0_i32_36 = arith.constant 0 : i32
    %52 = vector.broadcast %c0_i32_36 : i32 to vector<18x128xi32>
    %53 = arith.cmpi ne, %51, %52 : vector<18x128xi32>
    %c0_i32_37 = arith.constant 0 : i32
    %54 = vector.broadcast %c0_i32_37 : i32 to vector<18x128xi32>
    %55 = arith.cmpi slt, %51, %54 : vector<18x128xi32>
    %c0_i32_38 = arith.constant 0 : i32
    %56 = arith.cmpi slt, %49, %c0_i32_38 : i32
    %57 = vector.broadcast %56 : i1 to vector<18x128xi1>
    %58 = vector.broadcast %57 : vector<18x128xi1> to vector<18x128xi1>
    %59 = arith.xori %55, %58 : vector<18x128xi1>
    %60 = arith.andi %59, %53 : vector<18x128xi1>
    %61 = vector.broadcast %49 : i32 to vector<18x128xi32>
    %62 = arith.addi %51, %61 : vector<18x128xi32>
    %63 = arith.select %60, %62, %51 : vector<18x128xi1>, vector<18x128xi32>
    %c8_i32 = arith.constant 8 : i32
    %64 = vector.broadcast %c8_i32 : i32 to vector<18x128xi32>
    %65 = arith.cmpi slt, %63, %64 : vector<18x128xi32>
    %c0_39 = arith.constant 0 : index
    %c0_40 = arith.constant 0 : index
    %66 = vector.load %arg61[%c0_39, %c0_40] : memref<20x128xf32, #tpu.memory_space<vmem>>, vector<20x128xf32>
    %cst_41 = arith.constant 0.000000e+00 : f32
    %67 = vector.broadcast %cst_41 : f32 to vector<20x128xf32>
    %68 = arith.maximumf %66, %67 : vector<20x128xf32>
    %69 = arith.truncf %68 : vector<20x128xf32> to vector<20x128xbf16>
    %70 = vector.extract_strided_slice %69 {offsets = [0, 0], sizes = [18, 128], strides = [1, 1]} : vector<20x128xbf16> to vector<18x128xbf16>
    %71 = vector.extract_strided_slice %69 {offsets = [1, 0], sizes = [18, 128], strides = [1, 1]} : vector<20x128xbf16> to vector<18x128xbf16>
    %72 = vector.extract_strided_slice %69 {offsets = [2, 0], sizes = [18, 128], strides = [1, 1]} : vector<20x128xbf16> to vector<18x128xbf16>
    %73 = tpu.concatenate %70, %71, %72 in 1 : vector<18x128xbf16>, vector<18x128xbf16>, vector<18x128xbf16> -> vector<18x384xbf16>
    %c0_42 = arith.constant 0 : index
    %c0_43 = arith.constant 0 : index
    %74 = vector.load %arg8[%c0_42, %c0_43] : memref<384x128xbf16, #tpu.memory_space<vmem>>, vector<384x128xbf16>
    %cst_44 = arith.constant dense<0.000000e+00> : vector<18x128xf32>
    %75 = tpu.matmul %73, %74, %cst_44 {dimension_numbers = #tpu.dot_dimension_numbers<[1], [0], [0], [1], [0, 0, 1, 1], [], []>} : vector<18x384xbf16>, vector<384x128xbf16>, vector<18x128xf32> -> vector<18x128xf32>
    %c0_45 = arith.constant 0 : index
    %c0_46 = arith.constant 0 : index
    %76 = vector.load %arg9[%c0_45, %c0_46] : memref<1x128xf32, #tpu.memory_space<vmem>>, vector<1x128xf32>
    %77 = vector.broadcast %76 : vector<1x128xf32> to vector<18x128xf32>
    %78 = arith.mulf %75, %77 : vector<18x128xf32>
    %c0_47 = arith.constant 0 : index
    %c0_48 = arith.constant 0 : index
    %79 = vector.load %arg10[%c0_47, %c0_48] : memref<1x128xf32, #tpu.memory_space<vmem>>, vector<1x128xf32>
    %80 = vector.broadcast %79 : vector<1x128xf32> to vector<18x128xf32>
    %81 = arith.addf %78, %80 : vector<18x128xf32>
    %cst_49 = arith.constant 0.000000e+00 : f32
    %82 = vector.broadcast %cst_49 : f32 to vector<18x128xf32>
    %83 = arith.maximumf %81, %82 : vector<18x128xf32>
    %cst_50 = arith.constant 0.000000e+00 : f32
    %84 = vector.broadcast %cst_50 : f32 to vector<18x128xf32>
    %85 = arith.select %65, %83, %84 : vector<18x128xi1>, vector<18x128xf32>
    %c1_51 = arith.constant 1 : index
    %c0_52 = arith.constant 0 : index
    %86 = vector.load %arg62[%c1_51, %c0_52] : memref<20x128xf32, #tpu.memory_space<vmem>>, vector<18x128xf32>
    tpu.vector_store %arg62[%c1_51, %c0_52], %85 {strides = array<i32>} : memref<20x128xf32, #tpu.memory_space<vmem>>, vector<18x128xf32>,
    %c0_53 = arith.constant 0 : index
    %c0_54 = arith.constant 0 : index
    %87 = vector.load %arg62[%c0_53, %c0_54] : memref<20x128xf32, #tpu.memory_space<vmem>>, vector<20x128xf32>
    %88 = arith.truncf %87 : vector<20x128xf32> to vector<20x128xbf16>
    %89 = vector.extract_strided_slice %88 {offsets = [0, 0], sizes = [18, 128], strides = [1, 1]} : vector<20x128xbf16> to vector<18x128xbf16>
    %90 = vector.extract_strided_slice %88 {offsets = [1, 0], sizes = [18, 128], strides = [1, 1]} : vector<20x128xbf16> to vector<18x128xbf16>
    %91 = vector.extract_strided_slice %88 {offsets = [2, 0], sizes = [18, 128], strides = [1, 1]} : vector<20x128xbf16> to vector<18x128xbf16>
    %92 = tpu.concatenate %89, %90, %91 in 1 : vector<18x128xbf16>, vector<18x128xbf16>, vector<18x128xbf16> -> vector<18x384xbf16>
    %c0_55 = arith.constant 0 : index
    %c0_56 = arith.constant 0 : index
    %93 = vector.load %arg11[%c0_55, %c0_56] : memref<384x128xbf16, #tpu.memory_space<vmem>>, vector<384x128xbf16>
    %cst_57 = arith.constant dense<0.000000e+00> : vector<18x128xf32>
    %94 = tpu.matmul %92, %93, %cst_57 {dimension_numbers = #tpu.dot_dimension_numbers<[1], [0], [0], [1], [0, 0, 1, 1], [], []>} : vector<18x384xbf16>, vector<384x128xbf16>, vector<18x128xf32> -> vector<18x128xf32>
    %c0_58 = arith.constant 0 : index
    %c0_59 = arith.constant 0 : index
    %95 = vector.load %arg12[%c0_58, %c0_59] : memref<1x128xf32, #tpu.memory_space<vmem>>, vector<1x128xf32>
    %96 = vector.broadcast %95 : vector<1x128xf32> to vector<18x128xf32>
    %97 = arith.mulf %94, %96 : vector<18x128xf32>
    %c0_60 = arith.constant 0 : index
    %c0_61 = arith.constant 0 : index
    %98 = vector.load %arg13[%c0_60, %c0_61] : memref<1x128xf32, #tpu.memory_space<vmem>>, vector<1x128xf32>
    %99 = vector.broadcast %98 : vector<1x128xf32> to vector<18x128xf32>
    %100 = arith.addf %97, %99 : vector<18x128xf32>
    %c1_62 = arith.constant 1 : index
    %c0_63 = arith.constant 0 : index
    %101 = vector.load %arg61[%c1_62, %c0_63] : memref<20x128xf32, #tpu.memory_space<vmem>>, vector<18x128xf32>
    %cst_64 = arith.constant 0.000000e+00 : f32
    %102 = vector.broadcast %cst_64 : f32 to vector<18x128xf32>
    %103 = arith.select %65, %100, %102 : vector<18x128xi1>, vector<18x128xf32>
    %104 = arith.addf %101, %103 : vector<18x128xf32>
    %c1_65 = arith.constant 1 : index
    %c0_66 = arith.constant 0 : index
    %105 = vector.load %arg61[%c1_65, %c0_66] : memref<20x128xf32, #tpu.memory_space<vmem>>, vector<18x128xf32>
    tpu.vector_store %arg61[%c1_65, %c0_66], %104 {strides = array<i32>} : memref<20x128xf32, #tpu.memory_space<vmem>>, vector<18x128xf32>,
    %c0_67 = arith.constant 0 : index
    %c0_68 = arith.constant 0 : index
    %106 = vector.load %arg61[%c0_67, %c0_68] : memref<20x128xf32, #tpu.memory_space<vmem>>, vector<20x128xf32>
    %cst_69 = arith.constant 0.000000e+00 : f32
    %107 = vector.broadcast %cst_69 : f32 to vector<20x128xf32>
    %108 = arith.maximumf %106, %107 : vector<20x128xf32>
    %109 = arith.truncf %108 : vector<20x128xf32> to vector<20x128xbf16>
    %110 = vector.extract_strided_slice %109 {offsets = [0, 0], sizes = [18, 128], strides = [1, 1]} : vector<20x128xbf16> to vector<18x128xbf16>
    %111 = vector.extract_strided_slice %109 {offsets = [1, 0], sizes = [18, 128], strides = [1, 1]} : vector<20x128xbf16> to vector<18x128xbf16>
    %112 = vector.extract_strided_slice %109 {offsets = [2, 0], sizes = [18, 128], strides = [1, 1]} : vector<20x128xbf16> to vector<18x128xbf16>
    %113 = tpu.concatenate %110, %111, %112 in 1 : vector<18x128xbf16>, vector<18x128xbf16>, vector<18x128xbf16> -> vector<18x384xbf16>
    %c0_70 = arith.constant 0 : index
    %c0_71 = arith.constant 0 : index
    %114 = vector.load %arg14[%c0_70, %c0_71] : memref<384x128xbf16, #tpu.memory_space<vmem>>, vector<384x128xbf16>
    %cst_72 = arith.constant dense<0.000000e+00> : vector<18x128xf32>
    %115 = tpu.matmul %113, %114, %cst_72 {dimension_numbers = #tpu.dot_dimension_numbers<[1], [0], [0], [1], [0, 0, 1, 1], [], []>} : vector<18x384xbf16>, vector<384x128xbf16>, vector<18x128xf32> -> vector<18x128xf32>
    %c0_73 = arith.constant 0 : index
    %c0_74 = arith.constant 0 : index
    %116 = vector.load %arg15[%c0_73, %c0_74] : memref<1x128xf32, #tpu.memory_space<vmem>>, vector<1x128xf32>
    %117 = vector.broadcast %116 : vector<1x128xf32> to vector<18x128xf32>
    %118 = arith.mulf %115, %117 : vector<18x128xf32>
    %c0_75 = arith.constant 0 : index
    %c0_76 = arith.constant 0 : index
    %119 = vector.load %arg16[%c0_75, %c0_76] : memref<1x128xf32, #tpu.memory_space<vmem>>, vector<1x128xf32>
    %120 = vector.broadcast %119 : vector<1x128xf32> to vector<18x128xf32>
    %121 = arith.addf %118, %120 : vector<18x128xf32>
    %cst_77 = arith.constant 0.000000e+00 : f32
    %122 = vector.broadcast %cst_77 : f32 to vector<18x128xf32>
    %123 = arith.maximumf %121, %122 : vector<18x128xf32>
    %cst_78 = arith.constant 0.000000e+00 : f32
    %124 = vector.broadcast %cst_78 : f32 to vector<18x128xf32>
    %125 = arith.select %65, %123, %124 : vector<18x128xi1>, vector<18x128xf32>
    %c1_79 = arith.constant 1 : index
    %c0_80 = arith.constant 0 : index
    %126 = vector.load %arg62[%c1_79, %c0_80] : memref<20x128xf32, #tpu.memory_space<vmem>>, vector<18x128xf32>
    tpu.vector_store %arg62[%c1_79, %c0_80], %125 {strides = array<i32>} : memref<20x128xf32, #tpu.memory_space<vmem>>, vector<18x128xf32>,
    %c0_81 = arith.constant 0 : index
    %c0_82 = arith.constant 0 : index
    %127 = vector.load %arg62[%c0_81, %c0_82] : memref<20x128xf32, #tpu.memory_space<vmem>>, vector<20x128xf32>
    %128 = arith.truncf %127 : vector<20x128xf32> to vector<20x128xbf16>
    %129 = vector.extract_strided_slice %128 {offsets = [0, 0], sizes = [18, 128], strides = [1, 1]} : vector<20x128xbf16> to vector<18x128xbf16>
    %130 = vector.extract_strided_slice %128 {offsets = [1, 0], sizes = [18, 128], strides = [1, 1]} : vector<20x128xbf16> to vector<18x128xbf16>
    %131 = vector.extract_strided_slice %128 {offsets = [2, 0], sizes = [18, 128], strides = [1, 1]} : vector<20x128xbf16> to vector<18x128xbf16>
    %132 = tpu.concatenate %129, %130, %131 in 1 : vector<18x128xbf16>, vector<18x128xbf16>, vector<18x128xbf16> -> vector<18x384xbf16>
    %c0_83 = arith.constant 0 : index
    %c0_84 = arith.constant 0 : index
    %133 = vector.load %arg17[%c0_83, %c0_84] : memref<384x128xbf16, #tpu.memory_space<vmem>>, vector<384x128xbf16>
    %cst_85 = arith.constant dense<0.000000e+00> : vector<18x128xf32>
    %134 = tpu.matmul %132, %133, %cst_85 {dimension_numbers = #tpu.dot_dimension_numbers<[1], [0], [0], [1], [0, 0, 1, 1], [], []>} : vector<18x384xbf16>, vector<384x128xbf16>, vector<18x128xf32> -> vector<18x128xf32>
    %c0_86 = arith.constant 0 : index
    %c0_87 = arith.constant 0 : index
    %135 = vector.load %arg18[%c0_86, %c0_87] : memref<1x128xf32, #tpu.memory_space<vmem>>, vector<1x128xf32>
    %136 = vector.broadcast %135 : vector<1x128xf32> to vector<18x128xf32>
    %137 = arith.mulf %134, %136 : vector<18x128xf32>
    %c0_88 = arith.constant 0 : index
    %c0_89 = arith.constant 0 : index
    %138 = vector.load %arg19[%c0_88, %c0_89] : memref<1x128xf32, #tpu.memory_space<vmem>>, vector<1x128xf32>
    %139 = vector.broadcast %138 : vector<1x128xf32> to vector<18x128xf32>
    %140 = arith.addf %137, %139 : vector<18x128xf32>
    %c1_90 = arith.constant 1 : index
    %c0_91 = arith.constant 0 : index
    %141 = vector.load %arg61[%c1_90, %c0_91] : memref<20x128xf32, #tpu.memory_space<vmem>>, vector<18x128xf32>
    %cst_92 = arith.constant 0.000000e+00 : f32
    %142 = vector.broadcast %cst_92 : f32 to vector<18x128xf32>
    %143 = arith.select %65, %140, %142 : vector<18x128xi1>, vector<18x128xf32>
    %144 = arith.addf %141, %143 : vector<18x128xf32>
    %c1_93 = arith.constant 1 : index
    %c0_94 = arith.constant 0 : index
    %145 = vector.load %arg61[%c1_93, %c0_94] : memref<20x128xf32, #tpu.memory_space<vmem>>, vector<18x128xf32>
    tpu.vector_store %arg61[%c1_93, %c0_94], %144 {strides = array<i32>} : memref<20x128xf32, #tpu.memory_space<vmem>>, vector<18x128xf32>,
    %c0_95 = arith.constant 0 : index
    %c0_96 = arith.constant 0 : index
    %146 = vector.load %arg61[%c0_95, %c0_96] : memref<20x128xf32, #tpu.memory_space<vmem>>, vector<20x128xf32>
    %147 = arith.truncf %146 : vector<20x128xf32> to vector<20x128xbf16>
    %148 = vector.extract_strided_slice %147 {offsets = [0, 0], sizes = [18, 128], strides = [1, 1]} : vector<20x128xbf16> to vector<18x128xbf16>
    %149 = vector.extract_strided_slice %147 {offsets = [1, 0], sizes = [18, 128], strides = [1, 1]} : vector<20x128xbf16> to vector<18x128xbf16>
    %150 = vector.extract_strided_slice %147 {offsets = [2, 0], sizes = [18, 128], strides = [1, 1]} : vector<20x128xbf16> to vector<18x128xbf16>
    %151 = tpu.concatenate %148, %149, %150 in 1 : vector<18x128xbf16>, vector<18x128xbf16>, vector<18x128xbf16> -> vector<18x384xbf16>
    %c0_97 = arith.constant 0 : index
    %c0_98 = arith.constant 0 : index
    %152 = vector.load %arg20[%c0_97, %c0_98] : memref<384x256xbf16, #tpu.memory_space<vmem>>, vector<384x256xbf16>
    %cst_99 = arith.constant dense<0.000000e+00> : vector<18x256xf32>
    %153 = tpu.matmul %151, %152, %cst_99 {dimension_numbers = #tpu.dot_dimension_numbers<[1], [0], [0], [1], [0, 0, 1, 1], [], []>} : vector<18x384xbf16>, vector<384x256xbf16>, vector<18x256xf32> -> vector<18x256xf32>
    %c0_100 = arith.constant 0 : index
    %c0_101 = arith.constant 0 : index
    %154 = vector.load %arg21[%c0_100, %c0_101] : memref<1x256xf32, #tpu.memory_space<vmem>>, vector<1x256xf32>
    %155 = vector.broadcast %154 : vector<1x256xf32> to vector<18x256xf32>
    %156 = arith.mulf %153, %155 : vector<18x256xf32>
    %c0_102 = arith.constant 0 : index
    %c0_103 = arith.constant 0 : index
    %157 = vector.load %arg22[%c0_102, %c0_103] : memref<1x256xf32, #tpu.memory_space<vmem>>, vector<1x256xf32>
    %158 = vector.broadcast %157 : vector<1x256xf32> to vector<18x256xf32>
    %159 = arith.addf %156, %158 : vector<18x256xf32>
    %160 = arith.truncf %159 : vector<18x256xf32> to vector<18x256xbf16>
    %c0_104 = arith.constant 0 : index
    %c0_105 = arith.constant 0 : index
    %161 = vector.load %arg24[%c0_104, %c0_105] : memref<256x128xbf16, #tpu.memory_space<vmem>>, vector<256x128xbf16>
    %cst_106 = arith.constant dense<0.000000e+00> : vector<18x128xf32>
    %162 = tpu.matmul %160, %161, %cst_106 {dimension_numbers = #tpu.dot_dimension_numbers<[1], [0], [0], [1], [0, 0, 1, 1], [], []>} : vector<18x256xbf16>, vector<256x128xbf16>, vector<18x128xf32> -> vector<18x128xf32>
    %c0_107 = arith.constant 0 : index
    %c0_108 = arith.constant 0 : index
    %163 = vector.load %arg25[%c0_107, %c0_108] : memref<256x128xbf16, #tpu.memory_space<vmem>>, vector<256x128xbf16>
    %cst_109 = arith.constant dense<0.000000e+00> : vector<18x128xf32>
    %164 = tpu.matmul %160, %163, %cst_109 {dimension_numbers = #tpu.dot_dimension_numbers<[1], [0], [0], [1], [0, 0, 1, 1], [], []>} : vector<18x256xbf16>, vector<256x128xbf16>, vector<18x128xf32> -> vector<18x128xf32>
    %165 = arith.maximumf %162, %164 : vector<18x128xf32>
    %c0_110 = arith.constant 0 : index
    %c0_111 = arith.constant 0 : index
    %166 = vector.load %arg23[%c0_110, %c0_111] : memref<256x128xbf16, #tpu.memory_space<vmem>>, vector<256x128xbf16>
    %cst_112 = arith.constant dense<0.000000e+00> : vector<18x128xf32>
    %167 = tpu.matmul %160, %166, %cst_112 {dimension_numbers = #tpu.dot_dimension_numbers<[1], [0], [0], [1], [0, 0, 1, 1], [], []>} : vector<18x256xbf16>, vector<256x128xbf16>, vector<18x128xf32> -> vector<18x128xf32>
    %168 = arith.maximumf %165, %167 : vector<18x128xf32>
    %c0_113 = arith.constant 0 : index
    %c0_114 = arith.constant 0 : index
    %169 = vector.load %arg63[%c0_113, %c0_114] : memref<20x128xf32, #tpu.memory_space<vmem>>, vector<18x128xf32>
    tpu.vector_store %arg63[%c0_113, %c0_114], %168 {strides = array<i32>} : memref<20x128xf32, #tpu.memory_space<vmem>>, vector<18x128xf32>,
    %cst_115 = arith.constant 0.000000e+00 : f32
    %170 = vector.broadcast %cst_115 : f32 to vector<12x128xf32>
    %c0_116 = arith.constant 0 : index
    %c0_117 = arith.constant 0 : index
    %171 = vector.load %arg64[%c0_116, %c0_117] : memref<12x128xf32, #tpu.memory_space<vmem>>, vector<12x128xf32>
    tpu.vector_store %arg64[%c0_116, %c0_117], %170 {strides = array<i32>} : memref<12x128xf32, #tpu.memory_space<vmem>>, vector<12x128xf32>,
    %c0_118 = arith.constant 0 : index
    %c0_119 = arith.constant 0 : index
    %172 = tpu.strided_load %arg63[%c0_118, %c0_119] {strides = array<i32: 2, 1>} : memref<20x128xf32, #tpu.memory_space<vmem>>, vector<4x128xf32>
    %c1_120 = arith.constant 1 : index
    %c0_121 = arith.constant 0 : index
    %173 = tpu.strided_load %arg63[%c1_120, %c0_121] {strides = array<i32: 2, 1>} : memref<20x128xf32, #tpu.memory_space<vmem>>, vector<4x128xf32>
    %c1_i32_122 = arith.constant 1 : i32
    %174 = tpu.dynamic_rotate %173 by %c1_i32_122 dim 0 : vector<4x128xf32>, i32 -> vector<4x128xf32>
    %175 = tpu.iota {dimensions = array<i32: 0>} : vector<4x128xi32>
    %c0_i32_123 = arith.constant 0 : i32
    %176 = vector.broadcast %c0_i32_123 : i32 to vector<4x128xi32>
    %177 = arith.cmpi eq, %175, %176 : vector<4x128xi32>
    %178 = arith.select %177, %173, %174 : vector<4x128xi1>, vector<4x128xf32>
    %179 = arith.maximumf %172, %173 : vector<4x128xf32>
    %180 = arith.maximumf %179, %178 : vector<4x128xf32>
    %c1_124 = arith.constant 1 : index
    %c0_125 = arith.constant 0 : index
    %181 = vector.load %arg64[%c1_124, %c0_125] : memref<12x128xf32, #tpu.memory_space<vmem>>, vector<4x128xf32>
    tpu.vector_store %arg64[%c1_124, %c0_125], %180 {strides = array<i32>} : memref<12x128xf32, #tpu.memory_space<vmem>>, vector<4x128xf32>,
    %c10 = arith.constant 10 : index
    %c0_126 = arith.constant 0 : index
    %182 = tpu.strided_load %arg63[%c10, %c0_126] {strides = array<i32: 2, 1>} : memref<20x128xf32, #tpu.memory_space<vmem>>, vector<4x128xf32>
    %c11_127 = arith.constant 11 : index
    %c0_128 = arith.constant 0 : index
    %183 = tpu.strided_load %arg63[%c11_127, %c0_128] {strides = array<i32: 2, 1>} : memref<20x128xf32, #tpu.memory_space<vmem>>, vector<4x128xf32>
    %c1_i32_129 = arith.constant 1 : i32
    %184 = tpu.dynamic_rotate %183 by %c1_i32_129 dim 0 : vector<4x128xf32>, i32 -> vector<4x128xf32>
    %185 = tpu.iota {dimensions = array<i32: 0>} : vector<4x128xi32>
    %c0_i32_130 = arith.constant 0 : i32
    %186 = vector.broadcast %c0_i32_130 : i32 to vector<4x128xi32>
    %187 = arith.cmpi eq, %185, %186 : vector<4x128xi32>
    %188 = arith.select %187, %183, %184 : vector<4x128xi1>, vector<4x128xf32>
    %189 = arith.maximumf %182, %183 : vector<4x128xf32>
    %190 = arith.maximumf %189, %188 : vector<4x128xf32>
    %c7 = arith.constant 7 : index
    %c0_131 = arith.constant 0 : index
    %191 = vector.load %arg64[%c7, %c0_131] : memref<12x128xf32, #tpu.memory_space<vmem>>, vector<4x128xf32>
    tpu.vector_store %arg64[%c7, %c0_131], %190 {strides = array<i32>} : memref<12x128xf32, #tpu.memory_space<vmem>>, vector<4x128xf32>,
    %cst_132 = arith.constant 0.000000e+00 : f32
    %192 = vector.broadcast %cst_132 : f32 to vector<12x128xf32>
    %c0_133 = arith.constant 0 : index
    %c0_134 = arith.constant 0 : index
    %193 = vector.load %arg65[%c0_133, %c0_134] : memref<12x128xf32, #tpu.memory_space<vmem>>, vector<12x128xf32>
    tpu.vector_store %arg65[%c0_133, %c0_134], %192 {strides = array<i32>} : memref<12x128xf32, #tpu.memory_space<vmem>>, vector<12x128xf32>,
    %194 = tpu.iota {dimensions = array<i32: 0>} : vector<10x128xi32>
    %c6_i32 = arith.constant 6 : i32
    %c0_i32_135 = arith.constant 0 : i32
    %195 = arith.cmpi eq, %c6_i32, %c0_i32_135 : i32
    %c1_i32_136 = arith.constant 1 : i32
    %196 = arith.select %195, %c1_i32_136, %c6_i32 : i32
    %197 = vector.broadcast %196 : i32 to vector<10x128xi32>
    %198 = arith.remsi %194, %197 : vector<10x128xi32>
    %c0_i32_137 = arith.constant 0 : i32
    %199 = vector.broadcast %c0_i32_137 : i32 to vector<10x128xi32>
    %200 = arith.cmpi ne, %198, %199 : vector<10x128xi32>
    %c0_i32_138 = arith.constant 0 : i32
    %201 = vector.broadcast %c0_i32_138 : i32 to vector<10x128xi32>
    %202 = arith.cmpi slt, %198, %201 : vector<10x128xi32>
    %c0_i32_139 = arith.constant 0 : i32
    %203 = arith.cmpi slt, %196, %c0_i32_139 : i32
    %204 = vector.broadcast %203 : i1 to vector<10x128xi1>
    %205 = vector.broadcast %204 : vector<10x128xi1> to vector<10x128xi1>
    %206 = arith.xori %202, %205 : vector<10x128xi1>
    %207 = arith.andi %206, %200 : vector<10x128xi1>
    %208 = vector.broadcast %196 : i32 to vector<10x128xi32>
    %209 = arith.addi %198, %208 : vector<10x128xi32>
    %210 = arith.select %207, %209, %198 : vector<10x128xi1>, vector<10x128xi32>
    %c4_i32 = arith.constant 4 : i32
    %211 = vector.broadcast %c4_i32 : i32 to vector<10x128xi32>
    %212 = arith.cmpi slt, %210, %211 : vector<10x128xi32>
    %c0_140 = arith.constant 0 : index
    %c0_141 = arith.constant 0 : index
    %213 = vector.load %arg64[%c0_140, %c0_141] : memref<12x128xf32, #tpu.memory_space<vmem>>, vector<12x128xf32>
    %cst_142 = arith.constant 0.000000e+00 : f32
    %214 = vector.broadcast %cst_142 : f32 to vector<12x128xf32>
    %215 = arith.maximumf %213, %214 : vector<12x128xf32>
    %216 = arith.truncf %215 : vector<12x128xf32> to vector<12x128xbf16>
    %217 = vector.extract_strided_slice %216 {offsets = [0, 0], sizes = [10, 128], strides = [1, 1]} : vector<12x128xbf16> to vector<10x128xbf16>
    %218 = vector.extract_strided_slice %216 {offsets = [1, 0], sizes = [10, 128], strides = [1, 1]} : vector<12x128xbf16> to vector<10x128xbf16>
    %219 = vector.extract_strided_slice %216 {offsets = [2, 0], sizes = [10, 128], strides = [1, 1]} : vector<12x128xbf16> to vector<10x128xbf16>
    %220 = tpu.concatenate %217, %218, %219 in 1 : vector<10x128xbf16>, vector<10x128xbf16>, vector<10x128xbf16> -> vector<10x384xbf16>
    %c0_143 = arith.constant 0 : index
    %c0_144 = arith.constant 0 : index
    %221 = vector.load %arg26[%c0_143, %c0_144] : memref<384x128xbf16, #tpu.memory_space<vmem>>, vector<384x128xbf16>
    %cst_145 = arith.constant dense<0.000000e+00> : vector<10x128xf32>
    %222 = tpu.matmul %220, %221, %cst_145 {dimension_numbers = #tpu.dot_dimension_numbers<[1], [0], [0], [1], [0, 0, 1, 1], [], []>} : vector<10x384xbf16>, vector<384x128xbf16>, vector<10x128xf32> -> vector<10x128xf32>
    %c0_146 = arith.constant 0 : index
    %c0_147 = arith.constant 0 : index
    %223 = vector.load %arg27[%c0_146, %c0_147] : memref<1x128xf32, #tpu.memory_space<vmem>>, vector<1x128xf32>
    %224 = vector.broadcast %223 : vector<1x128xf32> to vector<10x128xf32>
    %225 = arith.mulf %222, %224 : vector<10x128xf32>
    %c0_148 = arith.constant 0 : index
    %c0_149 = arith.constant 0 : index
    %226 = vector.load %arg28[%c0_148, %c0_149] : memref<1x128xf32, #tpu.memory_space<vmem>>, vector<1x128xf32>
    %227 = vector.broadcast %226 : vector<1x128xf32> to vector<10x128xf32>
    %228 = arith.addf %225, %227 : vector<10x128xf32>
    %cst_150 = arith.constant 0.000000e+00 : f32
    %229 = vector.broadcast %cst_150 : f32 to vector<10x128xf32>
    %230 = arith.maximumf %228, %229 : vector<10x128xf32>
    %cst_151 = arith.constant 0.000000e+00 : f32
    %231 = vector.broadcast %cst_151 : f32 to vector<10x128xf32>
    %232 = arith.select %212, %230, %231 : vector<10x128xi1>, vector<10x128xf32>
    %c1_152 = arith.constant 1 : index
    %c0_153 = arith.constant 0 : index
    %233 = vector.load %arg65[%c1_152, %c0_153] : memref<12x128xf32, #tpu.memory_space<vmem>>, vector<10x128xf32>
    tpu.vector_store %arg65[%c1_152, %c0_153], %232 {strides = array<i32>} : memref<12x128xf32, #tpu.memory_space<vmem>>, vector<10x128xf32>,
    %c0_154 = arith.constant 0 : index
    %c0_155 = arith.constant 0 : index
    %234 = vector.load %arg65[%c0_154, %c0_155] : memref<12x128xf32, #tpu.memory_space<vmem>>, vector<12x128xf32>
    %235 = arith.truncf %234 : vector<12x128xf32> to vector<12x128xbf16>
    %236 = vector.extract_strided_slice %235 {offsets = [0, 0], sizes = [10, 128], strides = [1, 1]} : vector<12x128xbf16> to vector<10x128xbf16>
    %237 = vector.extract_strided_slice %235 {offsets = [1, 0], sizes = [10, 128], strides = [1, 1]} : vector<12x128xbf16> to vector<10x128xbf16>
    %238 = vector.extract_strided_slice %235 {offsets = [2, 0], sizes = [10, 128], strides = [1, 1]} : vector<12x128xbf16> to vector<10x128xbf16>
    %239 = tpu.concatenate %236, %237, %238 in 1 : vector<10x128xbf16>, vector<10x128xbf16>, vector<10x128xbf16> -> vector<10x384xbf16>
    %c0_156 = arith.constant 0 : index
    %c0_157 = arith.constant 0 : index
    %240 = vector.load %arg29[%c0_156, %c0_157] : memref<384x128xbf16, #tpu.memory_space<vmem>>, vector<384x128xbf16>
    %cst_158 = arith.constant dense<0.000000e+00> : vector<10x128xf32>
    %241 = tpu.matmul %239, %240, %cst_158 {dimension_numbers = #tpu.dot_dimension_numbers<[1], [0], [0], [1], [0, 0, 1, 1], [], []>} : vector<10x384xbf16>, vector<384x128xbf16>, vector<10x128xf32> -> vector<10x128xf32>
    %c0_159 = arith.constant 0 : index
    %c0_160 = arith.constant 0 : index
    %242 = vector.load %arg30[%c0_159, %c0_160] : memref<1x128xf32, #tpu.memory_space<vmem>>, vector<1x128xf32>
    %243 = vector.broadcast %242 : vector<1x128xf32> to vector<10x128xf32>
    %244 = arith.mulf %241, %243 : vector<10x128xf32>
    %c0_161 = arith.constant 0 : index
    %c0_162 = arith.constant 0 : index
    %245 = vector.load %arg31[%c0_161, %c0_162] : memref<1x128xf32, #tpu.memory_space<vmem>>, vector<1x128xf32>
    %246 = vector.broadcast %245 : vector<1x128xf32> to vector<10x128xf32>
    %247 = arith.addf %244, %246 : vector<10x128xf32>
    %c1_163 = arith.constant 1 : index
    %c0_164 = arith.constant 0 : index
    %248 = vector.load %arg64[%c1_163, %c0_164] : memref<12x128xf32, #tpu.memory_space<vmem>>, vector<10x128xf32>
    %cst_165 = arith.constant 0.000000e+00 : f32
    %249 = vector.broadcast %cst_165 : f32 to vector<10x128xf32>
    %250 = arith.select %212, %247, %249 : vector<10x128xi1>, vector<10x128xf32>
    %251 = arith.addf %248, %250 : vector<10x128xf32>
    %c1_166 = arith.constant 1 : index
    %c0_167 = arith.constant 0 : index
    %252 = vector.load %arg64[%c1_166, %c0_167] : memref<12x128xf32, #tpu.memory_space<vmem>>, vector<10x128xf32>
    tpu.vector_store %arg64[%c1_166, %c0_167], %251 {strides = array<i32>} : memref<12x128xf32, #tpu.memory_space<vmem>>, vector<10x128xf32>,
    %c0_168 = arith.constant 0 : index
    %c0_169 = arith.constant 0 : index
    %253 = vector.load %arg64[%c0_168, %c0_169] : memref<12x128xf32, #tpu.memory_space<vmem>>, vector<12x128xf32>
    %cst_170 = arith.constant 0.000000e+00 : f32
    %254 = vector.broadcast %cst_170 : f32 to vector<12x128xf32>
    %255 = arith.maximumf %253, %254 : vector<12x128xf32>
    %256 = arith.truncf %255 : vector<12x128xf32> to vector<12x128xbf16>
    %257 = vector.extract_strided_slice %256 {offsets = [0, 0], sizes = [10, 128], strides = [1, 1]} : vector<12x128xbf16> to vector<10x128xbf16>
    %258 = vector.extract_strided_slice %256 {offsets = [1, 0], sizes = [10, 128], strides = [1, 1]} : vector<12x128xbf16> to vector<10x128xbf16>
    %259 = vector.extract_strided_slice %256 {offsets = [2, 0], sizes = [10, 128], strides = [1, 1]} : vector<12x128xbf16> to vector<10x128xbf16>
    %260 = tpu.concatenate %257, %258, %259 in 1 : vector<10x128xbf16>, vector<10x128xbf16>, vector<10x128xbf16> -> vector<10x384xbf16>
    %c0_171 = arith.constant 0 : index
    %c0_172 = arith.constant 0 : index
    %261 = vector.load %arg32[%c0_171, %c0_172] : memref<384x128xbf16, #tpu.memory_space<vmem>>, vector<384x128xbf16>
    %cst_173 = arith.constant dense<0.000000e+00> : vector<10x128xf32>
    %262 = tpu.matmul %260, %261, %cst_173 {dimension_numbers = #tpu.dot_dimension_numbers<[1], [0], [0], [1], [0, 0, 1, 1], [], []>} : vector<10x384xbf16>, vector<384x128xbf16>, vector<10x128xf32> -> vector<10x128xf32>
    %c0_174 = arith.constant 0 : index
    %c0_175 = arith.constant 0 : index
    %263 = vector.load %arg33[%c0_174, %c0_175] : memref<1x128xf32, #tpu.memory_space<vmem>>, vector<1x128xf32>
    %264 = vector.broadcast %263 : vector<1x128xf32> to vector<10x128xf32>
    %265 = arith.mulf %262, %264 : vector<10x128xf32>
    %c0_176 = arith.constant 0 : index
    %c0_177 = arith.constant 0 : index
    %266 = vector.load %arg34[%c0_176, %c0_177] : memref<1x128xf32, #tpu.memory_space<vmem>>, vector<1x128xf32>
    %267 = vector.broadcast %266 : vector<1x128xf32> to vector<10x128xf32>
    %268 = arith.addf %265, %267 : vector<10x128xf32>
    %cst_178 = arith.constant 0.000000e+00 : f32
    %269 = vector.broadcast %cst_178 : f32 to vector<10x128xf32>
    %270 = arith.maximumf %268, %269 : vector<10x128xf32>
    %cst_179 = arith.constant 0.000000e+00 : f32
    %271 = vector.broadcast %cst_179 : f32 to vector<10x128xf32>
    %272 = arith.select %212, %270, %271 : vector<10x128xi1>, vector<10x128xf32>
    %c1_180 = arith.constant 1 : index
    %c0_181 = arith.constant 0 : index
    %273 = vector.load %arg65[%c1_180, %c0_181] : memref<12x128xf32, #tpu.memory_space<vmem>>, vector<10x128xf32>
    tpu.vector_store %arg65[%c1_180, %c0_181], %272 {strides = array<i32>} : memref<12x128xf32, #tpu.memory_space<vmem>>, vector<10x128xf32>,
    %c0_182 = arith.constant 0 : index
    %c0_183 = arith.constant 0 : index
    %274 = vector.load %arg65[%c0_182, %c0_183] : memref<12x128xf32, #tpu.memory_space<vmem>>, vector<12x128xf32>
    %275 = arith.truncf %274 : vector<12x128xf32> to vector<12x128xbf16>
    %276 = vector.extract_strided_slice %275 {offsets = [0, 0], sizes = [10, 128], strides = [1, 1]} : vector<12x128xbf16> to vector<10x128xbf16>
    %277 = vector.extract_strided_slice %275 {offsets = [1, 0], sizes = [10, 128], strides = [1, 1]} : vector<12x128xbf16> to vector<10x128xbf16>
    %278 = vector.extract_strided_slice %275 {offsets = [2, 0], sizes = [10, 128], strides = [1, 1]} : vector<12x128xbf16> to vector<10x128xbf16>
    %279 = tpu.concatenate %276, %277, %278 in 1 : vector<10x128xbf16>, vector<10x128xbf16>, vector<10x128xbf16> -> vector<10x384xbf16>
    %c0_184 = arith.constant 0 : index
    %c0_185 = arith.constant 0 : index
    %280 = vector.load %arg35[%c0_184, %c0_185] : memref<384x128xbf16, #tpu.memory_space<vmem>>, vector<384x128xbf16>
    %cst_186 = arith.constant dense<0.000000e+00> : vector<10x128xf32>
    %281 = tpu.matmul %279, %280, %cst_186 {dimension_numbers = #tpu.dot_dimension_numbers<[1], [0], [0], [1], [0, 0, 1, 1], [], []>} : vector<10x384xbf16>, vector<384x128xbf16>, vector<10x128xf32> -> vector<10x128xf32>
    %c0_187 = arith.constant 0 : index
    %c0_188 = arith.constant 0 : index
    %282 = vector.load %arg36[%c0_187, %c0_188] : memref<1x128xf32, #tpu.memory_space<vmem>>, vector<1x128xf32>
    %283 = vector.broadcast %282 : vector<1x128xf32> to vector<10x128xf32>
    %284 = arith.mulf %281, %283 : vector<10x128xf32>
    %c0_189 = arith.constant 0 : index
    %c0_190 = arith.constant 0 : index
    %285 = vector.load %arg37[%c0_189, %c0_190] : memref<1x128xf32, #tpu.memory_space<vmem>>, vector<1x128xf32>
    %286 = vector.broadcast %285 : vector<1x128xf32> to vector<10x128xf32>
    %287 = arith.addf %284, %286 : vector<10x128xf32>
    %c1_191 = arith.constant 1 : index
    %c0_192 = arith.constant 0 : index
    %288 = vector.load %arg64[%c1_191, %c0_192] : memref<12x128xf32, #tpu.memory_space<vmem>>, vector<10x128xf32>
    %cst_193 = arith.constant 0.000000e+00 : f32
    %289 = vector.broadcast %cst_193 : f32 to vector<10x128xf32>
    %290 = arith.select %212, %287, %289 : vector<10x128xi1>, vector<10x128xf32>
    %291 = arith.addf %288, %290 : vector<10x128xf32>
    %c1_194 = arith.constant 1 : index
    %c0_195 = arith.constant 0 : index
    %292 = vector.load %arg64[%c1_194, %c0_195] : memref<12x128xf32, #tpu.memory_space<vmem>>, vector<10x128xf32>
    tpu.vector_store %arg64[%c1_194, %c0_195], %291 {strides = array<i32>} : memref<12x128xf32, #tpu.memory_space<vmem>>, vector<10x128xf32>,
    %c0_196 = arith.constant 0 : index
    %c0_197 = arith.constant 0 : index
    %293 = vector.load %arg64[%c0_196, %c0_197] : memref<12x128xf32, #tpu.memory_space<vmem>>, vector<12x128xf32>
    %294 = arith.truncf %293 : vector<12x128xf32> to vector<12x128xbf16>
    %295 = vector.extract_strided_slice %294 {offsets = [0, 0], sizes = [10, 128], strides = [1, 1]} : vector<12x128xbf16> to vector<10x128xbf16>
    %296 = vector.extract_strided_slice %294 {offsets = [1, 0], sizes = [10, 128], strides = [1, 1]} : vector<12x128xbf16> to vector<10x128xbf16>
    %297 = vector.extract_strided_slice %294 {offsets = [2, 0], sizes = [10, 128], strides = [1, 1]} : vector<12x128xbf16> to vector<10x128xbf16>
    %298 = tpu.concatenate %295, %296, %297 in 1 : vector<10x128xbf16>, vector<10x128xbf16>, vector<10x128xbf16> -> vector<10x384xbf16>
    %c0_198 = arith.constant 0 : index
    %c0_199 = arith.constant 0 : index
    %299 = vector.load %arg38[%c0_198, %c0_199] : memref<384x128xbf16, #tpu.memory_space<vmem>>, vector<384x128xbf16>
    %cst_200 = arith.constant dense<0.000000e+00> : vector<10x128xf32>
    %300 = tpu.matmul %298, %299, %cst_200 {dimension_numbers = #tpu.dot_dimension_numbers<[1], [0], [0], [1], [0, 0, 1, 1], [], []>} : vector<10x384xbf16>, vector<384x128xbf16>, vector<10x128xf32> -> vector<10x128xf32>
    %c0_201 = arith.constant 0 : index
    %c0_202 = arith.constant 0 : index
    %301 = vector.load %arg39[%c0_201, %c0_202] : memref<1x128xf32, #tpu.memory_space<vmem>>, vector<1x128xf32>
    %302 = vector.broadcast %301 : vector<1x128xf32> to vector<10x128xf32>
    %303 = arith.mulf %300, %302 : vector<10x128xf32>
    %c0_203 = arith.constant 0 : index
    %c0_204 = arith.constant 0 : index
    %304 = vector.load %arg40[%c0_203, %c0_204] : memref<1x128xf32, #tpu.memory_space<vmem>>, vector<1x128xf32>
    %305 = vector.broadcast %304 : vector<1x128xf32> to vector<10x128xf32>
    %306 = arith.addf %303, %305 : vector<10x128xf32>
    %307 = arith.truncf %306 : vector<10x128xf32> to vector<10x128xbf16>
    %c0_205 = arith.constant 0 : index
    %c0_206 = arith.constant 0 : index
    %308 = vector.load %arg42[%c0_205, %c0_206] : memref<128x64xbf16, #tpu.memory_space<vmem>>, vector<128x64xbf16>
    %cst_207 = arith.constant dense<0.000000e+00> : vector<10x64xf32>
    %309 = tpu.matmul %307, %308, %cst_207 {dimension_numbers = #tpu.dot_dimension_numbers<[1], [0], [0], [1], [0, 0, 1, 1], [], []>} : vector<10x128xbf16>, vector<128x64xbf16>, vector<10x64xf32> -> vector<10x64xf32>
    %c0_208 = arith.constant 0 : index
    %c0_209 = arith.constant 0 : index
    %310 = vector.load %arg43[%c0_208, %c0_209] : memref<128x64xbf16, #tpu.memory_space<vmem>>, vector<128x64xbf16>
    %cst_210 = arith.constant dense<0.000000e+00> : vector<10x64xf32>
    %311 = tpu.matmul %307, %310, %cst_210 {dimension_numbers = #tpu.dot_dimension_numbers<[1], [0], [0], [1], [0, 0, 1, 1], [], []>} : vector<10x128xbf16>, vector<128x64xbf16>, vector<10x64xf32> -> vector<10x64xf32>
    %312 = arith.maximumf %309, %311 : vector<10x64xf32>
    %c0_211 = arith.constant 0 : index
    %c0_212 = arith.constant 0 : index
    %313 = vector.load %arg41[%c0_211, %c0_212] : memref<128x64xbf16, #tpu.memory_space<vmem>>, vector<128x64xbf16>
    %cst_213 = arith.constant dense<0.000000e+00> : vector<10x64xf32>
    %314 = tpu.matmul %307, %313, %cst_213 {dimension_numbers = #tpu.dot_dimension_numbers<[1], [0], [0], [1], [0, 0, 1, 1], [], []>} : vector<10x128xbf16>, vector<128x64xbf16>, vector<10x64xf32> -> vector<10x64xf32>
    %315 = arith.maximumf %312, %314 : vector<10x64xf32>
    %c0_214 = arith.constant 0 : index
    %c0_215 = arith.constant 0 : index
    %316 = vector.load %arg66[%c0_214, %c0_215] : memref<12x64xf32, #tpu.memory_space<vmem>>, vector<10x64xf32>
    tpu.vector_store %arg66[%c0_214, %c0_215], %315 {strides = array<i32>} : memref<12x64xf32, #tpu.memory_space<vmem>>, vector<10x64xf32>,
    %cst_216 = arith.constant 0.000000e+00 : f32
    %317 = vector.broadcast %cst_216 : f32 to vector<8x64xf32>
    %c0_217 = arith.constant 0 : index
    %c0_218 = arith.constant 0 : index
    %318 = vector.load %arg67[%c0_217, %c0_218] : memref<8x64xf32, #tpu.memory_space<vmem>>, vector<8x64xf32>
    tpu.vector_store %arg67[%c0_217, %c0_218], %317 {strides = array<i32>} : memref<8x64xf32, #tpu.memory_space<vmem>>, vector<8x64xf32>,
    %c0_219 = arith.constant 0 : index
    %c0_220 = arith.constant 0 : index
    %319 = tpu.strided_load %arg66[%c0_219, %c0_220] {strides = array<i32: 2, 1>} : memref<12x64xf32, #tpu.memory_space<vmem>>, vector<2x64xf32>
    %c1_221 = arith.constant 1 : index
    %c0_222 = arith.constant 0 : index
    %320 = tpu.strided_load %arg66[%c1_221, %c0_222] {strides = array<i32: 2, 1>} : memref<12x64xf32, #tpu.memory_space<vmem>>, vector<2x64xf32>
    %c1_i32_223 = arith.constant 1 : i32
    %321 = tpu.dynamic_rotate %320 by %c1_i32_223 dim 0 : vector<2x64xf32>, i32 -> vector<2x64xf32>
    %322 = tpu.iota {dimensions = array<i32: 0>} : vector<2x64xi32>
    %c0_i32_224 = arith.constant 0 : i32
    %323 = vector.broadcast %c0_i32_224 : i32 to vector<2x64xi32>
    %324 = arith.cmpi eq, %322, %323 : vector<2x64xi32>
    %325 = arith.select %324, %320, %321 : vector<2x64xi1>, vector<2x64xf32>
    %326 = arith.maximumf %319, %320 : vector<2x64xf32>
    %327 = arith.maximumf %326, %325 : vector<2x64xf32>
    %c1_225 = arith.constant 1 : index
    %c0_226 = arith.constant 0 : index
    %328 = vector.load %arg67[%c1_225, %c0_226] : memref<8x64xf32, #tpu.memory_space<vmem>>, vector<2x64xf32>
    tpu.vector_store %arg67[%c1_225, %c0_226], %327 {strides = array<i32>} : memref<8x64xf32, #tpu.memory_space<vmem>>, vector<2x64xf32>,
    %c6 = arith.constant 6 : index
    %c0_227 = arith.constant 0 : index
    %329 = tpu.strided_load %arg66[%c6, %c0_227] {strides = array<i32: 2, 1>} : memref<12x64xf32, #tpu.memory_space<vmem>>, vector<2x64xf32>
    %c7_228 = arith.constant 7 : index
    %c0_229 = arith.constant 0 : index
    %330 = tpu.strided_load %arg66[%c7_228, %c0_229] {strides = array<i32: 2, 1>} : memref<12x64xf32, #tpu.memory_space<vmem>>, vector<2x64xf32>
    %c1_i32_230 = arith.constant 1 : i32
    %331 = tpu.dynamic_rotate %330 by %c1_i32_230 dim 0 : vector<2x64xf32>, i32 -> vector<2x64xf32>
    %332 = tpu.iota {dimensions = array<i32: 0>} : vector<2x64xi32>
    %c0_i32_231 = arith.constant 0 : i32
    %333 = vector.broadcast %c0_i32_231 : i32 to vector<2x64xi32>
    %334 = arith.cmpi eq, %332, %333 : vector<2x64xi32>
    %335 = arith.select %334, %330, %331 : vector<2x64xi1>, vector<2x64xf32>
    %336 = arith.maximumf %329, %330 : vector<2x64xf32>
    %337 = arith.maximumf %336, %335 : vector<2x64xf32>
    %c5 = arith.constant 5 : index
    %c0_232 = arith.constant 0 : index
    %338 = vector.load %arg67[%c5, %c0_232] : memref<8x64xf32, #tpu.memory_space<vmem>>, vector<2x64xf32>
    tpu.vector_store %arg67[%c5, %c0_232], %337 {strides = array<i32>} : memref<8x64xf32, #tpu.memory_space<vmem>>, vector<2x64xf32>,
    %cst_233 = arith.constant 0.000000e+00 : f32
    %339 = vector.broadcast %cst_233 : f32 to vector<8x64xf32>
    %c0_234 = arith.constant 0 : index
    %c0_235 = arith.constant 0 : index
    %340 = vector.load %arg68[%c0_234, %c0_235] : memref<8x64xf32, #tpu.memory_space<vmem>>, vector<8x64xf32>
    tpu.vector_store %arg68[%c0_234, %c0_235], %339 {strides = array<i32>} : memref<8x64xf32, #tpu.memory_space<vmem>>, vector<8x64xf32>,
    %341 = tpu.iota {dimensions = array<i32: 0>} : vector<6x64xi32>
    %c4_i32_236 = arith.constant 4 : i32
    %c0_i32_237 = arith.constant 0 : i32
    %342 = arith.cmpi eq, %c4_i32_236, %c0_i32_237 : i32
    %c1_i32_238 = arith.constant 1 : i32
    %343 = arith.select %342, %c1_i32_238, %c4_i32_236 : i32
    %344 = vector.broadcast %343 : i32 to vector<6x64xi32>
    %345 = arith.remsi %341, %344 : vector<6x64xi32>
    %c0_i32_239 = arith.constant 0 : i32
    %346 = vector.broadcast %c0_i32_239 : i32 to vector<6x64xi32>
    %347 = arith.cmpi ne, %345, %346 : vector<6x64xi32>
    %c0_i32_240 = arith.constant 0 : i32
    %348 = vector.broadcast %c0_i32_240 : i32 to vector<6x64xi32>
    %349 = arith.cmpi slt, %345, %348 : vector<6x64xi32>
    %c0_i32_241 = arith.constant 0 : i32
    %350 = arith.cmpi slt, %343, %c0_i32_241 : i32
    %351 = vector.broadcast %350 : i1 to vector<6x64xi1>
    %352 = vector.broadcast %351 : vector<6x64xi1> to vector<6x64xi1>
    %353 = arith.xori %349, %352 : vector<6x64xi1>
    %354 = arith.andi %353, %347 : vector<6x64xi1>
    %355 = vector.broadcast %343 : i32 to vector<6x64xi32>
    %356 = arith.addi %345, %355 : vector<6x64xi32>
    %357 = arith.select %354, %356, %345 : vector<6x64xi1>, vector<6x64xi32>
    %c2_i32 = arith.constant 2 : i32
    %358 = vector.broadcast %c2_i32 : i32 to vector<6x64xi32>
    %359 = arith.cmpi slt, %357, %358 : vector<6x64xi32>
    %c0_242 = arith.constant 0 : index
    %c0_243 = arith.constant 0 : index
    %360 = vector.load %arg67[%c0_242, %c0_243] : memref<8x64xf32, #tpu.memory_space<vmem>>, vector<8x64xf32>
    %cst_244 = arith.constant 0.000000e+00 : f32
    %361 = vector.broadcast %cst_244 : f32 to vector<8x64xf32>
    %362 = arith.maximumf %360, %361 : vector<8x64xf32>
    %363 = arith.truncf %362 : vector<8x64xf32> to vector<8x64xbf16>
    %364 = vector.extract_strided_slice %363 {offsets = [0, 0], sizes = [6, 64], strides = [1, 1]} : vector<8x64xbf16> to vector<6x64xbf16>
    %365 = vector.extract_strided_slice %363 {offsets = [1, 0], sizes = [6, 64], strides = [1, 1]} : vector<8x64xbf16> to vector<6x64xbf16>
    %366 = vector.extract_strided_slice %363 {offsets = [2, 0], sizes = [6, 64], strides = [1, 1]} : vector<8x64xbf16> to vector<6x64xbf16>
    %367 = tpu.concatenate %364, %365, %366 in 1 : vector<6x64xbf16>, vector<6x64xbf16>, vector<6x64xbf16> -> vector<6x192xbf16>
    %c0_245 = arith.constant 0 : index
    %c0_246 = arith.constant 0 : index
    %368 = vector.load %arg44[%c0_245, %c0_246] : memref<192x64xbf16, #tpu.memory_space<vmem>>, vector<192x64xbf16>
    %cst_247 = arith.constant dense<0.000000e+00> : vector<6x64xf32>
    %369 = tpu.matmul %367, %368, %cst_247 {dimension_numbers = #tpu.dot_dimension_numbers<[1], [0], [0], [1], [0, 0, 1, 1], [], []>} : vector<6x192xbf16>, vector<192x64xbf16>, vector<6x64xf32> -> vector<6x64xf32>
    %c0_248 = arith.constant 0 : index
    %c0_249 = arith.constant 0 : index
    %370 = vector.load %arg45[%c0_248, %c0_249] : memref<1x64xf32, #tpu.memory_space<vmem>>, vector<1x64xf32>
    %371 = vector.broadcast %370 : vector<1x64xf32> to vector<6x64xf32>
    %372 = arith.mulf %369, %371 : vector<6x64xf32>
    %c0_250 = arith.constant 0 : index
    %c0_251 = arith.constant 0 : index
    %373 = vector.load %arg46[%c0_250, %c0_251] : memref<1x64xf32, #tpu.memory_space<vmem>>, vector<1x64xf32>
    %374 = vector.broadcast %373 : vector<1x64xf32> to vector<6x64xf32>
    %375 = arith.addf %372, %374 : vector<6x64xf32>
    %cst_252 = arith.constant 0.000000e+00 : f32
    %376 = vector.broadcast %cst_252 : f32 to vector<6x64xf32>
    %377 = arith.maximumf %375, %376 : vector<6x64xf32>
    %cst_253 = arith.constant 0.000000e+00 : f32
    %378 = vector.broadcast %cst_253 : f32 to vector<6x64xf32>
    %379 = arith.select %359, %377, %378 : vector<6x64xi1>, vector<6x64xf32>
    %c1_254 = arith.constant 1 : index
    %c0_255 = arith.constant 0 : index
    %380 = vector.load %arg68[%c1_254, %c0_255] : memref<8x64xf32, #tpu.memory_space<vmem>>, vector<6x64xf32>
    tpu.vector_store %arg68[%c1_254, %c0_255], %379 {strides = array<i32>} : memref<8x64xf32, #tpu.memory_space<vmem>>, vector<6x64xf32>,
    %c0_256 = arith.constant 0 : index
    %c0_257 = arith.constant 0 : index
    %381 = vector.load %arg68[%c0_256, %c0_257] : memref<8x64xf32, #tpu.memory_space<vmem>>, vector<8x64xf32>
    %382 = arith.truncf %381 : vector<8x64xf32> to vector<8x64xbf16>
    %383 = vector.extract_strided_slice %382 {offsets = [0, 0], sizes = [6, 64], strides = [1, 1]} : vector<8x64xbf16> to vector<6x64xbf16>
    %384 = vector.extract_strided_slice %382 {offsets = [1, 0], sizes = [6, 64], strides = [1, 1]} : vector<8x64xbf16> to vector<6x64xbf16>
    %385 = vector.extract_strided_slice %382 {offsets = [2, 0], sizes = [6, 64], strides = [1, 1]} : vector<8x64xbf16> to vector<6x64xbf16>
    %386 = tpu.concatenate %383, %384, %385 in 1 : vector<6x64xbf16>, vector<6x64xbf16>, vector<6x64xbf16> -> vector<6x192xbf16>
    %c0_258 = arith.constant 0 : index
    %c0_259 = arith.constant 0 : index
    %387 = vector.load %arg47[%c0_258, %c0_259] : memref<192x64xbf16, #tpu.memory_space<vmem>>, vector<192x64xbf16>
    %cst_260 = arith.constant dense<0.000000e+00> : vector<6x64xf32>
    %388 = tpu.matmul %386, %387, %cst_260 {dimension_numbers = #tpu.dot_dimension_numbers<[1], [0], [0], [1], [0, 0, 1, 1], [], []>} : vector<6x192xbf16>, vector<192x64xbf16>, vector<6x64xf32> -> vector<6x64xf32>
    %c0_261 = arith.constant 0 : index
    %c0_262 = arith.constant 0 : index
    %389 = vector.load %arg48[%c0_261, %c0_262] : memref<1x64xf32, #tpu.memory_space<vmem>>, vector<1x64xf32>
    %390 = vector.broadcast %389 : vector<1x64xf32> to vector<6x64xf32>
    %391 = arith.mulf %388, %390 : vector<6x64xf32>
    %c0_263 = arith.constant 0 : index
    %c0_264 = arith.constant 0 : index
    %392 = vector.load %arg49[%c0_263, %c0_264] : memref<1x64xf32, #tpu.memory_space<vmem>>, vector<1x64xf32>
    %393 = vector.broadcast %392 : vector<1x64xf32> to vector<6x64xf32>
    %394 = arith.addf %391, %393 : vector<6x64xf32>
    %c1_265 = arith.constant 1 : index
    %c0_266 = arith.constant 0 : index
    %395 = vector.load %arg67[%c1_265, %c0_266] : memref<8x64xf32, #tpu.memory_space<vmem>>, vector<6x64xf32>
    %cst_267 = arith.constant 0.000000e+00 : f32
    %396 = vector.broadcast %cst_267 : f32 to vector<6x64xf32>
    %397 = arith.select %359, %394, %396 : vector<6x64xi1>, vector<6x64xf32>
    %398 = arith.addf %395, %397 : vector<6x64xf32>
    %c1_268 = arith.constant 1 : index
    %c0_269 = arith.constant 0 : index
    %399 = vector.load %arg67[%c1_268, %c0_269] : memref<8x64xf32, #tpu.memory_space<vmem>>, vector<6x64xf32>
    tpu.vector_store %arg67[%c1_268, %c0_269], %398 {strides = array<i32>} : memref<8x64xf32, #tpu.memory_space<vmem>>, vector<6x64xf32>,
    %c0_270 = arith.constant 0 : index
    %c0_271 = arith.constant 0 : index
    %400 = vector.load %arg67[%c0_270, %c0_271] : memref<8x64xf32, #tpu.memory_space<vmem>>, vector<8x64xf32>
    %cst_272 = arith.constant 0.000000e+00 : f32
    %401 = vector.broadcast %cst_272 : f32 to vector<8x64xf32>
    %402 = arith.maximumf %400, %401 : vector<8x64xf32>
    %403 = arith.truncf %402 : vector<8x64xf32> to vector<8x64xbf16>
    %404 = vector.extract_strided_slice %403 {offsets = [0, 0], sizes = [6, 64], strides = [1, 1]} : vector<8x64xbf16> to vector<6x64xbf16>
    %405 = vector.extract_strided_slice %403 {offsets = [1, 0], sizes = [6, 64], strides = [1, 1]} : vector<8x64xbf16> to vector<6x64xbf16>
    %406 = vector.extract_strided_slice %403 {offsets = [2, 0], sizes = [6, 64], strides = [1, 1]} : vector<8x64xbf16> to vector<6x64xbf16>
    %407 = tpu.concatenate %404, %405, %406 in 1 : vector<6x64xbf16>, vector<6x64xbf16>, vector<6x64xbf16> -> vector<6x192xbf16>
    %c0_273 = arith.constant 0 : index
    %c0_274 = arith.constant 0 : index
    %408 = vector.load %arg50[%c0_273, %c0_274] : memref<192x64xbf16, #tpu.memory_space<vmem>>, vector<192x64xbf16>
    %cst_275 = arith.constant dense<0.000000e+00> : vector<6x64xf32>
    %409 = tpu.matmul %407, %408, %cst_275 {dimension_numbers = #tpu.dot_dimension_numbers<[1], [0], [0], [1], [0, 0, 1, 1], [], []>} : vector<6x192xbf16>, vector<192x64xbf16>, vector<6x64xf32> -> vector<6x64xf32>
    %c0_276 = arith.constant 0 : index
    %c0_277 = arith.constant 0 : index
    %410 = vector.load %arg51[%c0_276, %c0_277] : memref<1x64xf32, #tpu.memory_space<vmem>>, vector<1x64xf32>
    %411 = vector.broadcast %410 : vector<1x64xf32> to vector<6x64xf32>
    %412 = arith.mulf %409, %411 : vector<6x64xf32>
    %c0_278 = arith.constant 0 : index
    %c0_279 = arith.constant 0 : index
    %413 = vector.load %arg52[%c0_278, %c0_279] : memref<1x64xf32, #tpu.memory_space<vmem>>, vector<1x64xf32>
    %414 = vector.broadcast %413 : vector<1x64xf32> to vector<6x64xf32>
    %415 = arith.addf %412, %414 : vector<6x64xf32>
    %cst_280 = arith.constant 0.000000e+00 : f32
    %416 = vector.broadcast %cst_280 : f32 to vector<6x64xf32>
    %417 = arith.maximumf %415, %416 : vector<6x64xf32>
    %cst_281 = arith.constant 0.000000e+00 : f32
    %418 = vector.broadcast %cst_281 : f32 to vector<6x64xf32>
    %419 = arith.select %359, %417, %418 : vector<6x64xi1>, vector<6x64xf32>
    %c1_282 = arith.constant 1 : index
    %c0_283 = arith.constant 0 : index
    %420 = vector.load %arg68[%c1_282, %c0_283] : memref<8x64xf32, #tpu.memory_space<vmem>>, vector<6x64xf32>
    tpu.vector_store %arg68[%c1_282, %c0_283], %419 {strides = array<i32>} : memref<8x64xf32, #tpu.memory_space<vmem>>, vector<6x64xf32>,
    %c0_284 = arith.constant 0 : index
    %c0_285 = arith.constant 0 : index
    %421 = vector.load %arg68[%c0_284, %c0_285] : memref<8x64xf32, #tpu.memory_space<vmem>>, vector<8x64xf32>
    %422 = arith.truncf %421 : vector<8x64xf32> to vector<8x64xbf16>
    %423 = vector.extract_strided_slice %422 {offsets = [0, 0], sizes = [6, 64], strides = [1, 1]} : vector<8x64xbf16> to vector<6x64xbf16>
    %424 = vector.extract_strided_slice %422 {offsets = [1, 0], sizes = [6, 64], strides = [1, 1]} : vector<8x64xbf16> to vector<6x64xbf16>
    %425 = vector.extract_strided_slice %422 {offsets = [2, 0], sizes = [6, 64], strides = [1, 1]} : vector<8x64xbf16> to vector<6x64xbf16>
    %426 = tpu.concatenate %423, %424, %425 in 1 : vector<6x64xbf16>, vector<6x64xbf16>, vector<6x64xbf16> -> vector<6x192xbf16>
    %c0_286 = arith.constant 0 : index
    %c0_287 = arith.constant 0 : index
    %427 = vector.load %arg53[%c0_286, %c0_287] : memref<192x64xbf16, #tpu.memory_space<vmem>>, vector<192x64xbf16>
    %cst_288 = arith.constant dense<0.000000e+00> : vector<6x64xf32>
    %428 = tpu.matmul %426, %427, %cst_288 {dimension_numbers = #tpu.dot_dimension_numbers<[1], [0], [0], [1], [0, 0, 1, 1], [], []>} : vector<6x192xbf16>, vector<192x64xbf16>, vector<6x64xf32> -> vector<6x64xf32>
    %c0_289 = arith.constant 0 : index
    %c0_290 = arith.constant 0 : index
    %429 = vector.load %arg54[%c0_289, %c0_290] : memref<1x64xf32, #tpu.memory_space<vmem>>, vector<1x64xf32>
    %430 = vector.broadcast %429 : vector<1x64xf32> to vector<6x64xf32>
    %431 = arith.mulf %428, %430 : vector<6x64xf32>
    %c0_291 = arith.constant 0 : index
    %c0_292 = arith.constant 0 : index
    %432 = vector.load %arg55[%c0_291, %c0_292] : memref<1x64xf32, #tpu.memory_space<vmem>>, vector<1x64xf32>
    %433 = vector.broadcast %432 : vector<1x64xf32> to vector<6x64xf32>
    %434 = arith.addf %431, %433 : vector<6x64xf32>
    %c1_293 = arith.constant 1 : index
    %c0_294 = arith.constant 0 : index
    %435 = vector.load %arg67[%c1_293, %c0_294] : memref<8x64xf32, #tpu.memory_space<vmem>>, vector<6x64xf32>
    %cst_295 = arith.constant 0.000000e+00 : f32
    %436 = vector.broadcast %cst_295 : f32 to vector<6x64xf32>
    %437 = arith.select %359, %434, %436 : vector<6x64xi1>, vector<6x64xf32>
    %438 = arith.addf %435, %437 : vector<6x64xf32>
    %c1_296 = arith.constant 1 : index
    %c0_297 = arith.constant 0 : index
    %439 = vector.load %arg67[%c1_296, %c0_297] : memref<8x64xf32, #tpu.memory_space<vmem>>, vector<6x64xf32>
    tpu.vector_store %arg67[%c1_296, %c0_297], %438 {strides = array<i32>} : memref<8x64xf32, #tpu.memory_space<vmem>>, vector<6x64xf32>,
    %c1_298 = arith.constant 1 : index
    %c0_299 = arith.constant 0 : index
    %440 = tpu.strided_load %arg67[%c1_298, %c0_299] {strides = array<i32: 4, 1>} : memref<8x64xf32, #tpu.memory_space<vmem>>, vector<2x64xf32>
    %cst_300 = arith.constant 0.000000e+00 : f32
    %441 = vector.broadcast %cst_300 : f32 to vector<2x64xf32>
    %442 = arith.maximumf %440, %441 : vector<2x64xf32>
    %c2 = arith.constant 2 : index
    %c0_301 = arith.constant 0 : index
    %443 = tpu.strided_load %arg67[%c2, %c0_301] {strides = array<i32: 4, 1>} : memref<8x64xf32, #tpu.memory_space<vmem>>, vector<2x64xf32>
    %cst_302 = arith.constant 0.000000e+00 : f32
    %444 = vector.broadcast %cst_302 : f32 to vector<2x64xf32>
    %445 = arith.maximumf %443, %444 : vector<2x64xf32>
    %446 = tpu.concatenate %442, %445 in 1 : vector<2x64xf32>, vector<2x64xf32> -> vector<2x128xf32>
    %447 = arith.truncf %446 : vector<2x128xf32> to vector<2x128xbf16>
    %c0_303 = arith.constant 0 : index
    %c0_304 = arith.constant 0 : index
    %448 = vector.load %arg56[%c0_303, %c0_304] : memref<128x256xbf16, #tpu.memory_space<vmem>>, vector<128x256xbf16>
    %cst_305 = arith.constant dense<0.000000e+00> : vector<2x256xf32>
    %449 = tpu.matmul %447, %448, %cst_305 {dimension_numbers = #tpu.dot_dimension_numbers<[1], [0], [0], [1], [0, 0, 1, 1], [], []>} : vector<2x128xbf16>, vector<128x256xbf16>, vector<2x256xf32> -> vector<2x256xf32>
    %c0_306 = arith.constant 0 : index
    %c0_307 = arith.constant 0 : index
    %450 = vector.load %arg57[%c0_306, %c0_307] : memref<1x256xf32, #tpu.memory_space<vmem>>, vector<1x256xf32>
    %451 = vector.broadcast %450 : vector<1x256xf32> to vector<2x256xf32>
    %452 = arith.mulf %449, %451 : vector<2x256xf32>
    %c0_308 = arith.constant 0 : index
    %c0_309 = arith.constant 0 : index
    %453 = vector.load %arg58[%c0_308, %c0_309] : memref<1x256xf32, #tpu.memory_space<vmem>>, vector<1x256xf32>
    %454 = vector.broadcast %453 : vector<1x256xf32> to vector<2x256xf32>
    %455 = arith.addf %452, %454 : vector<2x256xf32>
    %cst_310 = arith.constant 0.000000e+00 : f32
    %456 = vector.broadcast %cst_310 : f32 to vector<2x256xf32>
    %457 = arith.maximumf %455, %456 : vector<2x256xf32>
    %c0_311 = arith.constant 0 : index
    %c0_312 = arith.constant 0 : index
    %458 = vector.load %arg59[%c0_311, %c0_312] : memref<2x256xf32, #tpu.memory_space<vmem>>, vector<2x256xf32>
    tpu.vector_store %arg59[%c0_311, %c0_312], %457 {strides = array<i32>} : memref<2x256xf32, #tpu.memory_space<vmem>>, vector<2x256xf32>,
    return
  }
  func.func @transform_0(%arg0: i32) -> (i32, i32) {
    %c0_i32 = arith.constant 0 : i32
    %c0_i32_0 = arith.constant 0 : i32
    return %arg0, %c0_i32 : i32, i32
  }
  func.func @transform_1(%arg0: i32) -> (i32, i32) {
    %c0_i32 = arith.constant 0 : i32
    %c0_i32_0 = arith.constant 0 : i32
    %c0_i32_1 = arith.constant 0 : i32
    return %c0_i32, %c0_i32_0 : i32, i32
  }
  func.func @transform_2(%arg0: i32) -> (i32, i32) {
    %c0_i32 = arith.constant 0 : i32
    %c0_i32_0 = arith.constant 0 : i32
    %c0_i32_1 = arith.constant 0 : i32
    return %c0_i32, %c0_i32_0 : i32, i32
  }
  func.func @transform_3(%arg0: i32) -> (i32, i32) {
    %c0_i32 = arith.constant 0 : i32
    %c0_i32_0 = arith.constant 0 : i32
    %c0_i32_1 = arith.constant 0 : i32
    return %c0_i32, %c0_i32_0 : i32, i32
  }
  func.func @transform_4(%arg0: i32) -> (i32, i32) {
    %c0_i32 = arith.constant 0 : i32
    %c0_i32_0 = arith.constant 0 : i32
    %c0_i32_1 = arith.constant 0 : i32
    return %c0_i32, %c0_i32_0 : i32, i32
  }
  func.func @transform_5(%arg0: i32) -> (i32, i32) {
    %c0_i32 = arith.constant 0 : i32
    %c0_i32_0 = arith.constant 0 : i32
    %c0_i32_1 = arith.constant 0 : i32
    return %c0_i32, %c0_i32_0 : i32, i32
  }
  func.func @transform_6(%arg0: i32) -> (i32, i32) {
    %c0_i32 = arith.constant 0 : i32
    %c0_i32_0 = arith.constant 0 : i32
    %c0_i32_1 = arith.constant 0 : i32
    return %c0_i32, %c0_i32_0 : i32, i32
  }
  func.func @transform_7(%arg0: i32) -> (i32, i32) {
    %c0_i32 = arith.constant 0 : i32
    %c0_i32_0 = arith.constant 0 : i32
    %c0_i32_1 = arith.constant 0 : i32
    return %c0_i32, %c0_i32_0 : i32, i32
  }
  func.func @transform_8(%arg0: i32) -> (i32, i32) {
    %c0_i32 = arith.constant 0 : i32
    %c0_i32_0 = arith.constant 0 : i32
    %c0_i32_1 = arith.constant 0 : i32
    return %c0_i32, %c0_i32_0 : i32, i32
  }
  func.func @transform_9(%arg0: i32) -> (i32, i32) {
    %c0_i32 = arith.constant 0 : i32
    %c0_i32_0 = arith.constant 0 : i32
    %c0_i32_1 = arith.constant 0 : i32
    return %c0_i32, %c0_i32_0 : i32, i32
  }
  func.func @transform_10(%arg0: i32) -> (i32, i32) {
    %c0_i32 = arith.constant 0 : i32
    %c0_i32_0 = arith.constant 0 : i32
    %c0_i32_1 = arith.constant 0 : i32
    return %c0_i32, %c0_i32_0 : i32, i32
  }
  func.func @transform_11(%arg0: i32) -> (i32, i32) {
    %c0_i32 = arith.constant 0 : i32
    %c0_i32_0 = arith.constant 0 : i32
    %c0_i32_1 = arith.constant 0 : i32
    return %c0_i32, %c0_i32_0 : i32, i32
  }
  func.func @transform_12(%arg0: i32) -> (i32, i32) {
    %c0_i32 = arith.constant 0 : i32
    %c0_i32_0 = arith.constant 0 : i32
    %c0_i32_1 = arith.constant 0 : i32
    return %c0_i32, %c0_i32_0 : i32, i32
  }
  func.func @transform_13(%arg0: i32) -> (i32, i32) {
    %c0_i32 = arith.constant 0 : i32
    %c0_i32_0 = arith.constant 0 : i32
    %c0_i32_1 = arith.constant 0 : i32
    return %c0_i32, %c0_i32_0 : i32, i32
  }
  func.func @transform_14(%arg0: i32) -> (i32, i32) {
    %c0_i32 = arith.constant 0 : i32
    %c0_i32_0 = arith.constant 0 : i32
    %c0_i32_1 = arith.constant 0 : i32
    return %c0_i32, %c0_i32_0 : i32, i32
  }
  func.func @transform_15(%arg0: i32) -> (i32, i32) {
    %c0_i32 = arith.constant 0 : i32
    %c0_i32_0 = arith.constant 0 : i32
    %c0_i32_1 = arith.constant 0 : i32
    return %c0_i32, %c0_i32_0 : i32, i32
  }
  func.func @transform_16(%arg0: i32) -> (i32, i32) {
    %c0_i32 = arith.constant 0 : i32
    %c0_i32_0 = arith.constant 0 : i32
    %c0_i32_1 = arith.constant 0 : i32
    return %c0_i32, %c0_i32_0 : i32, i32
  }
  func.func @transform_17(%arg0: i32) -> (i32, i32) {
    %c0_i32 = arith.constant 0 : i32
    %c0_i32_0 = arith.constant 0 : i32
    %c0_i32_1 = arith.constant 0 : i32
    return %c0_i32, %c0_i32_0 : i32, i32
  }
  func.func @transform_18(%arg0: i32) -> (i32, i32) {
    %c0_i32 = arith.constant 0 : i32
    %c0_i32_0 = arith.constant 0 : i32
    %c0_i32_1 = arith.constant 0 : i32
    return %c0_i32, %c0_i32_0 : i32, i32
  }
  func.func @transform_19(%arg0: i32) -> (i32, i32) {
    %c0_i32 = arith.constant 0 : i32
    %c0_i32_0 = arith.constant 0 : i32
    %c0_i32_1 = arith.constant 0 : i32
    return %c0_i32, %c0_i32_0 : i32, i32
  }
  func.func @transform_20(%arg0: i32) -> (i32, i32) {
    %c0_i32 = arith.constant 0 : i32
    %c0_i32_0 = arith.constant 0 : i32
    %c0_i32_1 = arith.constant 0 : i32
    return %c0_i32, %c0_i32_0 : i32, i32
  }
  func.func @transform_21(%arg0: i32) -> (i32, i32) {
    %c0_i32 = arith.constant 0 : i32
    %c0_i32_0 = arith.constant 0 : i32
    %c0_i32_1 = arith.constant 0 : i32
    return %c0_i32, %c0_i32_0 : i32, i32
  }
  func.func @transform_22(%arg0: i32) -> (i32, i32) {
    %c0_i32 = arith.constant 0 : i32
    %c0_i32_0 = arith.constant 0 : i32
    %c0_i32_1 = arith.constant 0 : i32
    return %c0_i32, %c0_i32_0 : i32, i32
  }
  func.func @transform_23(%arg0: i32) -> (i32, i32) {
    %c0_i32 = arith.constant 0 : i32
    %c0_i32_0 = arith.constant 0 : i32
    %c0_i32_1 = arith.constant 0 : i32
    return %c0_i32, %c0_i32_0 : i32, i32
  }
  func.func @transform_24(%arg0: i32) -> (i32, i32) {
    %c0_i32 = arith.constant 0 : i32
    %c0_i32_0 = arith.constant 0 : i32
    %c0_i32_1 = arith.constant 0 : i32
    return %c0_i32, %c0_i32_0 : i32, i32
  }
  func.func @transform_25(%arg0: i32) -> (i32, i32) {
    %c0_i32 = arith.constant 0 : i32
    %c0_i32_0 = arith.constant 0 : i32
    %c0_i32_1 = arith.constant 0 : i32
    return %c0_i32, %c0_i32_0 : i32, i32
  }
  func.func @transform_26(%arg0: i32) -> (i32, i32) {
    %c0_i32 = arith.constant 0 : i32
    %c0_i32_0 = arith.constant 0 : i32
    %c0_i32_1 = arith.constant 0 : i32
    return %c0_i32, %c0_i32_0 : i32, i32
  }
  func.func @transform_27(%arg0: i32) -> (i32, i32) {
    %c0_i32 = arith.constant 0 : i32
    %c0_i32_0 = arith.constant 0 : i32
    %c0_i32_1 = arith.constant 0 : i32
    return %c0_i32, %c0_i32_0 : i32, i32
  }
  func.func @transform_28(%arg0: i32) -> (i32, i32) {
    %c0_i32 = arith.constant 0 : i32
    %c0_i32_0 = arith.constant 0 : i32
    %c0_i32_1 = arith.constant 0 : i32
    return %c0_i32, %c0_i32_0 : i32, i32
  }
  func.func @transform_29(%arg0: i32) -> (i32, i32) {
    %c0_i32 = arith.constant 0 : i32
    %c0_i32_0 = arith.constant 0 : i32
    %c0_i32_1 = arith.constant 0 : i32
    return %c0_i32, %c0_i32_0 : i32, i32
  }
  func.func @transform_30(%arg0: i32) -> (i32, i32) {
    %c0_i32 = arith.constant 0 : i32
    %c0_i32_0 = arith.constant 0 : i32
    %c0_i32_1 = arith.constant 0 : i32
    return %c0_i32, %c0_i32_0 : i32, i32
  }
  func.func @transform_31(%arg0: i32) -> (i32, i32) {
    %c0_i32 = arith.constant 0 : i32
    %c0_i32_0 = arith.constant 0 : i32
    %c0_i32_1 = arith.constant 0 : i32
    return %c0_i32, %c0_i32_0 : i32, i32
  }
  func.func @transform_32(%arg0: i32) -> (i32, i32) {
    %c0_i32 = arith.constant 0 : i32
    %c0_i32_0 = arith.constant 0 : i32
    %c0_i32_1 = arith.constant 0 : i32
    return %c0_i32, %c0_i32_0 : i32, i32
  }
  func.func @transform_33(%arg0: i32) -> (i32, i32) {
    %c0_i32 = arith.constant 0 : i32
    %c0_i32_0 = arith.constant 0 : i32
    %c0_i32_1 = arith.constant 0 : i32
    return %c0_i32, %c0_i32_0 : i32, i32
  }
  func.func @transform_34(%arg0: i32) -> (i32, i32) {
    %c0_i32 = arith.constant 0 : i32
    %c0_i32_0 = arith.constant 0 : i32
    %c0_i32_1 = arith.constant 0 : i32
    return %c0_i32, %c0_i32_0 : i32, i32
  }
  func.func @transform_35(%arg0: i32) -> (i32, i32) {
    %c0_i32 = arith.constant 0 : i32
    %c0_i32_0 = arith.constant 0 : i32
    %c0_i32_1 = arith.constant 0 : i32
    return %c0_i32, %c0_i32_0 : i32, i32
  }
  func.func @transform_36(%arg0: i32) -> (i32, i32) {
    %c0_i32 = arith.constant 0 : i32
    %c0_i32_0 = arith.constant 0 : i32
    %c0_i32_1 = arith.constant 0 : i32
    return %c0_i32, %c0_i32_0 : i32, i32
  }
  func.func @transform_37(%arg0: i32) -> (i32, i32) {
    %c0_i32 = arith.constant 0 : i32
    %c0_i32_0 = arith.constant 0 : i32
    %c0_i32_1 = arith.constant 0 : i32
    return %c0_i32, %c0_i32_0 : i32, i32
  }
  func.func @transform_38(%arg0: i32) -> (i32, i32) {
    %c0_i32 = arith.constant 0 : i32
    %c0_i32_0 = arith.constant 0 : i32
    %c0_i32_1 = arith.constant 0 : i32
    return %c0_i32, %c0_i32_0 : i32, i32
  }
  func.func @transform_39(%arg0: i32) -> (i32, i32) {
    %c0_i32 = arith.constant 0 : i32
    %c0_i32_0 = arith.constant 0 : i32
    %c0_i32_1 = arith.constant 0 : i32
    return %c0_i32, %c0_i32_0 : i32, i32
  }
  func.func @transform_40(%arg0: i32) -> (i32, i32) {
    %c0_i32 = arith.constant 0 : i32
    %c0_i32_0 = arith.constant 0 : i32
    %c0_i32_1 = arith.constant 0 : i32
    return %c0_i32, %c0_i32_0 : i32, i32
  }
  func.func @transform_41(%arg0: i32) -> (i32, i32) {
    %c0_i32 = arith.constant 0 : i32
    %c0_i32_0 = arith.constant 0 : i32
    %c0_i32_1 = arith.constant 0 : i32
    return %c0_i32, %c0_i32_0 : i32, i32
  }
  func.func @transform_42(%arg0: i32) -> (i32, i32) {
    %c0_i32 = arith.constant 0 : i32
    %c0_i32_0 = arith.constant 0 : i32
    %c0_i32_1 = arith.constant 0 : i32
    return %c0_i32, %c0_i32_0 : i32, i32
  }
  func.func @transform_43(%arg0: i32) -> (i32, i32) {
    %c0_i32 = arith.constant 0 : i32
    %c0_i32_0 = arith.constant 0 : i32
    %c0_i32_1 = arith.constant 0 : i32
    return %c0_i32, %c0_i32_0 : i32, i32
  }
  func.func @transform_44(%arg0: i32) -> (i32, i32) {
    %c0_i32 = arith.constant 0 : i32
    %c0_i32_0 = arith.constant 0 : i32
    %c0_i32_1 = arith.constant 0 : i32
    return %c0_i32, %c0_i32_0 : i32, i32
  }
  func.func @transform_45(%arg0: i32) -> (i32, i32) {
    %c0_i32 = arith.constant 0 : i32
    %c0_i32_0 = arith.constant 0 : i32
    %c0_i32_1 = arith.constant 0 : i32
    return %c0_i32, %c0_i32_0 : i32, i32
  }
  func.func @transform_46(%arg0: i32) -> (i32, i32) {
    %c0_i32 = arith.constant 0 : i32
    %c0_i32_0 = arith.constant 0 : i32
    %c0_i32_1 = arith.constant 0 : i32
    return %c0_i32, %c0_i32_0 : i32, i32
  }
  func.func @transform_47(%arg0: i32) -> (i32, i32) {
    %c0_i32 = arith.constant 0 : i32
    %c0_i32_0 = arith.constant 0 : i32
    %c0_i32_1 = arith.constant 0 : i32
    return %c0_i32, %c0_i32_0 : i32, i32
  }
  func.func @transform_48(%arg0: i32) -> (i32, i32) {
    %c0_i32 = arith.constant 0 : i32
    %c0_i32_0 = arith.constant 0 : i32
    %c0_i32_1 = arith.constant 0 : i32
    return %c0_i32, %c0_i32_0 : i32, i32
  }
  func.func @transform_49(%arg0: i32) -> (i32, i32) {
    %c0_i32 = arith.constant 0 : i32
    %c0_i32_0 = arith.constant 0 : i32
    %c0_i32_1 = arith.constant 0 : i32
    return %c0_i32, %c0_i32_0 : i32, i32
  }
  func.func @transform_50(%arg0: i32) -> (i32, i32) {
    %c0_i32 = arith.constant 0 : i32
    %c0_i32_0 = arith.constant 0 : i32
    %c0_i32_1 = arith.constant 0 : i32
    return %c0_i32, %c0_i32_0 : i32, i32
  }
  func.func @transform_51(%arg0: i32) -> (i32, i32) {
    %c0_i32 = arith.constant 0 : i32
    %c0_i32_0 = arith.constant 0 : i32
    %c0_i32_1 = arith.constant 0 : i32
    return %c0_i32, %c0_i32_0 : i32, i32
  }
  func.func @transform_52(%arg0: i32) -> (i32, i32) {
    %c0_i32 = arith.constant 0 : i32
    %c0_i32_0 = arith.constant 0 : i32
    %c0_i32_1 = arith.constant 0 : i32
    return %c0_i32, %c0_i32_0 : i32, i32
  }
  func.func @transform_53(%arg0: i32) -> (i32, i32) {
    %c0_i32 = arith.constant 0 : i32
    %c0_i32_0 = arith.constant 0 : i32
    %c0_i32_1 = arith.constant 0 : i32
    return %c0_i32, %c0_i32_0 : i32, i32
  }
  func.func @transform_54(%arg0: i32) -> (i32, i32) {
    %c0_i32 = arith.constant 0 : i32
    %c0_i32_0 = arith.constant 0 : i32
    %c0_i32_1 = arith.constant 0 : i32
    return %c0_i32, %c0_i32_0 : i32, i32
  }
  func.func @transform_55(%arg0: i32) -> (i32, i32) {
    %c0_i32 = arith.constant 0 : i32
    %c0_i32_0 = arith.constant 0 : i32
    %c0_i32_1 = arith.constant 0 : i32
    return %c0_i32, %c0_i32_0 : i32, i32
  }
  func.func @transform_56(%arg0: i32) -> (i32, i32) {
    %c0_i32 = arith.constant 0 : i32
    %c0_i32_0 = arith.constant 0 : i32
    %c0_i32_1 = arith.constant 0 : i32
    return %c0_i32, %c0_i32_0 : i32, i32
  }
  func.func @transform_57(%arg0: i32) -> (i32, i32) {
    %c0_i32 = arith.constant 0 : i32
    %c0_i32_0 = arith.constant 0 : i32
    %c0_i32_1 = arith.constant 0 : i32
    return %c0_i32, %c0_i32_0 : i32, i32
  }
  func.func @transform_58(%arg0: i32) -> (i32, i32) {
    %c0_i32 = arith.constant 0 : i32
    %c0_i32_0 = arith.constant 0 : i32
    return %arg0, %c0_i32 : i32, i32
  }
}

</mosaic_0001>

<bundles_post_ra>
// kernel: impala_forward.1
= control target key start
LH: loop header
LB: loop body
LE: loop exit
PB: predicated region body
PF: predicated region fallthrough
CT: control target
= control target key end

     0   :  { %s9943_s6 = smov 1   ;;  %s9944_s10 = smov 2   ;;  %s11045_s0 = inlined_call_operand.smem [shape: u32[59], index: -1, kind: input, shape index: {}] }
   0x1   :  { %s10060_s5 = sld [smem:[%s11045_s0]]   ;;  %s9945_s14 = smov 3  }
   0x2   :  { %s10065_s9 = sld [smem:[%s11045_s0 + %s9943_s6]]   ;;  %s9946_s18 = smov 4  }
   0x3   :  { %s10070_s13 = sld [smem:[%s11045_s0 + %s9944_s10]]   ;;  %s9947_s22 = smov 5  }
   0x4   :  { %s10075_s17 = sld [smem:[%s11045_s0 + %s9945_s14]]   ;;  %s9948_s26 = smov 6  }
   0x5   :  { %s10080_s21 = sld [smem:[%s11045_s0 + %s9946_s18]]   ;;  %s9949_s30 = smov 7  }
   0x6   :  { %s10085_s25 = sld [smem:[%s11045_s0 + %s9947_s22]]   ;;  %s9950_s4 = smov 8  }
   0x7   :  { %11060 = sst [smem:[#allocation101_spill]] %s10060_s5  ;;  %s9951_s10 = smov 9  }
   0x8   :  { %11061 = sst [smem:[#allocation102_spill]] %s10065_s9  ;;  %s9952_s15 = smov 10  }
   0x9   :  { %11062 = sst [smem:[#allocation103_spill]] %s10070_s13  ;;  %s9953_s20 = smov 11  }
   0xa   :  { %11063 = sst [smem:[#allocation104_spill]] %s10075_s17  ;;  %s9955_s1 = smov 13  }
   0xb   :  { %s10090_s29 = sld [smem:[%s11045_s0 + %s9948_s26]]   ;;  %s9954_s26 = smov 12  }
   0xc   :  { %11064 = sst [smem:[#allocation105_spill]] %s10085_s25  ;;  %s9956_s7 = smov 14  }
   0xd   :  { %s10095_s3 = sld [smem:[%s11045_s0 + %s9949_s30]]   ;;  %s9958_s22 = smov 16  }
   0xe   :  { %s10100_s8 = sld [smem:[%s11045_s0 + %s9950_s4]]   ;;  %s9959_s28 = smov 17  }
   0xf   :  { %s10105_s14 = sld [smem:[%s11045_s0 + %s9951_s10]]  }
  0x10   :  { %s10110_s19 = sld [smem:[%s11045_s0 + %s9952_s15]]   ;;  %s9957_s15 = smov 15  }
  0x11   :  { %s10115_s24 = sld [smem:[%s11045_s0 + %s9953_s20]]  }
  0x12   :  { %s10120_s30 = sld [smem:[%s11045_s0 + %s9954_s26]]  }
  0x13   :  { %11065 = sst [smem:[#allocation106_spill]] %s10095_s3 }
  0x14   :  { %11066 = sst [smem:[#allocation107_spill]] %s10100_s8 }
  0x15   :  { %s10125_s6 = sld [smem:[%s11045_s0 + %s9955_s1]]  }
  0x16   :  { %11067 = sst [smem:[#allocation108_spill]] %s10110_s19 }
  0x17   :  { %11068 = sst [smem:[#allocation109_spill]] %s10115_s24 }
  0x18   :  { %s10130_s12 = sld [smem:[%s11045_s0 + %s9956_s7]]   ;;  %s9960_s7 = smov 18  }
  0x19   :  { %s10135_s20 = sld [smem:[%s11045_s0 + %s9957_s15]]   ;;  %s9961_s15 = smov 19  }
  0x1a   :  { %s10140_s27 = sld [smem:[%s11045_s0 + %s9958_s22]]   ;;  %s9962_s22 = smov 20  }
  0x1b   :  { %11069 = sst [smem:[#allocation110_spill]] %s10125_s6 }
  0x1c   :  { %s10145_s4 = sld [smem:[%s11045_s0 + %s9959_s28]]   ;;  %s9963_s28 = smov 21  }
  0x1d   :  { %s10150_s6 = sld [smem:[%s11045_s0 + %s9960_s7]]   ;;  %s9964_s7 = smov 22  }
  0x1e   :  { %11070 = sst [smem:[#allocation111_spill]] %s10130_s12 }
  0x1f   :  { %s10155_s19 = sld [smem:[%s11045_s0 + %s9961_s15]]   ;;  %s9965_s15 = smov 23  }
  0x20   :  { %11071 = sst [smem:[#allocation112_spill]] %s10140_s27 }
  0x21   :  { %s10160_s27 = sld [smem:[%s11045_s0 + %s9962_s22]]   ;;  %s9966_s22 = smov 24  }
  0x22   :  { %11072 = sst [smem:[#allocation113_spill]] %s10145_s4 }
  0x23   :  { %s10165_s3 = sld [smem:[%s11045_s0 + %s9963_s28]]   ;;  %s9967_s28 = smov 25  }
  0x24   :  { %s10170_s13 = sld [smem:[%s11045_s0 + %s9964_s7]]   ;;  %s9968_s7 = smov 26  }
  0x25   :  { %11073 = sst [smem:[#allocation114_spill]] %s10155_s19 }
  0x26   :  { %s10175_s19 = sld [smem:[%s11045_s0 + %s9965_s15]]   ;;  %s9969_s15 = smov 27  }
  0x27   :  { %11074 = sst [smem:[#allocation115_spill]] %s10160_s27 }
  0x28   :  { %s10180_s9 = sld [smem:[%s11045_s0 + %s9966_s22]]   ;;  %s9970_s22 = smov 28  }
  0x29   :  { %s10185_s5 = sld [smem:[%s11045_s0 + %s9967_s28]]   ;;  %s9971_s28 = smov 29  }
  0x2a   :  { %11075 = sst [smem:[#allocation116_spill]] %s10170_s13 }
  0x2b   :  { %s10190_s13 = sld [smem:[%s11045_s0 + %s9968_s7]]   ;;  %s9972_s7 = smov 30  }
  0x2c   :  { %s10195_s27 = sld [smem:[%s11045_s0 + %s9969_s15]]   ;;  %s9973_s15 = smov 31  }
  0x2d   :  { %s10205_s4 = sld [smem:[%s11045_s0 + %s9971_s28]]   ;;  %s9975_s28 = smov 33  }
  0x2e   :  { %11076 = sst [smem:[#allocation117_spill]] %s10180_s9 }
  0x2f   :  { %s10200_s9 = sld [smem:[%s11045_s0 + %s9970_s22]]   ;;  %s9974_s22 = smov 32  }
  0x30   :  { %s10215_s12 = sld [smem:[%s11045_s0 + %s9973_s15]]   ;;  %s9977_s15 = smov 35  }
  0x31   :  { %11077 = sst [smem:[#allocation118_spill]] %s10190_s13 }
  0x32   :  { %s10210_s13 = sld [smem:[%s11045_s0 + %s9972_s7]]   ;;  %s9976_s7 = smov 34  }
  0x33   :  { %s10225_s24 = sld [smem:[%s11045_s0 + %s9975_s28]]   ;;  %s9979_s28 = smov 37  }
  0x34   :  { %s10235_s8 = sld [smem:[%s11045_s0 + %s9977_s15]]   ;;  %s9981_s15 = smov 39  }
  0x35   :  { %11078 = sst [smem:[#allocation119_spill]] %s10200_s9 }
  0x36   :  { %s10220_s9 = sld [smem:[%s11045_s0 + %s9974_s22]]   ;;  %s9978_s22 = smov 36  }
  0x37   :  { %s10245_s25 = sld [smem:[%s11045_s0 + %s9979_s28]]   ;;  %s9983_s28 = smov 41  }
  0x38   :  { %11079 = sst [smem:[#allocation120_spill]] %s10210_s13 }
  0x39   :  { %s10230_s13 = sld [smem:[%s11045_s0 + %s9976_s7]]   ;;  %s9980_s7 = smov 38  }
  0x3a   :  { %s10255_s17 = sld [smem:[%s11045_s0 + %s9981_s15]]   ;;  %s9985_s15 = smov 43  }
  0x3c   :  { %11080 = sst [smem:[#allocation121_spill]] %s10220_s9 }
  0x3d   :  { %s10240_s9 = sld [smem:[%s11045_s0 + %s9978_s22]]   ;;  %s9982_s22 = smov 40  }
  0x3e   :  { %11083 = sst [smem:[#allocation124_spill]] %s10245_s25 }
  0x3f   :  { %11081 = sst [smem:[#allocation122_spill]] %s10230_s13 }
  0x40   :  { %s10250_s13 = sld [smem:[%s11045_s0 + %s9980_s7]]   ;;  %s9984_s7 = smov 42  }
  0x41   :  { %11085 = sst [smem:[#allocation126_spill]] %s10255_s17 }
  0x42   :  { %s10265_s25 = sld [smem:[%s11045_s0 + %s9983_s28]]   ;;  %s9987_s28 = smov 45  }
  0x43   :  { %11082 = sst [smem:[#allocation123_spill]] %s10240_s9 }
  0x44   :  { %s10260_s9 = sld [smem:[%s11045_s0 + %s9982_s22]]   ;;  %s9986_s22 = smov 44  }
  0x45   :  { %s10275_s17 = sld [smem:[%s11045_s0 + %s9985_s15]]   ;;  %s9989_s15 = smov 47  }
  0x46   :  { %11084 = sst [smem:[#allocation125_spill]] %s10250_s13 }
  0x47   :  { %s10270_s13 = sld [smem:[%s11045_s0 + %s9984_s7]]   ;;  %s9988_s7 = smov 46  }
  0x48   :  { %11087 = sst [smem:[#allocation128_spill]] %s10265_s25 }
  0x49   :  { %s10285_s25 = sld [smem:[%s11045_s0 + %s9987_s28]]   ;;  %s9991_s28 = smov 49  }
  0x4a   :  { %11086 = sst [smem:[#allocation127_spill]] %s10260_s9 }
  0x4b   :  { %11089 = sst [smem:[#allocation130_spill]] %s10275_s17 }
  0x4c   :  { %s10280_s9 = sld [smem:[%s11045_s0 + %s9986_s22]]   ;;  %s9990_s22 = smov 48  }
  0x4d   :  { %11088 = sst [smem:[#allocation129_spill]] %s10270_s13 }
  0x4e   :  { %s10290_s13 = sld [smem:[%s11045_s0 + %s9988_s7]]   ;;  %s9992_s7 = smov 50  }
  0x4f   :  { %11091 = sst [smem:[#allocation132_spill]] %s10285_s25 }
  0x50   :  { %s10295_s17 = sld [smem:[%s11045_s0 + %s9989_s15]]   ;;  %s9993_s15 = smov 51  }
  0x51   :  { %s10305_s25 = sld [smem:[%s11045_s0 + %s9991_s28]]   ;;  %s9995_s28 = smov 53  }
  0x52   :  { %11090 = sst [smem:[#allocation131_spill]] %s10280_s9 }
  0x53   :  { %s10300_s9 = sld [smem:[%s11045_s0 + %s9990_s22]]   ;;  %s9994_s22 = smov 52  }
  0x54   :  { %11092 = sst [smem:[#allocation133_spill]] %s10290_s13 }
  0x55   :  { %s10310_s13 = sld [smem:[%s11045_s0 + %s9992_s7]]   ;;  %s9996_s7 = smov 54  }
  0x56   :  { %11093 = sst [smem:[#allocation134_spill]] %s10295_s17 }
  0x57   :  { %11095 = sst [smem:[#allocation136_spill]] %s10305_s25 }
  0x58   :  { %s10315_s17 = sld [smem:[%s11045_s0 + %s9993_s15]]   ;;  %s9997_s15 = smov 55  }
  0x59   :  { %11094 = sst [smem:[#allocation135_spill]] %s10300_s9 }
  0x5a   :  { %s10320_s9 = sld [smem:[%s11045_s0 + %s9994_s22]]   ;;  %s9998_s22 = smov 56  }
  0x5b   :  { %11096 = sst [smem:[#allocation137_spill]] %s10310_s13 }
  0x5c   :  { %s10325_s25 = sld [smem:[%s11045_s0 + %s9995_s28]]   ;;  %s9999_s28 = smov 57  }
  0x5d   :  { %s10330_s13 = sld [smem:[%s11045_s0 + %s9996_s7]]   ;;  %s10000_s7 = smov 58  }
  0x5e   :  { %11097 = sst [smem:[#allocation138_spill]] %s10315_s17 }
  0x5f   :  { %s10335_s17 = sld [smem:[%s11045_s0 + %s9997_s15]]  }
  0x60   :  { %11098 = sst [smem:[#allocation139_spill]] %s10320_s9 }
  0x61   :  { %s10340_s9 = sld [smem:[%s11045_s0 + %s9998_s22]]  }
  0x62   :  { %11099 = sst [smem:[#allocation140_spill]] %s10325_s25 }
  0x63   :  { %11100 = sst [smem:[#allocation141_spill]] %s10330_s13 }
  0x64   :  { %s10345_s25 = sld [smem:[%s11045_s0 + %s9999_s28]]  }
  0x65   :  { %s10350_s13 = sld [smem:[%s11045_s0 + %s10000_s7]]  }
  0x66   :  { %122 = vsyncpa [#allocation12], 0 }
  0x67   :  { %123 = vsyncpa [#allocation15], 0 }
  0x68   :  { %124 = vsyncpa [#allocation18], 0 }
  0x69   :  { %125 = vsyncpa [#allocation21], 0 }
  0x6a   :  { %126 = vsyncpa [#allocation24], 0 }
  0x6b   :  { %127 = vsyncpa [#allocation27], 0 }
  0x6c   :  { %128 = vsyncpa [#allocation30], 0 }
  0x6d   :  { %129 = vsyncpa [#allocation33], 0 }
  0x6e   :  { %130 = vsyncpa [#allocation36], 0 }
  0x6f   :  { %131 = vsyncpa [#allocation39], 0 }
  0x70   :  { %132 = vsyncpa [#allocation42], 0 }
  0x71   :  { %133 = vsyncpa [#allocation45], 0 }
  0x72   :  { %134 = vsyncpa [#allocation48], 0 }
  0x73   :  { %135 = vsyncpa [#allocation51], 0 }
  0x74   :  { %136 = vsyncpa [#allocation54], 0 }
  0x75   :  { %137 = vsyncpa [#allocation57], 0 }
  0x76   :  { %138 = vsyncpa [#allocation60], 0 }
  0x77   :  { %139 = vsyncpa [#allocation63], 0 }
  0x78   :  { %140 = vsyncpa [#allocation66], 0 }
  0x79   :  { %141 = vsyncpa [#allocation69], 0 }
  0x7a   :  { %142 = vsyncpa [#allocation72], 0 }
  0x7b   :  { %143 = vsyncpa [#allocation75], 0 }
  0x7c   :  { %144 = vsyncpa [#allocation13], 0  ;;  %s10001_s0 = smov [#allocation14]  }
  0x7d   :  { %s166_s15 = sshll.u32 %s10001_s0, 4  ;;  %s167_s15 = int_to_ptr.vmem [resolvable:$true] %s166_s15 }
  0x7e   :  { %s9025_s16 = scalar_lea.vmem %s167_s15, 2048  ;;  %p9030_p1 = scmp.lt.s32.totalorder %s167_s15, %s167_s15 }
  0x7f   :  { %p9026_p0 = scmp.ne.s32.totalorder %s167_s15, %s9025_s16  ;;  %p9031_p2 = scmp.lt.s32.totalorder %s9025_s16, %s9025_s16 }
  0x81   :  { %p9032_p3 = por %p9031_p2, %p9030_p1 }
  0x83   :  { %p9033_p4 = pnand %p9032_p3, %p9026_p0 }
  0x85   :  { %9036 = shalt.err (!%p9033_p4)
}
  0x86   :  { %s10002_s18 = smov 64   ;;  %s10003_s22 = smov 4  }
  0x87   :  { %172 = dma.hbm_to_vmem [thread:$0]  %s10080_s21, 2048, %s167_s15, [#allocation15], %s10002_s18, %s10002_s18, %s10003_s22  }
  0x88   :  { %s10004_s23 = smov [#allocation17]   ;;  %s10005_s28 = smov [#allocation20]  }
  0x89   :  { %s190_s26 = sshll.u32 %s10004_s23, 4  ;;  %s215_s1 = sshll.u32 %s10005_s28, 4  ;;  %s191_s26 = int_to_ptr.vmem [resolvable:$true] %s190_s26  ;;  %s216_s1 = int_to_ptr.vmem [resolvable:$true] %s215_s1 }
  0x8a   :  { %s9045_s2 = scalar_lea.vmem %s191_s26, 2048  ;;  %p9050_p6 = scmp.lt.s32.totalorder %s191_s26, %s191_s26 }
  0x8b   :  { %p9046_p5 = scmp.ne.s32.totalorder %s191_s26, %s9045_s2  ;;  %p9051_p7 = scmp.lt.s32.totalorder %s9045_s2, %s9045_s2 }
  0x8d   :  { %p9052_p8 = por %p9051_p7, %p9050_p6 }
  0x8f   :  { %p9053_p9 = pnand %p9052_p8, %p9046_p5 }
  0x91   :  { %9056 = shalt.err (!%p9053_p9)
}
  0x92   :  { %196 = dma.hbm_to_vmem [thread:$0]  %s10090_s29, 2048, %s191_s26, [#allocation18], %s10002_s18, %s10002_s18, %s10003_s22  }
  0x93   :  { %s9065_s7 = scalar_lea.vmem %s216_s1, 16  ;;  %s9069_s21 = scalar_lea.vmem %s216_s1, 32 }
  0x94   :  { %p9066_p10 = scmp.ne.s32.totalorder %s216_s1, %s9065_s7  ;;  %p9070_p11 = scmp.lt.s32.totalorder %s216_s1, %s216_s1 }
  0x95   :  { %p9071_p12 = scmp.lt.s32.totalorder %s9069_s21, %s9065_s7 }
  0x97   :  { %p9072_p13 = por %p9071_p12, %p9070_p11 }
  0x99   :  { %p9073_p0 = pnand %p9072_p13, %p9066_p10 }
  0x9b   :  { %9076 = shalt.err (!%p9073_p0)
}
  0x9c   :  { %218 = dma.hbm_to_vmem [thread:$0]  %s10105_s14, 16, %s216_s1, [#allocation21]  }
  0x9d   :  { %s10006_s10 = smov [#allocation23]   ;;  %s10007_s0 = smov [#allocation26]  }
  0x9e   :  { %s237_s11 = sshll.u32 %s10006_s10, 4  ;;  %s259_s15 = sshll.u32 %s10007_s0, 4  ;;  %s238_s11 = int_to_ptr.vmem [resolvable:$true] %s237_s11  ;;  %s260_s15 = int_to_ptr.vmem [resolvable:$true] %s259_s15 }
  0x9f   :  { %s9085_s16 = scalar_lea.vmem %s238_s11, 16  ;;  %s9089_s23 = scalar_lea.vmem %s238_s11, 32 }
  0xa0   :  { %p9086_p1 = scmp.ne.s32.totalorder %s238_s11, %s9085_s16  ;;  %p9090_p2 = scmp.lt.s32.totalorder %s238_s11, %s238_s11 }
  0xa1   :  { %p9091_p3 = scmp.lt.s32.totalorder %s9089_s23, %s9085_s16 }
  0xa3   :  { %p9092_p4 = por %p9091_p3, %p9090_p2 }
  0xa5   :  { %p9093_p5 = pnand %p9092_p4, %p9086_p1 }
  0xa7   :  { %9096 = shalt.err (!%p9093_p5)
}
  0xa8   :  { %240 = dma.hbm_to_vmem [thread:$0]  %s10120_s30, 16, %s238_s11, [#allocation24]  }
  0xa9   :  { %s9105_s29 = scalar_lea.vmem %s260_s15, 16  ;;  %s9109_s26 = scalar_lea.vmem %s260_s15, 32 }
  0xaa   :  { %p9106_p6 = scmp.ne.s32.totalorder %s260_s15, %s9105_s29  ;;  %p9110_p7 = scmp.lt.s32.totalorder %s260_s15, %s260_s15 }
  0xab   :  { %p9111_p8 = scmp.lt.s32.totalorder %s9109_s26, %s9105_s29 }
  0xad   :  { %p9112_p9 = por %p9111_p8, %p9110_p7 }
  0xaf   :  { %p9113_p10 = pnand %p9112_p9, %p9106_p6 }
  0xb1   :  { %9116 = shalt.err (!%p9113_p10)
}
  0xb2   :  { %262 = dma.hbm_to_vmem [thread:$0]  %s10135_s20, 16, %s260_s15, [#allocation27]  }
  0xb3   :  { %s10008_s14 = smov [#allocation29]   ;;  %s10009_s1 = smov [#allocation32]  }
  0xb4   :  { %s281_s28 = sshll.u32 %s10008_s14, 4  ;;  %s303_s2 = sshll.u32 %s10009_s1, 4  ;;  %s282_s28 = int_to_ptr.vmem [resolvable:$true] %s281_s28  ;;  %s304_s2 = int_to_ptr.vmem [resolvable:$true] %s303_s2 }
  0xb5   :  { %s9125_s7 = scalar_lea.vmem %s282_s28, 16  ;;  %s9129_s21 = scalar_lea.vmem %s282_s28, 32 }
  0xb6   :  { %p9126_p11 = scmp.ne.s32.totalorder %s282_s28, %s9125_s7  ;;  %p9130_p12 = scmp.lt.s32.totalorder %s282_s28, %s282_s28 }
  0xb7   :  { %p9131_p13 = scmp.lt.s32.totalorder %s9129_s21, %s9125_s7 }
  0xb9   :  { %p9132_p0 = por %p9131_p13, %p9130_p12 }
  0xbb   :  { %p9133_p1 = pnand %p9132_p0, %p9126_p11 }
  0xbd   :  { %9136 = shalt.err (!%p9133_p1)
}
  0xbe   :  { %284 = dma.hbm_to_vmem [thread:$0]  %s10150_s6, 16, %s282_s28, [#allocation30]  }
  0xbf   :  { %s9145_s30 = scalar_lea.vmem %s304_s2, 32  ;;  %p9150_p3 = scmp.lt.s32.totalorder %s304_s2, %s304_s2 }
  0xc0   :  { %p9146_p2 = scmp.ne.s32.totalorder %s304_s2, %s9145_s30  ;;  %p9151_p4 = scmp.lt.s32.totalorder %s9145_s30, %s9145_s30 }
  0xc2   :  { %p9152_p5 = por %p9151_p4, %p9150_p3 }
  0xc4   :  { %p9153_p6 = pnand %p9152_p5, %p9146_p2 }
  0xc6   :  { %9156 = shalt.err (!%p9153_p6)
}
  0xc7   :  { %306 = dma.hbm_to_vmem [thread:$0]  %s10165_s3, 32, %s304_s2, [#allocation33]  }
  0xc8   :  { %s10010_s20 = smov [#allocation35]   ;;  %s10011_s11 = smov [#allocation38]  }
  0xc9   :  { %s324_s10 = sshll.u32 %s10010_s20, 4  ;;  %s348_s0 = sshll.u32 %s10011_s11, 4  ;;  %s325_s10 = int_to_ptr.vmem [resolvable:$true] %s324_s10  ;;  %s349_s0 = int_to_ptr.vmem [resolvable:$true] %s348_s0 }
  0xca   :  { %s9165_s15 = scalar_lea.vmem %s325_s10, 2048  ;;  %p9170_p8 = scmp.lt.s32.totalorder %s325_s10, %s325_s10 }
  0xcb   :  { %p9166_p7 = scmp.ne.s32.totalorder %s325_s10, %s9165_s15  ;;  %p9171_p9 = scmp.lt.s32.totalorder %s9165_s15, %s9165_s15 }
  0xcd   :  { %p9172_p10 = por %p9171_p9, %p9170_p8 }
  0xcf   :  { %p9173_p11 = pnand %p9172_p10, %p9166_p7 }
  0xd1   :  { %9176 = shalt.err (!%p9173_p11)
}
  0xd2   :  { %330 = dma.hbm_to_vmem [thread:$0]  %s10175_s19, 2048, %s325_s10, [#allocation36], %s10002_s18, %s10002_s18, %s10003_s22  }
  0xd3   :  { %s9185_s6 = scalar_lea.vmem %s349_s0, 3072  ;;  %p9190_p13 = scmp.lt.s32.totalorder %s349_s0, %s349_s0 }
  0xd4   :  { %p9186_p12 = scmp.ne.s32.totalorder %s349_s0, %s9185_s6  ;;  %p9191_p0 = scmp.lt.s32.totalorder %s9185_s6, %s9185_s6 }
  0xd6   :  { %p9192_p1 = por %p9191_p0, %p9190_p13 }
  0xd8   :  { %p9193_p2 = pnand %p9192_p1, %p9186_p12 }
  0xda   :  { %9196 = shalt.err (!%p9193_p2)
}
  0xdb   :  { %354 = dma.hbm_to_vmem [thread:$0]  %s10185_s5, 3072, %s349_s0, [#allocation39], %s10002_s18, %s10002_s18, %s10003_s22  }
  0xdc   :  { %s10012_s3 = smov [#allocation41]   ;;  %s10013_s23 = smov [#allocation44]  }
  0xdd   :  { %s371_s16 = sshll.u32 %s10012_s3, 4  ;;  %s393_s29 = sshll.u32 %s10013_s23, 4  ;;  %s372_s16 = int_to_ptr.vmem [resolvable:$true] %s371_s16  ;;  %s394_s29 = int_to_ptr.vmem [resolvable:$true] %s393_s29 }
  0xde   :  { %s9205_s26 = scalar_lea.vmem %s372_s16, 16  ;;  %s9209_s19 = scalar_lea.vmem %s372_s16, 32 }
  0xdf   :  { %p9206_p3 = scmp.ne.s32.totalorder %s372_s16, %s9205_s26  ;;  %p9210_p4 = scmp.lt.s32.totalorder %s372_s16, %s372_s16 }
  0xe0   :  { %p9211_p5 = scmp.lt.s32.totalorder %s9209_s19, %s9205_s26 }
  0xe2   :  { %p9212_p6 = por %p9211_p5, %p9210_p4 }
  0xe4   :  { %p9213_p7 = pnand %p9212_p6, %p9206_p3 }
  0xe6   :  { %9216 = shalt.err (!%p9213_p7)
}
  0xe7   :  { %374 = dma.hbm_to_vmem [thread:$0]  %s10195_s27, 16, %s372_s16, [#allocation42]  }
  0xe8   :  { %s9225_s14 = scalar_lea.vmem %s394_s29, 16  ;;  %s9229_s28 = scalar_lea.vmem %s394_s29, 32 }
  0xe9   :  { %p9226_p8 = scmp.ne.s32.totalorder %s394_s29, %s9225_s14  ;;  %p9230_p9 = scmp.lt.s32.totalorder %s394_s29, %s394_s29 }
  0xea   :  { %p9231_p10 = scmp.lt.s32.totalorder %s9229_s28, %s9225_s14 }
  0xec   :  { %p9232_p11 = por %p9231_p10, %p9230_p9 }
  0xee   :  { %p9233_p12 = pnand %p9232_p11, %p9226_p8 }
  0xf0   :  { %9236 = shalt.err (!%p9233_p12)
}
  0xf1   :  { %396 = dma.hbm_to_vmem [thread:$0]  %s10205_s4, 16, %s394_s29, [#allocation45]  }
  0xf2   :  { %s10014_s5 = smov [#allocation47]   ;;  %s10015_s2 = smov [#allocation50]  }
  0xf3   :  { %s412_s1 = sshll.u32 %s10014_s5, 4  ;;  %s435_s7 = sshll.u32 %s10015_s2, 4  ;;  %s413_s1 = int_to_ptr.vmem [resolvable:$true] %s412_s1  ;;  %s436_s7 = int_to_ptr.vmem [resolvable:$true] %s435_s7 }
  0xf4   :  { %s9245_s21 = scalar_lea.vmem %s413_s1, 3072  ;;  %p9250_p0 = scmp.lt.s32.totalorder %s413_s1, %s413_s1 }
  0xf5   :  { %p9246_p13 = scmp.ne.s32.totalorder %s413_s1, %s9245_s21  ;;  %p9251_p1 = scmp.lt.s32.totalorder %s9245_s21, %s9245_s21 }
  0xf7   :  { %p9252_p2 = por %p9251_p1, %p9250_p0 }
  0xf9   :  { %p9253_p3 = pnand %p9252_p2, %p9246_p13 }
  0xfb   :  { %9256 = shalt.err (!%p9253_p3)
}
  0xfc   :  { %418 = dma.hbm_to_vmem [thread:$0]  %s10215_s12, 3072, %s413_s1, [#allocation48], %s10002_s18, %s10002_s18, %s10003_s22  }
  0xfd   :  { %s9265_s27 = scalar_lea.vmem %s436_s7, 16  ;;  %s9269_s4 = scalar_lea.vmem %s436_s7, 32 }
  0xfe   :  { %p9266_p4 = scmp.ne.s32.totalorder %s436_s7, %s9265_s27  ;;  %p9270_p5 = scmp.lt.s32.totalorder %s436_s7, %s436_s7 }
  0xff   :  { %p9271_p6 = scmp.lt.s32.totalorder %s9269_s4, %s9265_s27 }
 0x101   :  { %p9272_p7 = por %p9271_p6, %p9270_p5 }
 0x103   :  { %p9273_p8 = pnand %p9272_p7, %p9266_p4 }
 0x105   :  { %9276 = shalt.err (!%p9273_p8)
}
 0x106   :  { %438 = dma.hbm_to_vmem [thread:$0]  %s10225_s24, 16, %s436_s7, [#allocation51]  }
 0x107   :  { %s10016_s30 = smov [#allocation53]   ;;  %s10017_s10 = smov [#allocation56]  }
 0x108   :  { %s457_s20 = sshll.u32 %s10016_s30, 4  ;;  %s476_s11 = sshll.u32 %s10017_s10, 4  ;;  %s458_s20 = int_to_ptr.vmem [resolvable:$true] %s457_s20  ;;  %s477_s11 = int_to_ptr.vmem [resolvable:$true] %s476_s11 }
 0x109   :  { %s9285_s0 = scalar_lea.vmem %s458_s20, 16  ;;  %s9289_s15 = scalar_lea.vmem %s458_s20, 32 }
 0x10a   :  { %p9286_p9 = scmp.ne.s32.totalorder %s458_s20, %s9285_s0  ;;  %p9290_p10 = scmp.lt.s32.totalorder %s458_s20, %s458_s20 }
 0x10b   :  { %p9291_p11 = scmp.lt.s32.totalorder %s9289_s15, %s9285_s0 }
 0x10d   :  { %p9292_p12 = por %p9291_p11, %p9290_p10 }
 0x10f   :  { %p9293_p13 = pnand %p9292_p12, %p9286_p9 }
 0x111   :  { %9296 = shalt.err (!%p9293_p13)
}
 0x112   :  { %460 = dma.hbm_to_vmem [thread:$0]  %s10235_s8, 16, %s458_s20, [#allocation54]  }
 0x113   :  { %s9305_s12 = scalar_lea.vmem %s477_s11, 3072  ;;  %p9310_p1 = scmp.lt.s32.totalorder %s477_s11, %s477_s11 }
 0x114   :  { %p9306_p0 = scmp.ne.s32.totalorder %s477_s11, %s9305_s12  ;;  %p9311_p2 = scmp.lt.s32.totalorder %s9305_s12, %s9305_s12 }
 0x116   :  { %p9312_p3 = por %p9311_p2, %p9310_p1 }
 0x118   :  { %p9313_p4 = pnand %p9312_p3, %p9306_p0 }
 0x11a   :  { %9316 = shalt.err (!%p9313_p4)
}
 0x11b   :  { %s11101_s24 = sld [smem:[#allocation124_spill]]  ;;  %s10018_s6 = smov [#allocation59]  }
 0x11c   :  { %s499_s3 = sshll.u32 %s10018_s6, 4  ;;  %s10019_s16 = smov [#allocation62]   ;;  %s500_s3 = int_to_ptr.vmem [resolvable:$true] %s499_s3 }
 0x11d   :  { %s527_s23 = sshll.u32 %s10019_s16, 4  ;;  %s9325_s29 = scalar_lea.vmem %s500_s3, 16  ;;  %s528_s23 = int_to_ptr.vmem [resolvable:$true] %s527_s23 }
 0x11e   :  { %p9326_p5 = scmp.ne.s32.totalorder %s500_s3, %s9325_s29  ;;  %s9329_s8 = scalar_lea.vmem %s500_s3, 32 }
 0x11f   :  { %p9330_p6 = scmp.lt.s32.totalorder %s500_s3, %s500_s3  ;;  %p9331_p7 = scmp.lt.s32.totalorder %s9329_s8, %s9325_s29 }
 0x121   :  { %482 = dma.hbm_to_vmem [thread:$0]  %s11101_s24, 3072, %s477_s11, [#allocation57], %s10002_s18, %s10002_s18, %s10003_s22  }
 0x122   :  { %p9332_p8 = por %p9331_p7, %p9330_p6 }
 0x124   :  { %p9333_p9 = pnand %p9332_p8, %p9326_p5 }
 0x126   :  { %9336 = shalt.err (!%p9333_p9)
}
 0x127   :  { %s11102_s26 = sld [smem:[#allocation126_spill]]  ;;  %s9345_s19 = scalar_lea.vmem %s528_s23, 16 }
 0x128   :  { %p9346_p10 = scmp.ne.s32.totalorder %s528_s23, %s9345_s19  ;;  %s9349_s14 = scalar_lea.vmem %s528_s23, 32 }
 0x129   :  { %p9350_p11 = scmp.lt.s32.totalorder %s528_s23, %s528_s23  ;;  %p9351_p12 = scmp.lt.s32.totalorder %s9349_s14, %s9345_s19 }
 0x12b   :  { %p9352_p13 = por %p9351_p12, %p9350_p11 }
 0x12d   :  { %502 = dma.hbm_to_vmem [thread:$0]  %s11102_s26, 16, %s500_s3, [#allocation60]  }
 0x12e   :  { %p9353_p0 = pnand %p9352_p13, %p9346_p10 }
 0x130   :  { %9356 = shalt.err (!%p9353_p0)
}
 0x131   :  { %s11103_s28 = sld [smem:[#allocation132_spill]]  ;;  %s10020_s5 = smov [#allocation65]  }
 0x132   :  { %s549_s1 = sshll.u32 %s10020_s5, 4  ;;  %s10021_s2 = smov [#allocation68]   ;;  %s550_s1 = int_to_ptr.vmem [resolvable:$true] %s549_s1 }
 0x133   :  { %s571_s7 = sshll.u32 %s10021_s2, 4  ;;  %s9365_s21 = scalar_lea.vmem %s550_s1, 16  ;;  %s572_s7 = int_to_ptr.vmem [resolvable:$true] %s571_s7 }
 0x134   :  { %p9366_p1 = scmp.ne.s32.totalorder %s550_s1, %s9365_s21  ;;  %s9369_s27 = scalar_lea.vmem %s550_s1, 32 }
 0x135   :  { %p9370_p2 = scmp.lt.s32.totalorder %s550_s1, %s550_s1  ;;  %p9371_p3 = scmp.lt.s32.totalorder %s9369_s27, %s9365_s21 }
 0x137   :  { %530 = dma.hbm_to_vmem [thread:$0]  %s11103_s28, 16, %s528_s23, [#allocation63]  }
 0x138   :  { %p9372_p4 = por %p9371_p3, %p9370_p2 }
 0x13a   :  { %p9373_p5 = pnand %p9372_p4, %p9366_p1 }
 0x13c   :  { %9376 = shalt.err (!%p9373_p5)
}
 0x13d   :  { %s11104_s4 = sld [smem:[#allocation135_spill]]  ;;  %s9385_s30 = scalar_lea.vmem %s572_s7, 16 }
 0x13e   :  { %p9386_p6 = scmp.ne.s32.totalorder %s572_s7, %s9385_s30  ;;  %s9389_s20 = scalar_lea.vmem %s572_s7, 32 }
 0x13f   :  { %p9390_p7 = scmp.lt.s32.totalorder %s572_s7, %s572_s7  ;;  %p9391_p8 = scmp.lt.s32.totalorder %s9389_s20, %s9385_s30 }
 0x141   :  { %p9392_p9 = por %p9391_p8, %p9390_p7 }
 0x143   :  { %552 = dma.hbm_to_vmem [thread:$0]  %s11104_s4, 16, %s550_s1, [#allocation66]  }
 0x144   :  { %p9393_p10 = pnand %p9392_p9, %p9386_p6 }
 0x146   :  { %9396 = shalt.err (!%p9393_p10)
}
 0x147   :  { %s11105_s10 = sld [smem:[#allocation138_spill]]  ;;  %s10022_s11 = smov [#allocation71]  }
 0x148   :  { %s593_s0 = sshll.u32 %s10022_s11, 4  ;;  %s10023_s15 = smov [#allocation74]   ;;  %s594_s0 = int_to_ptr.vmem [resolvable:$true] %s593_s0 }
 0x149   :  { %s615_s12 = sshll.u32 %s10023_s15, 4  ;;  %s9405_s24 = scalar_lea.vmem %s594_s0, 16  ;;  %s616_s12 = int_to_ptr.vmem [resolvable:$true] %s615_s12 }
 0x14a   :  { %p9406_p11 = scmp.ne.s32.totalorder %s594_s0, %s9405_s24  ;;  %s9409_s6 = scalar_lea.vmem %s594_s0, 32 }
 0x14b   :  { %p9410_p12 = scmp.lt.s32.totalorder %s594_s0, %s594_s0  ;;  %p9411_p13 = scmp.lt.s32.totalorder %s9409_s6, %s9405_s24 }
 0x14d   :  { %574 = dma.hbm_to_vmem [thread:$0]  %s11105_s10, 16, %s572_s7, [#allocation69]  }
 0x14e   :  { %p9412_p0 = por %p9411_p13, %p9410_p12 }
 0x150   :  { %p9413_p1 = pnand %p9412_p0, %p9406_p11 }
 0x152   :  { %9416 = shalt.err (!%p9413_p1)
}
 0x153   :  { %s11106_s3 = sld [smem:[#allocation141_spill]]  ;;  %s9425_s16 = scalar_lea.vmem %s616_s12, 32 }
 0x154   :  { %p9426_p2 = scmp.ne.s32.totalorder %s616_s12, %s9425_s16  ;;  %p9430_p3 = scmp.lt.s32.totalorder %s616_s12, %s616_s12 }
 0x155   :  { %p9431_p4 = scmp.lt.s32.totalorder %s9425_s16, %s9425_s16 }
 0x157   :  { %p9432_p5 = por %p9431_p4, %p9430_p3 }
 0x159   :  { %596 = dma.hbm_to_vmem [thread:$0]  %s11106_s3, 16, %s594_s0, [#allocation72]  }
 0x15a   :  { %p9433_p6 = pnand %p9432_p5, %p9426_p2 }
 0x15c   :  { %9436 = shalt.err (!%p9433_p6)
}
 0x15d   :  { %618 = dma.hbm_to_vmem [thread:$0]  %s10340_s9, 32, %s616_s12, [#allocation75]  }
 0x15e   :  { %s10024_s23 = smov [#allocation11]   ;;  %s10025_s8 = smov [#allocation16]  }
 0x15f   :  { %s157_s29 = sshll.u32 %s10024_s23, 4  ;;  %s178_s26 = sshll.u32 %s10025_s8, 4  ;;  %s158_s29 = int_to_ptr.vmem [resolvable:$true] %s157_s29  ;;  %s179_s26 = int_to_ptr.vmem [resolvable:$true] %s178_s26 }
 0x160   :  { %s9445_s19 = scalar_lea.vmem %s158_s29, 32  ;;  %p9450_p8 = scmp.lt.s32.totalorder %s158_s29, %s158_s29 }
 0x161   :  { %p9446_p7 = scmp.ne.s32.totalorder %s158_s29, %s9445_s19  ;;  %p9451_p9 = scmp.lt.s32.totalorder %s9445_s19, %s9445_s19 }
 0x163   :  { %p9452_p10 = por %p9451_p9, %p9450_p8 }
 0x165   :  { %p9453_p11 = pnand %p9452_p10, %p9446_p7 }
 0x167   :  { %9456 = shalt.err (!%p9453_p11)
}
 0x168   :  { %s11107_s14 = sld [smem:[#allocation104_spill]]  ;;  %s9465_s28 = scalar_lea.vmem %s179_s26, 2048 }
 0x169   :  { %p9466_p12 = scmp.ne.s32.totalorder %s179_s26, %s9465_s28  ;;  %p9470_p13 = scmp.lt.s32.totalorder %s179_s26, %s179_s26 }
 0x16a   :  { %p9471_p0 = scmp.lt.s32.totalorder %s9465_s28, %s9465_s28 }
 0x16c   :  { %p9472_p1 = por %p9471_p0, %p9470_p13 }
 0x16e   :  { %160 = dma.hbm_to_vmem [thread:$0]  %s11107_s14, 32, %s158_s29, [#allocation12]  }
 0x16f   :  { %p9473_p2 = pnand %p9472_p1, %p9466_p12 }
 0x171   :  { %9476 = shalt.err (!%p9473_p2)
}
 0x172   :  { %s11108_s9 = sld [smem:[#allocation105_spill]]  ;;  %s10026_s5 = smov [#allocation19]  }
 0x173   :  { %s205_s1 = sshll.u32 %s10026_s5, 4  ;;  %s10027_s2 = smov [#allocation22]   ;;  %s206_s1 = int_to_ptr.vmem [resolvable:$true] %s205_s1 }
 0x174   :  { %s227_s7 = sshll.u32 %s10027_s2, 4  ;;  %s9485_s21 = scalar_lea.vmem %s206_s1, 16  ;;  %s228_s7 = int_to_ptr.vmem [resolvable:$true] %s227_s7 }
 0x175   :  { %p9486_p3 = scmp.ne.s32.totalorder %s206_s1, %s9485_s21  ;;  %s9489_s27 = scalar_lea.vmem %s206_s1, 32 }
 0x176   :  { %p9490_p4 = scmp.lt.s32.totalorder %s206_s1, %s206_s1  ;;  %p9491_p5 = scmp.lt.s32.totalorder %s9489_s27, %s9485_s21 }
 0x178   :  { %184 = dma.hbm_to_vmem [thread:$0]  %s11108_s9, 2048, %s179_s26, [#allocation15], %s10002_s18, %s10002_s18, %s10003_s22  }
 0x179   :  { %p9492_p6 = por %p9491_p5, %p9490_p4 }
 0x17b   :  { %p9493_p7 = pnand %p9492_p6, %p9486_p3 }
 0x17d   :  { %9496 = shalt.err (!%p9493_p7)
}
 0x17e   :  { %s11109_s4 = sld [smem:[#allocation107_spill]]  ;;  %s9505_s30 = scalar_lea.vmem %s228_s7, 16 }
 0x17f   :  { %p9506_p8 = scmp.ne.s32.totalorder %s228_s7, %s9505_s30  ;;  %s9509_s20 = scalar_lea.vmem %s228_s7, 32 }
 0x180   :  { %p9510_p9 = scmp.lt.s32.totalorder %s228_s7, %s228_s7  ;;  %p9511_p10 = scmp.lt.s32.totalorder %s9509_s20, %s9505_s30 }
 0x182   :  { %p9512_p11 = por %p9511_p10, %p9510_p9 }
 0x184   :  { %208 = dma.hbm_to_vmem [thread:$0]  %s11109_s4, 16, %s206_s1, [#allocation18]  }
 0x185   :  { %p9513_p12 = pnand %p9512_p11, %p9506_p8 }
 0x187   :  { %9516 = shalt.err (!%p9513_p12)
}
 0x188   :  { %s11110_s10 = sld [smem:[#allocation109_spill]]  ;;  %s10028_s11 = smov [#allocation25]  }
 0x189   :  { %s249_s0 = sshll.u32 %s10028_s11, 4  ;;  %s10029_s15 = smov [#allocation28]   ;;  %s250_s0 = int_to_ptr.vmem [resolvable:$true] %s249_s0 }
 0x18a   :  { %s271_s12 = sshll.u32 %s10029_s15, 4  ;;  %s9525_s24 = scalar_lea.vmem %s250_s0, 16  ;;  %s272_s12 = int_to_ptr.vmem [resolvable:$true] %s271_s12 }
 0x18b   :  { %p9526_p13 = scmp.ne.s32.totalorder %s250_s0, %s9525_s24  ;;  %s9529_s6 = scalar_lea.vmem %s250_s0, 32 }
 0x18c   :  { %p9530_p0 = scmp.lt.s32.totalorder %s250_s0, %s250_s0  ;;  %p9531_p1 = scmp.lt.s32.totalorder %s9529_s6, %s9525_s24 }
 0x18e   :  { %230 = dma.hbm_to_vmem [thread:$0]  %s11110_s10, 16, %s228_s7, [#allocation21]  }
 0x18f   :  { %p9532_p2 = por %p9531_p1, %p9530_p0 }
 0x191   :  { %p9533_p3 = pnand %p9532_p2, %p9526_p13 }
 0x193   :  { %9536 = shalt.err (!%p9533_p3)
}
 0x194   :  { %s11111_s3 = sld [smem:[#allocation111_spill]]  ;;  %s9545_s16 = scalar_lea.vmem %s272_s12, 16 }
 0x195   :  { %p9546_p4 = scmp.ne.s32.totalorder %s272_s12, %s9545_s16  ;;  %s9549_s23 = scalar_lea.vmem %s272_s12, 32 }
 0x196   :  { %p9550_p5 = scmp.lt.s32.totalorder %s272_s12, %s272_s12  ;;  %p9551_p6 = scmp.lt.s32.totalorder %s9549_s23, %s9545_s16 }
 0x198   :  { %p9552_p7 = por %p9551_p6, %p9550_p5 }
 0x19a   :  { %252 = dma.hbm_to_vmem [thread:$0]  %s11111_s3, 16, %s250_s0, [#allocation24]  }
 0x19b   :  { %p9553_p8 = pnand %p9552_p7, %p9546_p4 }
 0x19d   :  { %9556 = shalt.err (!%p9553_p8)
}
 0x19e   :  { %s11112_s29 = sld [smem:[#allocation113_spill]]  ;;  %s10030_s8 = smov [#allocation31]  }
 0x19f   :  { %s293_s26 = sshll.u32 %s10030_s8, 4  ;;  %s10031_s19 = smov [#allocation34]   ;;  %s294_s26 = int_to_ptr.vmem [resolvable:$true] %s293_s26 }
 0x1a0   :  { %s312_s14 = sshll.u32 %s10031_s19, 4  ;;  %s9565_s28 = scalar_lea.vmem %s294_s26, 32  ;;  %s313_s14 = int_to_ptr.vmem [resolvable:$true] %s312_s14 }
 0x1a1   :  { %p9566_p9 = scmp.ne.s32.totalorder %s294_s26, %s9565_s28  ;;  %p9570_p10 = scmp.lt.s32.totalorder %s294_s26, %s294_s26 }
 0x1a2   :  { %p9571_p11 = scmp.lt.s32.totalorder %s9565_s28, %s9565_s28 }
 0x1a4   :  { %274 = dma.hbm_to_vmem [thread:$0]  %s11112_s29, 16, %s272_s12, [#allocation27]  }
 0x1a5   :  { %p9572_p12 = por %p9571_p11, %p9570_p10 }
 0x1a7   :  { %p9573_p13 = pnand %p9572_p12, %p9566_p9 }
 0x1a9   :  { %9576 = shalt.err (!%p9573_p13)
}
 0x1aa   :  { %s11113_s9 = sld [smem:[#allocation115_spill]]  ;;  %s9585_s5 = scalar_lea.vmem %s313_s14, 2048 }
 0x1ab   :  { %p9586_p0 = scmp.ne.s32.totalorder %s313_s14, %s9585_s5  ;;  %p9590_p1 = scmp.lt.s32.totalorder %s313_s14, %s313_s14 }
 0x1ac   :  { %p9591_p2 = scmp.lt.s32.totalorder %s9585_s5, %s9585_s5 }
 0x1ae   :  { %p9592_p3 = por %p9591_p2, %p9590_p1 }
 0x1b0   :  { %296 = dma.hbm_to_vmem [thread:$0]  %s11113_s9, 32, %s294_s26, [#allocation30]  }
 0x1b1   :  { %p9593_p4 = pnand %p9592_p3, %p9586_p0 }
 0x1b3   :  { %9596 = shalt.err (!%p9593_p4)
}
 0x1b4   :  { %s11114_s1 = sld [smem:[#allocation116_spill]]  ;;  %s10032_s2 = smov [#allocation37]  }
 0x1b5   :  { %s336_s7 = sshll.u32 %s10032_s2, 4  ;;  %s10033_s21 = smov [#allocation40]   ;;  %s337_s7 = int_to_ptr.vmem [resolvable:$true] %s336_s7 }
 0x1b6   :  { %s361_s27 = sshll.u32 %s10033_s21, 4  ;;  %s9605_s4 = scalar_lea.vmem %s337_s7, 2048  ;;  %s362_s27 = int_to_ptr.vmem [resolvable:$true] %s361_s27 }
 0x1b7   :  { %p9606_p5 = scmp.ne.s32.totalorder %s337_s7, %s9605_s4  ;;  %p9610_p6 = scmp.lt.s32.totalorder %s337_s7, %s337_s7 }
 0x1b8   :  { %p9611_p7 = scmp.lt.s32.totalorder %s9605_s4, %s9605_s4 }
 0x1ba   :  { %318 = dma.hbm_to_vmem [thread:$0]  %s11114_s1, 2048, %s313_s14, [#allocation33], %s10002_s18, %s10002_s18, %s10003_s22  }
 0x1bb   :  { %p9612_p8 = por %p9611_p7, %p9610_p6 }
 0x1bd   :  { %p9613_p9 = pnand %p9612_p8, %p9606_p5 }
 0x1bf   :  { %9616 = shalt.err (!%p9613_p9)
}
 0x1c0   :  { %s11115_s30 = sld [smem:[#allocation117_spill]]  ;;  %s9625_s20 = scalar_lea.vmem %s362_s27, 16 }
 0x1c1   :  { %p9626_p10 = scmp.ne.s32.totalorder %s362_s27, %s9625_s20  ;;  %s9629_s10 = scalar_lea.vmem %s362_s27, 32 }
 0x1c2   :  { %p9630_p11 = scmp.lt.s32.totalorder %s362_s27, %s362_s27  ;;  %p9631_p12 = scmp.lt.s32.totalorder %s9629_s10, %s9625_s20 }
 0x1c4   :  { %p9632_p13 = por %p9631_p12, %p9630_p11 }
 0x1c6   :  { %342 = dma.hbm_to_vmem [thread:$0]  %s11115_s30, 2048, %s337_s7, [#allocation36], %s10002_s18, %s10002_s18, %s10003_s22  }
 0x1c7   :  { %p9633_p0 = pnand %p9632_p13, %p9626_p10 }
 0x1c9   :  { %9636 = shalt.err (!%p9633_p0)
}
 0x1ca   :  { %s11116_s11 = sld [smem:[#allocation118_spill]]  ;;  %s10034_s0 = smov [#allocation43]  }
 0x1cb   :  { %s380_s15 = sshll.u32 %s10034_s0, 4  ;;  %s10035_s12 = smov [#allocation46]   ;;  %s381_s15 = int_to_ptr.vmem [resolvable:$true] %s380_s15 }
 0x1cc   :  { %s403_s24 = sshll.u32 %s10035_s12, 4  ;;  %s9645_s6 = scalar_lea.vmem %s381_s15, 3072  ;;  %s404_s24 = int_to_ptr.vmem [resolvable:$true] %s403_s24 }
 0x1cd   :  { %p9646_p1 = scmp.ne.s32.totalorder %s381_s15, %s9645_s6  ;;  %p9650_p2 = scmp.lt.s32.totalorder %s381_s15, %s381_s15 }
 0x1ce   :  { %p9651_p3 = scmp.lt.s32.totalorder %s9645_s6, %s9645_s6 }
 0x1d0   :  { %364 = dma.hbm_to_vmem [thread:$0]  %s11116_s11, 16, %s362_s27, [#allocation39]  }
 0x1d1   :  { %p9652_p4 = por %p9651_p3, %p9650_p2 }
 0x1d3   :  { %p9653_p5 = pnand %p9652_p4, %p9646_p1 }
 0x1d5   :  { %9656 = shalt.err (!%p9653_p5)
}
 0x1d6   :  { %s11117_s3 = sld [smem:[#allocation119_spill]]  ;;  %s9665_s16 = scalar_lea.vmem %s404_s24, 16 }
 0x1d7   :  { %p9666_p6 = scmp.ne.s32.totalorder %s404_s24, %s9665_s16  ;;  %s9669_s23 = scalar_lea.vmem %s404_s24, 32 }
 0x1d8   :  { %p9670_p7 = scmp.lt.s32.totalorder %s404_s24, %s404_s24  ;;  %p9671_p8 = scmp.lt.s32.totalorder %s9669_s23, %s9665_s16 }
 0x1da   :  { %p9672_p9 = por %p9671_p8, %p9670_p7 }
 0x1dc   :  { %386 = dma.hbm_to_vmem [thread:$0]  %s11117_s3, 3072, %s381_s15, [#allocation42], %s10002_s18, %s10002_s18, %s10003_s22  }
 0x1dd   :  { %p9673_p10 = pnand %p9672_p9, %p9666_p6 }
 0x1df   :  { %9676 = shalt.err (!%p9673_p10)
}
 0x1e0   :  { %s11118_s29 = sld [smem:[#allocation120_spill]]  ;;  %s10036_s8 = smov [#allocation49]  }
 0x1e1   :  { %s425_s26 = sshll.u32 %s10036_s8, 4  ;;  %s10037_s19 = smov [#allocation52]   ;;  %s426_s26 = int_to_ptr.vmem [resolvable:$true] %s425_s26 }
 0x1e2   :  { %s444_s14 = sshll.u32 %s10037_s19, 4  ;;  %s9685_s28 = scalar_lea.vmem %s426_s26, 16  ;;  %s445_s14 = int_to_ptr.vmem [resolvable:$true] %s444_s14 }
 0x1e3   :  { %p9686_p11 = scmp.ne.s32.totalorder %s426_s26, %s9685_s28  ;;  %s9689_s9 = scalar_lea.vmem %s426_s26, 32 }
 0x1e4   :  { %p9690_p12 = scmp.lt.s32.totalorder %s426_s26, %s426_s26  ;;  %p9691_p13 = scmp.lt.s32.totalorder %s9689_s9, %s9685_s28 }
 0x1e6   :  { %406 = dma.hbm_to_vmem [thread:$0]  %s11118_s29, 16, %s404_s24, [#allocation45]  }
 0x1e7   :  { %p9692_p0 = por %p9691_p13, %p9690_p12 }
 0x1e9   :  { %p9693_p1 = pnand %p9692_p0, %p9686_p11 }
 0x1eb   :  { %9696 = shalt.err (!%p9693_p1)
}
 0x1ec   :  { %s11119_s5 = sld [smem:[#allocation121_spill]]  ;;  %s9705_s1 = scalar_lea.vmem %s445_s14, 3072 }
 0x1ed   :  { %p9706_p2 = scmp.ne.s32.totalorder %s445_s14, %s9705_s1  ;;  %p9710_p3 = scmp.lt.s32.totalorder %s445_s14, %s445_s14 }
 0x1ee   :  { %p9711_p4 = scmp.lt.s32.totalorder %s9705_s1, %s9705_s1 }
 0x1f0   :  { %p9712_p5 = por %p9711_p4, %p9710_p3 }
 0x1f2   :  { %428 = dma.hbm_to_vmem [thread:$0]  %s11119_s5, 16, %s426_s26, [#allocation48]  }
 0x1f3   :  { %p9713_p6 = pnand %p9712_p5, %p9706_p2 }
 0x1f5   :  { %9716 = shalt.err (!%p9713_p6)
}
 0x1f6   :  { %s11120_s2 = sld [smem:[#allocation122_spill]]  ;;  %s10038_s7 = smov [#allocation55]  }
 0x1f7   :  { %s467_s21 = sshll.u32 %s10038_s7, 4  ;;  %s10039_s27 = smov [#allocation58]   ;;  %s468_s21 = int_to_ptr.vmem [resolvable:$true] %s467_s21 }
 0x1f8   :  { %s489_s4 = sshll.u32 %s10039_s27, 4  ;;  %s9725_s30 = scalar_lea.vmem %s468_s21, 16  ;;  %s490_s4 = int_to_ptr.vmem [resolvable:$true] %s489_s4 }
 0x1f9   :  { %p9726_p7 = scmp.ne.s32.totalorder %s468_s21, %s9725_s30  ;;  %s9729_s20 = scalar_lea.vmem %s468_s21, 32 }
 0x1fa   :  { %p9730_p8 = scmp.lt.s32.totalorder %s468_s21, %s468_s21  ;;  %p9731_p9 = scmp.lt.s32.totalorder %s9729_s20, %s9725_s30 }
 0x1fc   :  { %450 = dma.hbm_to_vmem [thread:$0]  %s11120_s2, 3072, %s445_s14, [#allocation51], %s10002_s18, %s10002_s18, %s10003_s22  }
 0x1fd   :  { %p9732_p10 = por %p9731_p9, %p9730_p8 }
 0x1ff   :  { %p9733_p11 = pnand %p9732_p10, %p9726_p7 }
 0x201   :  { %9736 = shalt.err (!%p9733_p11)
}
 0x202   :  { %s11121_s10 = sld [smem:[#allocation123_spill]]  ;;  %s9745_s11 = scalar_lea.vmem %s490_s4, 16 }
 0x203   :  { %p9746_p12 = scmp.ne.s32.totalorder %s490_s4, %s9745_s11  ;;  %s9749_s0 = scalar_lea.vmem %s490_s4, 32 }
 0x204   :  { %p9750_p13 = scmp.lt.s32.totalorder %s490_s4, %s490_s4  ;;  %p9751_p0 = scmp.lt.s32.totalorder %s9749_s0, %s9745_s11 }
 0x206   :  { %p9752_p1 = por %p9751_p0, %p9750_p13 }
 0x208   :  { %470 = dma.hbm_to_vmem [thread:$0]  %s11121_s10, 16, %s468_s21, [#allocation54]  }
 0x209   :  { %p9753_p2 = pnand %p9752_p1, %p9746_p12 }
 0x20b   :  { %9756 = shalt.err (!%p9753_p2)
}
 0x20c   :  { %s11122_s22 = sld [smem:[#allocation125_spill]]  ;;  %s10040_s15 = smov [#allocation61]  }
 0x20d   :  { %s517_s12 = sshll.u32 %s10040_s15, 4  ;;  %s10041_s24 = smov [#allocation64]   ;;  %s518_s12 = int_to_ptr.vmem [resolvable:$true] %s517_s12 }
 0x20e   :  { %s539_s6 = sshll.u32 %s10041_s24, 4  ;;  %s9765_s3 = scalar_lea.vmem %s518_s12, 16  ;;  %s540_s6 = int_to_ptr.vmem [resolvable:$true] %s539_s6 }
 0x20f   :  { %p9766_p3 = scmp.ne.s32.totalorder %s518_s12, %s9765_s3  ;;  %s9769_s16 = scalar_lea.vmem %s518_s12, 32 }
 0x210   :  { %p9770_p4 = scmp.lt.s32.totalorder %s518_s12, %s518_s12  ;;  %p9771_p5 = scmp.lt.s32.totalorder %s9769_s16, %s9765_s3 }
 0x212   :  { %492 = dma.hbm_to_vmem [thread:$0]  %s11122_s22, 16, %s490_s4, [#allocation57]  }
 0x213   :  { %p9772_p6 = por %p9771_p5, %p9770_p4 }
 0x215   :  { %p9773_p7 = pnand %p9772_p6, %p9766_p3 }
 0x217   :  { %9776 = shalt.err (!%p9773_p7)
}
 0x218   :  { %s11123_s23 = sld [smem:[#allocation131_spill]]  ;;  %s9785_s29 = scalar_lea.vmem %s540_s6, 16 }
 0x219   :  { %p9786_p8 = scmp.ne.s32.totalorder %s540_s6, %s9785_s29  ;;  %s9789_s8 = scalar_lea.vmem %s540_s6, 32 }
 0x21a   :  { %p9790_p9 = scmp.lt.s32.totalorder %s540_s6, %s540_s6  ;;  %p9791_p10 = scmp.lt.s32.totalorder %s9789_s8, %s9785_s29 }
 0x21c   :  { %p9792_p11 = por %p9791_p10, %p9790_p9 }
 0x21e   :  { %520 = dma.hbm_to_vmem [thread:$0]  %s11123_s23, 16, %s518_s12, [#allocation60]  }
 0x21f   :  { %p9793_p12 = pnand %p9792_p11, %p9786_p8 }
 0x221   :  { %9796 = shalt.err (!%p9793_p12)
}
 0x222   :  { %s11124_s26 = sld [smem:[#allocation134_spill]]  ;;  %s10042_s19 = smov [#allocation67]  }
 0x223   :  { %s561_s14 = sshll.u32 %s10042_s19, 4  ;;  %s10043_s28 = smov [#allocation70]   ;;  %s562_s14 = int_to_ptr.vmem [resolvable:$true] %s561_s14 }
 0x224   :  { %s583_s9 = sshll.u32 %s10043_s28, 4  ;;  %s9805_s5 = scalar_lea.vmem %s562_s14, 16  ;;  %s584_s9 = int_to_ptr.vmem [resolvable:$true] %s583_s9 }
 0x225   :  { %p9806_p13 = scmp.ne.s32.totalorder %s562_s14, %s9805_s5  ;;  %s9809_s1 = scalar_lea.vmem %s562_s14, 32 }
 0x226   :  { %p9810_p0 = scmp.lt.s32.totalorder %s562_s14, %s562_s14  ;;  %p9811_p1 = scmp.lt.s32.totalorder %s9809_s1, %s9805_s5 }
 0x228   :  { %542 = dma.hbm_to_vmem [thread:$0]  %s11124_s26, 16, %s540_s6, [#allocation63]  }
 0x229   :  { %p9812_p2 = por %p9811_p1, %p9810_p0 }
 0x22b   :  { %p9813_p3 = pnand %p9812_p2, %p9806_p13 }
 0x22d   :  { %9816 = shalt.err (!%p9813_p3)
}
 0x22e   :  { %s11125_s2 = sld [smem:[#allocation137_spill]]  ;;  %s9825_s7 = scalar_lea.vmem %s584_s9, 16 }
 0x22f   :  { %p9826_p4 = scmp.ne.s32.totalorder %s584_s9, %s9825_s7  ;;  %s9829_s21 = scalar_lea.vmem %s584_s9, 32 }
 0x230   :  { %p9830_p5 = scmp.lt.s32.totalorder %s584_s9, %s584_s9  ;;  %p9831_p6 = scmp.lt.s32.totalorder %s9829_s21, %s9825_s7 }
 0x232   :  { %p9832_p7 = por %p9831_p6, %p9830_p5 }
 0x234   :  { %564 = dma.hbm_to_vmem [thread:$0]  %s11125_s2, 16, %s562_s14, [#allocation66]  }
 0x235   :  { %p9833_p8 = pnand %p9832_p7, %p9826_p4 }
 0x237   :  { %9836 = shalt.err (!%p9833_p8)
}
 0x238   :  { %s11126_s27 = sld [smem:[#allocation140_spill]]  ;;  %s10044_s4 = smov [#allocation73]  }
 0x239   :  { %s602_s30 = sshll.u32 %s10044_s4, 4  ;;  %s603_s30 = int_to_ptr.vmem [resolvable:$true] %s602_s30 }
 0x23a   :  { %s9845_s20 = scalar_lea.vmem %s603_s30, 2048  ;;  %p9850_p10 = scmp.lt.s32.totalorder %s603_s30, %s603_s30 }
 0x23b   :  { %p9846_p9 = scmp.ne.s32.totalorder %s603_s30, %s9845_s20  ;;  %p9851_p11 = scmp.lt.s32.totalorder %s9845_s20, %s9845_s20 }
 0x23d   :  { %p9852_p12 = por %p9851_p11, %p9850_p10 }
 0x23e   :  { %586 = dma.hbm_to_vmem [thread:$0]  %s11126_s27, 16, %s584_s9, [#allocation69]  }
 0x23f   :  { %p9853_p13 = pnand %p9852_p12, %p9846_p9 }
 0x241   :  { %9856 = shalt.err (!%p9853_p13)
}
 0x242   :  { %s10045_s10 = smov 128   ;;  %s10046_s11 = smov 8  }
 0x243   :  { %608 = dma.hbm_to_vmem [thread:$0]  %s10335_s17, 2048, %s603_s30, [#allocation72], %s10045_s10, %s10045_s10, %s10046_s11  }
 0x244   :  { %s10047_s0 = smov [#allocation76]  }
 0x245   :  { %s625_s22 = sshll.u32 %s10047_s0, 4  ;;  %s626_s22 = int_to_ptr.vmem [resolvable:$true] %s625_s22 }
 0x246   :  { %s9865_s15 = scalar_lea.vmem %s626_s22, 32  ;;  %p9870_p1 = scmp.lt.s32.totalorder %s626_s22, %s626_s22 }
 0x247   :  { %p9866_p0 = scmp.ne.s32.totalorder %s626_s22, %s9865_s15  ;;  %p9871_p2 = scmp.lt.s32.totalorder %s9865_s15, %s9865_s15 }
 0x249   :  { %p9872_p3 = por %p9871_p2, %p9870_p1 }
 0x24b   :  { %p9873_p4 = pnand %p9872_p3, %p9866_p0 }
 0x24d   :  { %9876 = shalt.err (!%p9873_p4)
}
 0x24e   :  { %628 = dma.hbm_to_vmem [thread:$0]  %s10345_s25, 32, %s626_s22, [#allocation75]  }
 0x24f   :  { %9897 = dma.done.wait [#allocation12], 32  }
 0x250   :  { %9898 = vsyncadd [#allocation12], 4294967264 }
 0x251   :  { %9899 = dma.done.wait [#allocation15], 4096  }
 0x252   :  { %9900 = vsyncadd [#allocation15], 4294963200 }
 0x253   :  { %9901 = dma.done.wait [#allocation18], 2064  }
 0x254   :  { %9902 = vsyncadd [#allocation18], 4294965232 }
 0x255   :  { %9903 = dma.done.wait [#allocation21], 32  }
 0x256   :  { %9904 = vsyncadd [#allocation21], 4294967264 }
 0x257   :  { %9905 = dma.done.wait [#allocation24], 32  }
 0x258   :  { %9906 = vsyncadd [#allocation24], 4294967264 }
 0x259   :  { %9907 = dma.done.wait [#allocation27], 32  }
 0x25a   :  { %9908 = vsyncadd [#allocation27], 4294967264 }
 0x25b   :  { %9909 = dma.done.wait [#allocation30], 48  }
 0x25c   :  { %9910 = vsyncadd [#allocation30], 4294967248 }
 0x25d   :  { %9911 = dma.done.wait [#allocation33], 2080  }
 0x25e   :  { %9912 = vsyncadd [#allocation33], 4294965216 }
 0x25f   :  { %9913 = dma.done.wait [#allocation36], 4096  }
 0x260   :  { %9914 = vsyncadd [#allocation36], 4294963200 }
 0x261   :  { %9915 = dma.done.wait [#allocation39], 3088  }
 0x262   :  { %9916 = vsyncadd [#allocation39], 4294964208 }
 0x263   :  { %9917 = dma.done.wait [#allocation42], 3088  }
 0x264   :  { %9918 = vsyncadd [#allocation42], 4294964208 }
 0x265   :  { %9919 = dma.done.wait [#allocation45], 32  }
 0x266   :  { %9920 = vsyncadd [#allocation45], 4294967264 }
 0x267   :  { %9921 = dma.done.wait [#allocation48], 3088  }
 0x268   :  { %9922 = vsyncadd [#allocation48], 4294964208 }
 0x269   :  { %9923 = dma.done.wait [#allocation51], 3088  }
 0x26a   :  { %9924 = vsyncadd [#allocation51], 4294964208 }
 0x26b   :  { %9925 = dma.done.wait [#allocation54], 32  }
 0x26c   :  { %9926 = vsyncadd [#allocation54], 4294967264 }
 0x26d   :  { %9927 = dma.done.wait [#allocation57], 3088  }
 0x26e   :  { %9928 = vsyncadd [#allocation57], 4294964208 }
 0x26f   :  { %9929 = dma.done.wait [#allocation60], 32  }
 0x270   :  { %9930 = vsyncadd [#allocation60], 4294967264 }
 0x271   :  { %9931 = dma.done.wait [#allocation63], 32  }
 0x272   :  { %9932 = vsyncadd [#allocation63], 4294967264 }
 0x273   :  { %9933 = dma.done.wait [#allocation66], 32  }
 0x274   :  { %9934 = vsyncadd [#allocation66], 4294967264 }
 0x275   :  { %9935 = dma.done.wait [#allocation69], 32  }
 0x276   :  { %9936 = vsyncadd [#allocation69], 4294967264 }
 0x277   :  { %9937 = dma.done.wait [#allocation72], 2064  }
 0x278   :  { %9938 = vsyncadd [#allocation72], 4294965232 }
 0x279   :  { %9939 = dma.done.wait [#allocation75], 64  }
 0x27a   :  { %9940 = vsyncadd [#allocation75], 4294967232  ;;  %s11127_s17 = sld [smem:[#allocation101_spill]]  ;;  %vm777_vm0 = vsmask.f32 7424  ;;  %vm807_vm1 = vcmask 1046528  }
 0x27b   :  { %s11128_s25 = sld [smem:[#allocation102_spill]]  ;;  %vm813_vm2 = vcmask 523264   ;;  %v8536_v31 = vld [vmem:[#allocation16 + $0x78] sm:$0xff]   ;;  %v8540_v35 = vld [vmem:[#allocation16 + $0x70] sm:$0xff]   ;;  %v8544_v39 = vld [vmem:[#allocation16 + $0x68] sm:$0xff]  }
 0x27c   :  { %v8537_v32 = vld [vmem:[#allocation16 + $0x38] sm:$0xff]   ;;  %7618 = vmatprep.subr.bf16.mxu1 %v8536_v31  ;;  %v8541_v36 = vld [vmem:[#allocation16 + $0x30] sm:$0xff]   ;;  %v8545_v40 = vld [vmem:[#allocation16 + $0x28] sm:$0xff]   ;;  %s11129_s12 = sld [smem:[#allocation103_spill]] }
 0x27d   :  { %7619 = vmatpush3.bf16.msra.mxu1 %v8537_v32  ;;  %v8548_v43 = vld [vmem:[#allocation16 + $0x60] sm:$0xff]   ;;  %v8552_v47 = vld [vmem:[#allocation16 + $0x58] sm:$0xff]   ;;  %v8542_v57 = vld [vmem:[#allocation14 + $0x70] sm:$0xff]   ;;  %s11130_s24 = sld [smem:[#allocation106_spill]] }
 0x27e   :  { %7620 = vmatprep.subr.bf16.mxu1 %v8540_v35  ;;  %v8549_v44 = vld [vmem:[#allocation16 + $0x20] sm:$0xff]   ;;  %v8553_v49 = vld [vmem:[#allocation16 + $0x18] sm:$0xff]   ;;  %v8543_v61 = vld [vmem:[#allocation14 + $0x30] sm:$0xff]   ;;  %s11131_s6 = sld [smem:[#allocation108_spill]] }
 0x27f   :  { %v8538_v55 = vld [vmem:[#allocation14 + $0x78] sm:$0xff]   ;;  %v8546_v62 = vld [vmem:[#allocation14 + $0x68] sm:$0xff]   ;;  %s11142_s3 = sld [smem:[#allocation110_spill]] }
 0x280   :  { %v10429_v0 = vld [vmem:[%s11127_s17] sm:$0xff]   ;;  %v10432_v1 = vld [vmem:[%s11127_s17 + $0x8] sm:$0xff]   ;;  %v10435_v2 = vld [vmem:[%s11127_s17 + $0x10] ss:$0 sps:$4 sm:$0x33]   ;;  %s11143_s16 = sld [smem:[#allocation112_spill]] }
 0x281   :  { %v779_v3 = vshrl.u32 %v10429_v0, 16  ;;  %v781_v4 = vshll.u32 %v10429_v0, 16  ;;  %v786_v5 = vshll.u32 %v10432_v1, 16  ;;  %v790_v6 = vshrl.u32 %v10432_v1, 16  ;;  %v8500_v9 = vld [vmem:[%s11128_s25 + $0x74] ss:$8 sps:$4 sm:$0xff]   ;;  %7621 = vmatpush3.bf16.msra.mxu1 %v8541_v36 }
 0x282   :  { %v794_v7 = vshll.u32 %v10435_v2, 16  ;;  %v798_v8 = vshrl.u32 %v10435_v2, 16  ;;  %v8502_v10 = vld [vmem:[%s11128_s25 + $0x70] ss:$8 sps:$4 sm:$0xff]   ;;  %v8503_v13 = vld [vmem:[%s11128_s25 + $0x64] ss:$8 sps:$4 sm:$0xff]   ;;  %976 = vmatprep.subr.bf16.mxu0 %v8500_v9  ;;  %7622 = vmatprep.subr.bf16.mxu1 %v8544_v39 }
 0x283   :  { %v783_v11 = vrot.slane %v781_v4, 1  ;;  %v788_v12 = vrot.slane %v786_v5, 1  ;;  %977 = vmatpush1.bf16.msra.mxu0 %v8502_v10  ;;  %v8505_v17 = vld [vmem:[%s11128_s25 + $0x60] ss:$8 sps:$4 sm:$0xff]   ;;  %v808_v18 = vrot.slane %v10429_v0, 1  ;;  %v809_v19 = vrot.slane %v10432_v1, 1 }
 0x284   :  { %v796_v14 = vrot.slane %v794_v7, 1  ;;  %978 = vmatprep.subr.bf16.mxu0 %v8503_v13  ;;  %v8506_v21 = vld [vmem:[%s11128_s25 + $0x54] ss:$8 sps:$4 sm:$0xff]   ;;  %v8508_v25 = vld [vmem:[%s11128_s25 + $0x50] ss:$8 sps:$4 sm:$0xff]   ;;  %v811_v48 = vrot.slane %v10435_v2, 1 }
 0x285   :  { %v784_v15 = vor.u32 %v783_v11, %v779_v3  ;;  %v792_v16 = vor.u32 %v790_v6, %v788_v12  ;;  %v810_v23 = vsel %vm807_vm1, %v808_v18, %v809_v19  ;;  %v8509_v26 = vld [vmem:[%s11128_s25 + $0x44] ss:$8 sps:$4 sm:$0xff]   ;;  %v8511_v27 = vld [vmem:[%s11128_s25 + $0x40] ss:$8 sps:$4 sm:$0xff]   ;;  %v8512_v28 = vld [vmem:[%s11128_s25 + $0x34] ss:$8 sps:$4 sm:$0xff]   ;;  %7623 = vmatpush3.bf16.msra.mxu1 %v8545_v40 }
 0x286   :  { %v800_v20 = vor.u32 %v798_v8, %v796_v14  ;;  %7136 = vmatprep.mubr.msk.bf16.mxu0 %vm813_vm2, %v810_v23  ;;  %v8514_v29 = vld [vmem:[%s11128_s25 + $0x30] ss:$8 sps:$4 sm:$0xff]   ;;  %v8515_v30 = vld [vmem:[%s11128_s25 + $0x24] ss:$8 sps:$4 sm:$0xff]   ;;  %v8517_v33 = vld [vmem:[%s11128_s25 + $0x20] ss:$8 sps:$4 sm:$0xff]   ;;  %7624 = vmatprep.subr.bf16.mxu1 %v8548_v43  ;;  %v812_v59 = vsel %vm807_vm1, %v809_v19, %v811_v48 }
 0x287   :  { %v789_v22 = vsel %vm777_vm0, %v784_v15, %v788_v12  ;;  %v797_v24 = vsel %vm777_vm0, %v792_v16, %v796_v14  ;;  %979 = vmatpush1.bf16.msra.mxu0 %v8505_v17  ;;  %v8518_v34 = vld [vmem:[%s11128_s25 + $0x14] ss:$8 sps:$4 sm:$0xff]   ;;  %v8520_v37 = vld [vmem:[%s11128_s25 + $0x10] ss:$8 sps:$4 sm:$0xff]   ;;  %v8521_v38 = vld [vmem:[%s11128_s25 + $0x4] ss:$8 sps:$4 sm:$0xff]  }
 0x288   :  { %801 = vrot.lane.b32.xlu0 %v789_v22, %s10002_s18  ;;  %805 = vrot.lane.b32.xlu1 %v800_v20, %s10002_s18  ;;  %v8523_v41 = vld [vmem:[%s11128_s25] ss:$8 sps:$4 sm:$0xff]   ;;  %v8524_v42 = vld [vmem:[%s11128_s25 + $0xb4] ss:$8 sps:$4 sm:$0xff]   ;;  %s11144_s23 = sld [smem:[#allocation114_spill]] }
 0x289   :  { %980 = vmatprep.subr.bf16.mxu0 %v8506_v21  ;;  %v8526_v45 = vld [vmem:[%s11128_s25 + $0xb0] ss:$8 sps:$4 sm:$0xff]   ;;  %v8527_v46 = vld [vmem:[%s11128_s25 + $0xa4] ss:$8 sps:$4 sm:$0xff]   ;;  %7625 = vmatpush3.bf16.msra.mxu1 %v8549_v44  ;;  %v8529_v50 = vld [vmem:[%s11128_s25 + $0xa0] ss:$8 sps:$4 sm:$0xff]   ;;  %v1039_v21 = vlaneseq }
 0x28a   :  { %7626 = vmatprep.subr.bf16.mxu1 %v8552_v47  ;;  %v8530_v51 = vld [vmem:[%s11128_s25 + $0x94] ss:$8 sps:$4 sm:$0xff]   ;;  %v8532_v52 = vld [vmem:[%s11128_s25 + $0x90] ss:$8 sps:$4 sm:$0xff]   ;;  %v8533_v53 = vld [vmem:[%s11128_s25 + $0x84] ss:$8 sps:$4 sm:$0xff]  }
 0x28b   :  { %981 = vmatpush1.bf16.msra.mxu0 %v8508_v25  ;;  %v8535_v54 = vld [vmem:[%s11128_s25 + $0x80] ss:$8 sps:$4 sm:$0xff]   ;;  %v8550_v4 = vld [vmem:[#allocation14 + $0x60] sm:$0xff]   ;;  %v10490_v22 = vshrl.u32 %v1039_v21, 7  ;;  %s11149_s29 = sld [smem:[#allocation129_spill]] }
 0x28c   :  { %803 = vrot.lane.b32.xlu0 %v797_v24, %s10002_s18  ;;  %982 = vmatprep.subr.bf16.mxu0 %v8509_v26  ;;  %v8539_v56 = vld [vmem:[#allocation14 + $0x38] sm:$0xff]   ;;  %v8547_v3 = vld [vmem:[#allocation14 + $0x28] sm:$0xff]   ;;  %v8551_v6 = vld [vmem:[#allocation14 + $0x20] sm:$0xff]   ;;  %s11150_s8 = sld [smem:[#allocation128_spill]] }
 0x28d   :  { %7627 = vmatpush3.bf16.msra.mxu1 %v8553_v49  ;;  %v8554_v7 = vld [vmem:[#allocation14 + $0x58] sm:$0xff]   ;;  %v8556_v10 = vld [vmem:[#allocation16 + $0x50] sm:$0xff]   ;;  %v8560_v13 = vld [vmem:[#allocation16 + $0x48] sm:$0xff]   ;;  %v10493_v23 = vsub.s32 1, %v10490_v22  ;;  %v10496_v24 = vsub.s32 0, %v10490_v22  ;;  %vm1663_vm3 = vcmp.eq.s32.totalorder %v10490_v22, 0 }
 0x28e   :  { %v8555_v8 = vld [vmem:[#allocation14 + $0x18] sm:$0xff]   ;;  %v8558_v11 = vld [vmem:[#allocation14 + $0x50] sm:$0xff]   ;;  %7628 = vmatprep.subr.bf16.mxu1 %v8556_v10  ;;  %v8561_v14 = vld [vmem:[#allocation16 + $0x8] sm:$0xff]   ;;  %s11151_s26 = sld [smem:[#allocation127_spill]] }
 0x28f   :  { %983 = vmatpush1.bf16.msra.mxu0 %v8511_v27  ;;  %v8559_v12 = vld [vmem:[#allocation14 + $0x10] sm:$0xff]   ;;  %v8562_v15 = vld [vmem:[#allocation14 + $0x48] sm:$0xff]   ;;  %v8565_v17 = vld [vmem:[#allocation16] sm:$0xff]   ;;  %s11152_s19 = sld [smem:[#allocation130_spill]] }
 0x290   :  { %984 = vmatprep.subr.bf16.mxu0 %v8512_v28  ;;  %v8563_v16 = vld [vmem:[#allocation14 + $0x8] sm:$0xff]   ;;  %v8566_v18 = vld [vmem:[#allocation14 + $0x40] sm:$0xff]   ;;  %v8568_v20 = vld [vmem:[#allocation17 + $0x78] sm:$0xff]   ;;  %s11153_s14 = sld [smem:[#allocation133_spill]] }
 0x291   :  { %v8567_v19 = vld [vmem:[#allocation14] sm:$0xff]   ;;  %v1037_v25 = vld [vmem:[%s11129_s12] sm:$0x3]  ;;  %s11156_s28 = sld [smem:[#allocation136_spill]] }
 0x292   :  { %v1046_v27 = vrot.slane %v1037_v25, %v10493_v23  ;;  %v1042_v28 = vrot.slane %v1037_v25, %v10496_v24  ;;  %v8584_v21 = vld [vmem:[%s11130_s24 + $0xb8] sm:$0xff]   ;;  %s11157_s9 = sld [smem:[#allocation139_spill]] }
 0x293   :  { %985 = vmatpush1.bf16.msra.mxu0 %v8514_v29  ;;  %v8585_v25 = vld [vmem:[%s11130_s24 + $0x78] sm:$0xff]  }
 0x294   :  { %986 = vmatprep.subr.bf16.mxu0 %v8515_v30  ;;  %v1059_v30 = vld [vmem:[#allocation11] sm:$0x3] }
 0x295   :  { %v1064_v36 = vrot.slane %v1059_v30, %v10496_v24 }
 0x297   :  { %987 = vmatpush1.bf16.msra.mxu0 %v8517_v33  ;;  %v1068_v33 = vrot.slane %v1059_v30, %v10493_v23  ;;  %v8590_v30 = vld [vmem:[%s11130_s24 + $0x30] sm:$0xff]  }
 0x298   :  { %988 = vmatprep.subr.bf16.mxu0 %v8518_v34 }
 0x29b   :  { %989 = vmatpush1.bf16.msra.mxu0 %v8520_v37 }
 0x29c   :  { %990 = vmatprep.subr.bf16.mxu0 %v8521_v38 }
 0x29f   :  { %991 = vmatpush1.bf16.msra.mxu0 %v8523_v41 }
 0x2a0   :  { %1000 = vmatprep.subr.bf16.mxu0 %v8524_v42 }
 0x2a3   :  { %1001 = vmatpush2.bf16.msra.mxu0 %v8526_v45 }
 0x2a4   :  { %1002 = vmatprep.subr.bf16.mxu0 %v8527_v46 }
 0x2a7   :  { %1003 = vmatpush2.bf16.msra.mxu0 %v8529_v50 }
 0x2a8   :  { %1004 = vmatprep.subr.bf16.mxu0 %v8530_v51  ;;  %v8570_v51 = vld [vmem:[#allocation17 + $0x70] sm:$0xff]  }
 0x2ab   :  { %1005 = vmatpush2.bf16.msra.mxu0 %v8532_v52 }
 0x2ac   :  { %1006 = vmatprep.subr.bf16.mxu0 %v8533_v53 }
 0x2af   :  { %1007 = vmatpush2.bf16.msra.mxu0 %v8535_v54 }
 0x2b0   :  { %7686 = vmatprep.subr.bf16.mxu0 %v8538_v55 }
 0x2fa   :  { %v802_v58 = vpop.permute.xlu0 %801 }
 0x2fb   :  { %v815_v60 = vsel %vm813_vm2, %v10429_v0, %v802_v58  ;;  %v806_v0 = vpop.permute.xlu1 %805  ;;  %v8571_v58 = vld [vmem:[#allocation17 + $0x30] sm:$0xff]  }
 0x2fc   :  { %1009 = vmatmul.mubr.bf16.vlgmr.msra.gmra.mxu0 %v815_v60  ;;  %v821_v9 = vsel %vm813_vm2, %v10435_v2, %v806_v0  ;;  %v8564_v2 = vld [vmem:[#allocation16 + $0x40] sm:$0xff]   ;;  %v8572_v60 = vld [vmem:[#allocation17 + $0x68] sm:$0xff]  }
 0x2fd   :  { %7137 = vmatprep.mubr.msk.bf16.mxu0 %vm813_vm2, %v812_v59  ;;  %7687 = vmatpush3.bf16.msra.mxu0 %v8539_v56  ;;  %v8574_v0 = vld [vmem:[#allocation17 + $0x60] sm:$0xff]  }
 0x2fe   :  { %v804_v63 = vpop.permute.xlu0 %803  ;;  %7688 = vmatprep.subr.bf16.mxu0 %v8542_v57 }
 0x2ff   :  { %v818_v5 = vsel %vm813_vm2, %v10432_v1, %v804_v63  ;;  %v8557_v1 = vld [vmem:[#allocation16 + $0x10] sm:$0xff]  }
 0x300   :  { %7629 = vmatpush3.bf16.msra.mxu1 %v8557_v1 }
 0x301   :  { %7689 = vmatpush3.bf16.msra.mxu0 %v8543_v61  ;;  %7630 = vmatprep.subr.bf16.mxu1 %v8560_v13 }
 0x302   :  { %7690 = vmatprep.subr.bf16.mxu0 %v8546_v62 }
 0x304   :  { %1019 = vmatmul.mubr.bf16.gmra.mxu0 %v818_v5  ;;  %7631 = vmatpush3.bf16.msra.mxu1 %v8561_v14  ;;  %v8577_v14 = vld [vmem:[#allocation17 + $0x18] sm:$0xff]  }
 0x305   :  { %7138 = vmatprep.mubr.msk.bf16.mxu0 %vm813_vm2, %v811_v48  ;;  %7691 = vmatpush3.bf16.msra.mxu0 %v8547_v3  ;;  %v8569_v48 = vld [vmem:[#allocation17 + $0x38] sm:$0xff]  }
 0x306   :  { %7692 = vmatprep.subr.bf16.mxu0 %v8550_v4  ;;  %7632 = vmatprep.subr.bf16.mxu1 %v8564_v2  ;;  %v8580_v2 = vld [vmem:[#allocation17 + $0x48] sm:$0xff]  }
 0x308   :  { %7633 = vmatpush3.bf16.msra.mxu1 %v8565_v17  ;;  %v8581_v17 = vld [vmem:[#allocation17 + $0x8] sm:$0xff]  }
 0x309   :  { %7693 = vmatpush3.bf16.msra.mxu0 %v8551_v6  ;;  %7652 = vmatprep.subr.bf16.mxu1 %v8568_v20  ;;  %v8573_v6 = vld [vmem:[#allocation17 + $0x28] sm:$0xff]   ;;  %v10048_v20 = vmov 0.0  }
 0x30a   :  { %7694 = vmatprep.subr.bf16.mxu0 %v8554_v7  ;;  %1654 = vst [vmem:[#allocation3] sm:$0xff] %v10048_v20  ;;  %1655 = vst [vmem:[#allocation3 + $0x8] sm:$0xff] %v10048_v20 }
 0x30b   :  { %1656 = vst [vmem:[#allocation3 + $0x10] sm:$0xf] %v10048_v20  ;;  %1677 = vst [vmem:[#allocation4] sm:$0xff] %v10048_v20 }
 0x30c   :  { %1029 = vmatmul.mubr.bf16.gmra.mxu0 %v821_v9  ;;  %1678 = vst [vmem:[#allocation4 + $0x8] sm:$0xff] %v10048_v20  ;;  %1679 = vst [vmem:[#allocation4 + $0x10] sm:$0xf] %v10048_v20 }
 0x30d   :  { %7695 = vmatpush3.bf16.msra.mxu0 %v8555_v8  ;;  %4125 = vst [vmem:[#allocation6] sm:$0xff] %v10048_v20  ;;  %4126 = vst [vmem:[#allocation6 + $0x8] sm:$0xf] %v10048_v20 }
 0x30e   :  { %7696 = vmatprep.subr.bf16.mxu0 %v8558_v11  ;;  %v8575_v11 = vld [vmem:[#allocation17 + $0x20] sm:$0xff]   ;;  %4157 = vst [vmem:[#allocation7] sm:$0xff] %v10048_v20  ;;  %4158 = vst [vmem:[#allocation7 + $0x8] sm:$0xf] %v10048_v20 }
 0x30f   :  { %6078 = vst.msk [vmem:[#allocation9] sm:$0xff] %vm813_vm2, %v10048_v20  ;;  %6109 = vst.msk [vmem:[#allocation10] sm:$0xff] %vm813_vm2, %v10048_v20 }
 0x311   :  { %7697 = vmatpush3.bf16.msra.mxu0 %v8559_v12  ;;  %v8576_v12 = vld [vmem:[#allocation17 + $0x58] sm:$0xff]  }
 0x312   :  { %7698 = vmatprep.subr.bf16.mxu0 %v8562_v15  ;;  %v8578_v15 = vld [vmem:[#allocation17 + $0x50] sm:$0xff]  }
 0x315   :  { %7699 = vmatpush3.bf16.msra.mxu0 %v8563_v16  ;;  %v8579_v16 = vld [vmem:[#allocation17 + $0x10] sm:$0xff]  }
 0x316   :  { %7700 = vmatprep.subr.bf16.mxu0 %v8566_v18  ;;  %v8582_v18 = vld [vmem:[#allocation17 + $0x40] sm:$0xff]  }
 0x319   :  { %7701 = vmatpush3.bf16.msra.mxu0 %v8567_v19  ;;  %v8583_v19 = vld [vmem:[#allocation17] sm:$0xff]  }
 0x31a   :  { %8138 = vmatprep.subr.bf16.mxu0 %v8584_v21 }
 0x3bc   :  { %v1010_v26 = vpop.f32.mrf.mxu0 }
 0x3bd   :  { %v1049_v35 = vmul.f32 %v1042_v28, %v1010_v26  ;;  %v8586_v26 = vld [vmem:[%s11130_s24 + $0xb0] sm:$0xff]  }
 0x3be   :  { %v1012_v29 = vpop.f32.mrf.mxu0 }
 0x3bf   :  { %v1050_v32 = vmul.f32 %v1046_v27, %v1012_v29  ;;  %v1071_v43 = vadd.f32 %v1064_v36, %v1049_v35  ;;  %v8589_v29 = vld [vmem:[%s11130_s24 + $0xa8] sm:$0xff]   ;;  %v8595_v35 = vld [vmem:[%s11130_s24 + $0x98] sm:$0xff]  }
 0x3c0   :  { %v1014_v31 = vpop.f32.mrf.mxu0 }
 0x3c1   :  { %v1051_v34 = vmul.f32 %v1042_v28, %v1014_v31  ;;  %v1072_v41 = vadd.f32 %v1068_v33, %v1050_v32  ;;  %v8591_v31 = vld [vmem:[%s11130_s24 + $0x68] sm:$0xff]   ;;  %v8592_v32 = vld [vmem:[%s11130_s24 + $0xa0] sm:$0xff]  }
 0x3c2   :  { %v1016_v37 = vpop.f32.mrf.mxu0 }
 0x3c3   :  { %v1052_v38 = vmul.f32 %v1046_v27, %v1016_v37  ;;  %v1073_v39 = vadd.f32 %v1064_v36, %v1051_v34  ;;  %v8594_v34 = vld [vmem:[%s11130_s24 + $0x60] sm:$0xff]   ;;  %v8597_v37 = vld [vmem:[%s11130_s24 + $0x58] sm:$0xff]  }
 0x3c4   :  { %v1020_v40 = vpop.f32.mrf.mxu0 }
 0x3c5   :  { %v1074_v42 = vadd.f32 %v1068_v33, %v1052_v38  ;;  %v1053_v44 = vmul.f32 %v1042_v28, %v1020_v40  ;;  %v1081_v50 = vpack.c.bf16 %v1073_v39, %v1071_v43  ;;  %v8598_v38 = vld [vmem:[%s11130_s24 + $0x90] sm:$0xff]   ;;  %v8599_v39 = vld [vmem:[%s11130_s24 + $0x18] sm:$0xff]   ;;  %v8603_v43 = vld [vmem:[%s11130_s24 + $0x48] sm:$0xff]  }
 0x3c6   :  { %v1022_v45 = vpop.f32.mrf.mxu0  ;;  %v8600_v40 = vld [vmem:[%s11130_s24 + $0x50] sm:$0xff]  }
 0x3c7   :  { %v1054_v46 = vmul.f32 %v1046_v27, %v1022_v45  ;;  %v1082_v47 = vpack.c.bf16 %v1074_v42, %v1072_v41  ;;  %v1075_v53 = vadd.f32 %v1064_v36, %v1053_v44  ;;  %v8601_v41 = vld [vmem:[%s11130_s24 + $0x88] sm:$0xff]   ;;  %v8602_v42 = vld [vmem:[%s11130_s24 + $0x10] sm:$0xff]   ;;  %v8604_v44 = vld [vmem:[%s11130_s24 + $0x80] sm:$0xff]  }
 0x3c8   :  { %v1024_v49 = vpop.f32.mrf.mxu0  ;;  %v8605_v45 = vld [vmem:[%s11130_s24 + $0x8] sm:$0xff]  }
 0x3c9   :  { %v1055_v52 = vmul.f32 %v1042_v28, %v1024_v49  ;;  %1247 = vmatprep.mubr.bf16.mxu1 %v1082_v47  ;;  %1620 = vmatprep.mubr.bf16.mxu0 %v1082_v47  ;;  %v1076_v55 = vadd.f32 %v1068_v33, %v1054_v46  ;;  %v8606_v46 = vld [vmem:[%s11130_s24 + $0x40] sm:$0xff]  }
 0x3ca   :  { %v1026_v54 = vpop.f32.mrf.mxu0  ;;  %1248 = vmatmul.mubr.bf16.vlgmr.msra.gmra.mxu1 %v1081_v50  ;;  %1621 = vmatmul.mubr.bf16.vlgmr.msra.gmra.mxu0 %v1081_v50 }
 0x3cb   :  { %v1077_v56 = vadd.f32 %v1064_v36, %v1055_v52  ;;  %v1056_v57 = vmul.f32 %v1046_v27, %v1026_v54  ;;  %7653 = vmatpush3.bf16.msra.mxu1 %v8569_v48  ;;  %8139 = vmatpush3.bf16.msra.mxu0 %v8584_v21 }
 0x3cc   :  { %7654 = vmatprep.subr.bf16.mxu1 %v8570_v51  ;;  %v1030_v59 = vpop.f32.mrf.mxu0  ;;  %8140 = vmatprep.subr.bf16.mxu0 %v8586_v26 }
 0x3cd   :  { %v1078_v61 = vadd.f32 %v1068_v33, %v1056_v57  ;;  %v1057_v62 = vmul.f32 %v1042_v28, %v1030_v59  ;;  %v1083_v3 = vpack.c.bf16 %v1077_v56, %v1075_v53  ;;  %v8588_v28 = vld [vmem:[%s11130_s24 + $0x70] sm:$0xff]  }
 0x3ce   :  { %v1032_v63 = vpop.f32.mrf.mxu0 }
 0x3cf   :  { %7655 = vmatpush3.bf16.msra.mxu1 %v8571_v58  ;;  %v1084_v4 = vpack.c.bf16 %v1078_v61, %v1076_v55  ;;  %v1058_v5 = vmul.f32 %v1046_v27, %v1032_v63  ;;  %v1079_v9 = vadd.f32 %v1064_v36, %v1057_v62  ;;  %v8587_v27 = vld [vmem:[%s11130_s24 + $0x38] sm:$0xff]   ;;  %8141 = vmatpush3.bf16.msra.mxu0 %v8586_v26  ;;  %v8596_v36 = vld [vmem:[%s11130_s24 + $0x20] sm:$0xff]  }
 0x3d0   :  { %7656 = vmatprep.subr.bf16.mxu1 %v8572_v60  ;;  %v1034_v7 = vpop.f32.mrf.mxu0  ;;  %8142 = vmatprep.subr.bf16.mxu0 %v8589_v29 }
 0x3d1   :  { %1255 = vmatprep.mubr.bf16.mxu1 %v1084_v4  ;;  %1628 = vmatprep.mubr.bf16.mxu0 %v1084_v4  ;;  %v1080_v8 = vadd.f32 %v1068_v33, %v1058_v5  ;;  %v1085_v13 = vpack.c.bf16 %v1079_v9, %v1079_v9  ;;  %v8593_v33 = vld [vmem:[%s11130_s24 + $0x28] sm:$0xff]  }
 0x3d2   :  { %1256 = vmatmul.mubr.bf16.gmra.mxu1 %v1083_v3  ;;  %1629 = vmatmul.mubr.bf16.gmra.mxu0 %v1083_v3  ;;  %v1035_v10 = vpop.f32.mrf.mxu0 }
 0x3d3   :  { %v1086_v1 = vpack.c.bf16 %v1080_v8, %v1080_v8  ;;  %7657 = vmatpush3.bf16.msra.mxu1 %v8573_v6  ;;  %8143 = vmatpush3.bf16.msra.mxu0 %v8589_v29 }
 0x3d4   :  { %7658 = vmatprep.subr.bf16.mxu1 %v8574_v0  ;;  %8144 = vmatprep.subr.bf16.mxu0 %v8592_v32 }
 0x3d5   :  { %1263 = vmatprep.mubr.bf16.mxu1 %v1086_v1  ;;  %1636 = vmatprep.mubr.bf16.mxu0 %v1086_v1 }
 0x3d7   :  { %7659 = vmatpush3.bf16.msra.mxu1 %v8575_v11  ;;  %8145 = vmatpush3.bf16.msra.mxu0 %v8592_v32 }
 0x3d8   :  { %7660 = vmatprep.subr.bf16.mxu1 %v8576_v12  ;;  %8146 = vmatprep.subr.bf16.mxu0 %v8595_v35 }
 0x3da   :  { %1264 = vmatmul.mubr.bf16.gmra.mxu1 %v1085_v13  ;;  %1637 = vmatmul.mubr.bf16.gmra.mxu0 %v1085_v13 }
 0x3db   :  { %7661 = vmatpush3.bf16.msra.mxu1 %v8577_v14  ;;  %1431 = vmatprep.mubr.bf16.mxu1 %v1082_v47  ;;  %v8607_v47 = vld [vmem:[%s11130_s24] sm:$0xff]  }
 0x3dc   :  { %7662 = vmatprep.subr.bf16.mxu1 %v8578_v15  ;;  %8147 = vmatpush3.bf16.msra.mxu0 %v8595_v35 }
 0x3dd   :  { %8148 = vmatprep.subr.bf16.mxu0 %v8598_v38 }
 0x3df   :  { %7663 = vmatpush3.bf16.msra.mxu1 %v8579_v16 }
 0x3e0   :  { %7664 = vmatprep.subr.bf16.mxu1 %v8580_v2  ;;  %8149 = vmatpush3.bf16.msra.mxu0 %v8598_v38 }
 0x3e1   :  { %8150 = vmatprep.subr.bf16.mxu0 %v8601_v41 }
 0x3e3   :  { %7665 = vmatpush3.bf16.msra.mxu1 %v8581_v17 }
 0x3e4   :  { %7666 = vmatprep.subr.bf16.mxu1 %v8582_v18  ;;  %8151 = vmatpush3.bf16.msra.mxu0 %v8601_v41 }
 0x3e5   :  { %8152 = vmatprep.subr.bf16.mxu0 %v8604_v44 }
 0x3e7   :  { %7667 = vmatpush3.bf16.msra.mxu1 %v8583_v19 }
 0x3e8   :  { %7720 = vmatprep.subr.bf16.mxu1 %v8585_v25  ;;  %8153 = vmatpush3.bf16.msra.mxu0 %v8604_v44 }
 0x3ea   :  { %1432 = vmatmul.mubr.bf16.vlgmr.msra.gmra.mxu1 %v1081_v50 }
 0x3eb   :  { %1439 = vmatprep.mubr.bf16.mxu1 %v1084_v4  ;;  %7721 = vmatpush3.bf16.msra.mxu1 %v8587_v27 }
 0x3ec   :  { %7722 = vmatprep.subr.bf16.mxu1 %v8588_v28 }
 0x3ef   :  { %7723 = vmatpush3.bf16.msra.mxu1 %v8590_v30 }
 0x3f0   :  { %7724 = vmatprep.subr.bf16.mxu1 %v8591_v31 }
 0x3f2   :  { %1440 = vmatmul.mubr.bf16.gmra.mxu1 %v1083_v3 }
 0x3f3   :  { %1447 = vmatprep.mubr.bf16.mxu1 %v1086_v1  ;;  %7725 = vmatpush3.bf16.msra.mxu1 %v8593_v33 }
 0x3f4   :  { %7726 = vmatprep.subr.bf16.mxu1 %v8594_v34 }
 0x3f7   :  { %7727 = vmatpush3.bf16.msra.mxu1 %v8596_v36 }
 0x3f8   :  { %7728 = vmatprep.subr.bf16.mxu1 %v8597_v37 }
 0x3fa   :  { %1448 = vmatmul.mubr.bf16.gmra.mxu1 %v1085_v13 }
 0x3fb   :  { %7729 = vmatpush3.bf16.msra.mxu1 %v8599_v39 }
 0x3fc   :  { %7730 = vmatprep.subr.bf16.mxu1 %v8600_v40 }
 0x3ff   :  { %7731 = vmatpush3.bf16.msra.mxu1 %v8602_v42 }
 0x400   :  { %7732 = vmatprep.subr.bf16.mxu1 %v8603_v43 }
 0x403   :  { %7733 = vmatpush3.bf16.msra.mxu1 %v8605_v45 }
 0x404   :  { %7734 = vmatprep.subr.bf16.mxu1 %v8606_v46 }
 0x407   :  { %7735 = vmatpush3.bf16.msra.mxu1 %v8607_v47 }
 0x48a   :  { %v7634_v48 = vpop.f32.mrf.mxu1  ;;  %v7702_v49 = vpop.f32.mrf.mxu0 }
 0x48c   :  { %v7635_v50 = vpop.f32.mrf.mxu1  ;;  %v7703_v51 = vpop.f32.mrf.mxu0 }
 0x48d   :  { %v7636_v11 = vadd.f32 %v7635_v50, %v7634_v48  ;;  %v7704_v14 = vadd.f32 %v7703_v51, %v7702_v49 }
 0x48e   :  { %v7637_v52 = vpop.f32.mrf.mxu1  ;;  %v7705_v53 = vpop.f32.mrf.mxu0 }
 0x490   :  { %v7638_v54 = vpop.f32.mrf.mxu1  ;;  %v7706_v55 = vpop.f32.mrf.mxu0 }
 0x491   :  { %v7639_v2 = vadd.f32 %v7638_v54, %v7637_v52  ;;  %v7707_v20 = vadd.f32 %v7706_v55, %v7705_v53 }
 0x492   :  { %v7640_v56 = vpop.f32.mrf.mxu1  ;;  %v7708_v57 = vpop.f32.mrf.mxu0 }
 0x494   :  { %v7641_v58 = vpop.f32.mrf.mxu1  ;;  %v7709_v59 = vpop.f32.mrf.mxu0 }
 0x495   :  { %v7642_v26 = vadd.f32 %v7641_v58, %v7640_v56  ;;  %v7710_v30 = vadd.f32 %v7709_v59, %v7708_v57 }
 0x496   :  { %v7643_v60 = vpop.f32.mrf.mxu1  ;;  %v7711_v61 = vpop.f32.mrf.mxu0 }
 0x498   :  { %v7644_v62 = vpop.f32.mrf.mxu1  ;;  %v7712_v63 = vpop.f32.mrf.mxu0 }
 0x499   :  { %v7645_v33 = vadd.f32 %v7644_v62, %v7643_v60  ;;  %v7713_v37 = vadd.f32 %v7712_v63, %v7711_v61 }
 0x49a   :  { %v7646_v3 = vpop.f32.mrf.mxu1  ;;  %v7714_v4 = vpop.f32.mrf.mxu0 }
 0x49c   :  { %v7647_v5 = vpop.f32.mrf.mxu1  ;;  %v7715_v6 = vpop.f32.mrf.mxu0 }
 0x49d   :  { %v7648_v40 = vadd.f32 %v7647_v5, %v7646_v3  ;;  %v7716_v46 = vadd.f32 %v7715_v6, %v7714_v4 }
 0x49e   :  { %v7649_v7 = vpop.f32.mrf.mxu1  ;;  %v7717_v0 = vpop.f32.mrf.mxu0 }
 0x4a0   :  { %v7650_v8 = vpop.f32.mrf.mxu1  ;;  %v7718_v9 = vpop.f32.mrf.mxu0 }
 0x4aa   :  { %v7668_v10 = vpop.f32.mrf.mxu1 }
 0x4ac   :  { %v7669_v1 = vpop.f32.mrf.mxu1 }
 0x4ad   :  { %v7670_v12 = vadd.f32 %v7669_v1, %v7668_v10 }
 0x4ae   :  { %v7671_v13 = vpop.f32.mrf.mxu1 }
 0x4af   :  { %v1455_v15 = vmax.f32 %v7636_v11, %v7670_v12 }
 0x4b0   :  { %v7672_v16 = vpop.f32.mrf.mxu1 }
 0x4b1   :  { %v1644_v17 = vmax.f32 %v1455_v15, %v7704_v14  ;;  %v7673_v18 = vadd.f32 %v7672_v16, %v7671_v13 }
 0x4b2   :  { %v7674_v19 = vpop.f32.mrf.mxu1 }
 0x4b3   :  { %1649 = vst [vmem:[#allocation2] sm:$0xff] %v1644_v17  ;;  %v1456_v21 = vmax.f32 %v7639_v2, %v7673_v18  ;;  %v8608_v2 = vld [vmem:[%s11131_s6 + $0xb8] sm:$0xff]  }
 0x4b4   :  { %v7675_v25 = vpop.f32.mrf.mxu1  ;;  %8158 = vmatprep.subr.bf16.mxu0 %v8608_v2  ;;  %v8609_v17 = vld [vmem:[%s11131_s6 + $0x78] sm:$0xff]  }
 0x4b5   :  { %v1645_v27 = vmax.f32 %v1456_v21, %v7707_v20  ;;  %v7676_v28 = vadd.f32 %v7675_v25, %v7674_v19  ;;  %v8610_v18 = vld [vmem:[%s11131_s6 + $0x38] sm:$0xff]   ;;  %7758 = vmatprep.subr.bf16.mxu1 %v8609_v17  ;;  %v8611_v19 = vld [vmem:[%s11131_s6 + $0xb0] sm:$0xff]   ;;  %v8614_v25 = vld [vmem:[%s11131_s6 + $0xa8] sm:$0xff]  }
 0x4b6   :  { %v7677_v29 = vpop.f32.mrf.mxu1  ;;  %v8612_v20 = vld [vmem:[%s11131_s6 + $0x70] sm:$0xff]  }
 0x4b7   :  { %1650 = vst [vmem:[#allocation2 + $0x8] sm:$0xff] %v1645_v27  ;;  %v1457_v31 = vmax.f32 %v7642_v26, %v7676_v28  ;;  %v8613_v21 = vld [vmem:[%s11131_s6 + $0x30] sm:$0xff]   ;;  %v8615_v26 = vld [vmem:[%s11131_s6 + $0x68] sm:$0xff]   ;;  %v8617_v28 = vld [vmem:[%s11131_s6 + $0xa0] sm:$0xff]  }
 0x4b8   :  { %v7678_v32 = vpop.f32.mrf.mxu1  ;;  %v8616_v27 = vld [vmem:[%s11131_s6 + $0x28] sm:$0xff]  }
 0x4b9   :  { %v1646_v34 = vmax.f32 %v1457_v31, %v7710_v30  ;;  %v7679_v35 = vadd.f32 %v7678_v32, %v7677_v29  ;;  %v8618_v29 = vld [vmem:[%s11131_s6 + $0x60] sm:$0xff]   ;;  %v8620_v31 = vld [vmem:[%s11131_s6 + $0x98] sm:$0xff]  }
 0x4ba   :  { %v7680_v36 = vpop.f32.mrf.mxu1  ;;  %v8619_v30 = vld [vmem:[%s11131_s6 + $0x20] sm:$0xff]   ;;  %v8621_v32 = vld [vmem:[%s11131_s6 + $0x58] sm:$0xff]  }
 0x4bb   :  { %1651 = vst [vmem:[#allocation2 + $0x10] sm:$0xff] %v1646_v34  ;;  %v1458_v38 = vmax.f32 %v7645_v33, %v7679_v35  ;;  %v8622_v33 = vld [vmem:[%s11131_s6 + $0x18] sm:$0xff]   ;;  %v8623_v34 = vld [vmem:[%s11131_s6 + $0x90] sm:$0xff]  }
 0x4bc   :  { %v7681_v39 = vpop.f32.mrf.mxu1  ;;  %v8624_v35 = vld [vmem:[%s11131_s6 + $0x50] sm:$0xff]  }
 0x4bd   :  { %v1647_v41 = vmax.f32 %v1458_v38, %v7713_v37  ;;  %v7682_v42 = vadd.f32 %v7681_v39, %v7680_v36  ;;  %v8626_v36 = vld [vmem:[%s11131_s6 + $0x88] sm:$0xff]   ;;  %v8625_v37 = vld [vmem:[%s11131_s6 + $0x10] sm:$0xff]   ;;  %v8629_v39 = vld [vmem:[%s11131_s6 + $0x80] sm:$0xff]  }
 0x4be   :  { %v1657_v43 = vld [vmem:[#allocation2] ss:$2 sm:$0xff]  ;;  %v1659_v44 = vld [vmem:[#allocation2 + $0x1] ss:$2 sm:$0xff]  ;;  %v7683_v45 = vpop.f32.mrf.mxu1 }
 0x4bf   :  { %v1660_v47 = vrot.slane %v1659_v44, 7  ;;  %v1665_v48 = vmax.f32 %v1657_v43, %v1659_v44  ;;  %1652 = vst [vmem:[#allocation2 + $0x18] sm:$0xff] %v1647_v41  ;;  %v1459_v49 = vmax.f32 %v7648_v40, %v7682_v42  ;;  %v8627_v38 = vld [vmem:[%s11131_s6 + $0x48] sm:$0xff]   ;;  %v8630_v41 = vld [vmem:[%s11131_s6 + $0x40] sm:$0xff]   ;;  %v10564_v43 = vadd.s32 8, %v10490_v22 }
 0x4c0   :  { %v7684_v50 = vpop.f32.mrf.mxu1  ;;  %v8628_v40 = vld [vmem:[%s11131_s6 + $0x8] sm:$0xff]   ;;  %v8631_v42 = vld [vmem:[%s11131_s6] sm:$0xff]  }
 0x4c1   :  { %v1664_v51 = vsel %vm1663_vm3, %v1659_v44, %v1660_v47  ;;  %v1648_v52 = vmax.f32 %v1459_v49, %v7716_v46  ;;  %v10567_v44 = vmul.u32.u64.low 3435973837, %v10490_v22  ;;  %v10568_v45 = vmul.u32.u64.high 3435973837, %v10490_v22, %v10567_v44 }
 0x4c2   :  { %v10532_v53 = vmax.f32 %v1665_v48, %v1664_v51  ;;  %v10571_v46 = vmul.u32.u64.low 3435973837, %v10564_v43  ;;  %v10572_v47 = vmul.u32.u64.high 3435973837, %v10564_v43, %v10571_v46  ;;  %v1681_v48 = vadd.s32 16, %v10490_v22 }
 0x4c3   :  { %1653 = vst [vmem:[#allocation2 + $0x20] sm:$0x3] %v1648_v52  ;;  %v1688_v49 = vshrl.u32 %v10568_v45, 3 }
 0x4c4   :  { %1667 = vst [vmem:[#allocation3 + $0x1] sm:$0xff] %v10532_v53  ;;  %v10576_v50 = vmul.u32.u64.low 3435973837, %v1681_v48  ;;  %v10577_v51 = vmul.u32.u64.high 3435973837, %v1681_v48, %v10576_v50  ;;  %v1699_v52 = vshrl.u32 %v10572_v47, 3 }
 0x4ca   :  { %v1669_v54 = vld [vmem:[#allocation2 + $0x12] ss:$2 sm:$0xff]  ;;  %v1671_v55 = vld [vmem:[#allocation2 + $0x13] ss:$2 sm:$0xff] }
 0x4cb   :  { %v1672_v56 = vrot.slane %v1671_v55, 7  ;;  %v1674_v57 = vmax.f32 %v1669_v54, %v1671_v55  ;;  %v1733_v60 = vld [vmem:[#allocation3] sm:$0xff]  ;;  %v1689_v54 = vmul.u32 10, %v1688_v49 }
 0x4cc   :  { %v1736_v63 = vmax.f32 %v1733_v60, 0.0 }
 0x4cd   :  { %v1673_v58 = vsel %vm1663_vm3, %v1671_v55, %v1672_v56  ;;  %v1700_v56 = vmul.u32 10, %v1699_v52 }
 0x4ce   :  { %v1675_v59 = vmax.f32 %v1674_v57, %v1673_v58  ;;  %v1690_v57 = vsub.s32 %v10490_v22, %v1689_v54  ;;  %v1710_v58 = vshrl.u32 %v10577_v51, 3 }
 0x4d0   :  { %1676 = vst [vmem:[#allocation3 + $0xb] sm:$0xff] %v1675_v59  ;;  %vm1715_vm4 = vcmp.ne.s32.totalorder %v1690_v57, 0  ;;  %vm1718_vm5 = vcmp.lt.s32.totalorder %v1690_v57, 0 }
 0x4d1   :  { %vm10583_vm6 = vmand %vm1718_vm5, %vm1715_vm4 }
 0x4d7   :  { %v1734_v61 = vld [vmem:[#allocation3 + $0x8] sm:$0xff]  ;;  %v1735_v62 = vld [vmem:[#allocation3 + $0x10] sm:$0xf] }
 0x4d8   :  { %v1737_v3 = vmax.f32 %v1734_v61, 0.0  ;;  %v1738_v4 = vmax.f32 %v1735_v62, 0.0  ;;  %v1701_v62 = vsub.s32 %v10564_v43, %v1700_v56 }
 0x4da   :  { %v1739_v5 = vpack.c.bf16 %v1737_v3, %v1736_v63  ;;  %v1740_v6 = vpack.c.bf16 %v1738_v4, %v1738_v4  ;;  %v1711_v63 = vmul.u32 10, %v1710_v58  ;;  %v1724_v4 = vadd.s32 10, %v1690_v57 }
 0x4db   :  { %vm1716_vm7 = vcmp.ne.s32.totalorder %v1701_v62, 0  ;;  %vm1719_vm8 = vcmp.lt.s32.totalorder %v1701_v62, 0 }
 0x4dc   :  { %v1760_v7 = vrot.slane %v1739_v5, 1  ;;  %v1761_v0 = vrot.slane %v1740_v6, 1  ;;  %v1744_v8 = vshll.u32 %v1739_v5, 16  ;;  %v1749_v9 = vshll.u32 %v1740_v6, 16  ;;  %vm10589_vm9 = vmand %vm1719_vm8, %vm1716_vm7 }
 0x4dd   :  { %v1742_v1 = vshrl.u32 %v1739_v5, 16  ;;  %v1753_v14 = vshrl.u32 %v1740_v6, 16 }
 0x4de   :  { %v1762_v10 = vsel %vm807_vm1, %v1760_v7, %v1761_v0  ;;  %v1746_v11 = vrot.slane %v1744_v8, 1  ;;  %v1751_v12 = vrot.slane %v1749_v9, 1  ;;  %v7211_v7 = vld [vmem:[#allocation19] ss:$0 sm:$0xff]  ;;  %v1712_v9 = vsub.s32 %v1681_v48, %v1711_v63  ;;  %v8633_v63 = vld [vmem:[%s11142_s3 + $0x78] sm:$0xff]  }
 0x4df   :  { %8154 = vmatprep.mubr.bf16.mxu0 %v1762_v10  ;;  %v7212_v10 = vld [vmem:[#allocation20] ss:$0 sm:$0xff] }
 0x4e0   :  { %8155 = vmatmul.mubr.bf16.vlgmr.msra.gmra.mxu0 %v1761_v0  ;;  %v1747_v13 = vor.u32 %v1746_v11, %v1742_v1  ;;  %v1755_v16 = vor.u32 %v1753_v14, %v1751_v12  ;;  %v1725_v1 = vadd.s32 10, %v1701_v62  ;;  %vm1717_vm10 = vcmp.ne.s32.totalorder %v1712_v9, 0  ;;  %v8647_v14 = vld [vmem:[%s11142_s3 + $0x90] sm:$0xff]  }
 0x4e1   :  { %8159 = vmatpush3.bf16.msra.mxu0 %v8608_v2  ;;  %vm1720_vm11 = vcmp.lt.s32.totalorder %v1712_v9, 0 }
 0x4e2   :  { %v1752_v15 = vsel %vm777_vm0, %v1747_v13, %v1751_v12  ;;  %8160 = vmatprep.subr.bf16.mxu0 %v8611_v19  ;;  %v1727_v12 = vsel %vm10583_vm6, %v1724_v4, %v1690_v57  ;;  %vm1723_vm13 = vmand %vm1720_vm11, %vm1717_vm10  ;;  %v8635_v4 = vld [vmem:[%s11142_s3 + $0xb0] sm:$0xff]  }
 0x4e3   :  { %1989 = vmatprep.mubr.bf16.mxu1 %v1752_v15  ;;  %vm10593_vm12 = vcmp.lt.s32.totalorder %v1727_v12, 8  ;;  %v8645_v12 = vld [vmem:[%s11142_s3 + $0x58] sm:$0xff]  }
 0x4e4   :  { %1990 = vmatmul.mubr.bf16.vlgmr.msra.gmra.mxu1 %v1739_v5 }
 0x4e5   :  { %1997 = vmatprep.mubr.bf16.mxu1 %v1755_v16  ;;  %7759 = vmatpush3.bf16.msra.mxu1 %v8610_v18 }
 0x4e6   :  { %8161 = vmatpush3.bf16.msra.mxu0 %v8611_v19  ;;  %7760 = vmatprep.subr.bf16.mxu1 %v8612_v20  ;;  %v1728_v20 = vsel %vm10589_vm9, %v1725_v1, %v1701_v62  ;;  %v8632_v62 = vld [vmem:[%s11142_s3 + $0xb8] sm:$0xff]   ;;  %v8643_v1 = vld [vmem:[%s11142_s3 + $0x20] sm:$0xff]  }
 0x4e7   :  { %8162 = vmatprep.subr.bf16.mxu0 %v8614_v25  ;;  %vm10601_vm14 = vcmp.lt.s32.totalorder %v1728_v20, 8  ;;  %v8652_v20 = vld [vmem:[%s11142_s3 + $0x8] sm:$0xff]  }
 0x4e9   :  { %7761 = vmatpush3.bf16.msra.mxu1 %v8613_v21 }
 0x4ea   :  { %8163 = vmatpush3.bf16.msra.mxu0 %v8614_v25  ;;  %7762 = vmatprep.subr.bf16.mxu1 %v8615_v26 }
 0x4eb   :  { %8164 = vmatprep.subr.bf16.mxu0 %v8617_v28 }
 0x4ec   :  { %1998 = vmatmul.mubr.bf16.gmra.mxu1 %v1740_v6  ;;  %v8637_v6 = vld [vmem:[%s11142_s3 + $0x30] sm:$0xff]  }
 0x4ed   :  { %7763 = vmatpush3.bf16.msra.mxu1 %v8616_v27  ;;  %v1726_v27 = vadd.s32 10, %v1712_v9 }
 0x4ee   :  { %8165 = vmatpush3.bf16.msra.mxu0 %v8617_v28  ;;  %7764 = vmatprep.subr.bf16.mxu1 %v8618_v29 }
 0x4ef   :  { %8166 = vmatprep.subr.bf16.mxu0 %v8620_v31 }
 0x4f1   :  { %7765 = vmatpush3.bf16.msra.mxu1 %v8619_v30 }
 0x4f2   :  { %8167 = vmatpush3.bf16.msra.mxu0 %v8620_v31  ;;  %7766 = vmatprep.subr.bf16.mxu1 %v8621_v32 }
 0x4f3   :  { %8168 = vmatprep.subr.bf16.mxu0 %v8623_v34 }
 0x4f5   :  { %7767 = vmatpush3.bf16.msra.mxu1 %v8622_v33 }
 0x4f6   :  { %7768 = vmatprep.subr.bf16.mxu1 %v8624_v35  ;;  %8169 = vmatpush3.bf16.msra.mxu0 %v8623_v34 }
 0x4f7   :  { %8170 = vmatprep.subr.bf16.mxu0 %v8626_v36 }
 0x4f9   :  { %7769 = vmatpush3.bf16.msra.mxu1 %v8625_v37 }
 0x4fa   :  { %7770 = vmatprep.subr.bf16.mxu1 %v8627_v38  ;;  %8171 = vmatpush3.bf16.msra.mxu0 %v8626_v36  ;;  %v1729_v36 = vsel %vm1723_vm13, %v1726_v27, %v1712_v9  ;;  %v8641_v9 = vld [vmem:[%s11142_s3 + $0xa0] sm:$0xff]   ;;  %vm6082_vm13 = vcmask 1047554  }
 0x4fb   :  { %8172 = vmatprep.subr.bf16.mxu0 %v8629_v39  ;;  %vm10607_vm15 = vcmp.lt.s32.totalorder %v1729_v36, 8  ;;  %v7238_v36 = vld [vmem:[#allocation23] ss:$0 sm:$0xff] }
 0x4fd   :  { %7771 = vmatpush3.bf16.msra.mxu1 %v8628_v40 }
 0x4fe   :  { %7772 = vmatprep.subr.bf16.mxu1 %v8630_v41  ;;  %8173 = vmatpush3.bf16.msra.mxu0 %v8629_v39 }
 0x4ff   :  { %8178 = vmatprep.subr.bf16.mxu0 %v8632_v62 }
 0x501   :  { %7773 = vmatpush3.bf16.msra.mxu1 %v8631_v42 }
 0x502   :  { %7796 = vmatprep.subr.bf16.mxu1 %v8633_v63 }
 0x5a0   :  { %v8156_v55 = vpop.f32.mrf.mxu0 }
 0x5a2   :  { %v2039_v59 = vpop.f32.mrf.mxu0 }
 0x5a4   :  { %v7736_v60 = vpop.f32.mrf.mxu1  ;;  %v8157_v61 = vpop.f32.mrf.mxu0 }
 0x5a6   :  { %v7737_v3 = vpop.f32.mrf.mxu1  ;;  %v2042_v16 = vpop.f32.mrf.mxu0 }
 0x5a7   :  { %v7738_v5 = vadd.f32 %v7737_v3, %v7736_v60  ;;  %v8634_v3 = vld [vmem:[%s11142_s3 + $0x38] sm:$0xff]  }
 0x5a8   :  { %v7739_v0 = vpop.f32.mrf.mxu1 }
 0x5a9   :  { %v2040_v8 = vadd.f32 %v7738_v5, %v2039_v59  ;;  %v8636_v5 = vld [vmem:[%s11142_s3 + $0x70] sm:$0xff]  }
 0x5aa   :  { %v7740_v11 = vpop.f32.mrf.mxu1 }
 0x5ab   :  { %v2060_v13 = vmul.f32 %v7211_v7, %v2040_v8  ;;  %v7741_v15 = vadd.f32 %v7740_v11, %v7739_v0  ;;  %v8639_v0 = vld [vmem:[%s11142_s3 + $0x68] sm:$0xff]   ;;  %v8644_v11 = vld [vmem:[%s11142_s3 + $0x98] sm:$0xff]  }
 0x5ac   :  { %v7742_v2 = vpop.f32.mrf.mxu1  ;;  %v8640_v8 = vld [vmem:[%s11142_s3 + $0x28] sm:$0xff]  }
 0x5ad   :  { %v2070_v17 = vadd.f32 %v7212_v10, %v2060_v13  ;;  %v2043_v18 = vadd.f32 %v7741_v15, %v2042_v16  ;;  %v8646_v13 = vld [vmem:[%s11142_s3 + $0x18] sm:$0xff]   ;;  %v8648_v15 = vld [vmem:[%s11142_s3 + $0x50] sm:$0xff]   ;;  %v8650_v16 = vld [vmem:[%s11142_s3 + $0x88] sm:$0xff]  }
 0x5ae   :  { %v7743_v21 = vpop.f32.mrf.mxu1 }
 0x5af   :  { %v2073_v25 = vmax.f32 %v2070_v17, 0.0  ;;  %v2061_v26 = vmul.f32 %v7211_v7, %v2043_v18  ;;  %v7744_v28 = vadd.f32 %v7743_v21, %v7742_v2  ;;  %v8649_v2 = vld [vmem:[%s11142_s3 + $0x10] sm:$0xff]   ;;  %v8651_v17 = vld [vmem:[%s11142_s3 + $0x48] sm:$0xff]   ;;  %v8653_v18 = vld [vmem:[%s11142_s3 + $0x80] sm:$0xff]  }
 0x5b0   :  { %v7745_v29 = vpop.f32.mrf.mxu1  ;;  %v8654_v21 = vld [vmem:[%s11142_s3 + $0x40] sm:$0xff]  }
 0x5b1   :  { %v2076_v30 = vsel %vm10593_vm12, %v2073_v25, 0.0  ;;  %v2071_v31 = vadd.f32 %v7212_v10, %v2061_v26  ;;  %v2048_v32 = vadd.f32 %v8156_v55, %v7744_v28  ;;  %v8655_v25 = vld [vmem:[%s11142_s3] sm:$0xff]  }
 0x5b2   :  { %2079 = vst [vmem:[#allocation4 + $0x1] sm:$0xff] %v2076_v30  ;;  %v7746_v34 = vpop.f32.mrf.mxu1 }
 0x5b3   :  { %v2074_v35 = vmax.f32 %v2071_v31, 0.0  ;;  %v2062_v37 = vmul.f32 %v7211_v7, %v2048_v32  ;;  %v8638_v7 = vld [vmem:[%s11142_s3 + $0xa8] sm:$0xff]   ;;  %v7237_v32 = vld [vmem:[#allocation22] ss:$0 sm:$0xff] }
 0x5b5   :  { %v2077_v38 = vsel %vm10601_vm14, %v2074_v35, 0.0  ;;  %v2072_v39 = vadd.f32 %v7212_v10, %v2062_v37  ;;  %v8642_v10 = vld [vmem:[%s11142_s3 + $0x60] sm:$0xff]  }
 0x5b6   :  { %2080 = vst [vmem:[#allocation4 + $0x9] sm:$0xff] %v2077_v38 }
 0x5b7   :  { %v2075_v41 = vmax.f32 %v2072_v39, 0.0 }
 0x5b9   :  { %v2078_v42 = vsel %vm10607_vm15, %v2075_v41, 0.0  ;;  %v2082_v44 = vld [vmem:[#allocation4] sm:$0xff] }
 0x5ba   :  { %2081 = vst [vmem:[#allocation4 + $0x11] sm:$0x3] %v2078_v42 }
 0x5bd   :  { %v2083_v45 = vld [vmem:[#allocation4 + $0x8] sm:$0xff] }
 0x5be   :  { %v2085_v46 = vpack.c.bf16 %v2083_v45, %v2082_v44 }
 0x5c0   :  { %v2090_v47 = vshll.u32 %v2085_v46, 16  ;;  %v2106_v51 = vrot.slane %v2085_v46, 1  ;;  %v2088_v54 = vshrl.u32 %v2085_v46, 16 }
 0x5c1   :  { %v2084_v48 = vld [vmem:[#allocation4 + $0x10] sm:$0xf] }
 0x5c2   :  { %v2086_v49 = vpack.c.bf16 %v2084_v48, %v2084_v48  ;;  %v2092_v50 = vrot.slane %v2090_v47, 1 }
 0x5c4   :  { %v2107_v52 = vrot.slane %v2086_v49, 1  ;;  %v2095_v55 = vshll.u32 %v2086_v49, 16  ;;  %v2093_v57 = vor.u32 %v2092_v50, %v2088_v54  ;;  %v2099_v59 = vshrl.u32 %v2086_v49, 16 }
 0x5c6   :  { %v2108_v56 = vsel %vm807_vm1, %v2106_v51, %v2107_v52  ;;  %v2097_v58 = vrot.slane %v2095_v55, 1 }
 0x5c7   :  { %8174 = vmatprep.mubr.bf16.mxu0 %v2108_v56  ;;  %v2420_v56 = vld [vmem:[#allocation3 + $0x9] sm:$0xff] }
 0x5c8   :  { %8175 = vmatmul.mubr.bf16.vlgmr.msra.gmra.mxu0 %v2107_v52  ;;  %v2098_v60 = vsel %vm777_vm0, %v2093_v57, %v2097_v58  ;;  %v2101_v61 = vor.u32 %v2099_v59, %v2097_v58 }
 0x5c9   :  { %2335 = vmatprep.mubr.bf16.mxu1 %v2098_v60  ;;  %8179 = vmatpush3.bf16.msra.mxu0 %v8632_v62 }
 0x5ca   :  { %2336 = vmatmul.mubr.bf16.vlgmr.msra.gmra.mxu1 %v2085_v46  ;;  %8180 = vmatprep.subr.bf16.mxu0 %v8635_v4 }
 0x5cb   :  { %2343 = vmatprep.mubr.bf16.mxu1 %v2101_v61  ;;  %7797 = vmatpush3.bf16.msra.mxu1 %v8634_v3  ;;  %v2421_v61 = vld [vmem:[#allocation3 + $0x11] sm:$0x3] }
 0x5cc   :  { %7798 = vmatprep.subr.bf16.mxu1 %v8636_v5 }
 0x5cd   :  { %8181 = vmatpush3.bf16.msra.mxu0 %v8635_v4 }
 0x5ce   :  { %8182 = vmatprep.subr.bf16.mxu0 %v8638_v7 }
 0x5cf   :  { %7799 = vmatpush3.bf16.msra.mxu1 %v8637_v6 }
 0x5d0   :  { %7800 = vmatprep.subr.bf16.mxu1 %v8639_v0 }
 0x5d1   :  { %8183 = vmatpush3.bf16.msra.mxu0 %v8638_v7 }
 0x5d2   :  { %2344 = vmatmul.mubr.bf16.gmra.mxu1 %v2086_v49  ;;  %8184 = vmatprep.subr.bf16.mxu0 %v8641_v9 }
 0x5d3   :  { %7801 = vmatpush3.bf16.msra.mxu1 %v8640_v8 }
 0x5d4   :  { %7802 = vmatprep.subr.bf16.mxu1 %v8642_v10 }
 0x5d5   :  { %8185 = vmatpush3.bf16.msra.mxu0 %v8641_v9 }
 0x5d6   :  { %8186 = vmatprep.subr.bf16.mxu0 %v8644_v11 }
 0x5d7   :  { %7803 = vmatpush3.bf16.msra.mxu1 %v8643_v1 }
 0x5d8   :  { %7804 = vmatprep.subr.bf16.mxu1 %v8645_v12 }
 0x5d9   :  { %8187 = vmatpush3.bf16.msra.mxu0 %v8644_v11 }
 0x5da   :  { %8188 = vmatprep.subr.bf16.mxu0 %v8647_v14 }
 0x5db   :  { %7805 = vmatpush3.bf16.msra.mxu1 %v8646_v13 }
 0x5dc   :  { %7806 = vmatprep.subr.bf16.mxu1 %v8648_v15 }
 0x5dd   :  { %8189 = vmatpush3.bf16.msra.mxu0 %v8647_v14 }
 0x5de   :  { %8190 = vmatprep.subr.bf16.mxu0 %v8650_v16 }
 0x5df   :  { %7807 = vmatpush3.bf16.msra.mxu1 %v8649_v2 }
 0x5e0   :  { %7808 = vmatprep.subr.bf16.mxu1 %v8651_v17 }
 0x5e1   :  { %8191 = vmatpush3.bf16.msra.mxu0 %v8650_v16 }
 0x5e2   :  { %8192 = vmatprep.subr.bf16.mxu0 %v8653_v18 }
 0x5e3   :  { %7809 = vmatpush3.bf16.msra.mxu1 %v8652_v20  ;;  %v8656_v20 = vld [vmem:[%s11143_s16 + $0xb8] sm:$0xff]  }
 0x5e4   :  { %7810 = vmatprep.subr.bf16.mxu1 %v8654_v21  ;;  %v8657_v21 = vld [vmem:[%s11143_s16 + $0x78] sm:$0xff]  }
 0x5e5   :  { %8193 = vmatpush3.bf16.msra.mxu0 %v8653_v18 }
 0x5e6   :  { %8198 = vmatprep.subr.bf16.mxu0 %v8656_v20 }
 0x5e7   :  { %7811 = vmatpush3.bf16.msra.mxu1 %v8655_v25  ;;  %v8658_v25 = vld [vmem:[%s11143_s16 + $0x38] sm:$0xff]  }
 0x5e8   :  { %7834 = vmatprep.subr.bf16.mxu1 %v8657_v21 }
 0x688   :  { %v8176_v26 = vpop.f32.mrf.mxu0 }
 0x68a   :  { %v7774_v27 = vpop.f32.mrf.mxu1  ;;  %v2385_v28 = vpop.f32.mrf.mxu0 }
 0x68c   :  { %v7775_v29 = vpop.f32.mrf.mxu1  ;;  %v8177_v30 = vpop.f32.mrf.mxu0 }
 0x68d   :  { %v7776_v31 = vadd.f32 %v7775_v29, %v7774_v27  ;;  %v8660_v27 = vld [vmem:[%s11143_s16 + $0x70] sm:$0xff]   ;;  %v8662_v29 = vld [vmem:[%s11143_s16 + $0xa8] sm:$0xff]  }
 0x68e   :  { %v7777_v34 = vpop.f32.mrf.mxu1  ;;  %v2388_v41 = vpop.f32.mrf.mxu0  ;;  %v8663_v30 = vld [vmem:[%s11143_s16 + $0x68] sm:$0xff]  }
 0x68f   :  { %v2386_v35 = vadd.f32 %v7776_v31, %v2385_v28  ;;  %v8661_v28 = vld [vmem:[%s11143_s16 + $0x30] sm:$0xff]   ;;  %v8664_v31 = vld [vmem:[%s11143_s16 + $0x28] sm:$0xff]  }
 0x690   :  { %v7778_v37 = vpop.f32.mrf.mxu1 }
 0x691   :  { %v2406_v38 = vmul.f32 %v7237_v32, %v2386_v35  ;;  %v7779_v39 = vadd.f32 %v7778_v37, %v7777_v34  ;;  %v8666_v34 = vld [vmem:[%s11143_s16 + $0x60] sm:$0xff]   ;;  %v8669_v37 = vld [vmem:[%s11143_s16 + $0x58] sm:$0xff]  }
 0x692   :  { %v7780_v42 = vpop.f32.mrf.mxu1  ;;  %v8667_v35 = vld [vmem:[%s11143_s16 + $0x20] sm:$0xff]  }
 0x693   :  { %v2416_v44 = vadd.f32 %v7238_v36, %v2406_v38  ;;  %v2389_v45 = vadd.f32 %v7779_v39, %v2388_v41  ;;  %v8670_v38 = vld [vmem:[%s11143_s16 + $0x18] sm:$0xff]   ;;  %v8671_v39 = vld [vmem:[%s11143_s16 + $0x90] sm:$0xff]  }
 0x694   :  { %v7781_v46 = vpop.f32.mrf.mxu1  ;;  %v8672_v41 = vld [vmem:[%s11143_s16 + $0x50] sm:$0xff]  }
 0x695   :  { %v2422_v47 = vsel %vm10593_vm12, %v2416_v44, 0.0  ;;  %v2407_v48 = vmul.f32 %v7237_v32, %v2389_v45  ;;  %v7782_v49 = vadd.f32 %v7781_v46, %v7780_v42  ;;  %v8674_v42 = vld [vmem:[%s11143_s16 + $0x88] sm:$0xff]   ;;  %v8673_v44 = vld [vmem:[%s11143_s16 + $0x10] sm:$0xff]   ;;  %v8677_v46 = vld [vmem:[%s11143_s16 + $0x80] sm:$0xff]  }
 0x696   :  { %v10642_v50 = vadd.f32 %v2422_v47, %v10532_v53  ;;  %v7783_v51 = vpop.f32.mrf.mxu1  ;;  %v8675_v45 = vld [vmem:[%s11143_s16 + $0x48] sm:$0xff]  }
 0x697   :  { %v2417_v52 = vadd.f32 %v7238_v36, %v2407_v48  ;;  %v2394_v54 = vadd.f32 %v8176_v26, %v7782_v49  ;;  %v8659_v26 = vld [vmem:[%s11143_s16 + $0xb0] sm:$0xff]   ;;  %v8676_v47 = vld [vmem:[%s11143_s16 + $0x8] sm:$0xff]   ;;  %v8678_v48 = vld [vmem:[%s11143_s16 + $0x40] sm:$0xff]  }
 0x698   :  { %2428 = vst [vmem:[#allocation3 + $0x1] sm:$0xff] %v10642_v50  ;;  %v7784_v55 = vpop.f32.mrf.mxu1  ;;  %v8679_v49 = vld [vmem:[%s11143_s16] sm:$0xff]   ;;  %v8682_v51 = vld [vmem:[%s11144_s23 + $0x74] ss:$8 sps:$4 sm:$0xff]  }
 0x699   :  { %v2423_v57 = vsel %vm10601_vm14, %v2417_v52, 0.0  ;;  %v2408_v58 = vmul.f32 %v7237_v32, %v2394_v54  ;;  %v8665_v32 = vld [vmem:[%s11143_s16 + $0xa0] sm:$0xff]  }
 0x69a   :  { %v10647_v59 = vadd.f32 %v2423_v57, %v2420_v56 }
 0x69b   :  { %v2418_v60 = vadd.f32 %v7238_v36, %v2408_v58  ;;  %v8668_v36 = vld [vmem:[%s11143_s16 + $0x98] sm:$0xff]  }
 0x69c   :  { %2429 = vst [vmem:[#allocation3 + $0x9] sm:$0xff] %v10647_v59 }
 0x69d   :  { %v2424_v53 = vsel %vm10607_vm15, %v2418_v60, 0.0  ;;  %v7263_v60 = vld [vmem:[#allocation25] ss:$0 sm:$0xff] }
 0x69e   :  { %v2427_v62 = vadd.f32 %v2424_v53, %v2421_v61 }
 0x69f   :  { %v2431_v63 = vld [vmem:[#allocation3] sm:$0xff] }
 0x6a0   :  { %2430 = vst [vmem:[#allocation3 + $0x11] sm:$0x3] %v2427_v62  ;;  %v2434_v4 = vmax.f32 %v2431_v63, 0.0  ;;  %v7264_v62 = vld [vmem:[#allocation26] ss:$0 sm:$0xff] }
 0x6a3   :  { %v2432_v3 = vld [vmem:[#allocation3 + $0x8] sm:$0xff] }
 0x6a4   :  { %v2435_v5 = vmax.f32 %v2432_v3, 0.0 }
 0x6a6   :  { %v2437_v6 = vpack.c.bf16 %v2435_v5, %v2434_v4 }
 0x6a7   :  { %v2433_v7 = vld [vmem:[#allocation3 + $0x10] sm:$0xf] }
 0x6a8   :  { %v2436_v0 = vmax.f32 %v2433_v7, 0.0  ;;  %v2442_v8 = vshll.u32 %v2437_v6, 16  ;;  %v2458_v1 = vrot.slane %v2437_v6, 1  ;;  %v2440_v12 = vshrl.u32 %v2437_v6, 16 }
 0x6aa   :  { %v2438_v9 = vpack.c.bf16 %v2436_v0, %v2436_v0  ;;  %v2444_v10 = vrot.slane %v2442_v8, 1 }
 0x6ac   :  { %v2459_v11 = vrot.slane %v2438_v9, 1  ;;  %v2447_v13 = vshll.u32 %v2438_v9, 16  ;;  %v2445_v15 = vor.u32 %v2444_v10, %v2440_v12  ;;  %v2451_v2 = vshrl.u32 %v2438_v9, 16 }
 0x6ae   :  { %v2460_v14 = vsel %vm807_vm1, %v2458_v1, %v2459_v11  ;;  %v2449_v16 = vrot.slane %v2447_v13, 1 }
 0x6af   :  { %8194 = vmatprep.mubr.bf16.mxu0 %v2460_v14 }
 0x6b0   :  { %8195 = vmatmul.mubr.bf16.vlgmr.msra.gmra.mxu0 %v2459_v11  ;;  %v2450_v17 = vsel %vm777_vm0, %v2445_v15, %v2449_v16  ;;  %v2453_v18 = vor.u32 %v2451_v2, %v2449_v16 }
 0x6b1   :  { %2687 = vmatprep.mubr.bf16.mxu1 %v2450_v17  ;;  %8199 = vmatpush3.bf16.msra.mxu0 %v8656_v20 }
 0x6b2   :  { %2688 = vmatmul.mubr.bf16.vlgmr.msra.gmra.mxu1 %v2437_v6  ;;  %8200 = vmatprep.subr.bf16.mxu0 %v8659_v26 }
 0x6b3   :  { %2695 = vmatprep.mubr.bf16.mxu1 %v2453_v18  ;;  %7835 = vmatpush3.bf16.msra.mxu1 %v8658_v25 }
 0x6b4   :  { %7836 = vmatprep.subr.bf16.mxu1 %v8660_v27 }
 0x6b5   :  { %8201 = vmatpush3.bf16.msra.mxu0 %v8659_v26 }
 0x6b6   :  { %8202 = vmatprep.subr.bf16.mxu0 %v8662_v29 }
 0x6b7   :  { %7837 = vmatpush3.bf16.msra.mxu1 %v8661_v28 }
 0x6b8   :  { %7838 = vmatprep.subr.bf16.mxu1 %v8663_v30 }
 0x6b9   :  { %8203 = vmatpush3.bf16.msra.mxu0 %v8662_v29 }
 0x6ba   :  { %2696 = vmatmul.mubr.bf16.gmra.mxu1 %v2438_v9  ;;  %8204 = vmatprep.subr.bf16.mxu0 %v8665_v32 }
 0x6bb   :  { %7839 = vmatpush3.bf16.msra.mxu1 %v8664_v31 }
 0x6bc   :  { %7840 = vmatprep.subr.bf16.mxu1 %v8666_v34 }
 0x6bd   :  { %8205 = vmatpush3.bf16.msra.mxu0 %v8665_v32 }
 0x6be   :  { %8206 = vmatprep.subr.bf16.mxu0 %v8668_v36 }
 0x6bf   :  { %7841 = vmatpush3.bf16.msra.mxu1 %v8667_v35 }
 0x6c0   :  { %7842 = vmatprep.subr.bf16.mxu1 %v8669_v37 }
 0x6c1   :  { %8207 = vmatpush3.bf16.msra.mxu0 %v8668_v36 }
 0x6c2   :  { %8208 = vmatprep.subr.bf16.mxu0 %v8671_v39 }
 0x6c3   :  { %7843 = vmatpush3.bf16.msra.mxu1 %v8670_v38 }
 0x6c4   :  { %7844 = vmatprep.subr.bf16.mxu1 %v8672_v41 }
 0x6c5   :  { %8209 = vmatpush3.bf16.msra.mxu0 %v8671_v39 }
 0x6c6   :  { %8210 = vmatprep.subr.bf16.mxu0 %v8674_v42 }
 0x6c7   :  { %7845 = vmatpush3.bf16.msra.mxu1 %v8673_v44 }
 0x6c8   :  { %7846 = vmatprep.subr.bf16.mxu1 %v8675_v45 }
 0x6c9   :  { %8211 = vmatpush3.bf16.msra.mxu0 %v8674_v42  ;;  %v8680_v42 = vld [vmem:[%s11144_s23 + $0x70] ss:$8 sps:$4 sm:$0xff]  }
 0x6ca   :  { %8212 = vmatprep.subr.bf16.mxu0 %v8677_v46 }
 0x6cb   :  { %7847 = vmatpush3.bf16.msra.mxu1 %v8676_v47  ;;  %v8683_v47 = vld [vmem:[%s11144_s23 + $0x60] ss:$8 sps:$4 sm:$0xff]  }
 0x6cc   :  { %7848 = vmatprep.subr.bf16.mxu1 %v8678_v48  ;;  %v8688_v48 = vld [vmem:[%s11144_s23 + $0x54] ss:$8 sps:$4 sm:$0xff]  }
 0x6cd   :  { %8213 = vmatpush3.bf16.msra.mxu0 %v8677_v46  ;;  %v8685_v46 = vld [vmem:[%s11144_s23 + $0x64] ss:$8 sps:$4 sm:$0xff]  }
 0x6cf   :  { %7849 = vmatpush3.bf16.msra.mxu1 %v8679_v49  ;;  %v8686_v49 = vld [vmem:[%s11144_s23 + $0x50] ss:$8 sps:$4 sm:$0xff]  }
 0x6d0   :  { %3446 = vmatprep.subr.bf16.mxu1 %v8682_v51  ;;  %v8691_v51 = vld [vmem:[%s11144_s23 + $0x44] ss:$8 sps:$4 sm:$0xff]  }
 0x770   :  { %v8196_v52 = vpop.f32.mrf.mxu0 }
 0x772   :  { %v7812_v54 = vpop.f32.mrf.mxu1  ;;  %v2737_v55 = vpop.f32.mrf.mxu0 }
 0x774   :  { %v7813_v56 = vpop.f32.mrf.mxu1  ;;  %v8197_v57 = vpop.f32.mrf.mxu0 }
 0x775   :  { %v7814_v58 = vadd.f32 %v7813_v56, %v7812_v54  ;;  %v8694_v54 = vld [vmem:[%s11144_s23 + $0x34] ss:$8 sps:$4 sm:$0xff]   ;;  %v8697_v56 = vld [vmem:[%s11144_s23 + $0x24] ss:$8 sps:$4 sm:$0xff]   ;;  %v8695_v57 = vld [vmem:[%s11144_s23 + $0x20] ss:$8 sps:$4 sm:$0xff]  }
 0x776   :  { %v7815_v61 = vpop.f32.mrf.mxu1  ;;  %v2740_v5 = vpop.f32.mrf.mxu0 }
 0x777   :  { %v2738_v53 = vadd.f32 %v7814_v58, %v2737_v55  ;;  %v8692_v55 = vld [vmem:[%s11144_s23 + $0x30] ss:$8 sps:$4 sm:$0xff]   ;;  %v8700_v58 = vld [vmem:[%s11144_s23 + $0x14] ss:$8 sps:$4 sm:$0xff]  }
 0x778   :  { %v7816_v63 = vpop.f32.mrf.mxu1 }
 0x779   :  { %v2758_v3 = vmul.f32 %v7263_v60, %v2738_v53  ;;  %v7817_v4 = vadd.f32 %v7816_v63, %v7815_v61  ;;  %v8703_v61 = vld [vmem:[%s11144_s23 + $0x4] ss:$8 sps:$4 sm:$0xff]   ;;  %v8701_v53 = vld [vmem:[%s11144_s23] ss:$8 sps:$4 sm:$0xff]   ;;  %v8704_v63 = vld [vmem:[%s11144_s23 + $0x170] ss:$8 sps:$4 sm:$0xff]  }
 0x77a   :  { %v7818_v6 = vpop.f32.mrf.mxu1 }
 0x77b   :  { %v2768_v7 = vadd.f32 %v7264_v62, %v2758_v3  ;;  %v2741_v0 = vadd.f32 %v7817_v4, %v2740_v5  ;;  %v8709_v3 = vld [vmem:[%s11144_s23 + $0xf4] ss:$8 sps:$4 sm:$0xff]   ;;  %v8707_v4 = vld [vmem:[%s11144_s23 + $0xf0] ss:$8 sps:$4 sm:$0xff]   ;;  %v8712_v5 = vld [vmem:[%s11144_s23 + $0x164] ss:$8 sps:$4 sm:$0xff]  }
 0x77c   :  { %v7819_v8 = vpop.f32.mrf.mxu1 }
 0x77d   :  { %v2771_v9 = vmax.f32 %v2768_v7, 0.0  ;;  %v2759_v10 = vmul.f32 %v7263_v60, %v2741_v0  ;;  %v7820_v1 = vadd.f32 %v7819_v8, %v7818_v6  ;;  %v8710_v6 = vld [vmem:[%s11144_s23 + $0x160] ss:$8 sps:$4 sm:$0xff]   ;;  %v8715_v7 = vld [vmem:[%s11144_s23 + $0xe4] ss:$8 sps:$4 sm:$0xff]  }
 0x77e   :  { %v7821_v11 = vpop.f32.mrf.mxu1  ;;  %v8713_v0 = vld [vmem:[%s11144_s23 + $0xe0] ss:$8 sps:$4 sm:$0xff]   ;;  %v8718_v8 = vld [vmem:[%s11144_s23 + $0x154] ss:$8 sps:$4 sm:$0xff]  }
 0x77f   :  { %v2774_v12 = vsel %vm10593_vm12, %v2771_v9, 0.0  ;;  %v2769_v13 = vadd.f32 %v7264_v62, %v2759_v10  ;;  %v2746_v14 = vadd.f32 %v8196_v52, %v7820_v1  ;;  %v8689_v52 = vld [vmem:[%s11144_s23 + $0x40] ss:$8 sps:$4 sm:$0xff]   ;;  %v8716_v9 = vld [vmem:[%s11144_s23 + $0x150] ss:$8 sps:$4 sm:$0xff]  }
 0x780   :  { %2777 = vst [vmem:[#allocation4 + $0x1] sm:$0xff] %v2774_v12  ;;  %v7822_v15 = vpop.f32.mrf.mxu1  ;;  %v8721_v10 = vld [vmem:[%s11144_s23 + $0xd4] ss:$8 sps:$4 sm:$0xff]   ;;  %v8719_v1 = vld [vmem:[%s11144_s23 + $0xd0] ss:$8 sps:$4 sm:$0xff]  }
 0x781   :  { %v2772_v16 = vmax.f32 %v2769_v13, 0.0  ;;  %v2760_v2 = vmul.f32 %v7263_v60, %v2746_v14  ;;  %v8698_v60 = vld [vmem:[%s11144_s23 + $0x10] ss:$8 sps:$4 sm:$0xff]   ;;  %v8724_v11 = vld [vmem:[%s11144_s23 + $0x144] ss:$8 sps:$4 sm:$0xff]  }
 0x782   :  { %v8722_v12 = vld [vmem:[%s11144_s23 + $0x140] ss:$8 sps:$4 sm:$0xff]   ;;  %v8727_v13 = vld [vmem:[%s11144_s23 + $0xc4] ss:$8 sps:$4 sm:$0xff]   ;;  %v8730_v15 = vld [vmem:[%s11144_s23 + $0x134] ss:$8 sps:$4 sm:$0xff]  }
 0x783   :  { %v2775_v17 = vsel %vm10601_vm14, %v2772_v16, 0.0  ;;  %v2770_v18 = vadd.f32 %v7264_v62, %v2760_v2  ;;  %v8706_v62 = vld [vmem:[%s11144_s23 + $0x174] ss:$8 sps:$4 sm:$0xff]   ;;  %v8725_v14 = vld [vmem:[%s11144_s23 + $0xc0] ss:$8 sps:$4 sm:$0xff]  }
 0x784   :  { %2778 = vst [vmem:[#allocation4 + $0x9] sm:$0xff] %v2775_v17  ;;  %3497 = vmatprep.subr.bf16.mxu0 %v8706_v62  ;;  %v8728_v16 = vld [vmem:[%s11144_s23 + $0x130] ss:$8 sps:$4 sm:$0xff]   ;;  %v8733_v2 = vld [vmem:[%s11144_s23 + $0xb4] ss:$8 sps:$4 sm:$0xff]  }
 0x785   :  { %v2773_v20 = vmax.f32 %v2770_v18, 0.0  ;;  %v8731_v17 = vld [vmem:[%s11144_s23 + $0xb0] ss:$8 sps:$4 sm:$0xff]   ;;  %v8734_v18 = vld [vmem:[%s11144_s23 + $0x120] ss:$8 sps:$4 sm:$0xff]  }
 0x787   :  { %v2776_v21 = vsel %vm10607_vm15, %v2773_v20, 0.0  ;;  %v2780_v25 = vld [vmem:[#allocation4] sm:$0xff] }
 0x788   :  { %2779 = vst [vmem:[#allocation4 + $0x11] sm:$0x3] %v2776_v21  ;;  %v8736_v20 = vld [vmem:[%s11144_s23 + $0x124] ss:$8 sps:$4 sm:$0xff]  }
 0x789   :  { %v8739_v21 = vld [vmem:[%s11144_s23 + $0xa4] ss:$8 sps:$4 sm:$0xff]  }
 0x78b   :  { %v2781_v26 = vld [vmem:[#allocation4 + $0x8] sm:$0xff] }
 0x78c   :  { %v2783_v27 = vpack.c.bf16 %v2781_v26, %v2780_v25  ;;  %v8737_v25 = vld [vmem:[%s11144_s23 + $0xa0] ss:$8 sps:$4 sm:$0xff]   ;;  %v8742_v26 = vld [vmem:[%s11144_s23 + $0x114] ss:$8 sps:$4 sm:$0xff]  }
 0x78e   :  { %v2788_v28 = vshll.u32 %v2783_v27, 16  ;;  %v2804_v32 = vrot.slane %v2783_v27, 1  ;;  %v2786_v35 = vshrl.u32 %v2783_v27, 16 }
 0x78f   :  { %v2782_v29 = vld [vmem:[#allocation4 + $0x10] sm:$0xf] }
 0x790   :  { %v2784_v30 = vpack.c.bf16 %v2782_v29, %v2782_v29  ;;  %v2790_v31 = vrot.slane %v2788_v28, 1  ;;  %v8745_v28 = vld [vmem:[%s11144_s23 + $0x94] ss:$8 sps:$4 sm:$0xff]   ;;  %v8748_v29 = vld [vmem:[%s11144_s23 + $0x104] ss:$8 sps:$4 sm:$0xff]  }
 0x792   :  { %v2805_v34 = vrot.slane %v2784_v30, 1  ;;  %v2793_v36 = vshll.u32 %v2784_v30, 16  ;;  %v2791_v38 = vor.u32 %v2790_v31, %v2786_v35  ;;  %v2797_v41 = vshrl.u32 %v2784_v30, 16  ;;  %v8743_v31 = vld [vmem:[%s11144_s23 + $0x90] ss:$8 sps:$4 sm:$0xff]  }
 0x793   :  { %v8749_v35 = vld [vmem:[%s11144_s23 + $0x80] ss:$8 sps:$4 sm:$0xff]  }
 0x794   :  { %v2806_v37 = vsel %vm807_vm1, %v2804_v32, %v2805_v34  ;;  %v2795_v39 = vrot.slane %v2793_v36, 1  ;;  %v8746_v32 = vld [vmem:[%s11144_s23 + $0x100] ss:$8 sps:$4 sm:$0xff]  }
 0x795   :  { %8214 = vmatprep.mubr.bf16.mxu0 %v2806_v37  ;;  %v8752_v36 = vld [vmem:[#allocation35 + $0x78] sm:$0xff]  }
 0x796   :  { %8215 = vmatmul.mubr.bf16.vlgmr.msra.gmra.mxu0 %v2805_v34  ;;  %v2796_v44 = vsel %vm777_vm0, %v2791_v38, %v2795_v39  ;;  %v2799_v45 = vor.u32 %v2797_v41, %v2795_v39  ;;  %v8751_v34 = vld [vmem:[%s11144_s23 + $0x84] ss:$8 sps:$4 sm:$0xff]  }
 0x797   :  { %3033 = vmatprep.mubr.bf16.mxu1 %v2796_v44  ;;  %3498 = vmatpush1.bf16.msra.mxu0 %v8704_v63  ;;  %v8754_v37 = vld [vmem:[#allocation37 + $0x78] sm:$0xff]  }
 0x798   :  { %3034 = vmatmul.mubr.bf16.vlgmr.msra.gmra.mxu1 %v2783_v27  ;;  %3499 = vmatprep.subr.bf16.mxu0 %v8712_v5  ;;  %v8740_v27 = vld [vmem:[%s11144_s23 + $0x110] ss:$8 sps:$4 sm:$0xff]  }
 0x799   :  { %3041 = vmatprep.mubr.bf16.mxu1 %v2799_v45  ;;  %3447 = vmatpush1.bf16.msra.mxu1 %v8680_v42 }
 0x79a   :  { %3448 = vmatprep.subr.bf16.mxu1 %v8685_v46  ;;  %v7289_v46 = vld [vmem:[#allocation28] ss:$0 sm:$0xff] }
 0x79b   :  { %3500 = vmatpush1.bf16.msra.mxu0 %v8710_v6 }
 0x79c   :  { %3501 = vmatprep.subr.bf16.mxu0 %v8718_v8 }
 0x79d   :  { %3449 = vmatpush1.bf16.msra.mxu1 %v8683_v47 }
 0x79e   :  { %3450 = vmatprep.subr.bf16.mxu1 %v8688_v48 }
 0x79f   :  { %3502 = vmatpush1.bf16.msra.mxu0 %v8716_v9 }
 0x7a0   :  { %3042 = vmatmul.mubr.bf16.gmra.mxu1 %v2784_v30  ;;  %3503 = vmatprep.subr.bf16.mxu0 %v8724_v11  ;;  %v10049_v30 = vmov 0  }
 0x7a1   :  { %3451 = vmatpush1.bf16.msra.mxu1 %v8686_v49  ;;  %3529 = vmatprep.mubr.bf16.mxu0 %v10049_v30  ;;  %v7290_v49 = vld [vmem:[#allocation29] ss:$0 sm:$0xff] }
 0x7a2   :  { %3452 = vmatprep.subr.bf16.mxu1 %v8691_v51 }
 0x7a3   :  { %3504 = vmatpush1.bf16.msra.mxu0 %v8722_v12 }
 0x7a4   :  { %3505 = vmatprep.subr.bf16.mxu0 %v8730_v15 }
 0x7a5   :  { %3453 = vmatpush1.bf16.msra.mxu1 %v8689_v52 }
 0x7a6   :  { %3454 = vmatprep.subr.bf16.mxu1 %v8694_v54 }
 0x7a7   :  { %3506 = vmatpush1.bf16.msra.mxu0 %v8728_v16 }
 0x7a8   :  { %3507 = vmatprep.subr.bf16.mxu0 %v8736_v20  ;;  %v8756_v20 = vld [vmem:[#allocation35 + $0x70] sm:$0xff]  }
 0x7a9   :  { %3455 = vmatpush1.bf16.msra.mxu1 %v8692_v55 }
 0x7aa   :  { %3456 = vmatprep.subr.bf16.mxu1 %v8697_v56 }
 0x7ab   :  { %3508 = vmatpush1.bf16.msra.mxu0 %v8734_v18 }
 0x7ac   :  { %3509 = vmatprep.subr.bf16.mxu0 %v8742_v26 }
 0x7ad   :  { %3457 = vmatpush1.bf16.msra.mxu1 %v8695_v57 }
 0x7ae   :  { %3458 = vmatprep.subr.bf16.mxu1 %v8700_v58 }
 0x7af   :  { %3510 = vmatpush1.bf16.msra.mxu0 %v8740_v27  ;;  %v8755_v27 = vld [vmem:[#allocation37 + $0x38] sm:$0xff]  }
 0x7b0   :  { %3511 = vmatprep.subr.bf16.mxu0 %v8748_v29 }
 0x7b1   :  { %3459 = vmatpush1.bf16.msra.mxu1 %v8698_v60 }
 0x7b2   :  { %3460 = vmatprep.subr.bf16.mxu1 %v8703_v61 }
 0x7b3   :  { %3512 = vmatpush1.bf16.msra.mxu0 %v8746_v32  ;;  %v8758_v32 = vld [vmem:[#allocation37 + $0x70] sm:$0xff]  }
 0x7b4   :  { %7872 = vmatprep.subr.bf16.mxu0 %v8752_v36  ;;  %v8761_v36 = vld [vmem:[#allocation35 + $0x28] sm:$0xff]  }
 0x7b5   :  { %3461 = vmatpush1.bf16.msra.mxu1 %v8701_v53 }
 0x7b6   :  { %3462 = vmatprep.subr.bf16.mxu1 %v8709_v3 }
 0x7b9   :  { %3463 = vmatpush2.bf16.msra.mxu1 %v8707_v4 }
 0x7ba   :  { %3464 = vmatprep.subr.bf16.mxu1 %v8715_v7 }
 0x7bd   :  { %3465 = vmatpush2.bf16.msra.mxu1 %v8713_v0 }
 0x7be   :  { %3466 = vmatprep.subr.bf16.mxu1 %v8721_v10  ;;  %v3119_v10 = vld [vmem:[#allocation3 + $0x11] sm:$0x3] }
 0x7c1   :  { %3467 = vmatpush2.bf16.msra.mxu1 %v8719_v1 }
 0x7c2   :  { %3468 = vmatprep.subr.bf16.mxu1 %v8727_v13 }
 0x7c5   :  { %3469 = vmatpush2.bf16.msra.mxu1 %v8725_v14 }
 0x7c6   :  { %3470 = vmatprep.subr.bf16.mxu1 %v8733_v2 }
 0x7c9   :  { %3471 = vmatpush2.bf16.msra.mxu1 %v8731_v17 }
 0x7ca   :  { %3472 = vmatprep.subr.bf16.mxu1 %v8739_v21 }
 0x7cd   :  { %3473 = vmatpush2.bf16.msra.mxu1 %v8737_v25 }
 0x7ce   :  { %3474 = vmatprep.subr.bf16.mxu1 %v8745_v28 }
 0x7d1   :  { %3475 = vmatpush2.bf16.msra.mxu1 %v8743_v31  ;;  %v8757_v31 = vld [vmem:[#allocation35 + $0x30] sm:$0xff]  }
 0x7d2   :  { %3476 = vmatprep.subr.bf16.mxu1 %v8751_v34  ;;  %v8760_v34 = vld [vmem:[#allocation35 + $0x68] sm:$0xff]  }
 0x7d5   :  { %3477 = vmatpush2.bf16.msra.mxu1 %v8749_v35  ;;  %v8759_v35 = vld [vmem:[#allocation37 + $0x30] sm:$0xff]  }
 0x7d6   :  { %7900 = vmatprep.subr.bf16.mxu1 %v8754_v37  ;;  %v8762_v37 = vld [vmem:[#allocation37 + $0x68] sm:$0xff]  }
 0x856   :  { %v8216_v38 = vpop.f32.mrf.mxu0 }
 0x858   :  { %v7850_v39 = vpop.f32.mrf.mxu1  ;;  %v3083_v41 = vpop.f32.mrf.mxu0 }
 0x85a   :  { %v7851_v42 = vpop.f32.mrf.mxu1  ;;  %v8217_v44 = vpop.f32.mrf.mxu0 }
 0x85b   :  { %v7852_v45 = vadd.f32 %v7851_v42, %v7850_v39  ;;  %v8763_v39 = vld [vmem:[#allocation37 + $0x28] sm:$0xff]   ;;  %v8766_v42 = vld [vmem:[#allocation37 + $0x60] sm:$0xff]  }
 0x85c   :  { %v7853_v47 = vpop.f32.mrf.mxu1  ;;  %v3086_v55 = vpop.f32.mrf.mxu0  ;;  %v8767_v44 = vld [vmem:[#allocation37 + $0x20] sm:$0xff]  }
 0x85d   :  { %v3084_v48 = vadd.f32 %v7852_v45, %v3083_v41  ;;  %v8765_v41 = vld [vmem:[#allocation35 + $0x20] sm:$0xff]   ;;  %v8768_v45 = vld [vmem:[#allocation35 + $0x58] sm:$0xff]  }
 0x85e   :  { %v7854_v51 = vpop.f32.mrf.mxu1 }
 0x85f   :  { %v3104_v52 = vmul.f32 %v7289_v46, %v3084_v48  ;;  %v7855_v54 = vadd.f32 %v7854_v51, %v7853_v47  ;;  %v8770_v47 = vld [vmem:[#allocation37 + $0x58] sm:$0xff]   ;;  %v8773_v51 = vld [vmem:[#allocation35 + $0x10] sm:$0xff]  }
 0x860   :  { %v7856_v56 = vpop.f32.mrf.mxu1  ;;  %v8771_v48 = vld [vmem:[#allocation37 + $0x18] sm:$0xff]  }
 0x861   :  { %v3114_v57 = vadd.f32 %v7290_v49, %v3104_v52  ;;  %v3087_v58 = vadd.f32 %v7855_v54, %v3086_v55  ;;  %v8774_v52 = vld [vmem:[#allocation37 + $0x50] sm:$0xff]   ;;  %v8776_v55 = vld [vmem:[#allocation35 + $0x48] sm:$0xff]  }
 0x862   :  { %v7857_v60 = vpop.f32.mrf.mxu1  ;;  %v8775_v54 = vld [vmem:[#allocation37 + $0x10] sm:$0xff]  }
 0x863   :  { %v3120_v61 = vsel %vm10593_vm12, %v3114_v57, 0.0  ;;  %v3105_v53 = vmul.f32 %v7289_v46, %v3087_v58  ;;  %v7858_v62 = vadd.f32 %v7857_v60, %v7856_v56  ;;  %v8777_v56 = vld [vmem:[#allocation35 + $0x8] sm:$0xff]   ;;  %v8780_v60 = vld [vmem:[#allocation35 + $0x40] sm:$0xff]   ;;  %vm6076_vm12 = vcmask 517120  }
 0x864   :  { %v3123_v63 = vadd.f32 %v3120_v61, %v10642_v50  ;;  %v7859_v3 = vpop.f32.mrf.mxu1  ;;  %v8778_v57 = vld [vmem:[#allocation37 + $0x48] sm:$0xff]   ;;  %v8781_v61 = vld [vmem:[#allocation35] sm:$0xff]  }
 0x865   :  { %v3115_v4 = vadd.f32 %v7290_v49, %v3105_v53  ;;  %v3092_v5 = vadd.f32 %v8216_v38, %v7858_v62  ;;  %v8764_v38 = vld [vmem:[#allocation35 + $0x60] sm:$0xff]   ;;  %v8779_v58 = vld [vmem:[#allocation37 + $0x8] sm:$0xff]  }
 0x866   :  { %3126 = vst [vmem:[#allocation3 + $0x1] sm:$0xff] %v3123_v63  ;;  %v7860_v6 = vpop.f32.mrf.mxu1  ;;  %v8782_v53 = vld [vmem:[#allocation37 + $0x40] sm:$0xff]   ;;  %v8784_v63 = vld [vmem:[#allocation34 + $0x78] sm:$0xff]  }
 0x867   :  { %v3121_v7 = vsel %vm10601_vm14, %v3115_v4, 0.0  ;;  %v3106_v0 = vmul.f32 %v7289_v46, %v3092_v5  ;;  %v8769_v46 = vld [vmem:[#allocation35 + $0x18] sm:$0xff]   ;;  %v8783_v62 = vld [vmem:[#allocation37] sm:$0xff]   ;;  %vm6297_vm14 = vcmask 521216  }
 0x868   :  { %v3124_v8 = vadd.f32 %v3121_v7, %v10647_v59  ;;  %v8753_v59 = vld [vmem:[#allocation35 + $0x38] sm:$0xff]  }
 0x869   :  { %v3116_v9 = vadd.f32 %v7290_v49, %v3106_v0  ;;  %v8772_v49 = vld [vmem:[#allocation35 + $0x50] sm:$0xff]   ;;  %v3548_v6 = vld [vmem:[#allocation31] sm:$0x3] }
 0x86a   :  { %3127 = vst [vmem:[#allocation3 + $0x9] sm:$0xff] %v3124_v8 }
 0x86b   :  { %v3122_v19 = vsel %vm10607_vm15, %v3116_v9, 0.0  ;;  %v3557_v9 = vrot.slane %v3548_v6, %v10493_v23 }
 0x86c   :  { %v3125_v1 = vadd.f32 %v3122_v19, %v3119_v10 }
 0x86d   :  { %v3129_v50 = vld [vmem:[#allocation3] sm:$0xff] }
 0x86e   :  { %3128 = vst [vmem:[#allocation3 + $0x11] sm:$0x3] %v3125_v1  ;;  %v3553_v1 = vrot.slane %v3548_v6, %v10496_v24  ;;  %v8802_v6 = vld [vmem:[#allocation38 + $0xb0] sm:$0xff]  }
 0x871   :  { %v3130_v11 = vld [vmem:[#allocation3 + $0x8] sm:$0xff] }
 0x872   :  { %v3132_v12 = vpack.c.bf16 %v3130_v11, %v3129_v50  ;;  %v3566_v11 = vld [vmem:[#allocation32] sm:$0x3] }
 0x874   :  { %v3137_v13 = vshll.u32 %v3132_v12, 16  ;;  %v3153_v33 = vrot.slane %v3132_v12, 1  ;;  %v3135_v17 = vshrl.u32 %v3132_v12, 16 }
 0x875   :  { %v3131_v14 = vld [vmem:[#allocation3 + $0x10] sm:$0xf] }
 0x876   :  { %v3133_v15 = vpack.c.bf16 %v3131_v14, %v3131_v14  ;;  %v3139_v16 = vrot.slane %v3137_v13, 1 }
 0x878   :  { %v3154_v2 = vrot.slane %v3133_v15, 1  ;;  %v3142_v18 = vshll.u32 %v3133_v15, 16  ;;  %v3140_v25 = vor.u32 %v3139_v16, %v3135_v17  ;;  %v3146_v26 = vshrl.u32 %v3133_v15, 16 }
 0x879   :  { %v3575_v16 = vrot.slane %v3566_v11, %v10493_v23 }
 0x87a   :  { %v3155_v21 = vsel %vm807_vm1, %v3153_v33, %v3154_v2  ;;  %v3144_v40 = vrot.slane %v3142_v18, 1  ;;  %vm4130_vm1 = vcmask 1047556  }
 0x87b   :  { %3530 = vmatmul.mubr.bf16.vlgmr.msra.gmra.mxu0 %v3155_v21 }
 0x87c   :  { %v3145_v28 = vsel %vm777_vm0, %v3140_v25, %v3144_v40  ;;  %v3148_v29 = vor.u32 %v3146_v26, %v3144_v40  ;;  %3539 = vmatprep.mubr.bf16.mxu0 %v10049_v30  ;;  %7873 = vmatpush3.bf16.msra.mxu0 %v8753_v59  ;;  %v3571_v59 = vrot.slane %v3566_v11, %v10496_v24  ;;  %v8811_v11 = vld [vmem:[#allocation38 + $0x98] sm:$0xff]   ;;  %vm10050_vm0 = vmmov 0  }
 0x87d   :  { %3478 = vmatprep.mubr.bf16.mxu1 %v3145_v28  ;;  %7874 = vmatprep.subr.bf16.mxu0 %v8756_v20 }
 0x87e   :  { %3479 = vmatmul.mubr.bf16.vlgmr.msra.gmra.mxu1 %v3132_v12 }
 0x87f   :  { %3488 = vmatprep.mubr.bf16.mxu1 %v3148_v29  ;;  %7901 = vmatpush3.bf16.msra.mxu1 %v8755_v27 }
 0x880   :  { %7875 = vmatpush3.bf16.msra.mxu0 %v8757_v31  ;;  %7902 = vmatprep.subr.bf16.mxu1 %v8758_v32 }
 0x881   :  { %7876 = vmatprep.subr.bf16.mxu0 %v8760_v34 }
 0x883   :  { %3540 = vmatmul.mubr.bf16.gmra.mxu0 %v3154_v2  ;;  %7903 = vmatpush3.bf16.msra.mxu1 %v8759_v35 }
 0x884   :  { %7877 = vmatpush3.bf16.msra.mxu0 %v8761_v36  ;;  %7904 = vmatprep.subr.bf16.mxu1 %v8762_v37 }
 0x885   :  { %7878 = vmatprep.subr.bf16.mxu0 %v8764_v38  ;;  %v8785_v38 = vld [vmem:[#allocation34 + $0x38] sm:$0xff]  }
 0x886   :  { %3489 = vmatmul.mubr.bf16.gmra.mxu1 %v3133_v15 }
 0x887   :  { %7905 = vmatpush3.bf16.msra.mxu1 %v8763_v39 }
 0x888   :  { %7879 = vmatpush3.bf16.msra.mxu0 %v8765_v41  ;;  %7906 = vmatprep.subr.bf16.mxu1 %v8766_v42 }
 0x889   :  { %7880 = vmatprep.subr.bf16.mxu0 %v8768_v45 }
 0x88b   :  { %7907 = vmatpush3.bf16.msra.mxu1 %v8767_v44  ;;  %v8786_v44 = vld [vmem:[#allocation34 + $0x70] sm:$0xff]  }
 0x88c   :  { %7881 = vmatpush3.bf16.msra.mxu0 %v8769_v46  ;;  %7908 = vmatprep.subr.bf16.mxu1 %v8770_v47  ;;  %v8787_v47 = vld [vmem:[#allocation34 + $0x30] sm:$0xff]  }
 0x88d   :  { %7882 = vmatprep.subr.bf16.mxu0 %v8772_v49 }
 0x88f   :  { %7909 = vmatpush3.bf16.msra.mxu1 %v8771_v48  ;;  %v8788_v48 = vld [vmem:[#allocation34 + $0x68] sm:$0xff]  }
 0x890   :  { %7883 = vmatpush3.bf16.msra.mxu0 %v8773_v51  ;;  %7910 = vmatprep.subr.bf16.mxu1 %v8774_v52  ;;  %v8789_v51 = vld [vmem:[#allocation34 + $0x28] sm:$0xff]  }
 0x891   :  { %7884 = vmatprep.subr.bf16.mxu0 %v8776_v55  ;;  %v8791_v55 = vld [vmem:[#allocation34 + $0x20] sm:$0xff]  }
 0x893   :  { %7911 = vmatpush3.bf16.msra.mxu1 %v8775_v54  ;;  %v8790_v54 = vld [vmem:[#allocation34 + $0x60] sm:$0xff]  }
 0x894   :  { %7885 = vmatpush3.bf16.msra.mxu0 %v8777_v56  ;;  %7912 = vmatprep.subr.bf16.mxu1 %v8778_v57  ;;  %v8792_v56 = vld [vmem:[#allocation34 + $0x58] sm:$0xff]  }
 0x895   :  { %7886 = vmatprep.subr.bf16.mxu0 %v8780_v60  ;;  %v8793_v57 = vld [vmem:[#allocation34 + $0x18] sm:$0xff]   ;;  %v8795_v60 = vld [vmem:[#allocation34 + $0x10] sm:$0xff]  }
 0x897   :  { %7913 = vmatpush3.bf16.msra.mxu1 %v8779_v58  ;;  %v8794_v58 = vld [vmem:[#allocation34 + $0x50] sm:$0xff]  }
 0x898   :  { %7887 = vmatpush3.bf16.msra.mxu0 %v8781_v61  ;;  %7914 = vmatprep.subr.bf16.mxu1 %v8782_v53  ;;  %v8796_v61 = vld [vmem:[#allocation34 + $0x48] sm:$0xff]  }
 0x899   :  { %7928 = vmatprep.subr.bf16.mxu0 %v8784_v63  ;;  %v8797_v53 = vld [vmem:[#allocation34 + $0x8] sm:$0xff]   ;;  %v8799_v63 = vld [vmem:[#allocation34] sm:$0xff]  }
 0x89b   :  { %7915 = vmatpush3.bf16.msra.mxu1 %v8783_v62  ;;  %v8798_v62 = vld [vmem:[#allocation34 + $0x40] sm:$0xff]  }
 0x93b   :  { %v3531_v3 = vpop.f32.mrf.mxu0 }
 0x93d   :  { %v3533_v4 = vpop.f32.mrf.mxu0 }
 0x93e   :  { %v3480_v5 = vpop.f32.mrf.mxu1 }
 0x93f   :  { %v3535_v7 = vpop.f32.mrf.mxu0  ;;  %v3532_v19 = vadd.f32 %v3531_v3, %v3480_v5  ;;  %v10750_v3 = vld [vmem:[#allocation6] sm:$0xff]  ;;  %v8801_v5 = vld [vmem:[#allocation38 + $0x78] sm:$0xff]  }
 0x940   :  { %v3482_v0 = vpop.f32.mrf.mxu1  ;;  %7956 = vmatprep.subr.bf16.mxu1 %v8801_v5 }
 0x941   :  { %v3534_v8 = vadd.f32 %v3533_v4, %v3482_v0  ;;  %v3537_v10 = vpop.f32.mrf.mxu0  ;;  %v3560_v18 = vmul.f32 %v3553_v1, %v3532_v19  ;;  %v8800_v4 = vld [vmem:[#allocation38 + $0xb8] sm:$0xff]   ;;  %v8804_v0 = vld [vmem:[#allocation38 + $0x70] sm:$0xff]   ;;  %v8808_v19 = vld [vmem:[#allocation38 + $0xa0] sm:$0xff]  }
 0x942   :  { %v3484_v50 = vpop.f32.mrf.mxu1 }
 0x943   :  { %v3536_v12 = vadd.f32 %v3535_v7, %v3484_v50  ;;  %v3541_v13 = vpop.f32.mrf.mxu0  ;;  %v3561_v15 = vmul.f32 %v3557_v9, %v3534_v8  ;;  %v3578_v34 = vadd.f32 %v3571_v59, %v3560_v18  ;;  %v8803_v7 = vld [vmem:[#allocation38 + $0x38] sm:$0xff]   ;;  %v8805_v8 = vld [vmem:[#allocation38 + $0xa8] sm:$0xff]   ;;  %v8810_v50 = vld [vmem:[#allocation38 + $0x60] sm:$0xff]  }
 0x944   :  { %v3486_v14 = vpop.f32.mrf.mxu1  ;;  %v8820_v18 = vld [vmem:[#allocation38 + $0x80] sm:$0xff]  }
 0x945   :  { %v3562_v33 = vmul.f32 %v3553_v1, %v3536_v12  ;;  %v3538_v2 = vadd.f32 %v3537_v10, %v3486_v14  ;;  %v3543_v17 = vpop.f32.mrf.mxu0  ;;  %v3579_v28 = vadd.f32 %v3575_v16, %v3561_v15  ;;  %v8807_v10 = vld [vmem:[#allocation38 + $0x68] sm:$0xff]   ;;  %v8812_v12 = vld [vmem:[#allocation38 + $0x20] sm:$0xff]   ;;  %v8814_v14 = vld [vmem:[#allocation38 + $0x90] sm:$0xff]  }
 0x946   :  { %v3490_v20 = vpop.f32.mrf.mxu1  ;;  %v8815_v15 = vld [vmem:[#allocation38 + $0x18] sm:$0xff]  }
 0x947   :  { %v3563_v21 = vmul.f32 %v3557_v9, %v3538_v2  ;;  %v3545_v25 = vpop.f32.mrf.mxu0  ;;  %v3580_v40 = vadd.f32 %v3571_v59, %v3562_v33  ;;  %v3542_v26 = vadd.f32 %v3541_v13, %v3490_v20  ;;  %v8813_v13 = vld [vmem:[#allocation38 + $0x58] sm:$0xff]   ;;  %v8817_v33 = vld [vmem:[#allocation38 + $0x88] sm:$0xff]   ;;  %v8818_v2 = vld [vmem:[#allocation38 + $0x10] sm:$0xff]  }
 0x948   :  { %v3492_v27 = vpop.f32.mrf.mxu1  ;;  %v8822_v20 = vld [vmem:[#allocation38 + $0x40] sm:$0xff]  }
 0x949   :  { %v3581_v29 = vadd.f32 %v3575_v16, %v3563_v21  ;;  %v3544_v31 = vadd.f32 %v3543_v17, %v3492_v27  ;;  %v3546_v32 = vpop.f32.mrf.mxu0  ;;  %v3584_v39 = vpack.c.bf16 %v3580_v40, %v3578_v34  ;;  %v3564_v41 = vmul.f32 %v3553_v1, %v3542_v26  ;;  %v8809_v1 = vld [vmem:[#allocation38 + $0x28] sm:$0xff]   ;;  %v8823_v21 = vld [vmem:[#allocation38] sm:$0xff]  }
 0x94a   :  { %v3494_v35 = vpop.f32.mrf.mxu1  ;;  %v8819_v17 = vld [vmem:[#allocation38 + $0x48] sm:$0xff]  }
 0x94b   :  { %v3565_v36 = vmul.f32 %v3557_v9, %v3544_v31  ;;  %v3585_v37 = vpack.c.bf16 %v3581_v29, %v3579_v28  ;;  %v3582_v49 = vadd.f32 %v3571_v59, %v3564_v41  ;;  %v8806_v9 = vld [vmem:[#allocation38 + $0x30] sm:$0xff]   ;;  %v8821_v59 = vld [vmem:[#allocation38 + $0x8] sm:$0xff]  }
 0x94c   :  { %v3495_v42 = vpop.f32.mrf.mxu1 }
 0x94d   :  { %3748 = vmatprep.mubr.bf16.mxu0 %v3585_v37  ;;  %3924 = vmatprep.mubr.bf16.mxu1 %v3585_v37  ;;  %v3583_v45 = vadd.f32 %v3575_v16, %v3565_v36  ;;  %v3586_v52 = vpack.c.bf16 %v3582_v49, %v3582_v49  ;;  %v8816_v16 = vld [vmem:[#allocation38 + $0x50] sm:$0xff]  }
 0x94e   :  { %3749 = vmatmul.mubr.bf16.vlgmr.msra.gmra.mxu0 %v3584_v39  ;;  %3925 = vmatmul.mubr.bf16.vlgmr.msra.gmra.mxu1 %v3584_v39 }
 0x94f   :  { %7929 = vmatpush3.bf16.msra.mxu0 %v8785_v38  ;;  %v3587_v46 = vpack.c.bf16 %v3583_v45, %v3583_v45  ;;  %7957 = vmatpush3.bf16.msra.mxu1 %v8803_v7 }
 0x950   :  { %7930 = vmatprep.subr.bf16.mxu0 %v8786_v44  ;;  %7958 = vmatprep.subr.bf16.mxu1 %v8804_v0 }
 0x951   :  { %3756 = vmatprep.mubr.bf16.mxu0 %v3587_v46  ;;  %3932 = vmatprep.mubr.bf16.mxu1 %v3587_v46 }
 0x953   :  { %7931 = vmatpush3.bf16.msra.mxu0 %v8787_v47  ;;  %7959 = vmatpush3.bf16.msra.mxu1 %v8806_v9 }
 0x954   :  { %7932 = vmatprep.subr.bf16.mxu0 %v8788_v48  ;;  %7960 = vmatprep.subr.bf16.mxu1 %v8807_v10 }
 0x956   :  { %3757 = vmatmul.mubr.bf16.gmra.mxu0 %v3586_v52  ;;  %3933 = vmatmul.mubr.bf16.gmra.mxu1 %v3586_v52 }
 0x957   :  { %7933 = vmatpush3.bf16.msra.mxu0 %v8789_v51  ;;  %4103 = vmatprep.mubr.bf16.mxu0 %v3585_v37 }
 0x958   :  { %7934 = vmatprep.subr.bf16.mxu0 %v8790_v54  ;;  %7961 = vmatpush3.bf16.msra.mxu1 %v8809_v1 }
 0x959   :  { %7962 = vmatprep.subr.bf16.mxu1 %v8810_v50 }
 0x95b   :  { %7935 = vmatpush3.bf16.msra.mxu0 %v8791_v55 }
 0x95c   :  { %7936 = vmatprep.subr.bf16.mxu0 %v8792_v56  ;;  %7963 = vmatpush3.bf16.msra.mxu1 %v8812_v12 }
 0x95d   :  { %7964 = vmatprep.subr.bf16.mxu1 %v8813_v13 }
 0x95f   :  { %7937 = vmatpush3.bf16.msra.mxu0 %v8793_v57 }
 0x960   :  { %7938 = vmatprep.subr.bf16.mxu0 %v8794_v58  ;;  %7965 = vmatpush3.bf16.msra.mxu1 %v8815_v15 }
 0x961   :  { %7966 = vmatprep.subr.bf16.mxu1 %v8816_v16 }
 0x963   :  { %7939 = vmatpush3.bf16.msra.mxu0 %v8795_v60 }
 0x964   :  { %7940 = vmatprep.subr.bf16.mxu0 %v8796_v61  ;;  %7967 = vmatpush3.bf16.msra.mxu1 %v8818_v2 }
 0x965   :  { %7968 = vmatprep.subr.bf16.mxu1 %v8819_v17 }
 0x967   :  { %7941 = vmatpush3.bf16.msra.mxu0 %v8797_v53 }
 0x968   :  { %7942 = vmatprep.subr.bf16.mxu0 %v8798_v62  ;;  %7969 = vmatpush3.bf16.msra.mxu1 %v8821_v59 }
 0x969   :  { %7970 = vmatprep.subr.bf16.mxu1 %v8822_v20 }
 0x96b   :  { %7943 = vmatpush3.bf16.msra.mxu0 %v8799_v63 }
 0x96c   :  { %8218 = vmatprep.subr.bf16.mxu0 %v10750_v3  ;;  %7971 = vmatpush3.bf16.msra.mxu1 %v8823_v21 }
 0x96e   :  { %4104 = vmatmul.mubr.bf16.vlgmr.msra.gmra.mxu0 %v3584_v39 }
 0x96f   :  { %4111 = vmatprep.mubr.bf16.mxu0 %v3587_v46  ;;  %8219 = vmatpush3.bf16.msra.mxu0 %v8800_v4 }
 0x970   :  { %8220 = vmatprep.subr.bf16.mxu0 %v10750_v3 }
 0x973   :  { %8221 = vmatpush3.bf16.msra.mxu0 %v8802_v6 }
 0x974   :  { %8222 = vmatprep.subr.bf16.mxu0 %v10750_v3 }
 0x976   :  { %4112 = vmatmul.mubr.bf16.gmra.mxu0 %v3586_v52 }
 0x977   :  { %8223 = vmatpush3.bf16.msra.mxu0 %v8805_v8  ;;  %8234 = vmatprep.mubr.msk.bf16.mxu0 %vm10050_vm0, %v10750_v3 }
 0x978   :  { %8224 = vmatprep.subr.bf16.mxu0 %v10750_v3 }
 0x97b   :  { %8225 = vmatpush3.bf16.msra.mxu0 %v8808_v19 }
 0x97c   :  { %8226 = vmatprep.subr.bf16.mxu0 %v10750_v3 }
 0x97f   :  { %8227 = vmatpush3.bf16.msra.mxu0 %v8811_v11 }
 0x980   :  { %8228 = vmatprep.subr.bf16.mxu0 %v10750_v3 }
 0x983   :  { %8229 = vmatpush3.bf16.msra.mxu0 %v8814_v14 }
 0x984   :  { %8230 = vmatprep.subr.bf16.mxu0 %v10750_v3 }
 0x987   :  { %8231 = vmatpush3.bf16.msra.mxu0 %v8817_v33 }
 0x988   :  { %8232 = vmatprep.subr.bf16.mxu0 %v10750_v3 }
 0x98b   :  { %8233 = vmatpush3.bf16.msra.mxu0 %v8820_v18 }
 0x98c   :  { %8238 = vmatprep.subr.bf16.mxu0 %v10750_v3 }
 0xa0e   :  { %v7888_v25 = vpop.f32.mrf.mxu0  ;;  %v7916_v40 = vpop.f32.mrf.mxu1 }
 0xa10   :  { %v7889_v26 = vpop.f32.mrf.mxu0  ;;  %v7917_v27 = vpop.f32.mrf.mxu1 }
 0xa11   :  { %v7890_v44 = vadd.f32 %v7889_v26, %v7888_v25  ;;  %v7918_v45 = vadd.f32 %v7917_v27, %v7916_v40 }
 0xa12   :  { %v7891_v28 = vpop.f32.mrf.mxu0  ;;  %v7919_v29 = vpop.f32.mrf.mxu1 }
 0xa13   :  { %v3940_v48 = vmax.f32 %v7890_v44, %v7918_v45  ;;  %v8829_v44 = vld [vmem:[#allocation43 + $0xa8] sm:$0xff]   ;;  %v8830_v45 = vld [vmem:[#allocation43 + $0x30] sm:$0xff]  }
 0xa14   :  { %v7892_v31 = vpop.f32.mrf.mxu0  ;;  %v7920_v32 = vpop.f32.mrf.mxu1 }
 0xa15   :  { %v7893_v49 = vadd.f32 %v7892_v31, %v7891_v28  ;;  %v7921_v51 = vadd.f32 %v7920_v32, %v7919_v29 }
 0xa16   :  { %v7894_v34 = vpop.f32.mrf.mxu0  ;;  %v7922_v35 = vpop.f32.mrf.mxu1 }
 0xa17   :  { %v3941_v57 = vmax.f32 %v7893_v49, %v7921_v51  ;;  %v8834_v49 = vld [vmem:[#allocation43 + $0x60] sm:$0xff]   ;;  %v8835_v51 = vld [vmem:[#allocation43 + $0x98] sm:$0xff]  }
 0xa18   :  { %v7895_v36 = vpop.f32.mrf.mxu0  ;;  %v7923_v37 = vpop.f32.mrf.mxu1 }
 0xa19   :  { %v7896_v58 = vadd.f32 %v7895_v36, %v7894_v34  ;;  %v7924_v60 = vadd.f32 %v7923_v37, %v7922_v35  ;;  %v8824_v37 = vld [vmem:[#allocation43 + $0xb8] sm:$0xff]  }
 0xa1a   :  { %v7897_v38 = vpop.f32.mrf.mxu0  ;;  %v7925_v39 = vpop.f32.mrf.mxu1 }
 0xa1b   :  { %v3942_v4 = vmax.f32 %v7896_v58, %v7924_v60  ;;  %v8825_v38 = vld [vmem:[#allocation43 + $0x78] sm:$0xff]   ;;  %v8826_v39 = vld [vmem:[#allocation43 + $0xb0] sm:$0xff]   ;;  %v8841_v58 = vld [vmem:[#allocation43 + $0x88] sm:$0xff]  }
 0xa1c   :  { %v7898_v41 = vpop.f32.mrf.mxu0  ;;  %v7926_v42 = vpop.f32.mrf.mxu1  ;;  %7987 = vmatprep.subr.bf16.mxu1 %v8825_v38  ;;  %v8842_v60 = vld [vmem:[#allocation43 + $0x10] sm:$0xff]  }
 0xa1d   :  { %v8827_v41 = vld [vmem:[#allocation43 + $0x38] sm:$0xff]   ;;  %v8828_v42 = vld [vmem:[#allocation43 + $0x70] sm:$0xff]  }
 0xa2e   :  { %v7944_v46 = vpop.f32.mrf.mxu0 }
 0xa30   :  { %v7945_v47 = vpop.f32.mrf.mxu0 }
 0xa31   :  { %v7946_v52 = vadd.f32 %v7945_v47, %v7944_v46  ;;  %v8831_v46 = vld [vmem:[#allocation43 + $0x68] sm:$0xff]   ;;  %v8832_v47 = vld [vmem:[#allocation43 + $0xa0] sm:$0xff]  }
 0xa32   :  { %v7947_v54 = vpop.f32.mrf.mxu0 }
 0xa33   :  { %v4119_v55 = vmax.f32 %v3940_v48, %v7946_v52  ;;  %v8833_v48 = vld [vmem:[#allocation43 + $0x28] sm:$0xff]   ;;  %v8836_v52 = vld [vmem:[#allocation43 + $0x20] sm:$0xff]  }
 0xa34   :  { %v7948_v56 = vpop.f32.mrf.mxu0 }
 0xa35   :  { %4122 = vst [vmem:[#allocation5] sm:$0xff] %v4119_v55  ;;  %v7949_v61 = vadd.f32 %v7948_v56, %v7947_v54  ;;  %v8837_v54 = vld [vmem:[#allocation43 + $0x58] sm:$0xff]   ;;  %v8838_v55 = vld [vmem:[#allocation43 + $0x90] sm:$0xff]  }
 0xa36   :  { %v7950_v53 = vpop.f32.mrf.mxu0  ;;  %v8839_v56 = vld [vmem:[#allocation43 + $0x18] sm:$0xff]  }
 0xa37   :  { %v4120_v62 = vmax.f32 %v3941_v57, %v7949_v61  ;;  %v8840_v57 = vld [vmem:[#allocation43 + $0x50] sm:$0xff]   ;;  %v8843_v61 = vld [vmem:[#allocation43 + $0x48] sm:$0xff]  }
 0xa38   :  { %v7951_v63 = vpop.f32.mrf.mxu0 }
 0xa39   :  { %4123 = vst [vmem:[#allocation5 + $0x8] sm:$0xff] %v4120_v62  ;;  %v7952_v5 = vadd.f32 %v7951_v63, %v7950_v53  ;;  %v8844_v53 = vld [vmem:[#allocation43 + $0x80] sm:$0xff]   ;;  %v8845_v62 = vld [vmem:[#allocation43 + $0x8] sm:$0xff]  }
 0xa3a   :  { %v7953_v6 = vpop.f32.mrf.mxu0  ;;  %v8846_v63 = vld [vmem:[#allocation43 + $0x40] sm:$0xff]  }
 0xa3b   :  { %v4121_v7 = vmax.f32 %v3942_v4, %v7952_v5  ;;  %v8847_v4 = vld [vmem:[#allocation43] sm:$0xff]   ;;  %v10782_v5 = vmul.u32.u64.low 2863311531, %v10490_v22  ;;  %v10783_v6 = vmul.u32.u64.high 2863311531, %v10490_v22, %v10782_v5 }
 0xa3c   :  { %v4129_v0 = vld [vmem:[#allocation5 + $0x1] ss:$2 sm:$0xf]  ;;  %v7954_v8 = vpop.f32.mrf.mxu0  ;;  %v4127_v1 = vld [vmem:[#allocation5] ss:$2 sm:$0xf] }
 0xa3d   :  { %v4131_v9 = vrot.slane %v4129_v0, 4  ;;  %4124 = vst [vmem:[#allocation5 + $0x10] sm:$0x3] %v4121_v7  ;;  %v4139_v12 = vmax.f32 %v4127_v1, %v4129_v0  ;;  %v4165_v8 = vshrl.u32 %v10783_v6, 2  ;;  %v8861_v5 = vld [vmem:[#allocation47 + $0x58] sm:$0xff]   ;;  %v8862_v6 = vld [vmem:[#allocation47 + $0x90] sm:$0xff]  }
 0xa3f   :  { %v4132_v10 = vsel %vm4130_vm1, %v4131_v9, %v4129_v0  ;;  %v4166_v9 = vmul.u32 6, %v4165_v8  ;;  %v8865_v8 = vld [vmem:[#allocation47 + $0x88] sm:$0xff]  }
 0xa40   :  { %v4133_v19 = vrot.slane %v4132_v10, 4 }
 0xa42   :  { %v4134_v50 = vsel %vm4130_vm1, %v4133_v19, %v4129_v0 }
 0xa43   :  { %v4136_v11 = vrot.slane %v4134_v50, 3  ;;  %v4167_v50 = vsub.s32 %v10490_v22, %v4166_v9  ;;  %v8866_v9 = vld [vmem:[#allocation47 + $0x10] sm:$0xff]  }
 0xa44   :  { %v4145_v13 = vld [vmem:[#allocation5 + $0xb] ss:$2 sm:$0xf]  ;;  %v4143_v17 = vld [vmem:[#allocation5 + $0xa] ss:$2 sm:$0xf] }
 0xa45   :  { %v4138_v14 = vsel %vm1663_vm3, %v4129_v0, %v4136_v11  ;;  %v4146_v15 = vrot.slane %v4145_v13, 4  ;;  %v4154_v20 = vmax.f32 %v4143_v17, %v4145_v13  ;;  %vm4181_vm4 = vcmp.ne.s32.totalorder %v4167_v50, 0  ;;  %v7411_v17 = vld [vmem:[#allocation40] ss:$0 sm:$0xff] }
 0xa46   :  { %v4140_v16 = vmax.f32 %v4139_v12, %v4138_v14  ;;  %v10786_v7 = vmul.u32.u64.low 2863311531, %v10564_v43  ;;  %v10787_v0 = vmul.u32.u64.high 2863311531, %v10564_v43, %v10786_v7  ;;  %vm4183_vm5 = vcmp.lt.s32.totalorder %v4167_v50, 0 }
 0xa47   :  { %v4147_v33 = vsel %vm4130_vm1, %v4146_v15, %v4145_v13  ;;  %vm4185_vm6 = vmand %vm4183_vm5, %vm4181_vm4  ;;  %v8863_v7 = vld [vmem:[#allocation47 + $0x18] sm:$0xff]  }
 0xa48   :  { %4141 = vst [vmem:[#allocation6 + $0x1] sm:$0xf] %v4140_v16  ;;  %v4148_v2 = vrot.slane %v4147_v33, 4  ;;  %v4176_v10 = vshrl.u32 %v10787_v0, 2  ;;  %v4187_v33 = vadd.s32 6, %v4167_v50  ;;  %v8864_v0 = vld [vmem:[#allocation47 + $0x50] sm:$0xff]  }
 0xa4a   :  { %v4149_v18 = vsel %vm4130_vm1, %v4148_v2, %v4145_v13  ;;  %v4177_v11 = vmul.u32 6, %v4176_v10  ;;  %v8867_v10 = vld [vmem:[#allocation47 + $0x48] sm:$0xff]  }
 0xa4b   :  { %v4151_v59 = vrot.slane %v4149_v18, 3 }
 0xa4c   :  { %v4178_v15 = vsub.s32 %v10564_v43, %v4177_v11  ;;  %v8871_v11 = vld [vmem:[#allocation47] sm:$0xff]  }
 0xa4d   :  { %v4153_v21 = vsel %vm1663_vm3, %v4145_v13, %v4151_v59 }
 0xa4e   :  { %v4155_v25 = vmax.f32 %v4154_v20, %v4153_v21  ;;  %vm4182_vm7 = vcmp.ne.s32.totalorder %v4178_v15, 0  ;;  %vm4184_vm8 = vcmp.lt.s32.totalorder %v4178_v15, 0  ;;  %v7412_v20 = vld [vmem:[#allocation41] ss:$0 sm:$0xff] }
 0xa4f   :  { %vm4186_vm9 = vmand %vm4184_vm8, %vm4182_vm7 }
 0xa50   :  { %4156 = vst [vmem:[#allocation6 + $0x7] sm:$0xf] %v4155_v25  ;;  %v4189_v25 = vsel %vm4185_vm6, %v4187_v33, %v4167_v50  ;;  %v8870_v50 = vld [vmem:[#allocation47 + $0x40] sm:$0xff]  }
 0xa51   :  { %vm10793_vm10 = vcmp.lt.s32.totalorder %v4189_v25, 4 }
 0xa57   :  { %v4193_v40 = vld [vmem:[#allocation6] sm:$0xff]  ;;  %v4194_v26 = vld [vmem:[#allocation6 + $0x8] sm:$0xf] }
 0xa58   :  { %v4195_v27 = vmax.f32 %v4193_v40, 0.0  ;;  %v4196_v28 = vmax.f32 %v4194_v26, 0.0  ;;  %v4188_v26 = vadd.s32 6, %v4178_v15 }
 0xa5a   :  { %v4197_v29 = vpack.c.bf16 %v4196_v28, %v4195_v27 }
 0xa5c   :  { %v4207_v31 = vrot.slane %v4197_v29, 1  ;;  %v4201_v32 = vshll.u32 %v4197_v29, 16  ;;  %v4199_v34 = vshrl.u32 %v4197_v29, 16 }
 0xa5e   :  { %8235 = vmatmul.mubr.bf16.vlgmr.msra.gmra.mxu0 %v4207_v31  ;;  %v4203_v35 = vrot.slane %v4201_v32, 1  ;;  %v4190_v32 = vsel %vm4186_vm9, %v4188_v26, %v4178_v15 }
 0xa5f   :  { %8254 = vmatprep.mubr.msk.bf16.mxu0 %vm10050_vm0, %v10750_v3  ;;  %8239 = vmatpush3.bf16.msra.mxu0 %v8824_v37  ;;  %vm10799_vm11 = vcmp.lt.s32.totalorder %v4190_v32, 4 }
 0xa60   :  { %v4204_v36 = vor.u32 %v4203_v35, %v4199_v34  ;;  %8240 = vmatprep.subr.bf16.mxu0 %v10750_v3 }
 0xa62   :  { %4433 = vmatprep.mubr.bf16.mxu1 %v4204_v36 }
 0xa63   :  { %4434 = vmatmul.mubr.bf16.vlgmr.msra.gmra.mxu1 %v4197_v29  ;;  %8241 = vmatpush3.bf16.msra.mxu0 %v8826_v39 }
 0xa64   :  { %7988 = vmatpush3.bf16.msra.mxu1 %v8827_v41  ;;  %8242 = vmatprep.subr.bf16.mxu0 %v10750_v3 }
 0xa65   :  { %7989 = vmatprep.subr.bf16.mxu1 %v8828_v42 }
 0xa67   :  { %8243 = vmatpush3.bf16.msra.mxu0 %v8829_v44 }
 0xa68   :  { %7990 = vmatpush3.bf16.msra.mxu1 %v8830_v45  ;;  %8244 = vmatprep.subr.bf16.mxu0 %v10750_v3 }
 0xa69   :  { %7991 = vmatprep.subr.bf16.mxu1 %v8831_v46 }
 0xa6b   :  { %8245 = vmatpush3.bf16.msra.mxu0 %v8832_v47 }
 0xa6c   :  { %7992 = vmatpush3.bf16.msra.mxu1 %v8833_v48  ;;  %8246 = vmatprep.subr.bf16.mxu0 %v10750_v3 }
 0xa6d   :  { %7993 = vmatprep.subr.bf16.mxu1 %v8834_v49 }
 0xa6f   :  { %8247 = vmatpush3.bf16.msra.mxu0 %v8835_v51  ;;  %v8848_v51 = vld [vmem:[#allocation47 + $0xb8] sm:$0xff]  }
 0xa70   :  { %7994 = vmatpush3.bf16.msra.mxu1 %v8836_v52  ;;  %8248 = vmatprep.subr.bf16.mxu0 %v10750_v3  ;;  %v8849_v52 = vld [vmem:[#allocation47 + $0x78] sm:$0xff]  }
 0xa71   :  { %7995 = vmatprep.subr.bf16.mxu1 %v8837_v54  ;;  %v8850_v54 = vld [vmem:[#allocation47 + $0xb0] sm:$0xff]  }
 0xa73   :  { %8249 = vmatpush3.bf16.msra.mxu0 %v8838_v55  ;;  %v8851_v55 = vld [vmem:[#allocation47 + $0x38] sm:$0xff]  }
 0xa74   :  { %7996 = vmatpush3.bf16.msra.mxu1 %v8839_v56  ;;  %8250 = vmatprep.subr.bf16.mxu0 %v10750_v3  ;;  %v8852_v56 = vld [vmem:[#allocation47 + $0x70] sm:$0xff]  }
 0xa75   :  { %7997 = vmatprep.subr.bf16.mxu1 %v8840_v57  ;;  %v8853_v57 = vld [vmem:[#allocation47 + $0xa8] sm:$0xff]  }
 0xa77   :  { %8251 = vmatpush3.bf16.msra.mxu0 %v8841_v58  ;;  %v8854_v58 = vld [vmem:[#allocation47 + $0x30] sm:$0xff]  }
 0xa78   :  { %7998 = vmatpush3.bf16.msra.mxu1 %v8842_v60  ;;  %8252 = vmatprep.subr.bf16.mxu0 %v10750_v3  ;;  %v8855_v60 = vld [vmem:[#allocation47 + $0x68] sm:$0xff]  }
 0xa79   :  { %7999 = vmatprep.subr.bf16.mxu1 %v8843_v61  ;;  %v8856_v61 = vld [vmem:[#allocation47 + $0xa0] sm:$0xff]  }
 0xa7b   :  { %8253 = vmatpush3.bf16.msra.mxu0 %v8844_v53  ;;  %v8857_v53 = vld [vmem:[#allocation47 + $0x28] sm:$0xff]  }
 0xa7c   :  { %8000 = vmatpush3.bf16.msra.mxu1 %v8845_v62  ;;  %8258 = vmatprep.subr.bf16.mxu0 %v10750_v3  ;;  %v8858_v62 = vld [vmem:[#allocation47 + $0x60] sm:$0xff]  }
 0xa7d   :  { %8001 = vmatprep.subr.bf16.mxu1 %v8846_v63  ;;  %v8859_v63 = vld [vmem:[#allocation47 + $0x98] sm:$0xff]  }
 0xa80   :  { %8002 = vmatpush3.bf16.msra.mxu1 %v8847_v4  ;;  %v8860_v4 = vld [vmem:[#allocation47 + $0x20] sm:$0xff]  }
 0xa81   :  { %8018 = vmatprep.subr.bf16.mxu1 %v8849_v52  ;;  %v8872_v52 = vld [vmem:[#allocation52 + $0xb8] sm:$0xff]  }
 0xb1e   :  { %v4476_v19 = vpop.f32.mrf.mxu0 }
 0xb20   :  { %v8236_v1 = vpop.f32.mrf.mxu0 }
 0xb21   :  { %v8869_v1 = vld [vmem:[#allocation47 + $0x8] sm:$0xff]  }
 0xb22   :  { %v4479_v12 = vpop.f32.mrf.mxu0 }
 0xb23   :  { %v7972_v13 = vpop.f32.mrf.mxu1 }
 0xb24   :  { %v8237_v14 = vpop.f32.mrf.mxu0 }
 0xb25   :  { %v7973_v16 = vpop.f32.mrf.mxu1 }
 0xb26   :  { %v7974_v2 = vadd.f32 %v7973_v16, %v7972_v13 }
 0xb27   :  { %v7975_v18 = vpop.f32.mrf.mxu1 }
 0xb28   :  { %v4477_v59 = vadd.f32 %v7974_v2, %v4476_v19  ;;  %v8868_v19 = vld [vmem:[#allocation47 + $0x80] sm:$0xff]  }
 0xb29   :  { %v7976_v21 = vpop.f32.mrf.mxu1 }
 0xb2a   :  { %v4490_v40 = vmul.f32 %v7411_v17, %v4477_v59  ;;  %v7977_v27 = vadd.f32 %v7976_v21, %v7975_v18 }
 0xb2c   :  { %v4499_v28 = vadd.f32 %v7412_v20, %v4490_v40  ;;  %v4480_v29 = vadd.f32 %v7977_v27, %v4479_v12 }
 0xb2e   :  { %v4501_v31 = vmax.f32 %v4499_v28, 0.0  ;;  %v4491_v34 = vmul.f32 %v7411_v17, %v4480_v29  ;;  %v7437_v17 = vld [vmem:[#allocation44] ss:$0 sm:$0xff]  ;;  %v4813_v28 = vld [vmem:[#allocation6 + $0x1] sm:$0xff] }
 0xb30   :  { %v4503_v35 = vsel %vm10793_vm10, %v4501_v31, 0.0  ;;  %v4500_v36 = vadd.f32 %v7412_v20, %v4491_v34  ;;  %v7438_v20 = vld [vmem:[#allocation46] ss:$0 sm:$0xff] }
 0xb31   :  { %4505 = vst [vmem:[#allocation7 + $0x1] sm:$0xff] %v4503_v35  ;;  %v4814_v35 = vld [vmem:[#allocation6 + $0x9] sm:$0x3] }
 0xb32   :  { %v4502_v38 = vmax.f32 %v4500_v36, 0.0 }
 0xb34   :  { %v4504_v39 = vsel %vm10799_vm11, %v4502_v38, 0.0 }
 0xb35   :  { %4506 = vst [vmem:[#allocation7 + $0x9] sm:$0x3] %v4504_v39 }
 0xb38   :  { %v4507_v41 = vld [vmem:[#allocation7] sm:$0xff] }
 0xb3c   :  { %v4508_v42 = vld [vmem:[#allocation7 + $0x8] sm:$0xf] }
 0xb3d   :  { %v4509_v44 = vpack.c.bf16 %v4508_v42, %v4507_v41 }
 0xb3f   :  { %v4519_v45 = vrot.slane %v4509_v44, 1  ;;  %v4513_v46 = vshll.u32 %v4509_v44, 16  ;;  %v4511_v47 = vshrl.u32 %v4509_v44, 16 }
 0xb41   :  { %8255 = vmatmul.mubr.bf16.vlgmr.msra.gmra.mxu0 %v4519_v45  ;;  %v4515_v48 = vrot.slane %v4513_v46, 1 }
 0xb42   :  { %8274 = vmatprep.mubr.msk.bf16.mxu0 %vm10050_vm0, %v10750_v3  ;;  %8259 = vmatpush3.bf16.msra.mxu0 %v8848_v51 }
 0xb43   :  { %v4516_v49 = vor.u32 %v4515_v48, %v4511_v47  ;;  %8260 = vmatprep.subr.bf16.mxu0 %v10750_v3 }
 0xb45   :  { %4745 = vmatprep.mubr.bf16.mxu1 %v4516_v49 }
 0xb46   :  { %4746 = vmatmul.mubr.bf16.vlgmr.msra.gmra.mxu1 %v4509_v44  ;;  %8261 = vmatpush3.bf16.msra.mxu0 %v8850_v54  ;;  %v8873_v54 = vld [vmem:[#allocation52 + $0x78] sm:$0xff]  }
 0xb47   :  { %8262 = vmatprep.subr.bf16.mxu0 %v10750_v3  ;;  %8019 = vmatpush3.bf16.msra.mxu1 %v8851_v55  ;;  %v8874_v55 = vld [vmem:[#allocation52 + $0xb0] sm:$0xff]  }
 0xb48   :  { %8020 = vmatprep.subr.bf16.mxu1 %v8852_v56  ;;  %v8875_v56 = vld [vmem:[#allocation52 + $0x38] sm:$0xff]  }
 0xb4a   :  { %8263 = vmatpush3.bf16.msra.mxu0 %v8853_v57  ;;  %v8876_v57 = vld [vmem:[#allocation52 + $0x70] sm:$0xff]  }
 0xb4b   :  { %8021 = vmatpush3.bf16.msra.mxu1 %v8854_v58  ;;  %8264 = vmatprep.subr.bf16.mxu0 %v10750_v3  ;;  %v8877_v58 = vld [vmem:[#allocation52 + $0xa8] sm:$0xff]  }
 0xb4c   :  { %8022 = vmatprep.subr.bf16.mxu1 %v8855_v60  ;;  %v8878_v60 = vld [vmem:[#allocation52 + $0x30] sm:$0xff]  }
 0xb4e   :  { %8265 = vmatpush3.bf16.msra.mxu0 %v8856_v61  ;;  %v8879_v61 = vld [vmem:[#allocation52 + $0x68] sm:$0xff]  }
 0xb4f   :  { %8023 = vmatpush3.bf16.msra.mxu1 %v8857_v53  ;;  %8266 = vmatprep.subr.bf16.mxu0 %v10750_v3  ;;  %v8880_v53 = vld [vmem:[#allocation52 + $0xa0] sm:$0xff]  }
 0xb50   :  { %8024 = vmatprep.subr.bf16.mxu1 %v8858_v62  ;;  %v8881_v62 = vld [vmem:[#allocation52 + $0x28] sm:$0xff]  }
 0xb52   :  { %8267 = vmatpush3.bf16.msra.mxu0 %v8859_v63  ;;  %v8882_v63 = vld [vmem:[#allocation52 + $0x60] sm:$0xff]  }
 0xb53   :  { %8025 = vmatpush3.bf16.msra.mxu1 %v8860_v4  ;;  %8268 = vmatprep.subr.bf16.mxu0 %v10750_v3  ;;  %v8883_v4 = vld [vmem:[#allocation52 + $0x98] sm:$0xff]  }
 0xb54   :  { %8026 = vmatprep.subr.bf16.mxu1 %v8861_v5  ;;  %v8884_v5 = vld [vmem:[#allocation52 + $0x20] sm:$0xff]  }
 0xb56   :  { %8269 = vmatpush3.bf16.msra.mxu0 %v8862_v6  ;;  %v8885_v6 = vld [vmem:[#allocation52 + $0x58] sm:$0xff]  }
 0xb57   :  { %8027 = vmatpush3.bf16.msra.mxu1 %v8863_v7  ;;  %8270 = vmatprep.subr.bf16.mxu0 %v10750_v3  ;;  %v8886_v7 = vld [vmem:[#allocation52 + $0x90] sm:$0xff]  }
 0xb58   :  { %8028 = vmatprep.subr.bf16.mxu1 %v8864_v0  ;;  %v8887_v0 = vld [vmem:[#allocation52 + $0x18] sm:$0xff]  }
 0xb5a   :  { %8271 = vmatpush3.bf16.msra.mxu0 %v8865_v8  ;;  %v8888_v8 = vld [vmem:[#allocation52 + $0x50] sm:$0xff]  }
 0xb5b   :  { %8029 = vmatpush3.bf16.msra.mxu1 %v8866_v9  ;;  %8272 = vmatprep.subr.bf16.mxu0 %v10750_v3  ;;  %v8889_v9 = vld [vmem:[#allocation52 + $0x88] sm:$0xff]  }
 0xb5c   :  { %8030 = vmatprep.subr.bf16.mxu1 %v8867_v10  ;;  %v8890_v10 = vld [vmem:[#allocation52 + $0x10] sm:$0xff]  }
 0xb5e   :  { %8273 = vmatpush3.bf16.msra.mxu0 %v8868_v19  ;;  %v8891_v19 = vld [vmem:[#allocation52 + $0x48] sm:$0xff]  }
 0xb5f   :  { %8031 = vmatpush3.bf16.msra.mxu1 %v8869_v1  ;;  %8278 = vmatprep.subr.bf16.mxu0 %v10750_v3  ;;  %v8892_v1 = vld [vmem:[#allocation52 + $0x80] sm:$0xff]  }
 0xb60   :  { %8032 = vmatprep.subr.bf16.mxu1 %v8870_v50  ;;  %v8893_v50 = vld [vmem:[#allocation52 + $0x8] sm:$0xff]  }
 0xb63   :  { %8033 = vmatpush3.bf16.msra.mxu1 %v8871_v11  ;;  %v8894_v11 = vld [vmem:[#allocation52 + $0x40] sm:$0xff]  }
 0xb64   :  { %8049 = vmatprep.subr.bf16.mxu1 %v8873_v54  ;;  %v8899_v54 = vld [vmem:[#allocation56 + $0x38] sm:$0xff]  }
 0xc01   :  { %v4788_v12 = vpop.f32.mrf.mxu0 }
 0xc03   :  { %v8256_v13 = vpop.f32.mrf.mxu0 }
 0xc05   :  { %v4791_v14 = vpop.f32.mrf.mxu0 }
 0xc06   :  { %v8003_v15 = vpop.f32.mrf.mxu1 }
 0xc07   :  { %v8257_v16 = vpop.f32.mrf.mxu0 }
 0xc08   :  { %v8004_v33 = vpop.f32.mrf.mxu1 }
 0xc09   :  { %v8005_v2 = vadd.f32 %v8004_v33, %v8003_v15 }
 0xc0a   :  { %v8006_v18 = vpop.f32.mrf.mxu1 }
 0xc0b   :  { %v4789_v59 = vadd.f32 %v8005_v2, %v4788_v12  ;;  %v8895_v12 = vld [vmem:[#allocation52] sm:$0xff]  }
 0xc0c   :  { %v8007_v21 = vpop.f32.mrf.mxu1 }
 0xc0d   :  { %v4802_v25 = vmul.f32 %v7437_v17, %v4789_v59  ;;  %v8008_v40 = vadd.f32 %v8007_v21, %v8006_v18  ;;  %v7463_v18 = vld [vmem:[#allocation49] ss:$0 sm:$0xff]  ;;  %v7464_v21 = vld [vmem:[#allocation50] ss:$0 sm:$0xff] }
 0xc0f   :  { %v4811_v26 = vadd.f32 %v7438_v20, %v4802_v25  ;;  %v4792_v27 = vadd.f32 %v8008_v40, %v4791_v14 }
 0xc11   :  { %v4815_v29 = vsel %vm10793_vm10, %v4811_v26, 0.0  ;;  %v4803_v31 = vmul.f32 %v7437_v17, %v4792_v27 }
 0xc12   :  { %v10817_v32 = vadd.f32 %v4815_v29, %v4813_v28 }
 0xc13   :  { %v4812_v34 = vadd.f32 %v7438_v20, %v4803_v31 }
 0xc14   :  { %4819 = vst [vmem:[#allocation6 + $0x1] sm:$0xff] %v10817_v32 }
 0xc15   :  { %v4816_v36 = vsel %vm10799_vm11, %v4812_v34, 0.0 }
 0xc16   :  { %v4818_v38 = vadd.f32 %v4816_v36, %v4814_v35 }
 0xc18   :  { %4820 = vst [vmem:[#allocation6 + $0x9] sm:$0x3] %v4818_v38 }
 0xc1b   :  { %v4821_v39 = vld [vmem:[#allocation6] sm:$0xff] }
 0xc1c   :  { %v4823_v42 = vmax.f32 %v4821_v39, 0.0 }
 0xc1f   :  { %v4822_v41 = vld [vmem:[#allocation6 + $0x8] sm:$0xf] }
 0xc20   :  { %v4824_v44 = vmax.f32 %v4822_v41, 0.0 }
 0xc22   :  { %v4825_v45 = vpack.c.bf16 %v4824_v44, %v4823_v42 }
 0xc24   :  { %v4835_v46 = vrot.slane %v4825_v45, 1  ;;  %v4829_v47 = vshll.u32 %v4825_v45, 16  ;;  %v4827_v48 = vshrl.u32 %v4825_v45, 16 }
 0xc26   :  { %8275 = vmatmul.mubr.bf16.vlgmr.msra.gmra.mxu0 %v4835_v46  ;;  %v4831_v49 = vrot.slane %v4829_v47, 1 }
 0xc27   :  { %8294 = vmatprep.mubr.msk.bf16.mxu0 %vm10050_vm0, %v10750_v3  ;;  %8279 = vmatpush3.bf16.msra.mxu0 %v8872_v52  ;;  %v8898_v52 = vld [vmem:[#allocation56 + $0xb0] sm:$0xff]  }
 0xc28   :  { %v4832_v51 = vor.u32 %v4831_v49, %v4827_v48  ;;  %8280 = vmatprep.subr.bf16.mxu0 %v10750_v3  ;;  %v8896_v49 = vld [vmem:[#allocation56 + $0xb8] sm:$0xff]  }
 0xc2a   :  { %5061 = vmatprep.mubr.bf16.mxu1 %v4832_v51  ;;  %v8897_v51 = vld [vmem:[#allocation56 + $0x78] sm:$0xff]  }
 0xc2b   :  { %5062 = vmatmul.mubr.bf16.vlgmr.msra.gmra.mxu1 %v4825_v45  ;;  %8281 = vmatpush3.bf16.msra.mxu0 %v8874_v55  ;;  %v8900_v55 = vld [vmem:[#allocation56 + $0x70] sm:$0xff]  }
 0xc2c   :  { %8050 = vmatpush3.bf16.msra.mxu1 %v8875_v56  ;;  %8282 = vmatprep.subr.bf16.mxu0 %v10750_v3  ;;  %v8901_v56 = vld [vmem:[#allocation56 + $0xa8] sm:$0xff]  }
 0xc2d   :  { %8051 = vmatprep.subr.bf16.mxu1 %v8876_v57  ;;  %v8902_v57 = vld [vmem:[#allocation56 + $0x30] sm:$0xff]  }
 0xc2f   :  { %8283 = vmatpush3.bf16.msra.mxu0 %v8877_v58  ;;  %v8903_v58 = vld [vmem:[#allocation56 + $0x68] sm:$0xff]  }
 0xc30   :  { %8052 = vmatpush3.bf16.msra.mxu1 %v8878_v60  ;;  %8284 = vmatprep.subr.bf16.mxu0 %v10750_v3  ;;  %v8904_v60 = vld [vmem:[#allocation56 + $0xa0] sm:$0xff]  }
 0xc31   :  { %8053 = vmatprep.subr.bf16.mxu1 %v8879_v61  ;;  %v8905_v61 = vld [vmem:[#allocation56 + $0x28] sm:$0xff]  }
 0xc33   :  { %8285 = vmatpush3.bf16.msra.mxu0 %v8880_v53  ;;  %v8906_v53 = vld [vmem:[#allocation56 + $0x60] sm:$0xff]  }
 0xc34   :  { %8054 = vmatpush3.bf16.msra.mxu1 %v8881_v62  ;;  %8286 = vmatprep.subr.bf16.mxu0 %v10750_v3  ;;  %v8907_v62 = vld [vmem:[#allocation56 + $0x98] sm:$0xff]  }
 0xc35   :  { %8055 = vmatprep.subr.bf16.mxu1 %v8882_v63  ;;  %v8908_v63 = vld [vmem:[#allocation56 + $0x20] sm:$0xff]  }
 0xc37   :  { %8287 = vmatpush3.bf16.msra.mxu0 %v8883_v4  ;;  %v8909_v4 = vld [vmem:[#allocation56 + $0x58] sm:$0xff]  }
 0xc38   :  { %8056 = vmatpush3.bf16.msra.mxu1 %v8884_v5  ;;  %8288 = vmatprep.subr.bf16.mxu0 %v10750_v3  ;;  %v8910_v5 = vld [vmem:[#allocation56 + $0x90] sm:$0xff]  }
 0xc39   :  { %8057 = vmatprep.subr.bf16.mxu1 %v8885_v6  ;;  %v8911_v6 = vld [vmem:[#allocation56 + $0x18] sm:$0xff]  }
 0xc3b   :  { %8289 = vmatpush3.bf16.msra.mxu0 %v8886_v7  ;;  %v8912_v7 = vld [vmem:[#allocation56 + $0x50] sm:$0xff]  }
 0xc3c   :  { %8058 = vmatpush3.bf16.msra.mxu1 %v8887_v0  ;;  %8290 = vmatprep.subr.bf16.mxu0 %v10750_v3  ;;  %v8913_v0 = vld [vmem:[#allocation56 + $0x88] sm:$0xff]  }
 0xc3d   :  { %8059 = vmatprep.subr.bf16.mxu1 %v8888_v8  ;;  %v8914_v8 = vld [vmem:[#allocation56 + $0x10] sm:$0xff]  }
 0xc3f   :  { %8291 = vmatpush3.bf16.msra.mxu0 %v8889_v9  ;;  %v8915_v9 = vld [vmem:[#allocation56 + $0x48] sm:$0xff]  }
 0xc40   :  { %8060 = vmatpush3.bf16.msra.mxu1 %v8890_v10  ;;  %8292 = vmatprep.subr.bf16.mxu0 %v10750_v3  ;;  %v8916_v10 = vld [vmem:[#allocation56 + $0x80] sm:$0xff]  }
 0xc41   :  { %8061 = vmatprep.subr.bf16.mxu1 %v8891_v19  ;;  %v8917_v19 = vld [vmem:[#allocation56 + $0x8] sm:$0xff]  }
 0xc43   :  { %8293 = vmatpush3.bf16.msra.mxu0 %v8892_v1  ;;  %v8918_v1 = vld [vmem:[#allocation56 + $0x40] sm:$0xff]  }
 0xc44   :  { %8062 = vmatpush3.bf16.msra.mxu1 %v8893_v50  ;;  %8298 = vmatprep.subr.bf16.mxu0 %v10750_v3  ;;  %v8919_v50 = vld [vmem:[#allocation56] sm:$0xff]  }
 0xc45   :  { %8063 = vmatprep.subr.bf16.mxu1 %v8894_v11 }
 0xc48   :  { %8064 = vmatpush3.bf16.msra.mxu1 %v8895_v12 }
 0xc49   :  { %8080 = vmatprep.subr.bf16.mxu1 %v8897_v51  ;;  %v8924_v51 = vld [vmem:[%s11150_s8 + $0x28] sm:$0xff]  }
 0xce6   :  { %v5104_v13 = vpop.f32.mrf.mxu0 }
 0xce8   :  { %v8276_v14 = vpop.f32.mrf.mxu0 }
 0xcea   :  { %v5107_v15 = vpop.f32.mrf.mxu0 }
 0xceb   :  { %v8034_v16 = vpop.f32.mrf.mxu1 }
 0xcec   :  { %v8277_v33 = vpop.f32.mrf.mxu0 }
 0xced   :  { %v8035_v2 = vpop.f32.mrf.mxu1 }
 0xcee   :  { %v8036_v17 = vadd.f32 %v8035_v2, %v8034_v16  ;;  %v7489_v2 = vld [vmem:[#allocation53] ss:$0 sm:$0xff] }
 0xcef   :  { %v8037_v59 = vpop.f32.mrf.mxu1 }
 0xcf0   :  { %v5105_v20 = vadd.f32 %v8036_v17, %v5104_v13 }
 0xcf1   :  { %v8038_v25 = vpop.f32.mrf.mxu1 }
 0xcf2   :  { %v5118_v40 = vmul.f32 %v7463_v18, %v5105_v20  ;;  %v8039_v26 = vadd.f32 %v8038_v25, %v8037_v59  ;;  %v7490_v59 = vld [vmem:[#allocation55] ss:$0 sm:$0xff] }
 0xcf4   :  { %v5127_v27 = vadd.f32 %v7464_v21, %v5118_v40  ;;  %v5108_v28 = vadd.f32 %v8039_v26, %v5107_v15 }
 0xcf6   :  { %v5129_v29 = vmax.f32 %v5127_v27, 0.0  ;;  %v5119_v31 = vmul.f32 %v7463_v18, %v5108_v28 }
 0xcf8   :  { %v5131_v34 = vsel %vm10793_vm10, %v5129_v29, 0.0  ;;  %v5128_v35 = vadd.f32 %v7464_v21, %v5119_v31 }
 0xcf9   :  { %5133 = vst [vmem:[#allocation7 + $0x1] sm:$0xff] %v5131_v34  ;;  %v5442_v34 = vld [vmem:[#allocation6 + $0x9] sm:$0x3] }
 0xcfa   :  { %v5130_v36 = vmax.f32 %v5128_v35, 0.0 }
 0xcfc   :  { %v5132_v38 = vsel %vm10799_vm11, %v5130_v36, 0.0 }
 0xcfd   :  { %5134 = vst [vmem:[#allocation7 + $0x9] sm:$0x3] %v5132_v38 }
 0xd00   :  { %v5135_v39 = vld [vmem:[#allocation7] sm:$0xff] }
 0xd04   :  { %v5136_v41 = vld [vmem:[#allocation7 + $0x8] sm:$0xf] }
 0xd05   :  { %v5137_v42 = vpack.c.bf16 %v5136_v41, %v5135_v39 }
 0xd07   :  { %v5147_v44 = vrot.slane %v5137_v42, 1  ;;  %v5141_v45 = vshll.u32 %v5137_v42, 16  ;;  %v5139_v46 = vshrl.u32 %v5137_v42, 16 }
 0xd09   :  { %8295 = vmatmul.mubr.bf16.vlgmr.msra.gmra.mxu0 %v5147_v44  ;;  %v5143_v47 = vrot.slane %v5141_v45, 1 }
 0xd0a   :  { %8314 = vmatprep.mubr.msk.bf16.mxu0 %vm10050_vm0, %v10750_v3  ;;  %8299 = vmatpush3.bf16.msra.mxu0 %v8896_v49  ;;  %v8922_v49 = vld [vmem:[%s11150_s8 + $0x30] sm:$0xff]  }
 0xd0b   :  { %v5144_v48 = vor.u32 %v5143_v47, %v5139_v46  ;;  %8300 = vmatprep.subr.bf16.mxu0 %v10750_v3  ;;  %v8923_v46 = vld [vmem:[%s11149_s29 + $0x30] sm:$0xff]   ;;  %v8920_v47 = vld [vmem:[%s11150_s8 + $0x38] sm:$0xff]  }
 0xd0d   :  { %5373 = vmatprep.mubr.bf16.mxu1 %v5144_v48  ;;  %v8925_v48 = vld [vmem:[%s11149_s29 + $0x28] sm:$0xff]  }
 0xd0e   :  { %5374 = vmatmul.mubr.bf16.vlgmr.msra.gmra.mxu1 %v5137_v42  ;;  %8301 = vmatpush3.bf16.msra.mxu0 %v8898_v52  ;;  %v8921_v42 = vld [vmem:[%s11149_s29 + $0x38] sm:$0xff]   ;;  %v8926_v52 = vld [vmem:[%s11150_s8 + $0x20] sm:$0xff]  }
 0xd0f   :  { %8081 = vmatpush3.bf16.msra.mxu1 %v8899_v54  ;;  %8302 = vmatprep.subr.bf16.mxu0 %v10750_v3  ;;  %v8927_v54 = vld [vmem:[%s11149_s29 + $0x20] sm:$0xff]  }
 0xd10   :  { %8082 = vmatprep.subr.bf16.mxu1 %v8900_v55  ;;  %v8928_v55 = vld [vmem:[%s11150_s8 + $0x18] sm:$0xff]  }
 0xd12   :  { %8303 = vmatpush3.bf16.msra.mxu0 %v8901_v56  ;;  %v8929_v56 = vld [vmem:[%s11149_s29 + $0x18] sm:$0xff]  }
 0xd13   :  { %8083 = vmatpush3.bf16.msra.mxu1 %v8902_v57  ;;  %8304 = vmatprep.subr.bf16.mxu0 %v10750_v3  ;;  %v8930_v57 = vld [vmem:[%s11150_s8 + $0x10] sm:$0xff]  }
 0xd14   :  { %8084 = vmatprep.subr.bf16.mxu1 %v8903_v58  ;;  %v8931_v58 = vld [vmem:[%s11149_s29 + $0x10] sm:$0xff]  }
 0xd16   :  { %8305 = vmatpush3.bf16.msra.mxu0 %v8904_v60  ;;  %v8932_v60 = vld [vmem:[%s11150_s8 + $0x8] sm:$0xff]  }
 0xd17   :  { %8085 = vmatpush3.bf16.msra.mxu1 %v8905_v61  ;;  %8306 = vmatprep.subr.bf16.mxu0 %v10750_v3  ;;  %v8933_v61 = vld [vmem:[%s11149_s29 + $0x8] sm:$0xff]  }
 0xd18   :  { %8086 = vmatprep.subr.bf16.mxu1 %v8906_v53  ;;  %v8934_v53 = vld [vmem:[%s11150_s8] sm:$0xff]  }
 0xd1a   :  { %8307 = vmatpush3.bf16.msra.mxu0 %v8907_v62  ;;  %v8935_v62 = vld [vmem:[%s11149_s29] sm:$0xff]  }
 0xd1b   :  { %8087 = vmatpush3.bf16.msra.mxu1 %v8908_v63  ;;  %8308 = vmatprep.subr.bf16.mxu0 %v10750_v3 }
 0xd1c   :  { %8088 = vmatprep.subr.bf16.mxu1 %v8909_v4 }
 0xd1e   :  { %8309 = vmatpush3.bf16.msra.mxu0 %v8910_v5 }
 0xd1f   :  { %8089 = vmatpush3.bf16.msra.mxu1 %v8911_v6  ;;  %8310 = vmatprep.subr.bf16.mxu0 %v10750_v3 }
 0xd20   :  { %8090 = vmatprep.subr.bf16.mxu1 %v8912_v7 }
 0xd22   :  { %8311 = vmatpush3.bf16.msra.mxu0 %v8913_v0 }
 0xd23   :  { %8091 = vmatpush3.bf16.msra.mxu1 %v8914_v8  ;;  %8312 = vmatprep.subr.bf16.mxu0 %v10750_v3 }
 0xd24   :  { %8092 = vmatprep.subr.bf16.mxu1 %v8915_v9 }
 0xd26   :  { %8313 = vmatpush3.bf16.msra.mxu0 %v8916_v10 }
 0xd27   :  { %8093 = vmatpush3.bf16.msra.mxu1 %v8917_v19  ;;  %8338 = vmatprep.subr.bf16.mxu0 %v10750_v3  ;;  %v7515_v19 = vld [vmem:[#allocation58] ss:$0 sm:$0xff] }
 0xd28   :  { %8094 = vmatprep.subr.bf16.mxu1 %v8918_v1 }
 0xd2b   :  { %8095 = vmatpush3.bf16.msra.mxu1 %v8919_v50 }
 0xd2c   :  { %8318 = vmatprep.subr.bf16.mxu1 %v10750_v3 }
 0xdc9   :  { %v5416_v11 = vpop.f32.mrf.mxu0 }
 0xdcb   :  { %v8296_v12 = vpop.f32.mrf.mxu0 }
 0xdcd   :  { %v5419_v13 = vpop.f32.mrf.mxu0 }
 0xdce   :  { %v8065_v14 = vpop.f32.mrf.mxu1 }
 0xdcf   :  { %v8297_v15 = vpop.f32.mrf.mxu0 }
 0xdd0   :  { %v8066_v16 = vpop.f32.mrf.mxu1 }
 0xdd1   :  { %v8067_v33 = vadd.f32 %v8066_v16, %v8065_v14 }
 0xdd2   :  { %v8068_v17 = vpop.f32.mrf.mxu1 }
 0xdd3   :  { %v5417_v18 = vadd.f32 %v8067_v33, %v5416_v11  ;;  %v8936_v33 = vld [vmem:[%s11151_s26 + $0x38] sm:$0xff]  }
 0xdd4   :  { %v8069_v20 = vpop.f32.mrf.mxu1 }
 0xdd5   :  { %v5430_v21 = vmul.f32 %v7489_v2, %v5417_v18  ;;  %v8070_v25 = vadd.f32 %v8069_v20, %v8068_v17  ;;  %v8937_v17 = vld [vmem:[%s11151_s26 + $0x30] sm:$0xff]   ;;  %v8938_v18 = vld [vmem:[%s11151_s26 + $0x28] sm:$0xff]   ;;  %v8940_v20 = vld [vmem:[%s11151_s26 + $0x18] sm:$0xff]  }
 0xdd7   :  { %v5439_v40 = vadd.f32 %v7490_v59, %v5430_v21  ;;  %v5420_v26 = vadd.f32 %v8070_v25, %v5419_v13  ;;  %v7516_v13 = vld [vmem:[#allocation59] ss:$0 sm:$0xff]  ;;  %v8941_v21 = vld [vmem:[%s11151_s26 + $0x10] sm:$0xff]   ;;  %v8942_v25 = vld [vmem:[%s11151_s26 + $0x8] sm:$0xff]  }
 0xdd9   :  { %v5443_v27 = vsel %vm10793_vm10, %v5439_v40, 0.0  ;;  %v5431_v28 = vmul.f32 %v7489_v2, %v5420_v26  ;;  %v8943_v40 = vld [vmem:[%s11151_s26] sm:$0xff]   ;;  %v8944_v26 = vld [vmem:[%s11152_s19 + $0x38] sm:$0xff]  }
 0xdda   :  { %v5445_v29 = vadd.f32 %v5443_v27, %v10817_v32  ;;  %v8945_v27 = vld [vmem:[%s11152_s19 + $0x30] sm:$0xff]  }
 0xddb   :  { %v5440_v31 = vadd.f32 %v7490_v59, %v5431_v28  ;;  %v8939_v59 = vld [vmem:[%s11151_s26 + $0x20] sm:$0xff]   ;;  %v8946_v28 = vld [vmem:[%s11152_s19 + $0x28] sm:$0xff]  }
 0xddc   :  { %5447 = vst [vmem:[#allocation6 + $0x1] sm:$0xff] %v5445_v29  ;;  %v8947_v29 = vld [vmem:[%s11152_s19 + $0x20] sm:$0xff]  }
 0xddd   :  { %v5444_v35 = vsel %vm10799_vm11, %v5440_v31, 0.0  ;;  %v8949_v31 = vld [vmem:[%s11152_s19 + $0x10] sm:$0xff]  }
 0xdde   :  { %v5446_v36 = vadd.f32 %v5444_v35, %v5442_v34  ;;  %v8950_v34 = vld [vmem:[%s11152_s19 + $0x8] sm:$0xff]   ;;  %v8951_v35 = vld [vmem:[%s11152_s19] sm:$0xff]  }
 0xde0   :  { %5448 = vst [vmem:[#allocation6 + $0x9] sm:$0x3] %v5446_v36  ;;  %v8952_v36 = vld [vmem:[%s11152_s19 + $0x58] sm:$0xff]  }
 0xde3   :  { %v5449_v38 = vld [vmem:[#allocation6] sm:$0xff] }
 0xde7   :  { %v5450_v39 = vld [vmem:[#allocation6 + $0x8] sm:$0xf] }
 0xde8   :  { %v5451_v41 = vpack.c.bf16 %v5450_v39, %v5449_v38  ;;  %v8953_v38 = vld [vmem:[%s11152_s19 + $0x50] sm:$0xff]   ;;  %v8954_v39 = vld [vmem:[%s11152_s19 + $0x48] sm:$0xff]  }
 0xdea   :  { %v5461_v43 = vrot.slane %v5451_v41, 1  ;;  %v5455_v44 = vshll.u32 %v5451_v41, 16  ;;  %v5453_v32 = vshrl.u32 %v5451_v41, 16 }
 0xdec   :  { %8315 = vmatmul.mubr.bf16.vlgmr.msra.gmra.mxu0 %v5461_v43  ;;  %v5457_v45 = vrot.slane %v5455_v44, 1 }
 0xded   :  { %8339 = vmatpush3.bf16.msra.mxu0 %v8921_v42  ;;  %8354 = vmatprep.mubr.msk.bf16.mxu0 %vm10050_vm0, %v10750_v3 }
 0xdee   :  { %v5458_v37 = vor.u32 %v5457_v45, %v5453_v32  ;;  %8340 = vmatprep.subr.bf16.mxu0 %v10750_v3 }
 0xdf0   :  { %5687 = vmatprep.mubr.bf16.mxu1 %v5458_v37 }
 0xdf1   :  { %5688 = vmatmul.mubr.bf16.vlgmr.msra.gmra.mxu1 %v5451_v41  ;;  %8341 = vmatpush3.bf16.msra.mxu0 %v8923_v46  ;;  %v8955_v41 = vld [vmem:[%s11152_s19 + $0x40] sm:$0xff]  }
 0xdf2   :  { %8319 = vmatpush3.bf16.msra.mxu1 %v8920_v47  ;;  %8342 = vmatprep.subr.bf16.mxu0 %v10750_v3 }
 0xdf3   :  { %8320 = vmatprep.subr.bf16.mxu1 %v10750_v3  ;;  %8334 = vmatprep.mubr.msk.bf16.mxu1 %vm10050_vm0, %v10750_v3 }
 0xdf5   :  { %8343 = vmatpush3.bf16.msra.mxu0 %v8925_v48 }
 0xdf6   :  { %8321 = vmatpush3.bf16.msra.mxu1 %v8922_v49  ;;  %8344 = vmatprep.subr.bf16.mxu0 %v10750_v3 }
 0xdf7   :  { %8322 = vmatprep.subr.bf16.mxu1 %v10750_v3 }
 0xdf9   :  { %8345 = vmatpush3.bf16.msra.mxu0 %v8927_v54 }
 0xdfa   :  { %8323 = vmatpush3.bf16.msra.mxu1 %v8924_v51  ;;  %8346 = vmatprep.subr.bf16.mxu0 %v10750_v3 }
 0xdfb   :  { %8324 = vmatprep.subr.bf16.mxu1 %v10750_v3 }
 0xdfd   :  { %8347 = vmatpush3.bf16.msra.mxu0 %v8929_v56 }
 0xdfe   :  { %8325 = vmatpush3.bf16.msra.mxu1 %v8926_v52  ;;  %8348 = vmatprep.subr.bf16.mxu0 %v10750_v3 }
 0xdff   :  { %8326 = vmatprep.subr.bf16.mxu1 %v10750_v3 }
 0xe01   :  { %8349 = vmatpush3.bf16.msra.mxu0 %v8931_v58 }
 0xe02   :  { %8327 = vmatpush3.bf16.msra.mxu1 %v8928_v55  ;;  %8350 = vmatprep.subr.bf16.mxu0 %v10750_v3 }
 0xe03   :  { %8328 = vmatprep.subr.bf16.mxu1 %v10750_v3 }
 0xe05   :  { %8351 = vmatpush3.bf16.msra.mxu0 %v8933_v61 }
 0xe06   :  { %8329 = vmatpush3.bf16.msra.mxu1 %v8930_v57  ;;  %8352 = vmatprep.subr.bf16.mxu0 %v10750_v3 }
 0xe07   :  { %8330 = vmatprep.subr.bf16.mxu1 %v10750_v3 }
 0xe09   :  { %8353 = vmatpush3.bf16.msra.mxu0 %v8935_v62 }
 0xe0a   :  { %8331 = vmatpush3.bf16.msra.mxu1 %v8932_v60  ;;  %6239 = vmatprep.subr.bf16.mxu0 %v10049_v30 }
 0xe0b   :  { %8332 = vmatprep.subr.bf16.mxu1 %v10750_v3 }
 0xe0e   :  { %8333 = vmatpush3.bf16.msra.mxu1 %v8934_v53 }
 0xe0f   :  { %8358 = vmatprep.subr.bf16.mxu1 %v10750_v3 }
 0xeac   :  { %v5730_v63 = vpop.f32.mrf.mxu0 }
 0xeae   :  { %v8316_v4 = vpop.f32.mrf.mxu0 }
 0xeb0   :  { %v5733_v5 = vpop.f32.mrf.mxu0 }
 0xeb1   :  { %v8096_v6 = vpop.f32.mrf.mxu1 }
 0xeb2   :  { %v8317_v7 = vpop.f32.mrf.mxu0 }
 0xeb3   :  { %v8097_v0 = vpop.f32.mrf.mxu1 }
 0xeb4   :  { %v8098_v8 = vadd.f32 %v8097_v0, %v8096_v6 }
 0xeb5   :  { %v8099_v9 = vpop.f32.mrf.mxu1 }
 0xeb6   :  { %v5731_v10 = vadd.f32 %v8098_v8, %v5730_v63 }
 0xeb7   :  { %v8100_v1 = vpop.f32.mrf.mxu1 }
 0xeb8   :  { %v8101_v50 = vadd.f32 %v8100_v1, %v8099_v9  ;;  %v5744_v11 = vmul.f32 %v7515_v19, %v5731_v10 }
 0xeba   :  { %v5734_v12 = vadd.f32 %v8101_v50, %v5733_v5  ;;  %v5753_v15 = vadd.f32 %v7516_v13, %v5744_v11 }
 0xebc   :  { %v5745_v14 = vmul.f32 %v7515_v19, %v5734_v12 }
 0xebe   :  { %v5754_v16 = vadd.f32 %v7516_v13, %v5745_v14 }
 0xec0   :  { %v5755_v2 = vpack.c.bf16 %v5754_v16, %v5753_v15 }
 0xec2   :  { %8335 = vmatmul.mubr.bf16.vlgmr.msra.gmra.mxu1 %v5755_v2  ;;  %8355 = vmatmul.mubr.bf16.vlgmr.msra.gmra.mxu0 %v5755_v2 }
 0xec3   :  { %8359 = vmatpush3.bf16.msra.mxu1 %v8936_v33  ;;  %8374 = vmatprep.mubr.msk.bf16.mxu1 %vm10050_vm0, %v10750_v3 }
 0xec4   :  { %8360 = vmatprep.subr.bf16.mxu1 %v10750_v3  ;;  %6240 = vmatpush1.bf16.msra.mxu0 %v8944_v26  ;;  %v8958_v26 = vld [vmem:[%s11153_s14 + $0x28] sm:$0xff]  }
 0xec5   :  { %6241 = vmatprep.subr.bf16.mxu0 %v10049_v30 }
 0xec7   :  { %8361 = vmatpush3.bf16.msra.mxu1 %v8937_v17 }
 0xec8   :  { %8362 = vmatprep.subr.bf16.mxu1 %v10750_v3  ;;  %6242 = vmatpush1.bf16.msra.mxu0 %v8945_v27  ;;  %v8959_v27 = vld [vmem:[%s11153_s14 + $0x20] sm:$0xff]  }
 0xec9   :  { %6243 = vmatprep.subr.bf16.mxu0 %v10049_v30 }
 0xecb   :  { %8363 = vmatpush3.bf16.msra.mxu1 %v8938_v18 }
 0xecc   :  { %8364 = vmatprep.subr.bf16.mxu1 %v10750_v3  ;;  %6244 = vmatpush1.bf16.msra.mxu0 %v8946_v28  ;;  %v8960_v28 = vld [vmem:[%s11153_s14 + $0x18] sm:$0xff]  }
 0xecd   :  { %6245 = vmatprep.subr.bf16.mxu0 %v10049_v30 }
 0xecf   :  { %8365 = vmatpush3.bf16.msra.mxu1 %v8939_v59 }
 0xed0   :  { %8366 = vmatprep.subr.bf16.mxu1 %v10750_v3  ;;  %6246 = vmatpush1.bf16.msra.mxu0 %v8947_v29  ;;  %v8961_v29 = vld [vmem:[%s11153_s14 + $0x10] sm:$0xff]  }
 0xed1   :  { %6247 = vmatprep.subr.bf16.mxu0 %v10049_v30 }
 0xed3   :  { %8367 = vmatpush3.bf16.msra.mxu1 %v8940_v20 }
 0xed4   :  { %8368 = vmatprep.subr.bf16.mxu1 %v10750_v3 }
 0xed7   :  { %8369 = vmatpush3.bf16.msra.mxu1 %v8941_v21 }
 0xed8   :  { %8370 = vmatprep.subr.bf16.mxu1 %v10750_v3 }
 0xedb   :  { %8371 = vmatpush3.bf16.msra.mxu1 %v8942_v25  ;;  %v8956_v25 = vld [vmem:[%s11153_s14 + $0x38] sm:$0xff]  }
 0xedc   :  { %8372 = vmatprep.subr.bf16.mxu1 %v10750_v3  ;;  %v8948_v3 = vld [vmem:[%s11152_s19 + $0x18] sm:$0xff]  }
 0xedd   :  { %6248 = vmatpush1.bf16.msra.mxu0 %v8948_v3  ;;  %v8962_v3 = vld [vmem:[%s11153_s14 + $0x8] sm:$0xff]  }
 0xede   :  { %6249 = vmatprep.subr.bf16.mxu0 %v10049_v30 }
 0xedf   :  { %8373 = vmatpush3.bf16.msra.mxu1 %v8943_v40  ;;  %v8957_v40 = vld [vmem:[%s11153_s14 + $0x30] sm:$0xff]  }
 0xee0   :  { %6414 = vmatprep.subr.bf16.mxu1 %v10049_v30 }
 0xee1   :  { %6250 = vmatpush1.bf16.msra.mxu0 %v8949_v31  ;;  %v8963_v31 = vld [vmem:[%s11153_s14] sm:$0xff]  }
 0xee2   :  { %8375 = vmatmul.mubr.bf16.vlgmr.msra.gmra.mxu1 %v5755_v2  ;;  %6251 = vmatprep.subr.bf16.mxu0 %v10049_v30 }
 0xee3   :  { %6415 = vmatpush1.bf16.msra.mxu1 %v8956_v25 }
 0xee4   :  { %6416 = vmatprep.subr.bf16.mxu1 %v10049_v30 }
 0xee5   :  { %6252 = vmatpush1.bf16.msra.mxu0 %v8950_v34  ;;  %v8964_v34 = vld [vmem:[%s11153_s14 + $0x58] sm:$0xff]  }
 0xee6   :  { %6253 = vmatprep.subr.bf16.mxu0 %v10049_v30 }
 0xee7   :  { %6417 = vmatpush1.bf16.msra.mxu1 %v8957_v40 }
 0xee8   :  { %6418 = vmatprep.subr.bf16.mxu1 %v10049_v30 }
 0xee9   :  { %6254 = vmatpush1.bf16.msra.mxu0 %v8951_v35  ;;  %v8965_v35 = vld [vmem:[%s11153_s14 + $0x50] sm:$0xff]  }
 0xeea   :  { %6263 = vmatprep.subr.bf16.mxu0 %v10049_v30 }
 0xeeb   :  { %6419 = vmatpush1.bf16.msra.mxu1 %v8958_v26 }
 0xeec   :  { %6420 = vmatprep.subr.bf16.mxu1 %v10049_v30 }
 0xeed   :  { %6264 = vmatpush2.bf16.msra.mxu0 %v8952_v36  ;;  %v8966_v36 = vld [vmem:[%s11153_s14 + $0x48] sm:$0xff]  }
 0xeee   :  { %6265 = vmatprep.subr.bf16.mxu0 %v10049_v30 }
 0xeef   :  { %6421 = vmatpush1.bf16.msra.mxu1 %v8959_v27 }
 0xef0   :  { %6422 = vmatprep.subr.bf16.mxu1 %v10049_v30 }
 0xef1   :  { %6266 = vmatpush2.bf16.msra.mxu0 %v8953_v38  ;;  %v8967_v38 = vld [vmem:[%s11153_s14 + $0x40] sm:$0xff]  }
 0xef2   :  { %6267 = vmatprep.subr.bf16.mxu0 %v10049_v30 }
 0xef3   :  { %6423 = vmatpush1.bf16.msra.mxu1 %v8960_v28 }
 0xef4   :  { %6424 = vmatprep.subr.bf16.mxu1 %v10049_v30 }
 0xef5   :  { %6268 = vmatpush2.bf16.msra.mxu0 %v8954_v39  ;;  %v7554_v39 = vld [vmem:[#allocation61] ss:$0 sm:$0xff] }
 0xef6   :  { %6269 = vmatprep.subr.bf16.mxu0 %v10049_v30 }
 0xef7   :  { %6425 = vmatpush1.bf16.msra.mxu1 %v8961_v29  ;;  %v8980_v29 = vld [vmem:[%s11157_s9 + $0x38] sm:$0xff]  }
 0xef8   :  { %6426 = vmatprep.subr.bf16.mxu1 %v10049_v30 }
 0xef9   :  { %6270 = vmatpush2.bf16.msra.mxu0 %v8955_v41  ;;  %v6114_v41 = vand.u32 3, %v10490_v22 }
 0xefa   :  { %6590 = vmatprep.subr.bf16.mxu0 %v10049_v30 }
 0xefb   :  { %6427 = vmatpush1.bf16.msra.mxu1 %v8962_v3  ;;  %v8981_v3 = vld [vmem:[%s11157_s9 + $0x30] sm:$0xff]  }
 0xefc   :  { %6428 = vmatprep.subr.bf16.mxu1 %v10049_v30 }
 0xeff   :  { %6429 = vmatpush1.bf16.msra.mxu1 %v8963_v31  ;;  %v8982_v31 = vld [vmem:[%s11157_s9 + $0x28] sm:$0xff]  }
 0xf00   :  { %6438 = vmatprep.subr.bf16.mxu1 %v10049_v30 }
 0xf03   :  { %6439 = vmatpush2.bf16.msra.mxu1 %v8964_v34  ;;  %v8983_v34 = vld [vmem:[%s11157_s9 + $0x20] sm:$0xff]  }
 0xf04   :  { %6440 = vmatprep.subr.bf16.mxu1 %v10049_v30 }
 0xf07   :  { %6441 = vmatpush2.bf16.msra.mxu1 %v8965_v35  ;;  %v8984_v35 = vld [vmem:[%s11157_s9 + $0x18] sm:$0xff]  }
 0xf08   :  { %6442 = vmatprep.subr.bf16.mxu1 %v10049_v30 }
 0xf0b   :  { %6443 = vmatpush2.bf16.msra.mxu1 %v8966_v36  ;;  %v8985_v36 = vld [vmem:[%s11157_s9 + $0x10] sm:$0xff]  }
 0xf0c   :  { %6444 = vmatprep.subr.bf16.mxu1 %v10049_v30 }
 0xf0f   :  { %6445 = vmatpush2.bf16.msra.mxu1 %v8967_v38  ;;  %v8986_v38 = vld [vmem:[%s11157_s9 + $0x8] sm:$0xff]  }
 0xf10   :  { %6764 = vmatprep.subr.bf16.mxu1 %v10049_v30 }
 0xf82   :  { %v5854_v42 = vpop.f32.mrf.mxu1  ;;  %v5959_v43 = vpop.f32.mrf.mxu0 }
 0xf83   :  { %v5966_v48 = vmax.f32 %v5854_v42, %v5959_v43  ;;  %v7555_v43 = vld [vmem:[#allocation62] ss:$0 sm:$0xff] }
 0xf84   :  { %v8336_v44 = vpop.f32.mrf.mxu1  ;;  %v8356_v32 = vpop.f32.mrf.mxu0 }
 0xf86   :  { %v5857_v45 = vpop.f32.mrf.mxu1  ;;  %v5962_v46 = vpop.f32.mrf.mxu0 }
 0xf87   :  { %v5967_v54 = vmax.f32 %v5857_v45, %v5962_v46 }
 0xf88   :  { %v8337_v37 = vpop.f32.mrf.mxu1  ;;  %v8357_v47 = vpop.f32.mrf.mxu0 }
 0xfa2   :  { %v6066_v49 = vpop.f32.mrf.mxu1 }
 0xfa3   :  { %v6073_v51 = vmax.f32 %v5966_v48, %v6066_v49 }
 0xfa4   :  { %v8376_v52 = vpop.f32.mrf.mxu1 }
 0xfa5   :  { %6075 = vst.msk [vmem:[#allocation8] sm:$0xff] %vm813_vm2, %v6073_v51 }
 0xfa6   :  { %v6069_v55 = vpop.f32.mrf.mxu1 }
 0xfa7   :  { %v6074_v56 = vmax.f32 %v5967_v54, %v6069_v55 }
 0xfa8   :  { %v8377_v57 = vpop.f32.mrf.mxu1 }
 0xfa9   :  { %6077 = vst.msk [vmem:[#allocation8 + $0x8] sm:$0x3] %vm6076_vm12, %v6074_v56 }
 0xfac   :  { %v6081_v58 = vld [vmem:[#allocation8 + $0x1] ss:$2 sm:$0x3]  ;;  %v6079_v62 = vld [vmem:[#allocation8] ss:$2 sm:$0x3] }
 0xfad   :  { %v6083_v60 = vrot.slane %v6081_v58, 6  ;;  %v6091_v7 = vmax.f32 %v6079_v62, %v6081_v58  ;;  %v8970_v62 = vld [vmem:[%s11156_s28 + $0x28] sm:$0xff]  }
 0xfaf   :  { %v6084_v61 = vsel %vm6082_vm13, %v6083_v60, %v6081_v58 }
 0xfb0   :  { %v6085_v53 = vrot.slane %v6084_v61, 6  ;;  %v6097_v63 = vld [vmem:[#allocation8 + $0x7] ss:$2 sm:$0x3] }
 0xfb1   :  { %v6098_v5 = vrot.slane %v6097_v63, 6  ;;  %v6095_v19 = vld [vmem:[#allocation8 + $0x6] ss:$2 sm:$0x3] }
 0xfb2   :  { %v6086_v4 = vsel %vm6082_vm13, %v6085_v53, %v6081_v58  ;;  %v6106_v11 = vmax.f32 %v6095_v19, %v6097_v63  ;;  %v8968_v61 = vld [vmem:[%s11156_s28 + $0x38] sm:$0xff]   ;;  %v8969_v53 = vld [vmem:[%s11156_s28 + $0x30] sm:$0xff]  }
 0xfb3   :  { %v6088_v6 = vrot.slane %v6086_v4, 1  ;;  %v6099_v0 = vsel %vm6082_vm13, %v6098_v5, %v6097_v63  ;;  %v8972_v4 = vld [vmem:[%s11156_s28 + $0x18] sm:$0xff]   ;;  %v8973_v5 = vld [vmem:[%s11156_s28 + $0x10] sm:$0xff]  }
 0xfb4   :  { %v6100_v9 = vrot.slane %v6099_v0, 6  ;;  %v8976_v0 = vld [vmem:[%s11156_s28 + $0x58] sm:$0xff]  }
 0xfb5   :  { %v6090_v8 = vsel %vm1663_vm3, %v6081_v58, %v6088_v6  ;;  %v8974_v6 = vld [vmem:[%s11156_s28 + $0x8] sm:$0xff]   ;;  %v7569_v19 = vld [vmem:[#allocation64] ss:$0 sm:$0xff] }
 0xfb6   :  { %v6092_v10 = vmax.f32 %v6091_v7, %v6090_v8  ;;  %v6101_v1 = vsel %vm6082_vm13, %v6100_v9, %v6097_v63  ;;  %v8975_v7 = vld [vmem:[%s11156_s28] sm:$0xff]   ;;  %v8977_v8 = vld [vmem:[%s11156_s28 + $0x50] sm:$0xff]   ;;  %v8978_v9 = vld [vmem:[%s11156_s28 + $0x48] sm:$0xff]  }
 0xfb7   :  { %v6103_v50 = vrot.slane %v6101_v1, 1 }
 0xfb8   :  { %6093 = vst.msk [vmem:[#allocation9 + $0x1] sm:$0x3] %vm6076_vm12, %v6092_v10  ;;  %v8979_v10 = vld [vmem:[%s11156_s28 + $0x40] sm:$0xff]  }
 0xfb9   :  { %v6105_v12 = vsel %vm1663_vm3, %v6097_v63, %v6103_v50  ;;  %vm10966_vm3 = vcmp.lt.s32.totalorder %v6114_v41, 2  ;;  %v8971_v63 = vld [vmem:[%s11156_s28 + $0x20] sm:$0xff]   ;;  %v8988_v41 = vld [vmem:[%s11157_s9 + $0x58] sm:$0xff]  }
 0xfba   :  { %v6107_v13 = vmax.f32 %v6106_v11, %v6105_v12  ;;  %v7570_v50 = vld [vmem:[#allocation65] ss:$0 sm:$0xff] }
 0xfbc   :  { %6108 = vst.msk [vmem:[#allocation9 + $0x5] sm:$0x3] %vm6076_vm12, %v6107_v13 }
 0xfc3   :  { %v6123_v14 = vld [vmem:[#allocation9] sm:$0xff] }
 0xfc4   :  { %v6124_v15 = vmax.f32 %v6123_v14, 0.0 }
 0xfc6   :  { %v6125_v16 = vpack.c.bf16 %v6124_v15, %v6124_v15  ;;  %v6470_v15 = vld [vmem:[#allocation9 + $0x1] sm:$0x3f] }
 0xfc8   :  { %v6136_v33 = vrot.slane %v6125_v16, 1  ;;  %v6129_v2 = vshll.u32 %v6125_v16, 16  ;;  %v6127_v17 = vshrl.u32 %v6125_v16, 16 }
 0xfca   :  { %7553 = vmatprep.mubr.msk.bf16.mxu0 %vm813_vm2, %v6136_v33  ;;  %v6131_v18 = vrot.slane %v6129_v2, 1 }
 0xfcc   :  { %v6132_v59 = vor.u32 %v6131_v18, %v6127_v17 }
 0xfce   :  { %6133 = vrot.lane.b32.xlu1 %v6132_v59, %s10002_s18 }
0x1040   :  { %v6134_v20 = vpop.permute.xlu1 %6133 }
0x1041   :  { %v6138_v21 = vsel %vm813_vm2, %v6125_v16, %v6134_v20 }
0x1042   :  { %6272 = vmatmul.mubr.bf16.vlgmr.msra.gmra.mxu0 %v6138_v21 }
0x1043   :  { %6591 = vmatpush1.bf16.msra.mxu0 %v8968_v61 }
0x1044   :  { %6592 = vmatprep.subr.bf16.mxu0 %v10049_v30 }
0x1047   :  { %6593 = vmatpush1.bf16.msra.mxu0 %v8969_v53 }
0x1048   :  { %6594 = vmatprep.subr.bf16.mxu0 %v10049_v30 }
0x104b   :  { %6595 = vmatpush1.bf16.msra.mxu0 %v8970_v62 }
0x104c   :  { %6596 = vmatprep.subr.bf16.mxu0 %v10049_v30 }
0x104f   :  { %6597 = vmatpush1.bf16.msra.mxu0 %v8971_v63  ;;  %v8992_v63 = vld [vmem:[#allocation73 + $0x70] ss:$8 sps:$4 sm:$0xff]  }
0x1050   :  { %6598 = vmatprep.subr.bf16.mxu0 %v10049_v30 }
0x1053   :  { %6599 = vmatpush1.bf16.msra.mxu0 %v8972_v4  ;;  %v8994_v4 = vld [vmem:[#allocation73 + $0x74] ss:$8 sps:$4 sm:$0xff]  }
0x1054   :  { %6600 = vmatprep.subr.bf16.mxu0 %v10049_v30 }
0x1057   :  { %6601 = vmatpush1.bf16.msra.mxu0 %v8973_v5  ;;  %v8997_v5 = vld [vmem:[#allocation73 + $0x64] ss:$8 sps:$4 sm:$0xff]  }
0x1058   :  { %6602 = vmatprep.subr.bf16.mxu0 %v10049_v30 }
0x105b   :  { %6603 = vmatpush1.bf16.msra.mxu0 %v8974_v6  ;;  %v8995_v6 = vld [vmem:[#allocation73 + $0x60] ss:$8 sps:$4 sm:$0xff]  }
0x105c   :  { %6604 = vmatprep.subr.bf16.mxu0 %v10049_v30 }
0x105f   :  { %6605 = vmatpush1.bf16.msra.mxu0 %v8975_v7  ;;  %v9000_v7 = vld [vmem:[#allocation73 + $0x54] ss:$8 sps:$4 sm:$0xff]  }
0x1060   :  { %6614 = vmatprep.subr.bf16.mxu0 %v10049_v30 }
0x1063   :  { %6615 = vmatpush2.bf16.msra.mxu0 %v8976_v0  ;;  %v8998_v0 = vld [vmem:[#allocation73 + $0x50] ss:$8 sps:$4 sm:$0xff]  }
0x1064   :  { %6616 = vmatprep.subr.bf16.mxu0 %v10049_v30 }
0x1067   :  { %6617 = vmatpush2.bf16.msra.mxu0 %v8977_v8  ;;  %v9003_v8 = vld [vmem:[#allocation73 + $0x44] ss:$8 sps:$4 sm:$0xff]  }
0x1068   :  { %6618 = vmatprep.subr.bf16.mxu0 %v10049_v30 }
0x106b   :  { %6619 = vmatpush2.bf16.msra.mxu0 %v8978_v9  ;;  %v9001_v9 = vld [vmem:[#allocation73 + $0x40] ss:$8 sps:$4 sm:$0xff]  }
0x106c   :  { %6620 = vmatprep.subr.bf16.mxu0 %v10049_v30 }
0x106f   :  { %6621 = vmatpush2.bf16.msra.mxu0 %v8979_v10  ;;  %v9006_v10 = vld [vmem:[#allocation73 + $0x34] ss:$8 sps:$4 sm:$0xff]  }
0x1070   :  { %6932 = vmatprep.subr.bf16.mxu0 %v8994_v4 }
0x1102   :  { %v6273_v42 = vpop.f32.mrf.mxu0 }
0x1103   :  { %v6286_v44 = vmul.f32 %v7554_v39, %v6273_v42  ;;  %v8987_v39 = vld [vmem:[%s11157_s9] sm:$0xff]   ;;  %v8989_v42 = vld [vmem:[%s11157_s9 + $0x50] sm:$0xff]  }
0x1104   :  { %v6275_v32 = vpop.f32.mrf.mxu0 }
0x1105   :  { %v6294_v45 = vadd.f32 %v7555_v43, %v6286_v44  ;;  %v8990_v43 = vld [vmem:[%s11157_s9 + $0x48] sm:$0xff]   ;;  %v8991_v44 = vld [vmem:[%s11157_s9 + $0x40] sm:$0xff]  }
0x1106   :  { %v6276_v37 = vpop.f32.mrf.mxu0  ;;  %v7584_v32 = vld [vmem:[#allocation67] ss:$0 sm:$0xff] }
0x1107   :  { %v6295_v47 = vmax.f32 %v6294_v45, 0.0  ;;  %v7585_v37 = vld [vmem:[#allocation68] ss:$0 sm:$0xff] }
0x1108   :  { %v6277_v48 = vpop.f32.mrf.mxu0 }
0x1109   :  { %v6296_v49 = vsel %vm10966_vm3, %v6295_v47, 0.0 }
0x110a   :  { %6298 = vst.msk [vmem:[#allocation10 + $0x1] sm:$0x3f] %vm6297_vm14, %v6296_v49 }
0x1111   :  { %v6299_v22 = vld [vmem:[#allocation10] sm:$0xff] }
0x1112   :  { %v6300_v51 = vpack.c.bf16 %v6299_v22, %v6299_v22 }
0x1114   :  { %v6311_v52 = vrot.slane %v6300_v51, 1  ;;  %v6304_v54 = vshll.u32 %v6300_v51, 16  ;;  %v6302_v55 = vshrl.u32 %v6300_v51, 16 }
0x1116   :  { %7568 = vmatprep.mubr.msk.bf16.mxu1 %vm813_vm2, %v6311_v52  ;;  %v6306_v56 = vrot.slane %v6304_v54, 1 }
0x1118   :  { %v6307_v57 = vor.u32 %v6306_v56, %v6302_v55 }
0x111a   :  { %6308 = vrot.lane.b32.xlu0 %v6307_v57, %s10002_s18 }
0x118c   :  { %v6309_v58 = vpop.permute.xlu0 %6308 }
0x118d   :  { %v6313_v60 = vsel %vm813_vm2, %v6300_v51, %v6309_v58 }
0x118e   :  { %6447 = vmatmul.mubr.bf16.vlgmr.msra.gmra.mxu1 %v6313_v60 }
0x118f   :  { %6765 = vmatpush1.bf16.msra.mxu1 %v8980_v29 }
0x1190   :  { %6766 = vmatprep.subr.bf16.mxu1 %v10049_v30 }
0x1193   :  { %6767 = vmatpush1.bf16.msra.mxu1 %v8981_v3 }
0x1194   :  { %6768 = vmatprep.subr.bf16.mxu1 %v10049_v30 }
0x1197   :  { %6769 = vmatpush1.bf16.msra.mxu1 %v8982_v31 }
0x1198   :  { %6770 = vmatprep.subr.bf16.mxu1 %v10049_v30 }
0x119b   :  { %6771 = vmatpush1.bf16.msra.mxu1 %v8983_v34 }
0x119c   :  { %6772 = vmatprep.subr.bf16.mxu1 %v10049_v30 }
0x119f   :  { %6773 = vmatpush1.bf16.msra.mxu1 %v8984_v35  ;;  %v6973_v35 = vld [vmem:[#allocation74] sm:$0x3] }
0x11a0   :  { %6774 = vmatprep.subr.bf16.mxu1 %v10049_v30  ;;  %v6978_v46 = vrot.slane %v6973_v35, %v10496_v24 }
0x11a3   :  { %6775 = vmatpush1.bf16.msra.mxu1 %v8985_v36  ;;  %v6987_v36 = vld [vmem:[#allocation76] sm:$0x3] }
0x11a4   :  { %6776 = vmatprep.subr.bf16.mxu1 %v10049_v30 }
0x11a7   :  { %6777 = vmatpush1.bf16.msra.mxu1 %v8986_v38  ;;  %v6992_v38 = vrot.slane %v6987_v36, %v10496_v24 }
0x11a8   :  { %6778 = vmatprep.subr.bf16.mxu1 %v10049_v30 }
0x11ab   :  { %6779 = vmatpush1.bf16.msra.mxu1 %v8987_v39  ;;  %v6982_v39 = vrot.slane %v6973_v35, %v10493_v23 }
0x11ac   :  { %6788 = vmatprep.subr.bf16.mxu1 %v10049_v30 }
0x11af   :  { %6789 = vmatpush2.bf16.msra.mxu1 %v8988_v41 }
0x11b0   :  { %6790 = vmatprep.subr.bf16.mxu1 %v10049_v30 }
0x11b3   :  { %6791 = vmatpush2.bf16.msra.mxu1 %v8989_v42 }
0x11b4   :  { %6792 = vmatprep.subr.bf16.mxu1 %v10049_v30 }
0x11b7   :  { %6793 = vmatpush2.bf16.msra.mxu1 %v8990_v43  ;;  %v6996_v43 = vrot.slane %v6987_v36, %v10493_v23 }
0x11b8   :  { %6794 = vmatprep.subr.bf16.mxu1 %v10049_v30 }
0x11bb   :  { %6795 = vmatpush2.bf16.msra.mxu1 %v8991_v44 }
0x124e   :  { %v6448_v1 = vpop.f32.mrf.mxu1 }
0x124f   :  { %v6461_v11 = vmul.f32 %v7569_v19, %v6448_v1  ;;  %v9004_v19 = vld [vmem:[#allocation73 + $0x30] ss:$8 sps:$4 sm:$0xff]   ;;  %v9009_v1 = vld [vmem:[#allocation73 + $0x24] ss:$8 sps:$4 sm:$0xff]  }
0x1250   :  { %v6450_v12 = vpop.f32.mrf.mxu1 }
0x1251   :  { %v6469_v13 = vadd.f32 %v7570_v50, %v6461_v11  ;;  %v9007_v50 = vld [vmem:[#allocation73 + $0x20] ss:$8 sps:$4 sm:$0xff]   ;;  %v9012_v11 = vld [vmem:[#allocation73 + $0x14] ss:$8 sps:$4 sm:$0xff]   ;;  %v9010_v12 = vld [vmem:[#allocation73 + $0x10] ss:$8 sps:$4 sm:$0xff]  }
0x1252   :  { %v6451_v14 = vpop.f32.mrf.mxu1 }
0x1253   :  { %v6471_v16 = vsel %vm10966_vm3, %v6469_v13, 0.0  ;;  %v9015_v13 = vld [vmem:[#allocation73 + $0x4] ss:$8 sps:$4 sm:$0xff]   ;;  %v9013_v14 = vld [vmem:[#allocation73] ss:$8 sps:$4 sm:$0xff]  }
0x1254   :  { %v6472_v33 = vadd.f32 %v6471_v16, %v6470_v15  ;;  %v6452_v2 = vpop.f32.mrf.mxu1  ;;  %v7599_v15 = vld [vmem:[#allocation70] ss:$0 sm:$0xff] }
0x1256   :  { %6473 = vst.msk [vmem:[#allocation9 + $0x1] sm:$0x3f] %vm6297_vm14, %v6472_v33  ;;  %v7600_v33 = vld [vmem:[#allocation71] ss:$0 sm:$0xff] }
0x125d   :  { %v6474_v17 = vld [vmem:[#allocation9] sm:$0xff] }
0x125e   :  { %v6475_v18 = vmax.f32 %v6474_v17, 0.0 }
0x1260   :  { %v6476_v59 = vpack.c.bf16 %v6475_v18, %v6475_v18 }
0x1262   :  { %v6487_v20 = vrot.slane %v6476_v59, 1  ;;  %v6480_v21 = vshll.u32 %v6476_v59, 16  ;;  %v6478_v25 = vshrl.u32 %v6476_v59, 16 }
0x1264   :  { %7583 = vmatprep.mubr.msk.bf16.mxu0 %vm813_vm2, %v6487_v20  ;;  %v6482_v40 = vrot.slane %v6480_v21, 1  ;;  %v6820_v20 = vld [vmem:[#allocation9 + $0x1] sm:$0x3f] }
0x1266   :  { %v6483_v26 = vor.u32 %v6482_v40, %v6478_v25 }
0x1268   :  { %6484 = vrot.lane.b32.xlu1 %v6483_v26, %s10002_s18 }
0x12da   :  { %v6485_v27 = vpop.permute.xlu1 %6484 }
0x12db   :  { %v6489_v28 = vsel %vm813_vm2, %v6476_v59, %v6485_v27 }
0x12dc   :  { %6623 = vmatmul.mubr.bf16.vlgmr.msra.gmra.mxu0 %v6489_v28 }
0x12dd   :  { %6964 = vmatprep.mubr.bf16.mxu0 %v10049_v30  ;;  %6933 = vmatpush1.bf16.msra.mxu0 %v8992_v63 }
0x12de   :  { %6934 = vmatprep.subr.bf16.mxu0 %v8997_v5 }
0x12e1   :  { %6935 = vmatpush1.bf16.msra.mxu0 %v8995_v6 }
0x12e2   :  { %6936 = vmatprep.subr.bf16.mxu0 %v9000_v7 }
0x12e5   :  { %6937 = vmatpush1.bf16.msra.mxu0 %v8998_v0 }
0x12e6   :  { %6938 = vmatprep.subr.bf16.mxu0 %v9003_v8 }
0x12e9   :  { %6939 = vmatpush1.bf16.msra.mxu0 %v9001_v9 }
0x12ea   :  { %6940 = vmatprep.subr.bf16.mxu0 %v9006_v10 }
0x12ed   :  { %6941 = vmatpush1.bf16.msra.mxu0 %v9004_v19 }
0x12ee   :  { %6942 = vmatprep.subr.bf16.mxu0 %v9009_v1 }
0x12f1   :  { %6943 = vmatpush1.bf16.msra.mxu0 %v9007_v50 }
0x12f2   :  { %6944 = vmatprep.subr.bf16.mxu0 %v9012_v11 }
0x12f5   :  { %6945 = vmatpush1.bf16.msra.mxu0 %v9010_v12 }
0x12f6   :  { %6946 = vmatprep.subr.bf16.mxu0 %v9015_v13 }
0x12f9   :  { %6947 = vmatpush1.bf16.msra.mxu0 %v9013_v14 }
0x139c   :  { %v6624_v45 = vpop.f32.mrf.mxu0 }
0x139d   :  { %v6637_v47 = vmul.f32 %v7584_v32, %v6624_v45 }
0x139e   :  { %v6626_v48 = vpop.f32.mrf.mxu0 }
0x139f   :  { %v6645_v49 = vadd.f32 %v7585_v37, %v6637_v47 }
0x13a0   :  { %v6627_v22 = vpop.f32.mrf.mxu0 }
0x13a1   :  { %v6646_v51 = vmax.f32 %v6645_v49, 0.0 }
0x13a2   :  { %v6628_v52 = vpop.f32.mrf.mxu0 }
0x13a3   :  { %v6647_v54 = vsel %vm10966_vm3, %v6646_v51, 0.0 }
0x13a4   :  { %6648 = vst.msk [vmem:[#allocation10 + $0x1] sm:$0x3f] %vm6297_vm14, %v6647_v54 }
0x13ab   :  { %v6649_v55 = vld [vmem:[#allocation10] sm:$0xff] }
0x13ac   :  { %v6650_v56 = vpack.c.bf16 %v6649_v55, %v6649_v55 }
0x13ae   :  { %v6661_v57 = vrot.slane %v6650_v56, 1  ;;  %v6654_v58 = vshll.u32 %v6650_v56, 16  ;;  %v6652_v30 = vshrl.u32 %v6650_v56, 16 }
0x13b0   :  { %7598 = vmatprep.mubr.msk.bf16.mxu1 %vm813_vm2, %v6661_v57  ;;  %v6656_v60 = vrot.slane %v6654_v58, 1 }
0x13b2   :  { %v6657_v61 = vor.u32 %v6656_v60, %v6652_v30 }
0x13b4   :  { %6658 = vrot.lane.b32.xlu0 %v6657_v61, %s10002_s18 }
0x1426   :  { %v6659_v53 = vpop.permute.xlu0 %6658 }
0x1427   :  { %v6663_v62 = vsel %vm813_vm2, %v6650_v56, %v6659_v53 }
0x1428   :  { %6797 = vmatmul.mubr.bf16.vlgmr.msra.gmra.mxu1 %v6663_v62 }
0x14e8   :  { %v6798_v16 = vpop.f32.mrf.mxu1 }
0x14e9   :  { %v6811_v2 = vmul.f32 %v7599_v15, %v6798_v16 }
0x14ea   :  { %v6800_v17 = vpop.f32.mrf.mxu1 }
0x14eb   :  { %v6819_v18 = vadd.f32 %v7600_v33, %v6811_v2 }
0x14ec   :  { %v6801_v59 = vpop.f32.mrf.mxu1 }
0x14ed   :  { %v6821_v21 = vsel %vm10966_vm3, %v6819_v18, 0.0 }
0x14ee   :  { %v6822_v25 = vadd.f32 %v6821_v21, %v6820_v20  ;;  %v6802_v40 = vpop.f32.mrf.mxu1 }
0x14f0   :  { %6823 = vst.msk [vmem:[#allocation9 + $0x1] sm:$0x3f] %vm6297_vm14, %v6822_v25 }
0x14f7   :  { %v6828_v26 = vld [vmem:[#allocation9 + $0x2] ss:$4 sm:$0x3]  ;;  %v6825_v28 = vld [vmem:[#allocation9 + $0x1] ss:$4 sm:$0x3] }
0x14f8   :  { %v6829_v27 = vmax.f32 %v6828_v26, 0.0  ;;  %v6826_v29 = vmax.f32 %v6825_v28, 0.0 }
0x14fa   :  { %6831 = vrot.lane.b32.xlu1 %v6829_v27, %s10002_s18  ;;  %s10051_s18 = smov [#allocation77]  }
0x14fb   :  { %s7021_s5 = sshll.u32 %s10051_s18, 4  ;;  %s7022_s5 = int_to_ptr.vmem [resolvable:$true] %s7021_s5 }
0x14fc   :  { %s9877_s1 = scalar_lea.vmem %s7022_s5, 64  ;;  %p9882_p6 = scmp.lt.s32.totalorder %s7022_s5, %s7022_s5 }
0x14fd   :  { %p9878_p5 = scmp.ne.s32.totalorder %s7022_s5, %s9877_s1  ;;  %p9883_p7 = scmp.lt.s32.totalorder %s9877_s1, %s9877_s1 }
0x14ff   :  { %p9884_p8 = por %p9883_p7, %p9882_p6 }
0x1501   :  { %p9885_p9 = pnand %p9884_p8, %p9878_p5 }
0x156c   :  { %v6832_v3 = vpop.permute.xlu1 %6831 }
0x156d   :  { %v6834_v31 = vsel %vm813_vm2, %v6826_v29, %v6832_v3 }
0x156e   :  { %v6835_v34 = vpack.c.bf16 %v6834_v31, %v6834_v31 }
0x1570   :  { %6965 = vmatmul.mubr.bf16.vlgmr.msra.gmra.mxu0 %v6835_v34 }
0x1630   :  { %v6966_v41 = vpop.f32.mrf.mxu0 }
0x1631   :  { %v6985_v42 = vmul.f32 %v6978_v46, %v6966_v41 }
0x1632   :  { %v6968_v44 = vpop.f32.mrf.mxu0 }
0x1633   :  { %v6999_v32 = vadd.f32 %v6992_v38, %v6985_v42  ;;  %v6986_v45 = vmul.f32 %v6982_v39, %v6968_v44 }
0x1634   :  { %v6970_v37 = vpop.f32.mrf.mxu0 }
0x1635   :  { %v7000_v47 = vadd.f32 %v6996_v43, %v6986_v45  ;;  %v7001_v49 = vmax.f32 %v6999_v32, 0.0 }
0x1636   :  { %v6971_v48 = vpop.f32.mrf.mxu0 }
0x1637   :  { %v7002_v22 = vmax.f32 %v7000_v47, 0.0 }
0x1639   :  { %v7005_v51 = vcombine.low %v7001_v49, %v7002_v22 }
0x163b   :  { %7617 = vst.sshfl [vmem:[#allocation77] sm:$0x33 pattern:$0x76325410] %v7005_v51 }
0x163c   :  { %9888 = shalt.err (!%p9885_p9)
}
0x163d   :  { %7024 = dma.vmem_to_hbm [thread:$0]  %s7022_s5, 64, %s10350_s13, [#allocation13]  }
0x163e   :  { %9941 = dma.done.wait [#allocation13], 64  }
0x163f   :  { %9942 = vsyncadd [#allocation13], 4294967232 }
0x1640   :  { %7028 = vsyncpa [#allocation12], 1 }
0x1641   :  { %7029 = vsyncpa [#allocation15], 1 }
0x1642   :  { %7030 = vsyncpa [#allocation18], 1 }
0x1643   :  { %7031 = vsyncpa [#allocation21], 1 }
0x1644   :  { %7032 = vsyncpa [#allocation24], 1 }
0x1645   :  { %7033 = vsyncpa [#allocation27], 1 }
0x1646   :  { %7034 = vsyncpa [#allocation30], 1 }
0x1647   :  { %7035 = vsyncpa [#allocation33], 1 }
0x1648   :  { %7036 = vsyncpa [#allocation36], 1 }
0x1649   :  { %7037 = vsyncpa [#allocation39], 1 }
0x164a   :  { %7038 = vsyncpa [#allocation42], 1 }
0x164b   :  { %7039 = vsyncpa [#allocation45], 1 }
0x164c   :  { %7040 = vsyncpa [#allocation48], 1 }
0x164d   :  { %7041 = vsyncpa [#allocation51], 1 }
0x164e   :  { %7042 = vsyncpa [#allocation54], 1 }
0x164f   :  { %7043 = vsyncpa [#allocation57], 1 }
0x1650   :  { %7044 = vsyncpa [#allocation60], 1 }
0x1651   :  { %7045 = vsyncpa [#allocation63], 1 }
0x1652   :  { %7046 = vsyncpa [#allocation66], 1 }
0x1653   :  { %7047 = vsyncpa [#allocation69], 1 }
0x1654   :  { %7048 = vsyncpa [#allocation72], 1 }
0x1655   :  { %7049 = vsyncpa [#allocation75], 1 }
0x1656   :  { %7050 = vsyncpa [#allocation13], 1 }

</bundles_post_ra>
